<compile_context>
chip_gen: v7x
topology: tpu7x:2x2x1
jax: 0.10.0
libtpu: 0.0.40
codegen_flags: <defaults>
</compile_context>

<pallas_src>
import jax
import jax.numpy as jnp
from jax import lax
from jax.experimental import pallas as pl
from jax.experimental.pallas import tpu as pltpu


# --------------------------- Fused kernel builder -----------------------------
def make_fused_kernel(T, B, E, H, O, num_layers):
    """Builds a kernel with signature
       kernel(x2d, [wih_t, whh_t, bias]*L, dense_w_t, dense_b, out,
              gx_scr, seq_scr, h_scr, c_scr)
    x2d:      (T*B, E)   bf16   flattened embedded inputs
    wih_t:    (in, 4H)   bf16   W_ih^T (in = E for layer 0, H afterwards)
    whh_t:    (H, 4H)    bf16   W_hh^T
    bias:     (1, 4H)    f32    b_ih + b_hh
    dense_w_t:(H, O)     bf16
    dense_b:  (1, O)     f32
    out:      (B, O)     f32    dense(hidden[-1])
    """

    def kernel(*refs):
        x_ref = refs[0]
        pos = 1
        layer_refs = []
        for _ in range(num_layers):
            layer_refs.append((refs[pos], refs[pos + 1], refs[pos + 2]))
            pos += 3
        dw_ref, db_ref = refs[pos], refs[pos + 1]
        out_ref = refs[pos + 2]
        gx_scr, seq_scr, h_scr, c_scr = refs[pos + 3:pos + 7]

        for layer_idx, (wih_ref, whh_ref, b_ref) in enumerate(layer_refs):
            is_last_layer = layer_idx == num_layers - 1

            # ---- Hoisted input projection: one MXU matmul for all T steps ----
            if layer_idx == 0:
                x_all = x_ref[...]                               # (T*B, E) bf16
            else:
                x_all = seq_scr[...].astype(jnp.bfloat16)        # (T*B, H)
            gx_scr[...] = (
                jnp.dot(x_all, wih_ref[...],
                        preferred_element_type=jnp.float32)
                + b_ref[...]
            )                                                    # (T*B, 4H) f32

            # ---- Sequential recurrence: only h_prev @ W_hh^T per step ----
            h_scr[...] = jnp.zeros((B, H), jnp.float32)
            c_scr[...] = jnp.zeros((B, H), jnp.float32)
            whh = whh_ref[...]                                   # (H, 4H) bf16

            def step(t, carry, whh=whh, write_seq=not is_last_layer):
                row = pl.multiple_of(t * B, B)
                h_prev = h_scr[...]
                c_prev = c_scr[...]
                gates = gx_scr[pl.ds(row, B)] + jnp.dot(
                    h_prev.astype(jnp.bfloat16), whh,
                    preferred_element_type=jnp.float32)          # (B, 4H) f32
                i_g = jax.nn.sigmoid(gates[:, 0 * H:1 * H])
                f_g = jax.nn.sigmoid(gates[:, 1 * H:2 * H])
                g_g = jnp.tanh(gates[:, 2 * H:3 * H])
                o_g = jax.nn.sigmoid(gates[:, 3 * H:4 * H])
                c_new = f_g * c_prev + i_g * g_g
                h_new = o_g * jnp.tanh(c_new)
                c_scr[...] = c_new
                h_scr[...] = h_new
                if write_seq:                       # next layer's input sequence
                    seq_scr[pl.ds(row, B)] = h_new
                return carry

            lax.fori_loop(0, T, step, 0, unroll=True)

        # ---- Fused dense head on hidden[-1] of the top layer ----
        h_last = h_scr[...].astype(jnp.bfloat16)                 # (B, H)
        out_ref[...] = (
            jnp.dot(h_last, dw_ref[...], preferred_element_type=jnp.float32)
            + db_ref[...]
        ).astype(out_ref.dtype)

    return kernel


# --------------------------- Full module forward ------------------------------
def lstm_module_forward(x_idx, prep):
    """Equivalent of LSTM.forward (eval mode):
        features = embedding(x); output, (hidden, cell) = lstm(features)
        return dense(hidden[-1])
    x_idx: (T, B) int32 token indices.
    """
    T, B = x_idx.shape
    feats = prep["embedding"][x_idx]                  # (T, B, E) plain-JAX gather
    E = feats.shape[-1]
    H = prep["lstm_layers"][0]["whh_t"].shape[0]
    O = prep["dense_b"].shape[-1]
    num_layers = len(prep["lstm_layers"])

    x2d = feats.reshape(T * B, E).astype(jnp.bfloat16)

    args = [x2d]
    for layer in prep["lstm_layers"]:
        args += [layer["wih_t"], layer["whh_t"], layer["bias"]]
    args += [prep["dense_w_t"], prep["dense_b"]]

    kernel = make_fused_kernel(T, B, E, H, O, num_layers)

    # No grid: everything (inputs, weights, scratch) is VMEM-resident for the
    # whole call; weights are single-buffered.  At much larger B, add a batch-
    # tile "parallel" grid axis for megacore / v7x dual-TC sharding.
    return pl.pallas_call(
        kernel,
        out_shape=jax.ShapeDtypeStruct((B, O), jnp.float32),
        scratch_shapes=[
            pltpu.VMEM((T * B, 4 * H), jnp.float32),  # hoisted input-proj gates
            pltpu.VMEM((T * B, H), jnp.float32),      # per-layer h sequence
            pltpu.VMEM((B, H), jnp.float32),          # h state
            pltpu.VMEM((B, H), jnp.float32),          # c state
        ],
    )(*args)


# ------------------------------ Param handling --------------------------------
def init_params(key, vocab_size, embedding_length, hidden_size, output_size,
                num_layers):
    """Raw params in PyTorch nn.LSTM layout (w_ih (4H,in), w_hh (4H,H), b (4H,))."""
    keys = jax.random.split(key, 4 + 4 * num_layers)
    ki = iter(keys)
    params = {}
    params["embedding"] = jax.random.normal(
        next(ki), (vocab_size, embedding_length), jnp.float32)

    k_lstm = 1.0 / jnp.sqrt(hidden_size)
    layers = []
    in_dim = embedding_length
    for _ in range(num_layers):
        layers.append({
            "w_ih": jax.random.uniform(next(ki), (4 * hidden_size, in_dim),
                                       jnp.float32, -k_lstm, k_lstm),
            "w_hh": jax.random.uniform(next(ki), (4 * hidden_size, hidden_size),
                                       jnp.float32, -k_lstm, k_lstm),
            "b_ih": jax.random.uniform(next(ki), (4 * hidden_size,),
                                       jnp.float32, -k_lstm, k_lstm),
            "b_hh": jax.random.uniform(next(ki), (4 * hidden_size,),
                                       jnp.float32, -k_lstm, k_lstm),
        })
        in_dim = hidden_size
    params["lstm_layers"] = layers

    k_dense = 1.0 / jnp.sqrt(hidden_size)
    params["dense_w"] = jax.random.uniform(
        next(ki), (output_size, hidden_size), jnp.float32, -k_dense, k_dense)
    params["dense_b"] = jax.random.uniform(
        next(ki), (output_size,), jnp.float32, -k_dense, k_dense)
    return params


def prepare_params(raw):
    """One-time prep: transpose, fold biases, cast weights to bf16."""
    prep = {"embedding": jnp.asarray(raw["embedding"], jnp.float32)}
    layers = []
    for layer in raw["lstm_layers"]:
        layers.append({
            "wih_t": jnp.asarray(layer["w_ih"], jnp.float32).T.astype(jnp.bfloat16),
            "whh_t": jnp.asarray(layer["w_hh"], jnp.float32).T.astype(jnp.bfloat16),
            "bias": (jnp.asarray(layer["b_ih"], jnp.float32)
                     + jnp.asarray(layer["b_hh"], jnp.float32)).reshape(1, -1),
        })
    prep["lstm_layers"] = layers
    prep["dense_w_t"] = jnp.asarray(raw["dense_w"], jnp.float32).T.astype(jnp.bfloat16)
    prep["dense_b"] = jnp.asarray(raw["dense_b"], jnp.float32).reshape(1, -1)
    return prep


# ------------------------------ Pure-JAX reference ----------------------------
def reference_forward(x_idx, raw):
    feats = raw["embedding"][x_idx].astype(jnp.float32)          # (T, B, E)
    h_seq = feats
    for layer in raw["lstm_layers"]:
        w_ih, w_hh = layer["w_ih"], layer["w_hh"]
        b = layer["b_ih"] + layer["b_hh"]
        H = w_hh.shape[1]
        B = h_seq.shape[1]

        def step(carry, x_t, w_ih=w_ih, w_hh=w_hh, b=b, H=H):
            h, c = carry
            gates = x_t @ w_ih.T + h @ w_hh.T + b
            i_g = jax.nn.sigmoid(gates[:, 0 * H:1 * H])
            f_g = jax.nn.sigmoid(gates[:, 1 * H:2 * H])
            g_g = jnp.tanh(gates[:, 2 * H:3 * H])
            o_g = jax.nn.sigmoid(gates[:, 3 * H:4 * H])
            c = f_g * c + i_g * g_g
            h = o_g * jnp.tanh(c)
            return (h, c), h

        init = (jnp.zeros((B, H), jnp.float32), jnp.zeros((B, H), jnp.float32))
        _, h_seq = lax.scan(step, init, h_seq)
    return h_seq[-1] @ raw["dense_w"].T + raw["dense_b"]


# ----------------------------------- Main --------------------------------------
if __name__ == "__main__":
    # Small, lane-aligned shapes consistent with the module (H multiple of 128).
    vocab_size = 50
    embedding_length = 128
    hidden_size = 128
    output_size = 5
    num_layers = 2
    T, B = 16, 8   # (seq_len, batch) — nn.LSTM default batch_first=False

    key = jax.random.PRNGKey(0)
    k_params, k_idx = jax.random.split(key)
    raw = init_params(k_params, vocab_size, embedding_length, hidden_size,
                      output_size, num_layers)
    prep = prepare_params(raw)

    x_idx = jax.random.randint(k_idx, (T, B), 0, vocab_size, dtype=jnp.int32)

    fwd = jax.jit(lstm_module_forward)
    out = fwd(x_idx, prep)                            # (B, output_size)
    jax.block_until_ready(out)
    assert out.shape == (B, output_size)

    ref = reference_forward(x_idx, raw)
    assert bool(jnp.allclose(out, ref, atol=5e-2, rtol=5e-2)), (
        "mismatch, max abs diff = %s" % jnp.max(jnp.abs(out - ref)))
    print("KERNEL_OK")
</pallas_src>

<mosaic_0001>
module attributes {stable_mosaic.version = 11 : i64} {
  func.func @kernel(%arg0: memref<128x128xbf16, #tpu.memory_space<vmem>>, %arg1: memref<128x512xbf16, #tpu.memory_space<vmem>>, %arg2: memref<128x512xbf16, #tpu.memory_space<vmem>>, %arg3: memref<1x512xf32, #tpu.memory_space<vmem>>, %arg4: memref<128x512xbf16, #tpu.memory_space<vmem>>, %arg5: memref<128x512xbf16, #tpu.memory_space<vmem>>, %arg6: memref<1x512xf32, #tpu.memory_space<vmem>>, %arg7: memref<128x5xbf16, #tpu.memory_space<vmem>>, %arg8: memref<1x5xf32, #tpu.memory_space<vmem>>, %arg9: memref<8x5xf32, #tpu.memory_space<vmem>>, %arg10: memref<128x512xf32, #tpu.memory_space<vmem>>, %arg11: memref<128x128xf32, #tpu.memory_space<vmem>>, %arg12: memref<8x128xf32, #tpu.memory_space<vmem>>, %arg13: memref<8x128xf32, #tpu.memory_space<vmem>>) attributes {dimension_semantics = [], scalar_prefetch = 0 : i64, scratch_operands = 4 : i64, tpu.core_type = #tpu.core_type<tc>} {
    %c0 = arith.constant 0 : index
    %c0_0 = arith.constant 0 : index
    %0 = vector.load %arg0[%c0, %c0_0] : memref<128x128xbf16, #tpu.memory_space<vmem>>, vector<128x128xbf16>
    %c0_1 = arith.constant 0 : index
    %c0_2 = arith.constant 0 : index
    %1 = vector.load %arg1[%c0_1, %c0_2] : memref<128x512xbf16, #tpu.memory_space<vmem>>, vector<128x512xbf16>
    %cst = arith.constant dense<0.000000e+00> : vector<128x512xf32>
    %2 = tpu.matmul %0, %1, %cst {dimension_numbers = #tpu.dot_dimension_numbers<[1], [0], [0], [1], [0, 0, 1, 1], [], []>} : vector<128x128xbf16>, vector<128x512xbf16>, vector<128x512xf32> -> vector<128x512xf32>
    %c0_3 = arith.constant 0 : index
    %c0_4 = arith.constant 0 : index
    %3 = vector.load %arg3[%c0_3, %c0_4] : memref<1x512xf32, #tpu.memory_space<vmem>>, vector<1x512xf32>
    %4 = vector.broadcast %3 : vector<1x512xf32> to vector<128x512xf32>
    %5 = arith.addf %2, %4 : vector<128x512xf32>
    %c0_5 = arith.constant 0 : index
    %c0_6 = arith.constant 0 : index
    %6 = vector.load %arg10[%c0_5, %c0_6] : memref<128x512xf32, #tpu.memory_space<vmem>>, vector<128x512xf32>
    tpu.vector_store %arg10[%c0_5, %c0_6], %5 {strides = array<i32>} : memref<128x512xf32, #tpu.memory_space<vmem>>, vector<128x512xf32>,
    %cst_7 = arith.constant 0.000000e+00 : f32
    %7 = vector.broadcast %cst_7 : f32 to vector<8x128xf32>
    %c0_8 = arith.constant 0 : index
    %c0_9 = arith.constant 0 : index
    %8 = vector.load %arg12[%c0_8, %c0_9] : memref<8x128xf32, #tpu.memory_space<vmem>>, vector<8x128xf32>
    tpu.vector_store %arg12[%c0_8, %c0_9], %7 {strides = array<i32>} : memref<8x128xf32, #tpu.memory_space<vmem>>, vector<8x128xf32>,
    %cst_10 = arith.constant 0.000000e+00 : f32
    %9 = vector.broadcast %cst_10 : f32 to vector<8x128xf32>
    %c0_11 = arith.constant 0 : index
    %c0_12 = arith.constant 0 : index
    %10 = vector.load %arg13[%c0_11, %c0_12] : memref<8x128xf32, #tpu.memory_space<vmem>>, vector<8x128xf32>
    tpu.vector_store %arg13[%c0_11, %c0_12], %9 {strides = array<i32>} : memref<8x128xf32, #tpu.memory_space<vmem>>, vector<8x128xf32>,
    %c0_13 = arith.constant 0 : index
    %c0_14 = arith.constant 0 : index
    %11 = vector.load %arg2[%c0_13, %c0_14] : memref<128x512xbf16, #tpu.memory_space<vmem>>, vector<128x512xbf16>
    %c0_i32 = arith.constant 0 : i32
    %c8_i32 = arith.constant 8 : i32
    %12 = arith.muli %c0_i32, %c8_i32 : i32
    %13 = tpu.assume_multiple %12, 8 : i32
    %c0_15 = arith.constant 0 : index
    %c0_16 = arith.constant 0 : index
    %14 = vector.load %arg12[%c0_15, %c0_16] : memref<8x128xf32, #tpu.memory_space<vmem>>, vector<8x128xf32>
    %c0_17 = arith.constant 0 : index
    %c0_18 = arith.constant 0 : index
    %15 = vector.load %arg13[%c0_17, %c0_18] : memref<8x128xf32, #tpu.memory_space<vmem>>, vector<8x128xf32>
    %16 = arith.index_cast %13 : i32 to index
    %c0_19 = arith.constant 0 : index
    %17 = vector.load %arg10[%16, %c0_19] : memref<128x512xf32, #tpu.memory_space<vmem>>, vector<8x512xf32>
    %18 = arith.truncf %14 : vector<8x128xf32> to vector<8x128xbf16>
    %cst_20 = arith.constant dense<0.000000e+00> : vector<8x512xf32>
    %19 = tpu.matmul %18, %11, %cst_20 {dimension_numbers = #tpu.dot_dimension_numbers<[1], [0], [0], [1], [0, 0, 1, 1], [], []>} : vector<8x128xbf16>, vector<128x512xbf16>, vector<8x512xf32> -> vector<8x512xf32>
    %20 = arith.addf %17, %19 : vector<8x512xf32>
    %21 = vector.extract_strided_slice %20 {offsets = [0, 0], sizes = [8, 128], strides = [1, 1]} : vector<8x512xf32> to vector<8x128xf32>
    %22 = arith.negf %21 : vector<8x128xf32>
    %23 = math.exp %22 : vector<8x128xf32>
    %cst_21 = arith.constant 1.000000e+00 : f32
    %24 = vector.broadcast %cst_21 : f32 to vector<8x128xf32>
    %25 = arith.addf %24, %23 : vector<8x128xf32>
    %26 = arith.divf %24, %25 : vector<8x128xf32>
    %27 = vector.extract_strided_slice %20 {offsets = [0, 128], sizes = [8, 128], strides = [1, 1]} : vector<8x512xf32> to vector<8x128xf32>
    %28 = arith.negf %27 : vector<8x128xf32>
    %29 = math.exp %28 : vector<8x128xf32>
    %cst_22 = arith.constant 1.000000e+00 : f32
    %30 = vector.broadcast %cst_22 : f32 to vector<8x128xf32>
    %31 = arith.addf %30, %29 : vector<8x128xf32>
    %32 = arith.divf %30, %31 : vector<8x128xf32>
    %33 = vector.extract_strided_slice %20 {offsets = [0, 256], sizes = [8, 128], strides = [1, 1]} : vector<8x512xf32> to vector<8x128xf32>
    %34 = math.tanh %33 : vector<8x128xf32>
    %35 = vector.extract_strided_slice %20 {offsets = [0, 384], sizes = [8, 128], strides = [1, 1]} : vector<8x512xf32> to vector<8x128xf32>
    %36 = arith.negf %35 : vector<8x128xf32>
    %37 = math.exp %36 : vector<8x128xf32>
    %cst_23 = arith.constant 1.000000e+00 : f32
    %38 = vector.broadcast %cst_23 : f32 to vector<8x128xf32>
    %39 = arith.addf %38, %37 : vector<8x128xf32>
    %40 = arith.divf %38, %39 : vector<8x128xf32>
    %41 = arith.mulf %32, %15 : vector<8x128xf32>
    %42 = arith.mulf %26, %34 : vector<8x128xf32>
    %43 = arith.addf %41, %42 : vector<8x128xf32>
    %44 = math.tanh %43 : vector<8x128xf32>
    %45 = arith.mulf %40, %44 : vector<8x128xf32>
    %c0_24 = arith.constant 0 : index
    %c0_25 = arith.constant 0 : index
    %46 = vector.load %arg13[%c0_24, %c0_25] : memref<8x128xf32, #tpu.memory_space<vmem>>, vector<8x128xf32>
    tpu.vector_store %arg13[%c0_24, %c0_25], %43 {strides = array<i32>} : memref<8x128xf32, #tpu.memory_space<vmem>>, vector<8x128xf32>,
    %c0_26 = arith.constant 0 : index
    %c0_27 = arith.constant 0 : index
    %47 = vector.load %arg12[%c0_26, %c0_27] : memref<8x128xf32, #tpu.memory_space<vmem>>, vector<8x128xf32>
    tpu.vector_store %arg12[%c0_26, %c0_27], %45 {strides = array<i32>} : memref<8x128xf32, #tpu.memory_space<vmem>>, vector<8x128xf32>,
    %48 = arith.index_cast %13 : i32 to index
    %c0_28 = arith.constant 0 : index
    %49 = vector.load %arg11[%48, %c0_28] : memref<128x128xf32, #tpu.memory_space<vmem>>, vector<8x128xf32>
    tpu.vector_store %arg11[%48, %c0_28], %45 {strides = array<i32>} : memref<128x128xf32, #tpu.memory_space<vmem>>, vector<8x128xf32>,
    %c1_i32 = arith.constant 1 : i32
    %c8_i32_29 = arith.constant 8 : i32
    %50 = arith.muli %c1_i32, %c8_i32_29 : i32
    %51 = tpu.assume_multiple %50, 8 : i32
    %c0_30 = arith.constant 0 : index
    %c0_31 = arith.constant 0 : index
    %52 = vector.load %arg12[%c0_30, %c0_31] : memref<8x128xf32, #tpu.memory_space<vmem>>, vector<8x128xf32>
    %c0_32 = arith.constant 0 : index
    %c0_33 = arith.constant 0 : index
    %53 = vector.load %arg13[%c0_32, %c0_33] : memref<8x128xf32, #tpu.memory_space<vmem>>, vector<8x128xf32>
    %54 = arith.index_cast %51 : i32 to index
    %c0_34 = arith.constant 0 : index
    %55 = vector.load %arg10[%54, %c0_34] : memref<128x512xf32, #tpu.memory_space<vmem>>, vector<8x512xf32>
    %56 = arith.truncf %52 : vector<8x128xf32> to vector<8x128xbf16>
    %cst_35 = arith.constant dense<0.000000e+00> : vector<8x512xf32>
    %57 = tpu.matmul %56, %11, %cst_35 {dimension_numbers = #tpu.dot_dimension_numbers<[1], [0], [0], [1], [0, 0, 1, 1], [], []>} : vector<8x128xbf16>, vector<128x512xbf16>, vector<8x512xf32> -> vector<8x512xf32>
    %58 = arith.addf %55, %57 : vector<8x512xf32>
    %59 = vector.extract_strided_slice %58 {offsets = [0, 0], sizes = [8, 128], strides = [1, 1]} : vector<8x512xf32> to vector<8x128xf32>
    %60 = arith.negf %59 : vector<8x128xf32>
    %61 = math.exp %60 : vector<8x128xf32>
    %cst_36 = arith.constant 1.000000e+00 : f32
    %62 = vector.broadcast %cst_36 : f32 to vector<8x128xf32>
    %63 = arith.addf %62, %61 : vector<8x128xf32>
    %64 = arith.divf %62, %63 : vector<8x128xf32>
    %65 = vector.extract_strided_slice %58 {offsets = [0, 128], sizes = [8, 128], strides = [1, 1]} : vector<8x512xf32> to vector<8x128xf32>
    %66 = arith.negf %65 : vector<8x128xf32>
    %67 = math.exp %66 : vector<8x128xf32>
    %cst_37 = arith.constant 1.000000e+00 : f32
    %68 = vector.broadcast %cst_37 : f32 to vector<8x128xf32>
    %69 = arith.addf %68, %67 : vector<8x128xf32>
    %70 = arith.divf %68, %69 : vector<8x128xf32>
    %71 = vector.extract_strided_slice %58 {offsets = [0, 256], sizes = [8, 128], strides = [1, 1]} : vector<8x512xf32> to vector<8x128xf32>
    %72 = math.tanh %71 : vector<8x128xf32>
    %73 = vector.extract_strided_slice %58 {offsets = [0, 384], sizes = [8, 128], strides = [1, 1]} : vector<8x512xf32> to vector<8x128xf32>
    %74 = arith.negf %73 : vector<8x128xf32>
    %75 = math.exp %74 : vector<8x128xf32>
    %cst_38 = arith.constant 1.000000e+00 : f32
    %76 = vector.broadcast %cst_38 : f32 to vector<8x128xf32>
    %77 = arith.addf %76, %75 : vector<8x128xf32>
    %78 = arith.divf %76, %77 : vector<8x128xf32>
    %79 = arith.mulf %70, %53 : vector<8x128xf32>
    %80 = arith.mulf %64, %72 : vector<8x128xf32>
    %81 = arith.addf %79, %80 : vector<8x128xf32>
    %82 = math.tanh %81 : vector<8x128xf32>
    %83 = arith.mulf %78, %82 : vector<8x128xf32>
    %c0_39 = arith.constant 0 : index
    %c0_40 = arith.constant 0 : index
    %84 = vector.load %arg13[%c0_39, %c0_40] : memref<8x128xf32, #tpu.memory_space<vmem>>, vector<8x128xf32>
    tpu.vector_store %arg13[%c0_39, %c0_40], %81 {strides = array<i32>} : memref<8x128xf32, #tpu.memory_space<vmem>>, vector<8x128xf32>,
    %c0_41 = arith.constant 0 : index
    %c0_42 = arith.constant 0 : index
    %85 = vector.load %arg12[%c0_41, %c0_42] : memref<8x128xf32, #tpu.memory_space<vmem>>, vector<8x128xf32>
    tpu.vector_store %arg12[%c0_41, %c0_42], %83 {strides = array<i32>} : memref<8x128xf32, #tpu.memory_space<vmem>>, vector<8x128xf32>,
    %86 = arith.index_cast %51 : i32 to index
    %c0_43 = arith.constant 0 : index
    %87 = vector.load %arg11[%86, %c0_43] : memref<128x128xf32, #tpu.memory_space<vmem>>, vector<8x128xf32>
    tpu.vector_store %arg11[%86, %c0_43], %83 {strides = array<i32>} : memref<128x128xf32, #tpu.memory_space<vmem>>, vector<8x128xf32>,
    %c2_i32 = arith.constant 2 : i32
    %c8_i32_44 = arith.constant 8 : i32
    %88 = arith.muli %c2_i32, %c8_i32_44 : i32
    %89 = tpu.assume_multiple %88, 8 : i32
    %c0_45 = arith.constant 0 : index
    %c0_46 = arith.constant 0 : index
    %90 = vector.load %arg12[%c0_45, %c0_46] : memref<8x128xf32, #tpu.memory_space<vmem>>, vector<8x128xf32>
    %c0_47 = arith.constant 0 : index
    %c0_48 = arith.constant 0 : index
    %91 = vector.load %arg13[%c0_47, %c0_48] : memref<8x128xf32, #tpu.memory_space<vmem>>, vector<8x128xf32>
    %92 = arith.index_cast %89 : i32 to index
    %c0_49 = arith.constant 0 : index
    %93 = vector.load %arg10[%92, %c0_49] : memref<128x512xf32, #tpu.memory_space<vmem>>, vector<8x512xf32>
    %94 = arith.truncf %90 : vector<8x128xf32> to vector<8x128xbf16>
    %cst_50 = arith.constant dense<0.000000e+00> : vector<8x512xf32>
    %95 = tpu.matmul %94, %11, %cst_50 {dimension_numbers = #tpu.dot_dimension_numbers<[1], [0], [0], [1], [0, 0, 1, 1], [], []>} : vector<8x128xbf16>, vector<128x512xbf16>, vector<8x512xf32> -> vector<8x512xf32>
    %96 = arith.addf %93, %95 : vector<8x512xf32>
    %97 = vector.extract_strided_slice %96 {offsets = [0, 0], sizes = [8, 128], strides = [1, 1]} : vector<8x512xf32> to vector<8x128xf32>
    %98 = arith.negf %97 : vector<8x128xf32>
    %99 = math.exp %98 : vector<8x128xf32>
    %cst_51 = arith.constant 1.000000e+00 : f32
    %100 = vector.broadcast %cst_51 : f32 to vector<8x128xf32>
    %101 = arith.addf %100, %99 : vector<8x128xf32>
    %102 = arith.divf %100, %101 : vector<8x128xf32>
    %103 = vector.extract_strided_slice %96 {offsets = [0, 128], sizes = [8, 128], strides = [1, 1]} : vector<8x512xf32> to vector<8x128xf32>
    %104 = arith.negf %103 : vector<8x128xf32>
    %105 = math.exp %104 : vector<8x128xf32>
    %cst_52 = arith.constant 1.000000e+00 : f32
    %106 = vector.broadcast %cst_52 : f32 to vector<8x128xf32>
    %107 = arith.addf %106, %105 : vector<8x128xf32>
    %108 = arith.divf %106, %107 : vector<8x128xf32>
    %109 = vector.extract_strided_slice %96 {offsets = [0, 256], sizes = [8, 128], strides = [1, 1]} : vector<8x512xf32> to vector<8x128xf32>
    %110 = math.tanh %109 : vector<8x128xf32>
    %111 = vector.extract_strided_slice %96 {offsets = [0, 384], sizes = [8, 128], strides = [1, 1]} : vector<8x512xf32> to vector<8x128xf32>
    %112 = arith.negf %111 : vector<8x128xf32>
    %113 = math.exp %112 : vector<8x128xf32>
    %cst_53 = arith.constant 1.000000e+00 : f32
    %114 = vector.broadcast %cst_53 : f32 to vector<8x128xf32>
    %115 = arith.addf %114, %113 : vector<8x128xf32>
    %116 = arith.divf %114, %115 : vector<8x128xf32>
    %117 = arith.mulf %108, %91 : vector<8x128xf32>
    %118 = arith.mulf %102, %110 : vector<8x128xf32>
    %119 = arith.addf %117, %118 : vector<8x128xf32>
    %120 = math.tanh %119 : vector<8x128xf32>
    %121 = arith.mulf %116, %120 : vector<8x128xf32>
    %c0_54 = arith.constant 0 : index
    %c0_55 = arith.constant 0 : index
    %122 = vector.load %arg13[%c0_54, %c0_55] : memref<8x128xf32, #tpu.memory_space<vmem>>, vector<8x128xf32>
    tpu.vector_store %arg13[%c0_54, %c0_55], %119 {strides = array<i32>} : memref<8x128xf32, #tpu.memory_space<vmem>>, vector<8x128xf32>,
    %c0_56 = arith.constant 0 : index
    %c0_57 = arith.constant 0 : index
    %123 = vector.load %arg12[%c0_56, %c0_57] : memref<8x128xf32, #tpu.memory_space<vmem>>, vector<8x128xf32>
    tpu.vector_store %arg12[%c0_56, %c0_57], %121 {strides = array<i32>} : memref<8x128xf32, #tpu.memory_space<vmem>>, vector<8x128xf32>,
    %124 = arith.index_cast %89 : i32 to index
    %c0_58 = arith.constant 0 : index
    %125 = vector.load %arg11[%124, %c0_58] : memref<128x128xf32, #tpu.memory_space<vmem>>, vector<8x128xf32>
    tpu.vector_store %arg11[%124, %c0_58], %121 {strides = array<i32>} : memref<128x128xf32, #tpu.memory_space<vmem>>, vector<8x128xf32>,
    %c3_i32 = arith.constant 3 : i32
    %c8_i32_59 = arith.constant 8 : i32
    %126 = arith.muli %c3_i32, %c8_i32_59 : i32
    %127 = tpu.assume_multiple %126, 8 : i32
    %c0_60 = arith.constant 0 : index
    %c0_61 = arith.constant 0 : index
    %128 = vector.load %arg12[%c0_60, %c0_61] : memref<8x128xf32, #tpu.memory_space<vmem>>, vector<8x128xf32>
    %c0_62 = arith.constant 0 : index
    %c0_63 = arith.constant 0 : index
    %129 = vector.load %arg13[%c0_62, %c0_63] : memref<8x128xf32, #tpu.memory_space<vmem>>, vector<8x128xf32>
    %130 = arith.index_cast %127 : i32 to index
    %c0_64 = arith.constant 0 : index
    %131 = vector.load %arg10[%130, %c0_64] : memref<128x512xf32, #tpu.memory_space<vmem>>, vector<8x512xf32>
    %132 = arith.truncf %128 : vector<8x128xf32> to vector<8x128xbf16>
    %cst_65 = arith.constant dense<0.000000e+00> : vector<8x512xf32>
    %133 = tpu.matmul %132, %11, %cst_65 {dimension_numbers = #tpu.dot_dimension_numbers<[1], [0], [0], [1], [0, 0, 1, 1], [], []>} : vector<8x128xbf16>, vector<128x512xbf16>, vector<8x512xf32> -> vector<8x512xf32>
    %134 = arith.addf %131, %133 : vector<8x512xf32>
    %135 = vector.extract_strided_slice %134 {offsets = [0, 0], sizes = [8, 128], strides = [1, 1]} : vector<8x512xf32> to vector<8x128xf32>
    %136 = arith.negf %135 : vector<8x128xf32>
    %137 = math.exp %136 : vector<8x128xf32>
    %cst_66 = arith.constant 1.000000e+00 : f32
    %138 = vector.broadcast %cst_66 : f32 to vector<8x128xf32>
    %139 = arith.addf %138, %137 : vector<8x128xf32>
    %140 = arith.divf %138, %139 : vector<8x128xf32>
    %141 = vector.extract_strided_slice %134 {offsets = [0, 128], sizes = [8, 128], strides = [1, 1]} : vector<8x512xf32> to vector<8x128xf32>
    %142 = arith.negf %141 : vector<8x128xf32>
    %143 = math.exp %142 : vector<8x128xf32>
    %cst_67 = arith.constant 1.000000e+00 : f32
    %144 = vector.broadcast %cst_67 : f32 to vector<8x128xf32>
    %145 = arith.addf %144, %143 : vector<8x128xf32>
    %146 = arith.divf %144, %145 : vector<8x128xf32>
    %147 = vector.extract_strided_slice %134 {offsets = [0, 256], sizes = [8, 128], strides = [1, 1]} : vector<8x512xf32> to vector<8x128xf32>
    %148 = math.tanh %147 : vector<8x128xf32>
    %149 = vector.extract_strided_slice %134 {offsets = [0, 384], sizes = [8, 128], strides = [1, 1]} : vector<8x512xf32> to vector<8x128xf32>
    %150 = arith.negf %149 : vector<8x128xf32>
    %151 = math.exp %150 : vector<8x128xf32>
    %cst_68 = arith.constant 1.000000e+00 : f32
    %152 = vector.broadcast %cst_68 : f32 to vector<8x128xf32>
    %153 = arith.addf %152, %151 : vector<8x128xf32>
    %154 = arith.divf %152, %153 : vector<8x128xf32>
    %155 = arith.mulf %146, %129 : vector<8x128xf32>
    %156 = arith.mulf %140, %148 : vector<8x128xf32>
    %157 = arith.addf %155, %156 : vector<8x128xf32>
    %158 = math.tanh %157 : vector<8x128xf32>
    %159 = arith.mulf %154, %158 : vector<8x128xf32>
    %c0_69 = arith.constant 0 : index
    %c0_70 = arith.constant 0 : index
    %160 = vector.load %arg13[%c0_69, %c0_70] : memref<8x128xf32, #tpu.memory_space<vmem>>, vector<8x128xf32>
    tpu.vector_store %arg13[%c0_69, %c0_70], %157 {strides = array<i32>} : memref<8x128xf32, #tpu.memory_space<vmem>>, vector<8x128xf32>,
    %c0_71 = arith.constant 0 : index
    %c0_72 = arith.constant 0 : index
    %161 = vector.load %arg12[%c0_71, %c0_72] : memref<8x128xf32, #tpu.memory_space<vmem>>, vector<8x128xf32>
    tpu.vector_store %arg12[%c0_71, %c0_72], %159 {strides = array<i32>} : memref<8x128xf32, #tpu.memory_space<vmem>>, vector<8x128xf32>,
    %162 = arith.index_cast %127 : i32 to index
    %c0_73 = arith.constant 0 : index
    %163 = vector.load %arg11[%162, %c0_73] : memref<128x128xf32, #tpu.memory_space<vmem>>, vector<8x128xf32>
    tpu.vector_store %arg11[%162, %c0_73], %159 {strides = array<i32>} : memref<128x128xf32, #tpu.memory_space<vmem>>, vector<8x128xf32>,
    %c4_i32 = arith.constant 4 : i32
    %c8_i32_74 = arith.constant 8 : i32
    %164 = arith.muli %c4_i32, %c8_i32_74 : i32
    %165 = tpu.assume_multiple %164, 8 : i32
    %c0_75 = arith.constant 0 : index
    %c0_76 = arith.constant 0 : index
    %166 = vector.load %arg12[%c0_75, %c0_76] : memref<8x128xf32, #tpu.memory_space<vmem>>, vector<8x128xf32>
    %c0_77 = arith.constant 0 : index
    %c0_78 = arith.constant 0 : index
    %167 = vector.load %arg13[%c0_77, %c0_78] : memref<8x128xf32, #tpu.memory_space<vmem>>, vector<8x128xf32>
    %168 = arith.index_cast %165 : i32 to index
    %c0_79 = arith.constant 0 : index
    %169 = vector.load %arg10[%168, %c0_79] : memref<128x512xf32, #tpu.memory_space<vmem>>, vector<8x512xf32>
    %170 = arith.truncf %166 : vector<8x128xf32> to vector<8x128xbf16>
    %cst_80 = arith.constant dense<0.000000e+00> : vector<8x512xf32>
    %171 = tpu.matmul %170, %11, %cst_80 {dimension_numbers = #tpu.dot_dimension_numbers<[1], [0], [0], [1], [0, 0, 1, 1], [], []>} : vector<8x128xbf16>, vector<128x512xbf16>, vector<8x512xf32> -> vector<8x512xf32>
    %172 = arith.addf %169, %171 : vector<8x512xf32>
    %173 = vector.extract_strided_slice %172 {offsets = [0, 0], sizes = [8, 128], strides = [1, 1]} : vector<8x512xf32> to vector<8x128xf32>
    %174 = arith.negf %173 : vector<8x128xf32>
    %175 = math.exp %174 : vector<8x128xf32>
    %cst_81 = arith.constant 1.000000e+00 : f32
    %176 = vector.broadcast %cst_81 : f32 to vector<8x128xf32>
    %177 = arith.addf %176, %175 : vector<8x128xf32>
    %178 = arith.divf %176, %177 : vector<8x128xf32>
    %179 = vector.extract_strided_slice %172 {offsets = [0, 128], sizes = [8, 128], strides = [1, 1]} : vector<8x512xf32> to vector<8x128xf32>
    %180 = arith.negf %179 : vector<8x128xf32>
    %181 = math.exp %180 : vector<8x128xf32>
    %cst_82 = arith.constant 1.000000e+00 : f32
    %182 = vector.broadcast %cst_82 : f32 to vector<8x128xf32>
    %183 = arith.addf %182, %181 : vector<8x128xf32>
    %184 = arith.divf %182, %183 : vector<8x128xf32>
    %185 = vector.extract_strided_slice %172 {offsets = [0, 256], sizes = [8, 128], strides = [1, 1]} : vector<8x512xf32> to vector<8x128xf32>
    %186 = math.tanh %185 : vector<8x128xf32>
    %187 = vector.extract_strided_slice %172 {offsets = [0, 384], sizes = [8, 128], strides = [1, 1]} : vector<8x512xf32> to vector<8x128xf32>
    %188 = arith.negf %187 : vector<8x128xf32>
    %189 = math.exp %188 : vector<8x128xf32>
    %cst_83 = arith.constant 1.000000e+00 : f32
    %190 = vector.broadcast %cst_83 : f32 to vector<8x128xf32>
    %191 = arith.addf %190, %189 : vector<8x128xf32>
    %192 = arith.divf %190, %191 : vector<8x128xf32>
    %193 = arith.mulf %184, %167 : vector<8x128xf32>
    %194 = arith.mulf %178, %186 : vector<8x128xf32>
    %195 = arith.addf %193, %194 : vector<8x128xf32>
    %196 = math.tanh %195 : vector<8x128xf32>
    %197 = arith.mulf %192, %196 : vector<8x128xf32>
    %c0_84 = arith.constant 0 : index
    %c0_85 = arith.constant 0 : index
    %198 = vector.load %arg13[%c0_84, %c0_85] : memref<8x128xf32, #tpu.memory_space<vmem>>, vector<8x128xf32>
    tpu.vector_store %arg13[%c0_84, %c0_85], %195 {strides = array<i32>} : memref<8x128xf32, #tpu.memory_space<vmem>>, vector<8x128xf32>,
    %c0_86 = arith.constant 0 : index
    %c0_87 = arith.constant 0 : index
    %199 = vector.load %arg12[%c0_86, %c0_87] : memref<8x128xf32, #tpu.memory_space<vmem>>, vector<8x128xf32>
    tpu.vector_store %arg12[%c0_86, %c0_87], %197 {strides = array<i32>} : memref<8x128xf32, #tpu.memory_space<vmem>>, vector<8x128xf32>,
    %200 = arith.index_cast %165 : i32 to index
    %c0_88 = arith.constant 0 : index
    %201 = vector.load %arg11[%200, %c0_88] : memref<128x128xf32, #tpu.memory_space<vmem>>, vector<8x128xf32>
    tpu.vector_store %arg11[%200, %c0_88], %197 {strides = array<i32>} : memref<128x128xf32, #tpu.memory_space<vmem>>, vector<8x128xf32>,
    %c5_i32 = arith.constant 5 : i32
    %c8_i32_89 = arith.constant 8 : i32
    %202 = arith.muli %c5_i32, %c8_i32_89 : i32
    %203 = tpu.assume_multiple %202, 8 : i32
    %c0_90 = arith.constant 0 : index
    %c0_91 = arith.constant 0 : index
    %204 = vector.load %arg12[%c0_90, %c0_91] : memref<8x128xf32, #tpu.memory_space<vmem>>, vector<8x128xf32>
    %c0_92 = arith.constant 0 : index
    %c0_93 = arith.constant 0 : index
    %205 = vector.load %arg13[%c0_92, %c0_93] : memref<8x128xf32, #tpu.memory_space<vmem>>, vector<8x128xf32>
    %206 = arith.index_cast %203 : i32 to index
    %c0_94 = arith.constant 0 : index
    %207 = vector.load %arg10[%206, %c0_94] : memref<128x512xf32, #tpu.memory_space<vmem>>, vector<8x512xf32>
    %208 = arith.truncf %204 : vector<8x128xf32> to vector<8x128xbf16>
    %cst_95 = arith.constant dense<0.000000e+00> : vector<8x512xf32>
    %209 = tpu.matmul %208, %11, %cst_95 {dimension_numbers = #tpu.dot_dimension_numbers<[1], [0], [0], [1], [0, 0, 1, 1], [], []>} : vector<8x128xbf16>, vector<128x512xbf16>, vector<8x512xf32> -> vector<8x512xf32>
    %210 = arith.addf %207, %209 : vector<8x512xf32>
    %211 = vector.extract_strided_slice %210 {offsets = [0, 0], sizes = [8, 128], strides = [1, 1]} : vector<8x512xf32> to vector<8x128xf32>
    %212 = arith.negf %211 : vector<8x128xf32>
    %213 = math.exp %212 : vector<8x128xf32>
    %cst_96 = arith.constant 1.000000e+00 : f32
    %214 = vector.broadcast %cst_96 : f32 to vector<8x128xf32>
    %215 = arith.addf %214, %213 : vector<8x128xf32>
    %216 = arith.divf %214, %215 : vector<8x128xf32>
    %217 = vector.extract_strided_slice %210 {offsets = [0, 128], sizes = [8, 128], strides = [1, 1]} : vector<8x512xf32> to vector<8x128xf32>
    %218 = arith.negf %217 : vector<8x128xf32>
    %219 = math.exp %218 : vector<8x128xf32>
    %cst_97 = arith.constant 1.000000e+00 : f32
    %220 = vector.broadcast %cst_97 : f32 to vector<8x128xf32>
    %221 = arith.addf %220, %219 : vector<8x128xf32>
    %222 = arith.divf %220, %221 : vector<8x128xf32>
    %223 = vector.extract_strided_slice %210 {offsets = [0, 256], sizes = [8, 128], strides = [1, 1]} : vector<8x512xf32> to vector<8x128xf32>
    %224 = math.tanh %223 : vector<8x128xf32>
    %225 = vector.extract_strided_slice %210 {offsets = [0, 384], sizes = [8, 128], strides = [1, 1]} : vector<8x512xf32> to vector<8x128xf32>
    %226 = arith.negf %225 : vector<8x128xf32>
    %227 = math.exp %226 : vector<8x128xf32>
    %cst_98 = arith.constant 1.000000e+00 : f32
    %228 = vector.broadcast %cst_98 : f32 to vector<8x128xf32>
    %229 = arith.addf %228, %227 : vector<8x128xf32>
    %230 = arith.divf %228, %229 : vector<8x128xf32>
    %231 = arith.mulf %222, %205 : vector<8x128xf32>
    %232 = arith.mulf %216, %224 : vector<8x128xf32>
    %233 = arith.addf %231, %232 : vector<8x128xf32>
    %234 = math.tanh %233 : vector<8x128xf32>
    %235 = arith.mulf %230, %234 : vector<8x128xf32>
    %c0_99 = arith.constant 0 : index
    %c0_100 = arith.constant 0 : index
    %236 = vector.load %arg13[%c0_99, %c0_100] : memref<8x128xf32, #tpu.memory_space<vmem>>, vector<8x128xf32>
    tpu.vector_store %arg13[%c0_99, %c0_100], %233 {strides = array<i32>} : memref<8x128xf32, #tpu.memory_space<vmem>>, vector<8x128xf32>,
    %c0_101 = arith.constant 0 : index
    %c0_102 = arith.constant 0 : index
    %237 = vector.load %arg12[%c0_101, %c0_102] : memref<8x128xf32, #tpu.memory_space<vmem>>, vector<8x128xf32>
    tpu.vector_store %arg12[%c0_101, %c0_102], %235 {strides = array<i32>} : memref<8x128xf32, #tpu.memory_space<vmem>>, vector<8x128xf32>,
    %238 = arith.index_cast %203 : i32 to index
    %c0_103 = arith.constant 0 : index
    %239 = vector.load %arg11[%238, %c0_103] : memref<128x128xf32, #tpu.memory_space<vmem>>, vector<8x128xf32>
    tpu.vector_store %arg11[%238, %c0_103], %235 {strides = array<i32>} : memref<128x128xf32, #tpu.memory_space<vmem>>, vector<8x128xf32>,
    %c6_i32 = arith.constant 6 : i32
    %c8_i32_104 = arith.constant 8 : i32
    %240 = arith.muli %c6_i32, %c8_i32_104 : i32
    %241 = tpu.assume_multiple %240, 8 : i32
    %c0_105 = arith.constant 0 : index
    %c0_106 = arith.constant 0 : index
    %242 = vector.load %arg12[%c0_105, %c0_106] : memref<8x128xf32, #tpu.memory_space<vmem>>, vector<8x128xf32>
    %c0_107 = arith.constant 0 : index
    %c0_108 = arith.constant 0 : index
    %243 = vector.load %arg13[%c0_107, %c0_108] : memref<8x128xf32, #tpu.memory_space<vmem>>, vector<8x128xf32>
    %244 = arith.index_cast %241 : i32 to index
    %c0_109 = arith.constant 0 : index
    %245 = vector.load %arg10[%244, %c0_109] : memref<128x512xf32, #tpu.memory_space<vmem>>, vector<8x512xf32>
    %246 = arith.truncf %242 : vector<8x128xf32> to vector<8x128xbf16>
    %cst_110 = arith.constant dense<0.000000e+00> : vector<8x512xf32>
    %247 = tpu.matmul %246, %11, %cst_110 {dimension_numbers = #tpu.dot_dimension_numbers<[1], [0], [0], [1], [0, 0, 1, 1], [], []>} : vector<8x128xbf16>, vector<128x512xbf16>, vector<8x512xf32> -> vector<8x512xf32>
    %248 = arith.addf %245, %247 : vector<8x512xf32>
    %249 = vector.extract_strided_slice %248 {offsets = [0, 0], sizes = [8, 128], strides = [1, 1]} : vector<8x512xf32> to vector<8x128xf32>
    %250 = arith.negf %249 : vector<8x128xf32>
    %251 = math.exp %250 : vector<8x128xf32>
    %cst_111 = arith.constant 1.000000e+00 : f32
    %252 = vector.broadcast %cst_111 : f32 to vector<8x128xf32>
    %253 = arith.addf %252, %251 : vector<8x128xf32>
    %254 = arith.divf %252, %253 : vector<8x128xf32>
    %255 = vector.extract_strided_slice %248 {offsets = [0, 128], sizes = [8, 128], strides = [1, 1]} : vector<8x512xf32> to vector<8x128xf32>
    %256 = arith.negf %255 : vector<8x128xf32>
    %257 = math.exp %256 : vector<8x128xf32>
    %cst_112 = arith.constant 1.000000e+00 : f32
    %258 = vector.broadcast %cst_112 : f32 to vector<8x128xf32>
    %259 = arith.addf %258, %257 : vector<8x128xf32>
    %260 = arith.divf %258, %259 : vector<8x128xf32>
    %261 = vector.extract_strided_slice %248 {offsets = [0, 256], sizes = [8, 128], strides = [1, 1]} : vector<8x512xf32> to vector<8x128xf32>
    %262 = math.tanh %261 : vector<8x128xf32>
    %263 = vector.extract_strided_slice %248 {offsets = [0, 384], sizes = [8, 128], strides = [1, 1]} : vector<8x512xf32> to vector<8x128xf32>
    %264 = arith.negf %263 : vector<8x128xf32>
    %265 = math.exp %264 : vector<8x128xf32>
    %cst_113 = arith.constant 1.000000e+00 : f32
    %266 = vector.broadcast %cst_113 : f32 to vector<8x128xf32>
    %267 = arith.addf %266, %265 : vector<8x128xf32>
    %268 = arith.divf %266, %267 : vector<8x128xf32>
    %269 = arith.mulf %260, %243 : vector<8x128xf32>
    %270 = arith.mulf %254, %262 : vector<8x128xf32>
    %271 = arith.addf %269, %270 : vector<8x128xf32>
    %272 = math.tanh %271 : vector<8x128xf32>
    %273 = arith.mulf %268, %272 : vector<8x128xf32>
    %c0_114 = arith.constant 0 : index
    %c0_115 = arith.constant 0 : index
    %274 = vector.load %arg13[%c0_114, %c0_115] : memref<8x128xf32, #tpu.memory_space<vmem>>, vector<8x128xf32>
    tpu.vector_store %arg13[%c0_114, %c0_115], %271 {strides = array<i32>} : memref<8x128xf32, #tpu.memory_space<vmem>>, vector<8x128xf32>,
    %c0_116 = arith.constant 0 : index
    %c0_117 = arith.constant 0 : index
    %275 = vector.load %arg12[%c0_116, %c0_117] : memref<8x128xf32, #tpu.memory_space<vmem>>, vector<8x128xf32>
    tpu.vector_store %arg12[%c0_116, %c0_117], %273 {strides = array<i32>} : memref<8x128xf32, #tpu.memory_space<vmem>>, vector<8x128xf32>,
    %276 = arith.index_cast %241 : i32 to index
    %c0_118 = arith.constant 0 : index
    %277 = vector.load %arg11[%276, %c0_118] : memref<128x128xf32, #tpu.memory_space<vmem>>, vector<8x128xf32>
    tpu.vector_store %arg11[%276, %c0_118], %273 {strides = array<i32>} : memref<128x128xf32, #tpu.memory_space<vmem>>, vector<8x128xf32>,
    %c7_i32 = arith.constant 7 : i32
    %c8_i32_119 = arith.constant 8 : i32
    %278 = arith.muli %c7_i32, %c8_i32_119 : i32
    %279 = tpu.assume_multiple %278, 8 : i32
    %c0_120 = arith.constant 0 : index
    %c0_121 = arith.constant 0 : index
    %280 = vector.load %arg12[%c0_120, %c0_121] : memref<8x128xf32, #tpu.memory_space<vmem>>, vector<8x128xf32>
    %c0_122 = arith.constant 0 : index
    %c0_123 = arith.constant 0 : index
    %281 = vector.load %arg13[%c0_122, %c0_123] : memref<8x128xf32, #tpu.memory_space<vmem>>, vector<8x128xf32>
    %282 = arith.index_cast %279 : i32 to index
    %c0_124 = arith.constant 0 : index
    %283 = vector.load %arg10[%282, %c0_124] : memref<128x512xf32, #tpu.memory_space<vmem>>, vector<8x512xf32>
    %284 = arith.truncf %280 : vector<8x128xf32> to vector<8x128xbf16>
    %cst_125 = arith.constant dense<0.000000e+00> : vector<8x512xf32>
    %285 = tpu.matmul %284, %11, %cst_125 {dimension_numbers = #tpu.dot_dimension_numbers<[1], [0], [0], [1], [0, 0, 1, 1], [], []>} : vector<8x128xbf16>, vector<128x512xbf16>, vector<8x512xf32> -> vector<8x512xf32>
    %286 = arith.addf %283, %285 : vector<8x512xf32>
    %287 = vector.extract_strided_slice %286 {offsets = [0, 0], sizes = [8, 128], strides = [1, 1]} : vector<8x512xf32> to vector<8x128xf32>
    %288 = arith.negf %287 : vector<8x128xf32>
    %289 = math.exp %288 : vector<8x128xf32>
    %cst_126 = arith.constant 1.000000e+00 : f32
    %290 = vector.broadcast %cst_126 : f32 to vector<8x128xf32>
    %291 = arith.addf %290, %289 : vector<8x128xf32>
    %292 = arith.divf %290, %291 : vector<8x128xf32>
    %293 = vector.extract_strided_slice %286 {offsets = [0, 128], sizes = [8, 128], strides = [1, 1]} : vector<8x512xf32> to vector<8x128xf32>
    %294 = arith.negf %293 : vector<8x128xf32>
    %295 = math.exp %294 : vector<8x128xf32>
    %cst_127 = arith.constant 1.000000e+00 : f32
    %296 = vector.broadcast %cst_127 : f32 to vector<8x128xf32>
    %297 = arith.addf %296, %295 : vector<8x128xf32>
    %298 = arith.divf %296, %297 : vector<8x128xf32>
    %299 = vector.extract_strided_slice %286 {offsets = [0, 256], sizes = [8, 128], strides = [1, 1]} : vector<8x512xf32> to vector<8x128xf32>
    %300 = math.tanh %299 : vector<8x128xf32>
    %301 = vector.extract_strided_slice %286 {offsets = [0, 384], sizes = [8, 128], strides = [1, 1]} : vector<8x512xf32> to vector<8x128xf32>
    %302 = arith.negf %301 : vector<8x128xf32>
    %303 = math.exp %302 : vector<8x128xf32>
    %cst_128 = arith.constant 1.000000e+00 : f32
    %304 = vector.broadcast %cst_128 : f32 to vector<8x128xf32>
    %305 = arith.addf %304, %303 : vector<8x128xf32>
    %306 = arith.divf %304, %305 : vector<8x128xf32>
    %307 = arith.mulf %298, %281 : vector<8x128xf32>
    %308 = arith.mulf %292, %300 : vector<8x128xf32>
    %309 = arith.addf %307, %308 : vector<8x128xf32>
    %310 = math.tanh %309 : vector<8x128xf32>
    %311 = arith.mulf %306, %310 : vector<8x128xf32>
    %c0_129 = arith.constant 0 : index
    %c0_130 = arith.constant 0 : index
    %312 = vector.load %arg13[%c0_129, %c0_130] : memref<8x128xf32, #tpu.memory_space<vmem>>, vector<8x128xf32>
    tpu.vector_store %arg13[%c0_129, %c0_130], %309 {strides = array<i32>} : memref<8x128xf32, #tpu.memory_space<vmem>>, vector<8x128xf32>,
    %c0_131 = arith.constant 0 : index
    %c0_132 = arith.constant 0 : index
    %313 = vector.load %arg12[%c0_131, %c0_132] : memref<8x128xf32, #tpu.memory_space<vmem>>, vector<8x128xf32>
    tpu.vector_store %arg12[%c0_131, %c0_132], %311 {strides = array<i32>} : memref<8x128xf32, #tpu.memory_space<vmem>>, vector<8x128xf32>,
    %314 = arith.index_cast %279 : i32 to index
    %c0_133 = arith.constant 0 : index
    %315 = vector.load %arg11[%314, %c0_133] : memref<128x128xf32, #tpu.memory_space<vmem>>, vector<8x128xf32>
    tpu.vector_store %arg11[%314, %c0_133], %311 {strides = array<i32>} : memref<128x128xf32, #tpu.memory_space<vmem>>, vector<8x128xf32>,
    %c8_i32_134 = arith.constant 8 : i32
    %c8_i32_135 = arith.constant 8 : i32
    %316 = arith.muli %c8_i32_134, %c8_i32_135 : i32
    %317 = tpu.assume_multiple %316, 8 : i32
    %c0_136 = arith.constant 0 : index
    %c0_137 = arith.constant 0 : index
    %318 = vector.load %arg12[%c0_136, %c0_137] : memref<8x128xf32, #tpu.memory_space<vmem>>, vector<8x128xf32>
    %c0_138 = arith.constant 0 : index
    %c0_139 = arith.constant 0 : index
    %319 = vector.load %arg13[%c0_138, %c0_139] : memref<8x128xf32, #tpu.memory_space<vmem>>, vector<8x128xf32>
    %320 = arith.index_cast %317 : i32 to index
    %c0_140 = arith.constant 0 : index
    %321 = vector.load %arg10[%320, %c0_140] : memref<128x512xf32, #tpu.memory_space<vmem>>, vector<8x512xf32>
    %322 = arith.truncf %318 : vector<8x128xf32> to vector<8x128xbf16>
    %cst_141 = arith.constant dense<0.000000e+00> : vector<8x512xf32>
    %323 = tpu.matmul %322, %11, %cst_141 {dimension_numbers = #tpu.dot_dimension_numbers<[1], [0], [0], [1], [0, 0, 1, 1], [], []>} : vector<8x128xbf16>, vector<128x512xbf16>, vector<8x512xf32> -> vector<8x512xf32>
    %324 = arith.addf %321, %323 : vector<8x512xf32>
    %325 = vector.extract_strided_slice %324 {offsets = [0, 0], sizes = [8, 128], strides = [1, 1]} : vector<8x512xf32> to vector<8x128xf32>
    %326 = arith.negf %325 : vector<8x128xf32>
    %327 = math.exp %326 : vector<8x128xf32>
    %cst_142 = arith.constant 1.000000e+00 : f32
    %328 = vector.broadcast %cst_142 : f32 to vector<8x128xf32>
    %329 = arith.addf %328, %327 : vector<8x128xf32>
    %330 = arith.divf %328, %329 : vector<8x128xf32>
    %331 = vector.extract_strided_slice %324 {offsets = [0, 128], sizes = [8, 128], strides = [1, 1]} : vector<8x512xf32> to vector<8x128xf32>
    %332 = arith.negf %331 : vector<8x128xf32>
    %333 = math.exp %332 : vector<8x128xf32>
    %cst_143 = arith.constant 1.000000e+00 : f32
    %334 = vector.broadcast %cst_143 : f32 to vector<8x128xf32>
    %335 = arith.addf %334, %333 : vector<8x128xf32>
    %336 = arith.divf %334, %335 : vector<8x128xf32>
    %337 = vector.extract_strided_slice %324 {offsets = [0, 256], sizes = [8, 128], strides = [1, 1]} : vector<8x512xf32> to vector<8x128xf32>
    %338 = math.tanh %337 : vector<8x128xf32>
    %339 = vector.extract_strided_slice %324 {offsets = [0, 384], sizes = [8, 128], strides = [1, 1]} : vector<8x512xf32> to vector<8x128xf32>
    %340 = arith.negf %339 : vector<8x128xf32>
    %341 = math.exp %340 : vector<8x128xf32>
    %cst_144 = arith.constant 1.000000e+00 : f32
    %342 = vector.broadcast %cst_144 : f32 to vector<8x128xf32>
    %343 = arith.addf %342, %341 : vector<8x128xf32>
    %344 = arith.divf %342, %343 : vector<8x128xf32>
    %345 = arith.mulf %336, %319 : vector<8x128xf32>
    %346 = arith.mulf %330, %338 : vector<8x128xf32>
    %347 = arith.addf %345, %346 : vector<8x128xf32>
    %348 = math.tanh %347 : vector<8x128xf32>
    %349 = arith.mulf %344, %348 : vector<8x128xf32>
    %c0_145 = arith.constant 0 : index
    %c0_146 = arith.constant 0 : index
    %350 = vector.load %arg13[%c0_145, %c0_146] : memref<8x128xf32, #tpu.memory_space<vmem>>, vector<8x128xf32>
    tpu.vector_store %arg13[%c0_145, %c0_146], %347 {strides = array<i32>} : memref<8x128xf32, #tpu.memory_space<vmem>>, vector<8x128xf32>,
    %c0_147 = arith.constant 0 : index
    %c0_148 = arith.constant 0 : index
    %351 = vector.load %arg12[%c0_147, %c0_148] : memref<8x128xf32, #tpu.memory_space<vmem>>, vector<8x128xf32>
    tpu.vector_store %arg12[%c0_147, %c0_148], %349 {strides = array<i32>} : memref<8x128xf32, #tpu.memory_space<vmem>>, vector<8x128xf32>,
    %352 = arith.index_cast %317 : i32 to index
    %c0_149 = arith.constant 0 : index
    %353 = vector.load %arg11[%352, %c0_149] : memref<128x128xf32, #tpu.memory_space<vmem>>, vector<8x128xf32>
    tpu.vector_store %arg11[%352, %c0_149], %349 {strides = array<i32>} : memref<128x128xf32, #tpu.memory_space<vmem>>, vector<8x128xf32>,
    %c9_i32 = arith.constant 9 : i32
    %c8_i32_150 = arith.constant 8 : i32
    %354 = arith.muli %c9_i32, %c8_i32_150 : i32
    %355 = tpu.assume_multiple %354, 8 : i32
    %c0_151 = arith.constant 0 : index
    %c0_152 = arith.constant 0 : index
    %356 = vector.load %arg12[%c0_151, %c0_152] : memref<8x128xf32, #tpu.memory_space<vmem>>, vector<8x128xf32>
    %c0_153 = arith.constant 0 : index
    %c0_154 = arith.constant 0 : index
    %357 = vector.load %arg13[%c0_153, %c0_154] : memref<8x128xf32, #tpu.memory_space<vmem>>, vector<8x128xf32>
    %358 = arith.index_cast %355 : i32 to index
    %c0_155 = arith.constant 0 : index
    %359 = vector.load %arg10[%358, %c0_155] : memref<128x512xf32, #tpu.memory_space<vmem>>, vector<8x512xf32>
    %360 = arith.truncf %356 : vector<8x128xf32> to vector<8x128xbf16>
    %cst_156 = arith.constant dense<0.000000e+00> : vector<8x512xf32>
    %361 = tpu.matmul %360, %11, %cst_156 {dimension_numbers = #tpu.dot_dimension_numbers<[1], [0], [0], [1], [0, 0, 1, 1], [], []>} : vector<8x128xbf16>, vector<128x512xbf16>, vector<8x512xf32> -> vector<8x512xf32>
    %362 = arith.addf %359, %361 : vector<8x512xf32>
    %363 = vector.extract_strided_slice %362 {offsets = [0, 0], sizes = [8, 128], strides = [1, 1]} : vector<8x512xf32> to vector<8x128xf32>
    %364 = arith.negf %363 : vector<8x128xf32>
    %365 = math.exp %364 : vector<8x128xf32>
    %cst_157 = arith.constant 1.000000e+00 : f32
    %366 = vector.broadcast %cst_157 : f32 to vector<8x128xf32>
    %367 = arith.addf %366, %365 : vector<8x128xf32>
    %368 = arith.divf %366, %367 : vector<8x128xf32>
    %369 = vector.extract_strided_slice %362 {offsets = [0, 128], sizes = [8, 128], strides = [1, 1]} : vector<8x512xf32> to vector<8x128xf32>
    %370 = arith.negf %369 : vector<8x128xf32>
    %371 = math.exp %370 : vector<8x128xf32>
    %cst_158 = arith.constant 1.000000e+00 : f32
    %372 = vector.broadcast %cst_158 : f32 to vector<8x128xf32>
    %373 = arith.addf %372, %371 : vector<8x128xf32>
    %374 = arith.divf %372, %373 : vector<8x128xf32>
    %375 = vector.extract_strided_slice %362 {offsets = [0, 256], sizes = [8, 128], strides = [1, 1]} : vector<8x512xf32> to vector<8x128xf32>
    %376 = math.tanh %375 : vector<8x128xf32>
    %377 = vector.extract_strided_slice %362 {offsets = [0, 384], sizes = [8, 128], strides = [1, 1]} : vector<8x512xf32> to vector<8x128xf32>
    %378 = arith.negf %377 : vector<8x128xf32>
    %379 = math.exp %378 : vector<8x128xf32>
    %cst_159 = arith.constant 1.000000e+00 : f32
    %380 = vector.broadcast %cst_159 : f32 to vector<8x128xf32>
    %381 = arith.addf %380, %379 : vector<8x128xf32>
    %382 = arith.divf %380, %381 : vector<8x128xf32>
    %383 = arith.mulf %374, %357 : vector<8x128xf32>
    %384 = arith.mulf %368, %376 : vector<8x128xf32>
    %385 = arith.addf %383, %384 : vector<8x128xf32>
    %386 = math.tanh %385 : vector<8x128xf32>
    %387 = arith.mulf %382, %386 : vector<8x128xf32>
    %c0_160 = arith.constant 0 : index
    %c0_161 = arith.constant 0 : index
    %388 = vector.load %arg13[%c0_160, %c0_161] : memref<8x128xf32, #tpu.memory_space<vmem>>, vector<8x128xf32>
    tpu.vector_store %arg13[%c0_160, %c0_161], %385 {strides = array<i32>} : memref<8x128xf32, #tpu.memory_space<vmem>>, vector<8x128xf32>,
    %c0_162 = arith.constant 0 : index
    %c0_163 = arith.constant 0 : index
    %389 = vector.load %arg12[%c0_162, %c0_163] : memref<8x128xf32, #tpu.memory_space<vmem>>, vector<8x128xf32>
    tpu.vector_store %arg12[%c0_162, %c0_163], %387 {strides = array<i32>} : memref<8x128xf32, #tpu.memory_space<vmem>>, vector<8x128xf32>,
    %390 = arith.index_cast %355 : i32 to index
    %c0_164 = arith.constant 0 : index
    %391 = vector.load %arg11[%390, %c0_164] : memref<128x128xf32, #tpu.memory_space<vmem>>, vector<8x128xf32>
    tpu.vector_store %arg11[%390, %c0_164], %387 {strides = array<i32>} : memref<128x128xf32, #tpu.memory_space<vmem>>, vector<8x128xf32>,
    %c10_i32 = arith.constant 10 : i32
    %c8_i32_165 = arith.constant 8 : i32
    %392 = arith.muli %c10_i32, %c8_i32_165 : i32
    %393 = tpu.assume_multiple %392, 8 : i32
    %c0_166 = arith.constant 0 : index
    %c0_167 = arith.constant 0 : index
    %394 = vector.load %arg12[%c0_166, %c0_167] : memref<8x128xf32, #tpu.memory_space<vmem>>, vector<8x128xf32>
    %c0_168 = arith.constant 0 : index
    %c0_169 = arith.constant 0 : index
    %395 = vector.load %arg13[%c0_168, %c0_169] : memref<8x128xf32, #tpu.memory_space<vmem>>, vector<8x128xf32>
    %396 = arith.index_cast %393 : i32 to index
    %c0_170 = arith.constant 0 : index
    %397 = vector.load %arg10[%396, %c0_170] : memref<128x512xf32, #tpu.memory_space<vmem>>, vector<8x512xf32>
    %398 = arith.truncf %394 : vector<8x128xf32> to vector<8x128xbf16>
    %cst_171 = arith.constant dense<0.000000e+00> : vector<8x512xf32>
    %399 = tpu.matmul %398, %11, %cst_171 {dimension_numbers = #tpu.dot_dimension_numbers<[1], [0], [0], [1], [0, 0, 1, 1], [], []>} : vector<8x128xbf16>, vector<128x512xbf16>, vector<8x512xf32> -> vector<8x512xf32>
    %400 = arith.addf %397, %399 : vector<8x512xf32>
    %401 = vector.extract_strided_slice %400 {offsets = [0, 0], sizes = [8, 128], strides = [1, 1]} : vector<8x512xf32> to vector<8x128xf32>
    %402 = arith.negf %401 : vector<8x128xf32>
    %403 = math.exp %402 : vector<8x128xf32>
    %cst_172 = arith.constant 1.000000e+00 : f32
    %404 = vector.broadcast %cst_172 : f32 to vector<8x128xf32>
    %405 = arith.addf %404, %403 : vector<8x128xf32>
    %406 = arith.divf %404, %405 : vector<8x128xf32>
    %407 = vector.extract_strided_slice %400 {offsets = [0, 128], sizes = [8, 128], strides = [1, 1]} : vector<8x512xf32> to vector<8x128xf32>
    %408 = arith.negf %407 : vector<8x128xf32>
    %409 = math.exp %408 : vector<8x128xf32>
    %cst_173 = arith.constant 1.000000e+00 : f32
    %410 = vector.broadcast %cst_173 : f32 to vector<8x128xf32>
    %411 = arith.addf %410, %409 : vector<8x128xf32>
    %412 = arith.divf %410, %411 : vector<8x128xf32>
    %413 = vector.extract_strided_slice %400 {offsets = [0, 256], sizes = [8, 128], strides = [1, 1]} : vector<8x512xf32> to vector<8x128xf32>
    %414 = math.tanh %413 : vector<8x128xf32>
    %415 = vector.extract_strided_slice %400 {offsets = [0, 384], sizes = [8, 128], strides = [1, 1]} : vector<8x512xf32> to vector<8x128xf32>
    %416 = arith.negf %415 : vector<8x128xf32>
    %417 = math.exp %416 : vector<8x128xf32>
    %cst_174 = arith.constant 1.000000e+00 : f32
    %418 = vector.broadcast %cst_174 : f32 to vector<8x128xf32>
    %419 = arith.addf %418, %417 : vector<8x128xf32>
    %420 = arith.divf %418, %419 : vector<8x128xf32>
    %421 = arith.mulf %412, %395 : vector<8x128xf32>
    %422 = arith.mulf %406, %414 : vector<8x128xf32>
    %423 = arith.addf %421, %422 : vector<8x128xf32>
    %424 = math.tanh %423 : vector<8x128xf32>
    %425 = arith.mulf %420, %424 : vector<8x128xf32>
    %c0_175 = arith.constant 0 : index
    %c0_176 = arith.constant 0 : index
    %426 = vector.load %arg13[%c0_175, %c0_176] : memref<8x128xf32, #tpu.memory_space<vmem>>, vector<8x128xf32>
    tpu.vector_store %arg13[%c0_175, %c0_176], %423 {strides = array<i32>} : memref<8x128xf32, #tpu.memory_space<vmem>>, vector<8x128xf32>,
    %c0_177 = arith.constant 0 : index
    %c0_178 = arith.constant 0 : index
    %427 = vector.load %arg12[%c0_177, %c0_178] : memref<8x128xf32, #tpu.memory_space<vmem>>, vector<8x128xf32>
    tpu.vector_store %arg12[%c0_177, %c0_178], %425 {strides = array<i32>} : memref<8x128xf32, #tpu.memory_space<vmem>>, vector<8x128xf32>,
    %428 = arith.index_cast %393 : i32 to index
    %c0_179 = arith.constant 0 : index
    %429 = vector.load %arg11[%428, %c0_179] : memref<128x128xf32, #tpu.memory_space<vmem>>, vector<8x128xf32>
    tpu.vector_store %arg11[%428, %c0_179], %425 {strides = array<i32>} : memref<128x128xf32, #tpu.memory_space<vmem>>, vector<8x128xf32>,
    %c11_i32 = arith.constant 11 : i32
    %c8_i32_180 = arith.constant 8 : i32
    %430 = arith.muli %c11_i32, %c8_i32_180 : i32
    %431 = tpu.assume_multiple %430, 8 : i32
    %c0_181 = arith.constant 0 : index
    %c0_182 = arith.constant 0 : index
    %432 = vector.load %arg12[%c0_181, %c0_182] : memref<8x128xf32, #tpu.memory_space<vmem>>, vector<8x128xf32>
    %c0_183 = arith.constant 0 : index
    %c0_184 = arith.constant 0 : index
    %433 = vector.load %arg13[%c0_183, %c0_184] : memref<8x128xf32, #tpu.memory_space<vmem>>, vector<8x128xf32>
    %434 = arith.index_cast %431 : i32 to index
    %c0_185 = arith.constant 0 : index
    %435 = vector.load %arg10[%434, %c0_185] : memref<128x512xf32, #tpu.memory_space<vmem>>, vector<8x512xf32>
    %436 = arith.truncf %432 : vector<8x128xf32> to vector<8x128xbf16>
    %cst_186 = arith.constant dense<0.000000e+00> : vector<8x512xf32>
    %437 = tpu.matmul %436, %11, %cst_186 {dimension_numbers = #tpu.dot_dimension_numbers<[1], [0], [0], [1], [0, 0, 1, 1], [], []>} : vector<8x128xbf16>, vector<128x512xbf16>, vector<8x512xf32> -> vector<8x512xf32>
    %438 = arith.addf %435, %437 : vector<8x512xf32>
    %439 = vector.extract_strided_slice %438 {offsets = [0, 0], sizes = [8, 128], strides = [1, 1]} : vector<8x512xf32> to vector<8x128xf32>
    %440 = arith.negf %439 : vector<8x128xf32>
    %441 = math.exp %440 : vector<8x128xf32>
    %cst_187 = arith.constant 1.000000e+00 : f32
    %442 = vector.broadcast %cst_187 : f32 to vector<8x128xf32>
    %443 = arith.addf %442, %441 : vector<8x128xf32>
    %444 = arith.divf %442, %443 : vector<8x128xf32>
    %445 = vector.extract_strided_slice %438 {offsets = [0, 128], sizes = [8, 128], strides = [1, 1]} : vector<8x512xf32> to vector<8x128xf32>
    %446 = arith.negf %445 : vector<8x128xf32>
    %447 = math.exp %446 : vector<8x128xf32>
    %cst_188 = arith.constant 1.000000e+00 : f32
    %448 = vector.broadcast %cst_188 : f32 to vector<8x128xf32>
    %449 = arith.addf %448, %447 : vector<8x128xf32>
    %450 = arith.divf %448, %449 : vector<8x128xf32>
    %451 = vector.extract_strided_slice %438 {offsets = [0, 256], sizes = [8, 128], strides = [1, 1]} : vector<8x512xf32> to vector<8x128xf32>
    %452 = math.tanh %451 : vector<8x128xf32>
    %453 = vector.extract_strided_slice %438 {offsets = [0, 384], sizes = [8, 128], strides = [1, 1]} : vector<8x512xf32> to vector<8x128xf32>
    %454 = arith.negf %453 : vector<8x128xf32>
    %455 = math.exp %454 : vector<8x128xf32>
    %cst_189 = arith.constant 1.000000e+00 : f32
    %456 = vector.broadcast %cst_189 : f32 to vector<8x128xf32>
    %457 = arith.addf %456, %455 : vector<8x128xf32>
    %458 = arith.divf %456, %457 : vector<8x128xf32>
    %459 = arith.mulf %450, %433 : vector<8x128xf32>
    %460 = arith.mulf %444, %452 : vector<8x128xf32>
    %461 = arith.addf %459, %460 : vector<8x128xf32>
    %462 = math.tanh %461 : vector<8x128xf32>
    %463 = arith.mulf %458, %462 : vector<8x128xf32>
    %c0_190 = arith.constant 0 : index
    %c0_191 = arith.constant 0 : index
    %464 = vector.load %arg13[%c0_190, %c0_191] : memref<8x128xf32, #tpu.memory_space<vmem>>, vector<8x128xf32>
    tpu.vector_store %arg13[%c0_190, %c0_191], %461 {strides = array<i32>} : memref<8x128xf32, #tpu.memory_space<vmem>>, vector<8x128xf32>,
    %c0_192 = arith.constant 0 : index
    %c0_193 = arith.constant 0 : index
    %465 = vector.load %arg12[%c0_192, %c0_193] : memref<8x128xf32, #tpu.memory_space<vmem>>, vector<8x128xf32>
    tpu.vector_store %arg12[%c0_192, %c0_193], %463 {strides = array<i32>} : memref<8x128xf32, #tpu.memory_space<vmem>>, vector<8x128xf32>,
    %466 = arith.index_cast %431 : i32 to index
    %c0_194 = arith.constant 0 : index
    %467 = vector.load %arg11[%466, %c0_194] : memref<128x128xf32, #tpu.memory_space<vmem>>, vector<8x128xf32>
    tpu.vector_store %arg11[%466, %c0_194], %463 {strides = array<i32>} : memref<128x128xf32, #tpu.memory_space<vmem>>, vector<8x128xf32>,
    %c12_i32 = arith.constant 12 : i32
    %c8_i32_195 = arith.constant 8 : i32
    %468 = arith.muli %c12_i32, %c8_i32_195 : i32
    %469 = tpu.assume_multiple %468, 8 : i32
    %c0_196 = arith.constant 0 : index
    %c0_197 = arith.constant 0 : index
    %470 = vector.load %arg12[%c0_196, %c0_197] : memref<8x128xf32, #tpu.memory_space<vmem>>, vector<8x128xf32>
    %c0_198 = arith.constant 0 : index
    %c0_199 = arith.constant 0 : index
    %471 = vector.load %arg13[%c0_198, %c0_199] : memref<8x128xf32, #tpu.memory_space<vmem>>, vector<8x128xf32>
    %472 = arith.index_cast %469 : i32 to index
    %c0_200 = arith.constant 0 : index
    %473 = vector.load %arg10[%472, %c0_200] : memref<128x512xf32, #tpu.memory_space<vmem>>, vector<8x512xf32>
    %474 = arith.truncf %470 : vector<8x128xf32> to vector<8x128xbf16>
    %cst_201 = arith.constant dense<0.000000e+00> : vector<8x512xf32>
    %475 = tpu.matmul %474, %11, %cst_201 {dimension_numbers = #tpu.dot_dimension_numbers<[1], [0], [0], [1], [0, 0, 1, 1], [], []>} : vector<8x128xbf16>, vector<128x512xbf16>, vector<8x512xf32> -> vector<8x512xf32>
    %476 = arith.addf %473, %475 : vector<8x512xf32>
    %477 = vector.extract_strided_slice %476 {offsets = [0, 0], sizes = [8, 128], strides = [1, 1]} : vector<8x512xf32> to vector<8x128xf32>
    %478 = arith.negf %477 : vector<8x128xf32>
    %479 = math.exp %478 : vector<8x128xf32>
    %cst_202 = arith.constant 1.000000e+00 : f32
    %480 = vector.broadcast %cst_202 : f32 to vector<8x128xf32>
    %481 = arith.addf %480, %479 : vector<8x128xf32>
    %482 = arith.divf %480, %481 : vector<8x128xf32>
    %483 = vector.extract_strided_slice %476 {offsets = [0, 128], sizes = [8, 128], strides = [1, 1]} : vector<8x512xf32> to vector<8x128xf32>
    %484 = arith.negf %483 : vector<8x128xf32>
    %485 = math.exp %484 : vector<8x128xf32>
    %cst_203 = arith.constant 1.000000e+00 : f32
    %486 = vector.broadcast %cst_203 : f32 to vector<8x128xf32>
    %487 = arith.addf %486, %485 : vector<8x128xf32>
    %488 = arith.divf %486, %487 : vector<8x128xf32>
    %489 = vector.extract_strided_slice %476 {offsets = [0, 256], sizes = [8, 128], strides = [1, 1]} : vector<8x512xf32> to vector<8x128xf32>
    %490 = math.tanh %489 : vector<8x128xf32>
    %491 = vector.extract_strided_slice %476 {offsets = [0, 384], sizes = [8, 128], strides = [1, 1]} : vector<8x512xf32> to vector<8x128xf32>
    %492 = arith.negf %491 : vector<8x128xf32>
    %493 = math.exp %492 : vector<8x128xf32>
    %cst_204 = arith.constant 1.000000e+00 : f32
    %494 = vector.broadcast %cst_204 : f32 to vector<8x128xf32>
    %495 = arith.addf %494, %493 : vector<8x128xf32>
    %496 = arith.divf %494, %495 : vector<8x128xf32>
    %497 = arith.mulf %488, %471 : vector<8x128xf32>
    %498 = arith.mulf %482, %490 : vector<8x128xf32>
    %499 = arith.addf %497, %498 : vector<8x128xf32>
    %500 = math.tanh %499 : vector<8x128xf32>
    %501 = arith.mulf %496, %500 : vector<8x128xf32>
    %c0_205 = arith.constant 0 : index
    %c0_206 = arith.constant 0 : index
    %502 = vector.load %arg13[%c0_205, %c0_206] : memref<8x128xf32, #tpu.memory_space<vmem>>, vector<8x128xf32>
    tpu.vector_store %arg13[%c0_205, %c0_206], %499 {strides = array<i32>} : memref<8x128xf32, #tpu.memory_space<vmem>>, vector<8x128xf32>,
    %c0_207 = arith.constant 0 : index
    %c0_208 = arith.constant 0 : index
    %503 = vector.load %arg12[%c0_207, %c0_208] : memref<8x128xf32, #tpu.memory_space<vmem>>, vector<8x128xf32>
    tpu.vector_store %arg12[%c0_207, %c0_208], %501 {strides = array<i32>} : memref<8x128xf32, #tpu.memory_space<vmem>>, vector<8x128xf32>,
    %504 = arith.index_cast %469 : i32 to index
    %c0_209 = arith.constant 0 : index
    %505 = vector.load %arg11[%504, %c0_209] : memref<128x128xf32, #tpu.memory_space<vmem>>, vector<8x128xf32>
    tpu.vector_store %arg11[%504, %c0_209], %501 {strides = array<i32>} : memref<128x128xf32, #tpu.memory_space<vmem>>, vector<8x128xf32>,
    %c13_i32 = arith.constant 13 : i32
    %c8_i32_210 = arith.constant 8 : i32
    %506 = arith.muli %c13_i32, %c8_i32_210 : i32
    %507 = tpu.assume_multiple %506, 8 : i32
    %c0_211 = arith.constant 0 : index
    %c0_212 = arith.constant 0 : index
    %508 = vector.load %arg12[%c0_211, %c0_212] : memref<8x128xf32, #tpu.memory_space<vmem>>, vector<8x128xf32>
    %c0_213 = arith.constant 0 : index
    %c0_214 = arith.constant 0 : index
    %509 = vector.load %arg13[%c0_213, %c0_214] : memref<8x128xf32, #tpu.memory_space<vmem>>, vector<8x128xf32>
    %510 = arith.index_cast %507 : i32 to index
    %c0_215 = arith.constant 0 : index
    %511 = vector.load %arg10[%510, %c0_215] : memref<128x512xf32, #tpu.memory_space<vmem>>, vector<8x512xf32>
    %512 = arith.truncf %508 : vector<8x128xf32> to vector<8x128xbf16>
    %cst_216 = arith.constant dense<0.000000e+00> : vector<8x512xf32>
    %513 = tpu.matmul %512, %11, %cst_216 {dimension_numbers = #tpu.dot_dimension_numbers<[1], [0], [0], [1], [0, 0, 1, 1], [], []>} : vector<8x128xbf16>, vector<128x512xbf16>, vector<8x512xf32> -> vector<8x512xf32>
    %514 = arith.addf %511, %513 : vector<8x512xf32>
    %515 = vector.extract_strided_slice %514 {offsets = [0, 0], sizes = [8, 128], strides = [1, 1]} : vector<8x512xf32> to vector<8x128xf32>
    %516 = arith.negf %515 : vector<8x128xf32>
    %517 = math.exp %516 : vector<8x128xf32>
    %cst_217 = arith.constant 1.000000e+00 : f32
    %518 = vector.broadcast %cst_217 : f32 to vector<8x128xf32>
    %519 = arith.addf %518, %517 : vector<8x128xf32>
    %520 = arith.divf %518, %519 : vector<8x128xf32>
    %521 = vector.extract_strided_slice %514 {offsets = [0, 128], sizes = [8, 128], strides = [1, 1]} : vector<8x512xf32> to vector<8x128xf32>
    %522 = arith.negf %521 : vector<8x128xf32>
    %523 = math.exp %522 : vector<8x128xf32>
    %cst_218 = arith.constant 1.000000e+00 : f32
    %524 = vector.broadcast %cst_218 : f32 to vector<8x128xf32>
    %525 = arith.addf %524, %523 : vector<8x128xf32>
    %526 = arith.divf %524, %525 : vector<8x128xf32>
    %527 = vector.extract_strided_slice %514 {offsets = [0, 256], sizes = [8, 128], strides = [1, 1]} : vector<8x512xf32> to vector<8x128xf32>
    %528 = math.tanh %527 : vector<8x128xf32>
    %529 = vector.extract_strided_slice %514 {offsets = [0, 384], sizes = [8, 128], strides = [1, 1]} : vector<8x512xf32> to vector<8x128xf32>
    %530 = arith.negf %529 : vector<8x128xf32>
    %531 = math.exp %530 : vector<8x128xf32>
    %cst_219 = arith.constant 1.000000e+00 : f32
    %532 = vector.broadcast %cst_219 : f32 to vector<8x128xf32>
    %533 = arith.addf %532, %531 : vector<8x128xf32>
    %534 = arith.divf %532, %533 : vector<8x128xf32>
    %535 = arith.mulf %526, %509 : vector<8x128xf32>
    %536 = arith.mulf %520, %528 : vector<8x128xf32>
    %537 = arith.addf %535, %536 : vector<8x128xf32>
    %538 = math.tanh %537 : vector<8x128xf32>
    %539 = arith.mulf %534, %538 : vector<8x128xf32>
    %c0_220 = arith.constant 0 : index
    %c0_221 = arith.constant 0 : index
    %540 = vector.load %arg13[%c0_220, %c0_221] : memref<8x128xf32, #tpu.memory_space<vmem>>, vector<8x128xf32>
    tpu.vector_store %arg13[%c0_220, %c0_221], %537 {strides = array<i32>} : memref<8x128xf32, #tpu.memory_space<vmem>>, vector<8x128xf32>,
    %c0_222 = arith.constant 0 : index
    %c0_223 = arith.constant 0 : index
    %541 = vector.load %arg12[%c0_222, %c0_223] : memref<8x128xf32, #tpu.memory_space<vmem>>, vector<8x128xf32>
    tpu.vector_store %arg12[%c0_222, %c0_223], %539 {strides = array<i32>} : memref<8x128xf32, #tpu.memory_space<vmem>>, vector<8x128xf32>,
    %542 = arith.index_cast %507 : i32 to index
    %c0_224 = arith.constant 0 : index
    %543 = vector.load %arg11[%542, %c0_224] : memref<128x128xf32, #tpu.memory_space<vmem>>, vector<8x128xf32>
    tpu.vector_store %arg11[%542, %c0_224], %539 {strides = array<i32>} : memref<128x128xf32, #tpu.memory_space<vmem>>, vector<8x128xf32>,
    %c14_i32 = arith.constant 14 : i32
    %c8_i32_225 = arith.constant 8 : i32
    %544 = arith.muli %c14_i32, %c8_i32_225 : i32
    %545 = tpu.assume_multiple %544, 8 : i32
    %c0_226 = arith.constant 0 : index
    %c0_227 = arith.constant 0 : index
    %546 = vector.load %arg12[%c0_226, %c0_227] : memref<8x128xf32, #tpu.memory_space<vmem>>, vector<8x128xf32>
    %c0_228 = arith.constant 0 : index
    %c0_229 = arith.constant 0 : index
    %547 = vector.load %arg13[%c0_228, %c0_229] : memref<8x128xf32, #tpu.memory_space<vmem>>, vector<8x128xf32>
    %548 = arith.index_cast %545 : i32 to index
    %c0_230 = arith.constant 0 : index
    %549 = vector.load %arg10[%548, %c0_230] : memref<128x512xf32, #tpu.memory_space<vmem>>, vector<8x512xf32>
    %550 = arith.truncf %546 : vector<8x128xf32> to vector<8x128xbf16>
    %cst_231 = arith.constant dense<0.000000e+00> : vector<8x512xf32>
    %551 = tpu.matmul %550, %11, %cst_231 {dimension_numbers = #tpu.dot_dimension_numbers<[1], [0], [0], [1], [0, 0, 1, 1], [], []>} : vector<8x128xbf16>, vector<128x512xbf16>, vector<8x512xf32> -> vector<8x512xf32>
    %552 = arith.addf %549, %551 : vector<8x512xf32>
    %553 = vector.extract_strided_slice %552 {offsets = [0, 0], sizes = [8, 128], strides = [1, 1]} : vector<8x512xf32> to vector<8x128xf32>
    %554 = arith.negf %553 : vector<8x128xf32>
    %555 = math.exp %554 : vector<8x128xf32>
    %cst_232 = arith.constant 1.000000e+00 : f32
    %556 = vector.broadcast %cst_232 : f32 to vector<8x128xf32>
    %557 = arith.addf %556, %555 : vector<8x128xf32>
    %558 = arith.divf %556, %557 : vector<8x128xf32>
    %559 = vector.extract_strided_slice %552 {offsets = [0, 128], sizes = [8, 128], strides = [1, 1]} : vector<8x512xf32> to vector<8x128xf32>
    %560 = arith.negf %559 : vector<8x128xf32>
    %561 = math.exp %560 : vector<8x128xf32>
    %cst_233 = arith.constant 1.000000e+00 : f32
    %562 = vector.broadcast %cst_233 : f32 to vector<8x128xf32>
    %563 = arith.addf %562, %561 : vector<8x128xf32>
    %564 = arith.divf %562, %563 : vector<8x128xf32>
    %565 = vector.extract_strided_slice %552 {offsets = [0, 256], sizes = [8, 128], strides = [1, 1]} : vector<8x512xf32> to vector<8x128xf32>
    %566 = math.tanh %565 : vector<8x128xf32>
    %567 = vector.extract_strided_slice %552 {offsets = [0, 384], sizes = [8, 128], strides = [1, 1]} : vector<8x512xf32> to vector<8x128xf32>
    %568 = arith.negf %567 : vector<8x128xf32>
    %569 = math.exp %568 : vector<8x128xf32>
    %cst_234 = arith.constant 1.000000e+00 : f32
    %570 = vector.broadcast %cst_234 : f32 to vector<8x128xf32>
    %571 = arith.addf %570, %569 : vector<8x128xf32>
    %572 = arith.divf %570, %571 : vector<8x128xf32>
    %573 = arith.mulf %564, %547 : vector<8x128xf32>
    %574 = arith.mulf %558, %566 : vector<8x128xf32>
    %575 = arith.addf %573, %574 : vector<8x128xf32>
    %576 = math.tanh %575 : vector<8x128xf32>
    %577 = arith.mulf %572, %576 : vector<8x128xf32>
    %c0_235 = arith.constant 0 : index
    %c0_236 = arith.constant 0 : index
    %578 = vector.load %arg13[%c0_235, %c0_236] : memref<8x128xf32, #tpu.memory_space<vmem>>, vector<8x128xf32>
    tpu.vector_store %arg13[%c0_235, %c0_236], %575 {strides = array<i32>} : memref<8x128xf32, #tpu.memory_space<vmem>>, vector<8x128xf32>,
    %c0_237 = arith.constant 0 : index
    %c0_238 = arith.constant 0 : index
    %579 = vector.load %arg12[%c0_237, %c0_238] : memref<8x128xf32, #tpu.memory_space<vmem>>, vector<8x128xf32>
    tpu.vector_store %arg12[%c0_237, %c0_238], %577 {strides = array<i32>} : memref<8x128xf32, #tpu.memory_space<vmem>>, vector<8x128xf32>,
    %580 = arith.index_cast %545 : i32 to index
    %c0_239 = arith.constant 0 : index
    %581 = vector.load %arg11[%580, %c0_239] : memref<128x128xf32, #tpu.memory_space<vmem>>, vector<8x128xf32>
    tpu.vector_store %arg11[%580, %c0_239], %577 {strides = array<i32>} : memref<128x128xf32, #tpu.memory_space<vmem>>, vector<8x128xf32>,
    %c15_i32 = arith.constant 15 : i32
    %c8_i32_240 = arith.constant 8 : i32
    %582 = arith.muli %c15_i32, %c8_i32_240 : i32
    %583 = tpu.assume_multiple %582, 8 : i32
    %c0_241 = arith.constant 0 : index
    %c0_242 = arith.constant 0 : index
    %584 = vector.load %arg12[%c0_241, %c0_242] : memref<8x128xf32, #tpu.memory_space<vmem>>, vector<8x128xf32>
    %c0_243 = arith.constant 0 : index
    %c0_244 = arith.constant 0 : index
    %585 = vector.load %arg13[%c0_243, %c0_244] : memref<8x128xf32, #tpu.memory_space<vmem>>, vector<8x128xf32>
    %586 = arith.index_cast %583 : i32 to index
    %c0_245 = arith.constant 0 : index
    %587 = vector.load %arg10[%586, %c0_245] : memref<128x512xf32, #tpu.memory_space<vmem>>, vector<8x512xf32>
    %588 = arith.truncf %584 : vector<8x128xf32> to vector<8x128xbf16>
    %cst_246 = arith.constant dense<0.000000e+00> : vector<8x512xf32>
    %589 = tpu.matmul %588, %11, %cst_246 {dimension_numbers = #tpu.dot_dimension_numbers<[1], [0], [0], [1], [0, 0, 1, 1], [], []>} : vector<8x128xbf16>, vector<128x512xbf16>, vector<8x512xf32> -> vector<8x512xf32>
    %590 = arith.addf %587, %589 : vector<8x512xf32>
    %591 = vector.extract_strided_slice %590 {offsets = [0, 0], sizes = [8, 128], strides = [1, 1]} : vector<8x512xf32> to vector<8x128xf32>
    %592 = arith.negf %591 : vector<8x128xf32>
    %593 = math.exp %592 : vector<8x128xf32>
    %cst_247 = arith.constant 1.000000e+00 : f32
    %594 = vector.broadcast %cst_247 : f32 to vector<8x128xf32>
    %595 = arith.addf %594, %593 : vector<8x128xf32>
    %596 = arith.divf %594, %595 : vector<8x128xf32>
    %597 = vector.extract_strided_slice %590 {offsets = [0, 128], sizes = [8, 128], strides = [1, 1]} : vector<8x512xf32> to vector<8x128xf32>
    %598 = arith.negf %597 : vector<8x128xf32>
    %599 = math.exp %598 : vector<8x128xf32>
    %cst_248 = arith.constant 1.000000e+00 : f32
    %600 = vector.broadcast %cst_248 : f32 to vector<8x128xf32>
    %601 = arith.addf %600, %599 : vector<8x128xf32>
    %602 = arith.divf %600, %601 : vector<8x128xf32>
    %603 = vector.extract_strided_slice %590 {offsets = [0, 256], sizes = [8, 128], strides = [1, 1]} : vector<8x512xf32> to vector<8x128xf32>
    %604 = math.tanh %603 : vector<8x128xf32>
    %605 = vector.extract_strided_slice %590 {offsets = [0, 384], sizes = [8, 128], strides = [1, 1]} : vector<8x512xf32> to vector<8x128xf32>
    %606 = arith.negf %605 : vector<8x128xf32>
    %607 = math.exp %606 : vector<8x128xf32>
    %cst_249 = arith.constant 1.000000e+00 : f32
    %608 = vector.broadcast %cst_249 : f32 to vector<8x128xf32>
    %609 = arith.addf %608, %607 : vector<8x128xf32>
    %610 = arith.divf %608, %609 : vector<8x128xf32>
    %611 = arith.mulf %602, %585 : vector<8x128xf32>
    %612 = arith.mulf %596, %604 : vector<8x128xf32>
    %613 = arith.addf %611, %612 : vector<8x128xf32>
    %614 = math.tanh %613 : vector<8x128xf32>
    %615 = arith.mulf %610, %614 : vector<8x128xf32>
    %c0_250 = arith.constant 0 : index
    %c0_251 = arith.constant 0 : index
    %616 = vector.load %arg13[%c0_250, %c0_251] : memref<8x128xf32, #tpu.memory_space<vmem>>, vector<8x128xf32>
    tpu.vector_store %arg13[%c0_250, %c0_251], %613 {strides = array<i32>} : memref<8x128xf32, #tpu.memory_space<vmem>>, vector<8x128xf32>,
    %c0_252 = arith.constant 0 : index
    %c0_253 = arith.constant 0 : index
    %617 = vector.load %arg12[%c0_252, %c0_253] : memref<8x128xf32, #tpu.memory_space<vmem>>, vector<8x128xf32>
    tpu.vector_store %arg12[%c0_252, %c0_253], %615 {strides = array<i32>} : memref<8x128xf32, #tpu.memory_space<vmem>>, vector<8x128xf32>,
    %618 = arith.index_cast %583 : i32 to index
    %c0_254 = arith.constant 0 : index
    %619 = vector.load %arg11[%618, %c0_254] : memref<128x128xf32, #tpu.memory_space<vmem>>, vector<8x128xf32>
    tpu.vector_store %arg11[%618, %c0_254], %615 {strides = array<i32>} : memref<128x128xf32, #tpu.memory_space<vmem>>, vector<8x128xf32>,
    %c16_i32 = arith.constant 16 : i32
    %c0_255 = arith.constant 0 : index
    %c0_256 = arith.constant 0 : index
    %620 = vector.load %arg11[%c0_255, %c0_256] : memref<128x128xf32, #tpu.memory_space<vmem>>, vector<128x128xf32>
    %621 = arith.truncf %620 : vector<128x128xf32> to vector<128x128xbf16>
    %c0_257 = arith.constant 0 : index
    %c0_258 = arith.constant 0 : index
    %622 = vector.load %arg4[%c0_257, %c0_258] : memref<128x512xbf16, #tpu.memory_space<vmem>>, vector<128x512xbf16>
    %cst_259 = arith.constant dense<0.000000e+00> : vector<128x512xf32>
    %623 = tpu.matmul %621, %622, %cst_259 {dimension_numbers = #tpu.dot_dimension_numbers<[1], [0], [0], [1], [0, 0, 1, 1], [], []>} : vector<128x128xbf16>, vector<128x512xbf16>, vector<128x512xf32> -> vector<128x512xf32>
    %c0_260 = arith.constant 0 : index
    %c0_261 = arith.constant 0 : index
    %624 = vector.load %arg6[%c0_260, %c0_261] : memref<1x512xf32, #tpu.memory_space<vmem>>, vector<1x512xf32>
    %625 = vector.broadcast %624 : vector<1x512xf32> to vector<128x512xf32>
    %626 = arith.addf %623, %625 : vector<128x512xf32>
    %c0_262 = arith.constant 0 : index
    %c0_263 = arith.constant 0 : index
    %627 = vector.load %arg10[%c0_262, %c0_263] : memref<128x512xf32, #tpu.memory_space<vmem>>, vector<128x512xf32>
    tpu.vector_store %arg10[%c0_262, %c0_263], %626 {strides = array<i32>} : memref<128x512xf32, #tpu.memory_space<vmem>>, vector<128x512xf32>,
    %cst_264 = arith.constant 0.000000e+00 : f32
    %628 = vector.broadcast %cst_264 : f32 to vector<8x128xf32>
    %c0_265 = arith.constant 0 : index
    %c0_266 = arith.constant 0 : index
    %629 = vector.load %arg12[%c0_265, %c0_266] : memref<8x128xf32, #tpu.memory_space<vmem>>, vector<8x128xf32>
    tpu.vector_store %arg12[%c0_265, %c0_266], %628 {strides = array<i32>} : memref<8x128xf32, #tpu.memory_space<vmem>>, vector<8x128xf32>,
    %cst_267 = arith.constant 0.000000e+00 : f32
    %630 = vector.broadcast %cst_267 : f32 to vector<8x128xf32>
    %c0_268 = arith.constant 0 : index
    %c0_269 = arith.constant 0 : index
    %631 = vector.load %arg13[%c0_268, %c0_269] : memref<8x128xf32, #tpu.memory_space<vmem>>, vector<8x128xf32>
    tpu.vector_store %arg13[%c0_268, %c0_269], %630 {strides = array<i32>} : memref<8x128xf32, #tpu.memory_space<vmem>>, vector<8x128xf32>,
    %c0_270 = arith.constant 0 : index
    %c0_271 = arith.constant 0 : index
    %632 = vector.load %arg5[%c0_270, %c0_271] : memref<128x512xbf16, #tpu.memory_space<vmem>>, vector<128x512xbf16>
    %c0_i32_272 = arith.constant 0 : i32
    %c8_i32_273 = arith.constant 8 : i32
    %633 = arith.muli %c0_i32_272, %c8_i32_273 : i32
    %634 = tpu.assume_multiple %633, 8 : i32
    %c0_274 = arith.constant 0 : index
    %c0_275 = arith.constant 0 : index
    %635 = vector.load %arg12[%c0_274, %c0_275] : memref<8x128xf32, #tpu.memory_space<vmem>>, vector<8x128xf32>
    %c0_276 = arith.constant 0 : index
    %c0_277 = arith.constant 0 : index
    %636 = vector.load %arg13[%c0_276, %c0_277] : memref<8x128xf32, #tpu.memory_space<vmem>>, vector<8x128xf32>
    %637 = arith.index_cast %634 : i32 to index
    %c0_278 = arith.constant 0 : index
    %638 = vector.load %arg10[%637, %c0_278] : memref<128x512xf32, #tpu.memory_space<vmem>>, vector<8x512xf32>
    %639 = arith.truncf %635 : vector<8x128xf32> to vector<8x128xbf16>
    %cst_279 = arith.constant dense<0.000000e+00> : vector<8x512xf32>
    %640 = tpu.matmul %639, %632, %cst_279 {dimension_numbers = #tpu.dot_dimension_numbers<[1], [0], [0], [1], [0, 0, 1, 1], [], []>} : vector<8x128xbf16>, vector<128x512xbf16>, vector<8x512xf32> -> vector<8x512xf32>
    %641 = arith.addf %638, %640 : vector<8x512xf32>
    %642 = vector.extract_strided_slice %641 {offsets = [0, 0], sizes = [8, 128], strides = [1, 1]} : vector<8x512xf32> to vector<8x128xf32>
    %643 = arith.negf %642 : vector<8x128xf32>
    %644 = math.exp %643 : vector<8x128xf32>
    %cst_280 = arith.constant 1.000000e+00 : f32
    %645 = vector.broadcast %cst_280 : f32 to vector<8x128xf32>
    %646 = arith.addf %645, %644 : vector<8x128xf32>
    %647 = arith.divf %645, %646 : vector<8x128xf32>
    %648 = vector.extract_strided_slice %641 {offsets = [0, 128], sizes = [8, 128], strides = [1, 1]} : vector<8x512xf32> to vector<8x128xf32>
    %649 = arith.negf %648 : vector<8x128xf32>
    %650 = math.exp %649 : vector<8x128xf32>
    %cst_281 = arith.constant 1.000000e+00 : f32
    %651 = vector.broadcast %cst_281 : f32 to vector<8x128xf32>
    %652 = arith.addf %651, %650 : vector<8x128xf32>
    %653 = arith.divf %651, %652 : vector<8x128xf32>
    %654 = vector.extract_strided_slice %641 {offsets = [0, 256], sizes = [8, 128], strides = [1, 1]} : vector<8x512xf32> to vector<8x128xf32>
    %655 = math.tanh %654 : vector<8x128xf32>
    %656 = vector.extract_strided_slice %641 {offsets = [0, 384], sizes = [8, 128], strides = [1, 1]} : vector<8x512xf32> to vector<8x128xf32>
    %657 = arith.negf %656 : vector<8x128xf32>
    %658 = math.exp %657 : vector<8x128xf32>
    %cst_282 = arith.constant 1.000000e+00 : f32
    %659 = vector.broadcast %cst_282 : f32 to vector<8x128xf32>
    %660 = arith.addf %659, %658 : vector<8x128xf32>
    %661 = arith.divf %659, %660 : vector<8x128xf32>
    %662 = arith.mulf %653, %636 : vector<8x128xf32>
    %663 = arith.mulf %647, %655 : vector<8x128xf32>
    %664 = arith.addf %662, %663 : vector<8x128xf32>
    %665 = math.tanh %664 : vector<8x128xf32>
    %666 = arith.mulf %661, %665 : vector<8x128xf32>
    %c0_283 = arith.constant 0 : index
    %c0_284 = arith.constant 0 : index
    %667 = vector.load %arg13[%c0_283, %c0_284] : memref<8x128xf32, #tpu.memory_space<vmem>>, vector<8x128xf32>
    tpu.vector_store %arg13[%c0_283, %c0_284], %664 {strides = array<i32>} : memref<8x128xf32, #tpu.memory_space<vmem>>, vector<8x128xf32>,
    %c0_285 = arith.constant 0 : index
    %c0_286 = arith.constant 0 : index
    %668 = vector.load %arg12[%c0_285, %c0_286] : memref<8x128xf32, #tpu.memory_space<vmem>>, vector<8x128xf32>
    tpu.vector_store %arg12[%c0_285, %c0_286], %666 {strides = array<i32>} : memref<8x128xf32, #tpu.memory_space<vmem>>, vector<8x128xf32>,
    %c1_i32_287 = arith.constant 1 : i32
    %c8_i32_288 = arith.constant 8 : i32
    %669 = arith.muli %c1_i32_287, %c8_i32_288 : i32
    %670 = tpu.assume_multiple %669, 8 : i32
    %c0_289 = arith.constant 0 : index
    %c0_290 = arith.constant 0 : index
    %671 = vector.load %arg12[%c0_289, %c0_290] : memref<8x128xf32, #tpu.memory_space<vmem>>, vector<8x128xf32>
    %c0_291 = arith.constant 0 : index
    %c0_292 = arith.constant 0 : index
    %672 = vector.load %arg13[%c0_291, %c0_292] : memref<8x128xf32, #tpu.memory_space<vmem>>, vector<8x128xf32>
    %673 = arith.index_cast %670 : i32 to index
    %c0_293 = arith.constant 0 : index
    %674 = vector.load %arg10[%673, %c0_293] : memref<128x512xf32, #tpu.memory_space<vmem>>, vector<8x512xf32>
    %675 = arith.truncf %671 : vector<8x128xf32> to vector<8x128xbf16>
    %cst_294 = arith.constant dense<0.000000e+00> : vector<8x512xf32>
    %676 = tpu.matmul %675, %632, %cst_294 {dimension_numbers = #tpu.dot_dimension_numbers<[1], [0], [0], [1], [0, 0, 1, 1], [], []>} : vector<8x128xbf16>, vector<128x512xbf16>, vector<8x512xf32> -> vector<8x512xf32>
    %677 = arith.addf %674, %676 : vector<8x512xf32>
    %678 = vector.extract_strided_slice %677 {offsets = [0, 0], sizes = [8, 128], strides = [1, 1]} : vector<8x512xf32> to vector<8x128xf32>
    %679 = arith.negf %678 : vector<8x128xf32>
    %680 = math.exp %679 : vector<8x128xf32>
    %cst_295 = arith.constant 1.000000e+00 : f32
    %681 = vector.broadcast %cst_295 : f32 to vector<8x128xf32>
    %682 = arith.addf %681, %680 : vector<8x128xf32>
    %683 = arith.divf %681, %682 : vector<8x128xf32>
    %684 = vector.extract_strided_slice %677 {offsets = [0, 128], sizes = [8, 128], strides = [1, 1]} : vector<8x512xf32> to vector<8x128xf32>
    %685 = arith.negf %684 : vector<8x128xf32>
    %686 = math.exp %685 : vector<8x128xf32>
    %cst_296 = arith.constant 1.000000e+00 : f32
    %687 = vector.broadcast %cst_296 : f32 to vector<8x128xf32>
    %688 = arith.addf %687, %686 : vector<8x128xf32>
    %689 = arith.divf %687, %688 : vector<8x128xf32>
    %690 = vector.extract_strided_slice %677 {offsets = [0, 256], sizes = [8, 128], strides = [1, 1]} : vector<8x512xf32> to vector<8x128xf32>
    %691 = math.tanh %690 : vector<8x128xf32>
    %692 = vector.extract_strided_slice %677 {offsets = [0, 384], sizes = [8, 128], strides = [1, 1]} : vector<8x512xf32> to vector<8x128xf32>
    %693 = arith.negf %692 : vector<8x128xf32>
    %694 = math.exp %693 : vector<8x128xf32>
    %cst_297 = arith.constant 1.000000e+00 : f32
    %695 = vector.broadcast %cst_297 : f32 to vector<8x128xf32>
    %696 = arith.addf %695, %694 : vector<8x128xf32>
    %697 = arith.divf %695, %696 : vector<8x128xf32>
    %698 = arith.mulf %689, %672 : vector<8x128xf32>
    %699 = arith.mulf %683, %691 : vector<8x128xf32>
    %700 = arith.addf %698, %699 : vector<8x128xf32>
    %701 = math.tanh %700 : vector<8x128xf32>
    %702 = arith.mulf %697, %701 : vector<8x128xf32>
    %c0_298 = arith.constant 0 : index
    %c0_299 = arith.constant 0 : index
    %703 = vector.load %arg13[%c0_298, %c0_299] : memref<8x128xf32, #tpu.memory_space<vmem>>, vector<8x128xf32>
    tpu.vector_store %arg13[%c0_298, %c0_299], %700 {strides = array<i32>} : memref<8x128xf32, #tpu.memory_space<vmem>>, vector<8x128xf32>,
    %c0_300 = arith.constant 0 : index
    %c0_301 = arith.constant 0 : index
    %704 = vector.load %arg12[%c0_300, %c0_301] : memref<8x128xf32, #tpu.memory_space<vmem>>, vector<8x128xf32>
    tpu.vector_store %arg12[%c0_300, %c0_301], %702 {strides = array<i32>} : memref<8x128xf32, #tpu.memory_space<vmem>>, vector<8x128xf32>,
    %c2_i32_302 = arith.constant 2 : i32
    %c8_i32_303 = arith.constant 8 : i32
    %705 = arith.muli %c2_i32_302, %c8_i32_303 : i32
    %706 = tpu.assume_multiple %705, 8 : i32
    %c0_304 = arith.constant 0 : index
    %c0_305 = arith.constant 0 : index
    %707 = vector.load %arg12[%c0_304, %c0_305] : memref<8x128xf32, #tpu.memory_space<vmem>>, vector<8x128xf32>
    %c0_306 = arith.constant 0 : index
    %c0_307 = arith.constant 0 : index
    %708 = vector.load %arg13[%c0_306, %c0_307] : memref<8x128xf32, #tpu.memory_space<vmem>>, vector<8x128xf32>
    %709 = arith.index_cast %706 : i32 to index
    %c0_308 = arith.constant 0 : index
    %710 = vector.load %arg10[%709, %c0_308] : memref<128x512xf32, #tpu.memory_space<vmem>>, vector<8x512xf32>
    %711 = arith.truncf %707 : vector<8x128xf32> to vector<8x128xbf16>
    %cst_309 = arith.constant dense<0.000000e+00> : vector<8x512xf32>
    %712 = tpu.matmul %711, %632, %cst_309 {dimension_numbers = #tpu.dot_dimension_numbers<[1], [0], [0], [1], [0, 0, 1, 1], [], []>} : vector<8x128xbf16>, vector<128x512xbf16>, vector<8x512xf32> -> vector<8x512xf32>
    %713 = arith.addf %710, %712 : vector<8x512xf32>
    %714 = vector.extract_strided_slice %713 {offsets = [0, 0], sizes = [8, 128], strides = [1, 1]} : vector<8x512xf32> to vector<8x128xf32>
    %715 = arith.negf %714 : vector<8x128xf32>
    %716 = math.exp %715 : vector<8x128xf32>
    %cst_310 = arith.constant 1.000000e+00 : f32
    %717 = vector.broadcast %cst_310 : f32 to vector<8x128xf32>
    %718 = arith.addf %717, %716 : vector<8x128xf32>
    %719 = arith.divf %717, %718 : vector<8x128xf32>
    %720 = vector.extract_strided_slice %713 {offsets = [0, 128], sizes = [8, 128], strides = [1, 1]} : vector<8x512xf32> to vector<8x128xf32>
    %721 = arith.negf %720 : vector<8x128xf32>
    %722 = math.exp %721 : vector<8x128xf32>
    %cst_311 = arith.constant 1.000000e+00 : f32
    %723 = vector.broadcast %cst_311 : f32 to vector<8x128xf32>
    %724 = arith.addf %723, %722 : vector<8x128xf32>
    %725 = arith.divf %723, %724 : vector<8x128xf32>
    %726 = vector.extract_strided_slice %713 {offsets = [0, 256], sizes = [8, 128], strides = [1, 1]} : vector<8x512xf32> to vector<8x128xf32>
    %727 = math.tanh %726 : vector<8x128xf32>
    %728 = vector.extract_strided_slice %713 {offsets = [0, 384], sizes = [8, 128], strides = [1, 1]} : vector<8x512xf32> to vector<8x128xf32>
    %729 = arith.negf %728 : vector<8x128xf32>
    %730 = math.exp %729 : vector<8x128xf32>
    %cst_312 = arith.constant 1.000000e+00 : f32
    %731 = vector.broadcast %cst_312 : f32 to vector<8x128xf32>
    %732 = arith.addf %731, %730 : vector<8x128xf32>
    %733 = arith.divf %731, %732 : vector<8x128xf32>
    %734 = arith.mulf %725, %708 : vector<8x128xf32>
    %735 = arith.mulf %719, %727 : vector<8x128xf32>
    %736 = arith.addf %734, %735 : vector<8x128xf32>
    %737 = math.tanh %736 : vector<8x128xf32>
    %738 = arith.mulf %733, %737 : vector<8x128xf32>
    %c0_313 = arith.constant 0 : index
    %c0_314 = arith.constant 0 : index
    %739 = vector.load %arg13[%c0_313, %c0_314] : memref<8x128xf32, #tpu.memory_space<vmem>>, vector<8x128xf32>
    tpu.vector_store %arg13[%c0_313, %c0_314], %736 {strides = array<i32>} : memref<8x128xf32, #tpu.memory_space<vmem>>, vector<8x128xf32>,
    %c0_315 = arith.constant 0 : index
    %c0_316 = arith.constant 0 : index
    %740 = vector.load %arg12[%c0_315, %c0_316] : memref<8x128xf32, #tpu.memory_space<vmem>>, vector<8x128xf32>
    tpu.vector_store %arg12[%c0_315, %c0_316], %738 {strides = array<i32>} : memref<8x128xf32, #tpu.memory_space<vmem>>, vector<8x128xf32>,
    %c3_i32_317 = arith.constant 3 : i32
    %c8_i32_318 = arith.constant 8 : i32
    %741 = arith.muli %c3_i32_317, %c8_i32_318 : i32
    %742 = tpu.assume_multiple %741, 8 : i32
    %c0_319 = arith.constant 0 : index
    %c0_320 = arith.constant 0 : index
    %743 = vector.load %arg12[%c0_319, %c0_320] : memref<8x128xf32, #tpu.memory_space<vmem>>, vector<8x128xf32>
    %c0_321 = arith.constant 0 : index
    %c0_322 = arith.constant 0 : index
    %744 = vector.load %arg13[%c0_321, %c0_322] : memref<8x128xf32, #tpu.memory_space<vmem>>, vector<8x128xf32>
    %745 = arith.index_cast %742 : i32 to index
    %c0_323 = arith.constant 0 : index
    %746 = vector.load %arg10[%745, %c0_323] : memref<128x512xf32, #tpu.memory_space<vmem>>, vector<8x512xf32>
    %747 = arith.truncf %743 : vector<8x128xf32> to vector<8x128xbf16>
    %cst_324 = arith.constant dense<0.000000e+00> : vector<8x512xf32>
    %748 = tpu.matmul %747, %632, %cst_324 {dimension_numbers = #tpu.dot_dimension_numbers<[1], [0], [0], [1], [0, 0, 1, 1], [], []>} : vector<8x128xbf16>, vector<128x512xbf16>, vector<8x512xf32> -> vector<8x512xf32>
    %749 = arith.addf %746, %748 : vector<8x512xf32>
    %750 = vector.extract_strided_slice %749 {offsets = [0, 0], sizes = [8, 128], strides = [1, 1]} : vector<8x512xf32> to vector<8x128xf32>
    %751 = arith.negf %750 : vector<8x128xf32>
    %752 = math.exp %751 : vector<8x128xf32>
    %cst_325 = arith.constant 1.000000e+00 : f32
    %753 = vector.broadcast %cst_325 : f32 to vector<8x128xf32>
    %754 = arith.addf %753, %752 : vector<8x128xf32>
    %755 = arith.divf %753, %754 : vector<8x128xf32>
    %756 = vector.extract_strided_slice %749 {offsets = [0, 128], sizes = [8, 128], strides = [1, 1]} : vector<8x512xf32> to vector<8x128xf32>
    %757 = arith.negf %756 : vector<8x128xf32>
    %758 = math.exp %757 : vector<8x128xf32>
    %cst_326 = arith.constant 1.000000e+00 : f32
    %759 = vector.broadcast %cst_326 : f32 to vector<8x128xf32>
    %760 = arith.addf %759, %758 : vector<8x128xf32>
    %761 = arith.divf %759, %760 : vector<8x128xf32>
    %762 = vector.extract_strided_slice %749 {offsets = [0, 256], sizes = [8, 128], strides = [1, 1]} : vector<8x512xf32> to vector<8x128xf32>
    %763 = math.tanh %762 : vector<8x128xf32>
    %764 = vector.extract_strided_slice %749 {offsets = [0, 384], sizes = [8, 128], strides = [1, 1]} : vector<8x512xf32> to vector<8x128xf32>
    %765 = arith.negf %764 : vector<8x128xf32>
    %766 = math.exp %765 : vector<8x128xf32>
    %cst_327 = arith.constant 1.000000e+00 : f32
    %767 = vector.broadcast %cst_327 : f32 to vector<8x128xf32>
    %768 = arith.addf %767, %766 : vector<8x128xf32>
    %769 = arith.divf %767, %768 : vector<8x128xf32>
    %770 = arith.mulf %761, %744 : vector<8x128xf32>
    %771 = arith.mulf %755, %763 : vector<8x128xf32>
    %772 = arith.addf %770, %771 : vector<8x128xf32>
    %773 = math.tanh %772 : vector<8x128xf32>
    %774 = arith.mulf %769, %773 : vector<8x128xf32>
    %c0_328 = arith.constant 0 : index
    %c0_329 = arith.constant 0 : index
    %775 = vector.load %arg13[%c0_328, %c0_329] : memref<8x128xf32, #tpu.memory_space<vmem>>, vector<8x128xf32>
    tpu.vector_store %arg13[%c0_328, %c0_329], %772 {strides = array<i32>} : memref<8x128xf32, #tpu.memory_space<vmem>>, vector<8x128xf32>,
    %c0_330 = arith.constant 0 : index
    %c0_331 = arith.constant 0 : index
    %776 = vector.load %arg12[%c0_330, %c0_331] : memref<8x128xf32, #tpu.memory_space<vmem>>, vector<8x128xf32>
    tpu.vector_store %arg12[%c0_330, %c0_331], %774 {strides = array<i32>} : memref<8x128xf32, #tpu.memory_space<vmem>>, vector<8x128xf32>,
    %c4_i32_332 = arith.constant 4 : i32
    %c8_i32_333 = arith.constant 8 : i32
    %777 = arith.muli %c4_i32_332, %c8_i32_333 : i32
    %778 = tpu.assume_multiple %777, 8 : i32
    %c0_334 = arith.constant 0 : index
    %c0_335 = arith.constant 0 : index
    %779 = vector.load %arg12[%c0_334, %c0_335] : memref<8x128xf32, #tpu.memory_space<vmem>>, vector<8x128xf32>
    %c0_336 = arith.constant 0 : index
    %c0_337 = arith.constant 0 : index
    %780 = vector.load %arg13[%c0_336, %c0_337] : memref<8x128xf32, #tpu.memory_space<vmem>>, vector<8x128xf32>
    %781 = arith.index_cast %778 : i32 to index
    %c0_338 = arith.constant 0 : index
    %782 = vector.load %arg10[%781, %c0_338] : memref<128x512xf32, #tpu.memory_space<vmem>>, vector<8x512xf32>
    %783 = arith.truncf %779 : vector<8x128xf32> to vector<8x128xbf16>
    %cst_339 = arith.constant dense<0.000000e+00> : vector<8x512xf32>
    %784 = tpu.matmul %783, %632, %cst_339 {dimension_numbers = #tpu.dot_dimension_numbers<[1], [0], [0], [1], [0, 0, 1, 1], [], []>} : vector<8x128xbf16>, vector<128x512xbf16>, vector<8x512xf32> -> vector<8x512xf32>
    %785 = arith.addf %782, %784 : vector<8x512xf32>
    %786 = vector.extract_strided_slice %785 {offsets = [0, 0], sizes = [8, 128], strides = [1, 1]} : vector<8x512xf32> to vector<8x128xf32>
    %787 = arith.negf %786 : vector<8x128xf32>
    %788 = math.exp %787 : vector<8x128xf32>
    %cst_340 = arith.constant 1.000000e+00 : f32
    %789 = vector.broadcast %cst_340 : f32 to vector<8x128xf32>
    %790 = arith.addf %789, %788 : vector<8x128xf32>
    %791 = arith.divf %789, %790 : vector<8x128xf32>
    %792 = vector.extract_strided_slice %785 {offsets = [0, 128], sizes = [8, 128], strides = [1, 1]} : vector<8x512xf32> to vector<8x128xf32>
    %793 = arith.negf %792 : vector<8x128xf32>
    %794 = math.exp %793 : vector<8x128xf32>
    %cst_341 = arith.constant 1.000000e+00 : f32
    %795 = vector.broadcast %cst_341 : f32 to vector<8x128xf32>
    %796 = arith.addf %795, %794 : vector<8x128xf32>
    %797 = arith.divf %795, %796 : vector<8x128xf32>
    %798 = vector.extract_strided_slice %785 {offsets = [0, 256], sizes = [8, 128], strides = [1, 1]} : vector<8x512xf32> to vector<8x128xf32>
    %799 = math.tanh %798 : vector<8x128xf32>
    %800 = vector.extract_strided_slice %785 {offsets = [0, 384], sizes = [8, 128], strides = [1, 1]} : vector<8x512xf32> to vector<8x128xf32>
    %801 = arith.negf %800 : vector<8x128xf32>
    %802 = math.exp %801 : vector<8x128xf32>
    %cst_342 = arith.constant 1.000000e+00 : f32
    %803 = vector.broadcast %cst_342 : f32 to vector<8x128xf32>
    %804 = arith.addf %803, %802 : vector<8x128xf32>
    %805 = arith.divf %803, %804 : vector<8x128xf32>
    %806 = arith.mulf %797, %780 : vector<8x128xf32>
    %807 = arith.mulf %791, %799 : vector<8x128xf32>
    %808 = arith.addf %806, %807 : vector<8x128xf32>
    %809 = math.tanh %808 : vector<8x128xf32>
    %810 = arith.mulf %805, %809 : vector<8x128xf32>
    %c0_343 = arith.constant 0 : index
    %c0_344 = arith.constant 0 : index
    %811 = vector.load %arg13[%c0_343, %c0_344] : memref<8x128xf32, #tpu.memory_space<vmem>>, vector<8x128xf32>
    tpu.vector_store %arg13[%c0_343, %c0_344], %808 {strides = array<i32>} : memref<8x128xf32, #tpu.memory_space<vmem>>, vector<8x128xf32>,
    %c0_345 = arith.constant 0 : index
    %c0_346 = arith.constant 0 : index
    %812 = vector.load %arg12[%c0_345, %c0_346] : memref<8x128xf32, #tpu.memory_space<vmem>>, vector<8x128xf32>
    tpu.vector_store %arg12[%c0_345, %c0_346], %810 {strides = array<i32>} : memref<8x128xf32, #tpu.memory_space<vmem>>, vector<8x128xf32>,
    %c5_i32_347 = arith.constant 5 : i32
    %c8_i32_348 = arith.constant 8 : i32
    %813 = arith.muli %c5_i32_347, %c8_i32_348 : i32
    %814 = tpu.assume_multiple %813, 8 : i32
    %c0_349 = arith.constant 0 : index
    %c0_350 = arith.constant 0 : index
    %815 = vector.load %arg12[%c0_349, %c0_350] : memref<8x128xf32, #tpu.memory_space<vmem>>, vector<8x128xf32>
    %c0_351 = arith.constant 0 : index
    %c0_352 = arith.constant 0 : index
    %816 = vector.load %arg13[%c0_351, %c0_352] : memref<8x128xf32, #tpu.memory_space<vmem>>, vector<8x128xf32>
    %817 = arith.index_cast %814 : i32 to index
    %c0_353 = arith.constant 0 : index
    %818 = vector.load %arg10[%817, %c0_353] : memref<128x512xf32, #tpu.memory_space<vmem>>, vector<8x512xf32>
    %819 = arith.truncf %815 : vector<8x128xf32> to vector<8x128xbf16>
    %cst_354 = arith.constant dense<0.000000e+00> : vector<8x512xf32>
    %820 = tpu.matmul %819, %632, %cst_354 {dimension_numbers = #tpu.dot_dimension_numbers<[1], [0], [0], [1], [0, 0, 1, 1], [], []>} : vector<8x128xbf16>, vector<128x512xbf16>, vector<8x512xf32> -> vector<8x512xf32>
    %821 = arith.addf %818, %820 : vector<8x512xf32>
    %822 = vector.extract_strided_slice %821 {offsets = [0, 0], sizes = [8, 128], strides = [1, 1]} : vector<8x512xf32> to vector<8x128xf32>
    %823 = arith.negf %822 : vector<8x128xf32>
    %824 = math.exp %823 : vector<8x128xf32>
    %cst_355 = arith.constant 1.000000e+00 : f32
    %825 = vector.broadcast %cst_355 : f32 to vector<8x128xf32>
    %826 = arith.addf %825, %824 : vector<8x128xf32>
    %827 = arith.divf %825, %826 : vector<8x128xf32>
    %828 = vector.extract_strided_slice %821 {offsets = [0, 128], sizes = [8, 128], strides = [1, 1]} : vector<8x512xf32> to vector<8x128xf32>
    %829 = arith.negf %828 : vector<8x128xf32>
    %830 = math.exp %829 : vector<8x128xf32>
    %cst_356 = arith.constant 1.000000e+00 : f32
    %831 = vector.broadcast %cst_356 : f32 to vector<8x128xf32>
    %832 = arith.addf %831, %830 : vector<8x128xf32>
    %833 = arith.divf %831, %832 : vector<8x128xf32>
    %834 = vector.extract_strided_slice %821 {offsets = [0, 256], sizes = [8, 128], strides = [1, 1]} : vector<8x512xf32> to vector<8x128xf32>
    %835 = math.tanh %834 : vector<8x128xf32>
    %836 = vector.extract_strided_slice %821 {offsets = [0, 384], sizes = [8, 128], strides = [1, 1]} : vector<8x512xf32> to vector<8x128xf32>
    %837 = arith.negf %836 : vector<8x128xf32>
    %838 = math.exp %837 : vector<8x128xf32>
    %cst_357 = arith.constant 1.000000e+00 : f32
    %839 = vector.broadcast %cst_357 : f32 to vector<8x128xf32>
    %840 = arith.addf %839, %838 : vector<8x128xf32>
    %841 = arith.divf %839, %840 : vector<8x128xf32>
    %842 = arith.mulf %833, %816 : vector<8x128xf32>
    %843 = arith.mulf %827, %835 : vector<8x128xf32>
    %844 = arith.addf %842, %843 : vector<8x128xf32>
    %845 = math.tanh %844 : vector<8x128xf32>
    %846 = arith.mulf %841, %845 : vector<8x128xf32>
    %c0_358 = arith.constant 0 : index
    %c0_359 = arith.constant 0 : index
    %847 = vector.load %arg13[%c0_358, %c0_359] : memref<8x128xf32, #tpu.memory_space<vmem>>, vector<8x128xf32>
    tpu.vector_store %arg13[%c0_358, %c0_359], %844 {strides = array<i32>} : memref<8x128xf32, #tpu.memory_space<vmem>>, vector<8x128xf32>,
    %c0_360 = arith.constant 0 : index
    %c0_361 = arith.constant 0 : index
    %848 = vector.load %arg12[%c0_360, %c0_361] : memref<8x128xf32, #tpu.memory_space<vmem>>, vector<8x128xf32>
    tpu.vector_store %arg12[%c0_360, %c0_361], %846 {strides = array<i32>} : memref<8x128xf32, #tpu.memory_space<vmem>>, vector<8x128xf32>,
    %c6_i32_362 = arith.constant 6 : i32
    %c8_i32_363 = arith.constant 8 : i32
    %849 = arith.muli %c6_i32_362, %c8_i32_363 : i32
    %850 = tpu.assume_multiple %849, 8 : i32
    %c0_364 = arith.constant 0 : index
    %c0_365 = arith.constant 0 : index
    %851 = vector.load %arg12[%c0_364, %c0_365] : memref<8x128xf32, #tpu.memory_space<vmem>>, vector<8x128xf32>
    %c0_366 = arith.constant 0 : index
    %c0_367 = arith.constant 0 : index
    %852 = vector.load %arg13[%c0_366, %c0_367] : memref<8x128xf32, #tpu.memory_space<vmem>>, vector<8x128xf32>
    %853 = arith.index_cast %850 : i32 to index
    %c0_368 = arith.constant 0 : index
    %854 = vector.load %arg10[%853, %c0_368] : memref<128x512xf32, #tpu.memory_space<vmem>>, vector<8x512xf32>
    %855 = arith.truncf %851 : vector<8x128xf32> to vector<8x128xbf16>
    %cst_369 = arith.constant dense<0.000000e+00> : vector<8x512xf32>
    %856 = tpu.matmul %855, %632, %cst_369 {dimension_numbers = #tpu.dot_dimension_numbers<[1], [0], [0], [1], [0, 0, 1, 1], [], []>} : vector<8x128xbf16>, vector<128x512xbf16>, vector<8x512xf32> -> vector<8x512xf32>
    %857 = arith.addf %854, %856 : vector<8x512xf32>
    %858 = vector.extract_strided_slice %857 {offsets = [0, 0], sizes = [8, 128], strides = [1, 1]} : vector<8x512xf32> to vector<8x128xf32>
    %859 = arith.negf %858 : vector<8x128xf32>
    %860 = math.exp %859 : vector<8x128xf32>
    %cst_370 = arith.constant 1.000000e+00 : f32
    %861 = vector.broadcast %cst_370 : f32 to vector<8x128xf32>
    %862 = arith.addf %861, %860 : vector<8x128xf32>
    %863 = arith.divf %861, %862 : vector<8x128xf32>
    %864 = vector.extract_strided_slice %857 {offsets = [0, 128], sizes = [8, 128], strides = [1, 1]} : vector<8x512xf32> to vector<8x128xf32>
    %865 = arith.negf %864 : vector<8x128xf32>
    %866 = math.exp %865 : vector<8x128xf32>
    %cst_371 = arith.constant 1.000000e+00 : f32
    %867 = vector.broadcast %cst_371 : f32 to vector<8x128xf32>
    %868 = arith.addf %867, %866 : vector<8x128xf32>
    %869 = arith.divf %867, %868 : vector<8x128xf32>
    %870 = vector.extract_strided_slice %857 {offsets = [0, 256], sizes = [8, 128], strides = [1, 1]} : vector<8x512xf32> to vector<8x128xf32>
    %871 = math.tanh %870 : vector<8x128xf32>
    %872 = vector.extract_strided_slice %857 {offsets = [0, 384], sizes = [8, 128], strides = [1, 1]} : vector<8x512xf32> to vector<8x128xf32>
    %873 = arith.negf %872 : vector<8x128xf32>
    %874 = math.exp %873 : vector<8x128xf32>
    %cst_372 = arith.constant 1.000000e+00 : f32
    %875 = vector.broadcast %cst_372 : f32 to vector<8x128xf32>
    %876 = arith.addf %875, %874 : vector<8x128xf32>
    %877 = arith.divf %875, %876 : vector<8x128xf32>
    %878 = arith.mulf %869, %852 : vector<8x128xf32>
    %879 = arith.mulf %863, %871 : vector<8x128xf32>
    %880 = arith.addf %878, %879 : vector<8x128xf32>
    %881 = math.tanh %880 : vector<8x128xf32>
    %882 = arith.mulf %877, %881 : vector<8x128xf32>
    %c0_373 = arith.constant 0 : index
    %c0_374 = arith.constant 0 : index
    %883 = vector.load %arg13[%c0_373, %c0_374] : memref<8x128xf32, #tpu.memory_space<vmem>>, vector<8x128xf32>
    tpu.vector_store %arg13[%c0_373, %c0_374], %880 {strides = array<i32>} : memref<8x128xf32, #tpu.memory_space<vmem>>, vector<8x128xf32>,
    %c0_375 = arith.constant 0 : index
    %c0_376 = arith.constant 0 : index
    %884 = vector.load %arg12[%c0_375, %c0_376] : memref<8x128xf32, #tpu.memory_space<vmem>>, vector<8x128xf32>
    tpu.vector_store %arg12[%c0_375, %c0_376], %882 {strides = array<i32>} : memref<8x128xf32, #tpu.memory_space<vmem>>, vector<8x128xf32>,
    %c7_i32_377 = arith.constant 7 : i32
    %c8_i32_378 = arith.constant 8 : i32
    %885 = arith.muli %c7_i32_377, %c8_i32_378 : i32
    %886 = tpu.assume_multiple %885, 8 : i32
    %c0_379 = arith.constant 0 : index
    %c0_380 = arith.constant 0 : index
    %887 = vector.load %arg12[%c0_379, %c0_380] : memref<8x128xf32, #tpu.memory_space<vmem>>, vector<8x128xf32>
    %c0_381 = arith.constant 0 : index
    %c0_382 = arith.constant 0 : index
    %888 = vector.load %arg13[%c0_381, %c0_382] : memref<8x128xf32, #tpu.memory_space<vmem>>, vector<8x128xf32>
    %889 = arith.index_cast %886 : i32 to index
    %c0_383 = arith.constant 0 : index
    %890 = vector.load %arg10[%889, %c0_383] : memref<128x512xf32, #tpu.memory_space<vmem>>, vector<8x512xf32>
    %891 = arith.truncf %887 : vector<8x128xf32> to vector<8x128xbf16>
    %cst_384 = arith.constant dense<0.000000e+00> : vector<8x512xf32>
    %892 = tpu.matmul %891, %632, %cst_384 {dimension_numbers = #tpu.dot_dimension_numbers<[1], [0], [0], [1], [0, 0, 1, 1], [], []>} : vector<8x128xbf16>, vector<128x512xbf16>, vector<8x512xf32> -> vector<8x512xf32>
    %893 = arith.addf %890, %892 : vector<8x512xf32>
    %894 = vector.extract_strided_slice %893 {offsets = [0, 0], sizes = [8, 128], strides = [1, 1]} : vector<8x512xf32> to vector<8x128xf32>
    %895 = arith.negf %894 : vector<8x128xf32>
    %896 = math.exp %895 : vector<8x128xf32>
    %cst_385 = arith.constant 1.000000e+00 : f32
    %897 = vector.broadcast %cst_385 : f32 to vector<8x128xf32>
    %898 = arith.addf %897, %896 : vector<8x128xf32>
    %899 = arith.divf %897, %898 : vector<8x128xf32>
    %900 = vector.extract_strided_slice %893 {offsets = [0, 128], sizes = [8, 128], strides = [1, 1]} : vector<8x512xf32> to vector<8x128xf32>
    %901 = arith.negf %900 : vector<8x128xf32>
    %902 = math.exp %901 : vector<8x128xf32>
    %cst_386 = arith.constant 1.000000e+00 : f32
    %903 = vector.broadcast %cst_386 : f32 to vector<8x128xf32>
    %904 = arith.addf %903, %902 : vector<8x128xf32>
    %905 = arith.divf %903, %904 : vector<8x128xf32>
    %906 = vector.extract_strided_slice %893 {offsets = [0, 256], sizes = [8, 128], strides = [1, 1]} : vector<8x512xf32> to vector<8x128xf32>
    %907 = math.tanh %906 : vector<8x128xf32>
    %908 = vector.extract_strided_slice %893 {offsets = [0, 384], sizes = [8, 128], strides = [1, 1]} : vector<8x512xf32> to vector<8x128xf32>
    %909 = arith.negf %908 : vector<8x128xf32>
    %910 = math.exp %909 : vector<8x128xf32>
    %cst_387 = arith.constant 1.000000e+00 : f32
    %911 = vector.broadcast %cst_387 : f32 to vector<8x128xf32>
    %912 = arith.addf %911, %910 : vector<8x128xf32>
    %913 = arith.divf %911, %912 : vector<8x128xf32>
    %914 = arith.mulf %905, %888 : vector<8x128xf32>
    %915 = arith.mulf %899, %907 : vector<8x128xf32>
    %916 = arith.addf %914, %915 : vector<8x128xf32>
    %917 = math.tanh %916 : vector<8x128xf32>
    %918 = arith.mulf %913, %917 : vector<8x128xf32>
    %c0_388 = arith.constant 0 : index
    %c0_389 = arith.constant 0 : index
    %919 = vector.load %arg13[%c0_388, %c0_389] : memref<8x128xf32, #tpu.memory_space<vmem>>, vector<8x128xf32>
    tpu.vector_store %arg13[%c0_388, %c0_389], %916 {strides = array<i32>} : memref<8x128xf32, #tpu.memory_space<vmem>>, vector<8x128xf32>,
    %c0_390 = arith.constant 0 : index
    %c0_391 = arith.constant 0 : index
    %920 = vector.load %arg12[%c0_390, %c0_391] : memref<8x128xf32, #tpu.memory_space<vmem>>, vector<8x128xf32>
    tpu.vector_store %arg12[%c0_390, %c0_391], %918 {strides = array<i32>} : memref<8x128xf32, #tpu.memory_space<vmem>>, vector<8x128xf32>,
    %c8_i32_392 = arith.constant 8 : i32
    %c8_i32_393 = arith.constant 8 : i32
    %921 = arith.muli %c8_i32_392, %c8_i32_393 : i32
    %922 = tpu.assume_multiple %921, 8 : i32
    %c0_394 = arith.constant 0 : index
    %c0_395 = arith.constant 0 : index
    %923 = vector.load %arg12[%c0_394, %c0_395] : memref<8x128xf32, #tpu.memory_space<vmem>>, vector<8x128xf32>
    %c0_396 = arith.constant 0 : index
    %c0_397 = arith.constant 0 : index
    %924 = vector.load %arg13[%c0_396, %c0_397] : memref<8x128xf32, #tpu.memory_space<vmem>>, vector<8x128xf32>
    %925 = arith.index_cast %922 : i32 to index
    %c0_398 = arith.constant 0 : index
    %926 = vector.load %arg10[%925, %c0_398] : memref<128x512xf32, #tpu.memory_space<vmem>>, vector<8x512xf32>
    %927 = arith.truncf %923 : vector<8x128xf32> to vector<8x128xbf16>
    %cst_399 = arith.constant dense<0.000000e+00> : vector<8x512xf32>
    %928 = tpu.matmul %927, %632, %cst_399 {dimension_numbers = #tpu.dot_dimension_numbers<[1], [0], [0], [1], [0, 0, 1, 1], [], []>} : vector<8x128xbf16>, vector<128x512xbf16>, vector<8x512xf32> -> vector<8x512xf32>
    %929 = arith.addf %926, %928 : vector<8x512xf32>
    %930 = vector.extract_strided_slice %929 {offsets = [0, 0], sizes = [8, 128], strides = [1, 1]} : vector<8x512xf32> to vector<8x128xf32>
    %931 = arith.negf %930 : vector<8x128xf32>
    %932 = math.exp %931 : vector<8x128xf32>
    %cst_400 = arith.constant 1.000000e+00 : f32
    %933 = vector.broadcast %cst_400 : f32 to vector<8x128xf32>
    %934 = arith.addf %933, %932 : vector<8x128xf32>
    %935 = arith.divf %933, %934 : vector<8x128xf32>
    %936 = vector.extract_strided_slice %929 {offsets = [0, 128], sizes = [8, 128], strides = [1, 1]} : vector<8x512xf32> to vector<8x128xf32>
    %937 = arith.negf %936 : vector<8x128xf32>
    %938 = math.exp %937 : vector<8x128xf32>
    %cst_401 = arith.constant 1.000000e+00 : f32
    %939 = vector.broadcast %cst_401 : f32 to vector<8x128xf32>
    %940 = arith.addf %939, %938 : vector<8x128xf32>
    %941 = arith.divf %939, %940 : vector<8x128xf32>
    %942 = vector.extract_strided_slice %929 {offsets = [0, 256], sizes = [8, 128], strides = [1, 1]} : vector<8x512xf32> to vector<8x128xf32>
    %943 = math.tanh %942 : vector<8x128xf32>
    %944 = vector.extract_strided_slice %929 {offsets = [0, 384], sizes = [8, 128], strides = [1, 1]} : vector<8x512xf32> to vector<8x128xf32>
    %945 = arith.negf %944 : vector<8x128xf32>
    %946 = math.exp %945 : vector<8x128xf32>
    %cst_402 = arith.constant 1.000000e+00 : f32
    %947 = vector.broadcast %cst_402 : f32 to vector<8x128xf32>
    %948 = arith.addf %947, %946 : vector<8x128xf32>
    %949 = arith.divf %947, %948 : vector<8x128xf32>
    %950 = arith.mulf %941, %924 : vector<8x128xf32>
    %951 = arith.mulf %935, %943 : vector<8x128xf32>
    %952 = arith.addf %950, %951 : vector<8x128xf32>
    %953 = math.tanh %952 : vector<8x128xf32>
    %954 = arith.mulf %949, %953 : vector<8x128xf32>
    %c0_403 = arith.constant 0 : index
    %c0_404 = arith.constant 0 : index
    %955 = vector.load %arg13[%c0_403, %c0_404] : memref<8x128xf32, #tpu.memory_space<vmem>>, vector<8x128xf32>
    tpu.vector_store %arg13[%c0_403, %c0_404], %952 {strides = array<i32>} : memref<8x128xf32, #tpu.memory_space<vmem>>, vector<8x128xf32>,
    %c0_405 = arith.constant 0 : index
    %c0_406 = arith.constant 0 : index
    %956 = vector.load %arg12[%c0_405, %c0_406] : memref<8x128xf32, #tpu.memory_space<vmem>>, vector<8x128xf32>
    tpu.vector_store %arg12[%c0_405, %c0_406], %954 {strides = array<i32>} : memref<8x128xf32, #tpu.memory_space<vmem>>, vector<8x128xf32>,
    %c9_i32_407 = arith.constant 9 : i32
    %c8_i32_408 = arith.constant 8 : i32
    %957 = arith.muli %c9_i32_407, %c8_i32_408 : i32
    %958 = tpu.assume_multiple %957, 8 : i32
    %c0_409 = arith.constant 0 : index
    %c0_410 = arith.constant 0 : index
    %959 = vector.load %arg12[%c0_409, %c0_410] : memref<8x128xf32, #tpu.memory_space<vmem>>, vector<8x128xf32>
    %c0_411 = arith.constant 0 : index
    %c0_412 = arith.constant 0 : index
    %960 = vector.load %arg13[%c0_411, %c0_412] : memref<8x128xf32, #tpu.memory_space<vmem>>, vector<8x128xf32>
    %961 = arith.index_cast %958 : i32 to index
    %c0_413 = arith.constant 0 : index
    %962 = vector.load %arg10[%961, %c0_413] : memref<128x512xf32, #tpu.memory_space<vmem>>, vector<8x512xf32>
    %963 = arith.truncf %959 : vector<8x128xf32> to vector<8x128xbf16>
    %cst_414 = arith.constant dense<0.000000e+00> : vector<8x512xf32>
    %964 = tpu.matmul %963, %632, %cst_414 {dimension_numbers = #tpu.dot_dimension_numbers<[1], [0], [0], [1], [0, 0, 1, 1], [], []>} : vector<8x128xbf16>, vector<128x512xbf16>, vector<8x512xf32> -> vector<8x512xf32>
    %965 = arith.addf %962, %964 : vector<8x512xf32>
    %966 = vector.extract_strided_slice %965 {offsets = [0, 0], sizes = [8, 128], strides = [1, 1]} : vector<8x512xf32> to vector<8x128xf32>
    %967 = arith.negf %966 : vector<8x128xf32>
    %968 = math.exp %967 : vector<8x128xf32>
    %cst_415 = arith.constant 1.000000e+00 : f32
    %969 = vector.broadcast %cst_415 : f32 to vector<8x128xf32>
    %970 = arith.addf %969, %968 : vector<8x128xf32>
    %971 = arith.divf %969, %970 : vector<8x128xf32>
    %972 = vector.extract_strided_slice %965 {offsets = [0, 128], sizes = [8, 128], strides = [1, 1]} : vector<8x512xf32> to vector<8x128xf32>
    %973 = arith.negf %972 : vector<8x128xf32>
    %974 = math.exp %973 : vector<8x128xf32>
    %cst_416 = arith.constant 1.000000e+00 : f32
    %975 = vector.broadcast %cst_416 : f32 to vector<8x128xf32>
    %976 = arith.addf %975, %974 : vector<8x128xf32>
    %977 = arith.divf %975, %976 : vector<8x128xf32>
    %978 = vector.extract_strided_slice %965 {offsets = [0, 256], sizes = [8, 128], strides = [1, 1]} : vector<8x512xf32> to vector<8x128xf32>
    %979 = math.tanh %978 : vector<8x128xf32>
    %980 = vector.extract_strided_slice %965 {offsets = [0, 384], sizes = [8, 128], strides = [1, 1]} : vector<8x512xf32> to vector<8x128xf32>
    %981 = arith.negf %980 : vector<8x128xf32>
    %982 = math.exp %981 : vector<8x128xf32>
    %cst_417 = arith.constant 1.000000e+00 : f32
    %983 = vector.broadcast %cst_417 : f32 to vector<8x128xf32>
    %984 = arith.addf %983, %982 : vector<8x128xf32>
    %985 = arith.divf %983, %984 : vector<8x128xf32>
    %986 = arith.mulf %977, %960 : vector<8x128xf32>
    %987 = arith.mulf %971, %979 : vector<8x128xf32>
    %988 = arith.addf %986, %987 : vector<8x128xf32>
    %989 = math.tanh %988 : vector<8x128xf32>
    %990 = arith.mulf %985, %989 : vector<8x128xf32>
    %c0_418 = arith.constant 0 : index
    %c0_419 = arith.constant 0 : index
    %991 = vector.load %arg13[%c0_418, %c0_419] : memref<8x128xf32, #tpu.memory_space<vmem>>, vector<8x128xf32>
    tpu.vector_store %arg13[%c0_418, %c0_419], %988 {strides = array<i32>} : memref<8x128xf32, #tpu.memory_space<vmem>>, vector<8x128xf32>,
    %c0_420 = arith.constant 0 : index
    %c0_421 = arith.constant 0 : index
    %992 = vector.load %arg12[%c0_420, %c0_421] : memref<8x128xf32, #tpu.memory_space<vmem>>, vector<8x128xf32>
    tpu.vector_store %arg12[%c0_420, %c0_421], %990 {strides = array<i32>} : memref<8x128xf32, #tpu.memory_space<vmem>>, vector<8x128xf32>,
    %c10_i32_422 = arith.constant 10 : i32
    %c8_i32_423 = arith.constant 8 : i32
    %993 = arith.muli %c10_i32_422, %c8_i32_423 : i32
    %994 = tpu.assume_multiple %993, 8 : i32
    %c0_424 = arith.constant 0 : index
    %c0_425 = arith.constant 0 : index
    %995 = vector.load %arg12[%c0_424, %c0_425] : memref<8x128xf32, #tpu.memory_space<vmem>>, vector<8x128xf32>
    %c0_426 = arith.constant 0 : index
    %c0_427 = arith.constant 0 : index
    %996 = vector.load %arg13[%c0_426, %c0_427] : memref<8x128xf32, #tpu.memory_space<vmem>>, vector<8x128xf32>
    %997 = arith.index_cast %994 : i32 to index
    %c0_428 = arith.constant 0 : index
    %998 = vector.load %arg10[%997, %c0_428] : memref<128x512xf32, #tpu.memory_space<vmem>>, vector<8x512xf32>
    %999 = arith.truncf %995 : vector<8x128xf32> to vector<8x128xbf16>
    %cst_429 = arith.constant dense<0.000000e+00> : vector<8x512xf32>
    %1000 = tpu.matmul %999, %632, %cst_429 {dimension_numbers = #tpu.dot_dimension_numbers<[1], [0], [0], [1], [0, 0, 1, 1], [], []>} : vector<8x128xbf16>, vector<128x512xbf16>, vector<8x512xf32> -> vector<8x512xf32>
    %1001 = arith.addf %998, %1000 : vector<8x512xf32>
    %1002 = vector.extract_strided_slice %1001 {offsets = [0, 0], sizes = [8, 128], strides = [1, 1]} : vector<8x512xf32> to vector<8x128xf32>
    %1003 = arith.negf %1002 : vector<8x128xf32>
    %1004 = math.exp %1003 : vector<8x128xf32>
    %cst_430 = arith.constant 1.000000e+00 : f32
    %1005 = vector.broadcast %cst_430 : f32 to vector<8x128xf32>
    %1006 = arith.addf %1005, %1004 : vector<8x128xf32>
    %1007 = arith.divf %1005, %1006 : vector<8x128xf32>
    %1008 = vector.extract_strided_slice %1001 {offsets = [0, 128], sizes = [8, 128], strides = [1, 1]} : vector<8x512xf32> to vector<8x128xf32>
    %1009 = arith.negf %1008 : vector<8x128xf32>
    %1010 = math.exp %1009 : vector<8x128xf32>
    %cst_431 = arith.constant 1.000000e+00 : f32
    %1011 = vector.broadcast %cst_431 : f32 to vector<8x128xf32>
    %1012 = arith.addf %1011, %1010 : vector<8x128xf32>
    %1013 = arith.divf %1011, %1012 : vector<8x128xf32>
    %1014 = vector.extract_strided_slice %1001 {offsets = [0, 256], sizes = [8, 128], strides = [1, 1]} : vector<8x512xf32> to vector<8x128xf32>
    %1015 = math.tanh %1014 : vector<8x128xf32>
    %1016 = vector.extract_strided_slice %1001 {offsets = [0, 384], sizes = [8, 128], strides = [1, 1]} : vector<8x512xf32> to vector<8x128xf32>
    %1017 = arith.negf %1016 : vector<8x128xf32>
    %1018 = math.exp %1017 : vector<8x128xf32>
    %cst_432 = arith.constant 1.000000e+00 : f32
    %1019 = vector.broadcast %cst_432 : f32 to vector<8x128xf32>
    %1020 = arith.addf %1019, %1018 : vector<8x128xf32>
    %1021 = arith.divf %1019, %1020 : vector<8x128xf32>
    %1022 = arith.mulf %1013, %996 : vector<8x128xf32>
    %1023 = arith.mulf %1007, %1015 : vector<8x128xf32>
    %1024 = arith.addf %1022, %1023 : vector<8x128xf32>
    %1025 = math.tanh %1024 : vector<8x128xf32>
    %1026 = arith.mulf %1021, %1025 : vector<8x128xf32>
    %c0_433 = arith.constant 0 : index
    %c0_434 = arith.constant 0 : index
    %1027 = vector.load %arg13[%c0_433, %c0_434] : memref<8x128xf32, #tpu.memory_space<vmem>>, vector<8x128xf32>
    tpu.vector_store %arg13[%c0_433, %c0_434], %1024 {strides = array<i32>} : memref<8x128xf32, #tpu.memory_space<vmem>>, vector<8x128xf32>,
    %c0_435 = arith.constant 0 : index
    %c0_436 = arith.constant 0 : index
    %1028 = vector.load %arg12[%c0_435, %c0_436] : memref<8x128xf32, #tpu.memory_space<vmem>>, vector<8x128xf32>
    tpu.vector_store %arg12[%c0_435, %c0_436], %1026 {strides = array<i32>} : memref<8x128xf32, #tpu.memory_space<vmem>>, vector<8x128xf32>,
    %c11_i32_437 = arith.constant 11 : i32
    %c8_i32_438 = arith.constant 8 : i32
    %1029 = arith.muli %c11_i32_437, %c8_i32_438 : i32
    %1030 = tpu.assume_multiple %1029, 8 : i32
    %c0_439 = arith.constant 0 : index
    %c0_440 = arith.constant 0 : index
    %1031 = vector.load %arg12[%c0_439, %c0_440] : memref<8x128xf32, #tpu.memory_space<vmem>>, vector<8x128xf32>
    %c0_441 = arith.constant 0 : index
    %c0_442 = arith.constant 0 : index
    %1032 = vector.load %arg13[%c0_441, %c0_442] : memref<8x128xf32, #tpu.memory_space<vmem>>, vector<8x128xf32>
    %1033 = arith.index_cast %1030 : i32 to index
    %c0_443 = arith.constant 0 : index
    %1034 = vector.load %arg10[%1033, %c0_443] : memref<128x512xf32, #tpu.memory_space<vmem>>, vector<8x512xf32>
    %1035 = arith.truncf %1031 : vector<8x128xf32> to vector<8x128xbf16>
    %cst_444 = arith.constant dense<0.000000e+00> : vector<8x512xf32>
    %1036 = tpu.matmul %1035, %632, %cst_444 {dimension_numbers = #tpu.dot_dimension_numbers<[1], [0], [0], [1], [0, 0, 1, 1], [], []>} : vector<8x128xbf16>, vector<128x512xbf16>, vector<8x512xf32> -> vector<8x512xf32>
    %1037 = arith.addf %1034, %1036 : vector<8x512xf32>
    %1038 = vector.extract_strided_slice %1037 {offsets = [0, 0], sizes = [8, 128], strides = [1, 1]} : vector<8x512xf32> to vector<8x128xf32>
    %1039 = arith.negf %1038 : vector<8x128xf32>
    %1040 = math.exp %1039 : vector<8x128xf32>
    %cst_445 = arith.constant 1.000000e+00 : f32
    %1041 = vector.broadcast %cst_445 : f32 to vector<8x128xf32>
    %1042 = arith.addf %1041, %1040 : vector<8x128xf32>
    %1043 = arith.divf %1041, %1042 : vector<8x128xf32>
    %1044 = vector.extract_strided_slice %1037 {offsets = [0, 128], sizes = [8, 128], strides = [1, 1]} : vector<8x512xf32> to vector<8x128xf32>
    %1045 = arith.negf %1044 : vector<8x128xf32>
    %1046 = math.exp %1045 : vector<8x128xf32>
    %cst_446 = arith.constant 1.000000e+00 : f32
    %1047 = vector.broadcast %cst_446 : f32 to vector<8x128xf32>
    %1048 = arith.addf %1047, %1046 : vector<8x128xf32>
    %1049 = arith.divf %1047, %1048 : vector<8x128xf32>
    %1050 = vector.extract_strided_slice %1037 {offsets = [0, 256], sizes = [8, 128], strides = [1, 1]} : vector<8x512xf32> to vector<8x128xf32>
    %1051 = math.tanh %1050 : vector<8x128xf32>
    %1052 = vector.extract_strided_slice %1037 {offsets = [0, 384], sizes = [8, 128], strides = [1, 1]} : vector<8x512xf32> to vector<8x128xf32>
    %1053 = arith.negf %1052 : vector<8x128xf32>
    %1054 = math.exp %1053 : vector<8x128xf32>
    %cst_447 = arith.constant 1.000000e+00 : f32
    %1055 = vector.broadcast %cst_447 : f32 to vector<8x128xf32>
    %1056 = arith.addf %1055, %1054 : vector<8x128xf32>
    %1057 = arith.divf %1055, %1056 : vector<8x128xf32>
    %1058 = arith.mulf %1049, %1032 : vector<8x128xf32>
    %1059 = arith.mulf %1043, %1051 : vector<8x128xf32>
    %1060 = arith.addf %1058, %1059 : vector<8x128xf32>
    %1061 = math.tanh %1060 : vector<8x128xf32>
    %1062 = arith.mulf %1057, %1061 : vector<8x128xf32>
    %c0_448 = arith.constant 0 : index
    %c0_449 = arith.constant 0 : index
    %1063 = vector.load %arg13[%c0_448, %c0_449] : memref<8x128xf32, #tpu.memory_space<vmem>>, vector<8x128xf32>
    tpu.vector_store %arg13[%c0_448, %c0_449], %1060 {strides = array<i32>} : memref<8x128xf32, #tpu.memory_space<vmem>>, vector<8x128xf32>,
    %c0_450 = arith.constant 0 : index
    %c0_451 = arith.constant 0 : index
    %1064 = vector.load %arg12[%c0_450, %c0_451] : memref<8x128xf32, #tpu.memory_space<vmem>>, vector<8x128xf32>
    tpu.vector_store %arg12[%c0_450, %c0_451], %1062 {strides = array<i32>} : memref<8x128xf32, #tpu.memory_space<vmem>>, vector<8x128xf32>,
    %c12_i32_452 = arith.constant 12 : i32
    %c8_i32_453 = arith.constant 8 : i32
    %1065 = arith.muli %c12_i32_452, %c8_i32_453 : i32
    %1066 = tpu.assume_multiple %1065, 8 : i32
    %c0_454 = arith.constant 0 : index
    %c0_455 = arith.constant 0 : index
    %1067 = vector.load %arg12[%c0_454, %c0_455] : memref<8x128xf32, #tpu.memory_space<vmem>>, vector<8x128xf32>
    %c0_456 = arith.constant 0 : index
    %c0_457 = arith.constant 0 : index
    %1068 = vector.load %arg13[%c0_456, %c0_457] : memref<8x128xf32, #tpu.memory_space<vmem>>, vector<8x128xf32>
    %1069 = arith.index_cast %1066 : i32 to index
    %c0_458 = arith.constant 0 : index
    %1070 = vector.load %arg10[%1069, %c0_458] : memref<128x512xf32, #tpu.memory_space<vmem>>, vector<8x512xf32>
    %1071 = arith.truncf %1067 : vector<8x128xf32> to vector<8x128xbf16>
    %cst_459 = arith.constant dense<0.000000e+00> : vector<8x512xf32>
    %1072 = tpu.matmul %1071, %632, %cst_459 {dimension_numbers = #tpu.dot_dimension_numbers<[1], [0], [0], [1], [0, 0, 1, 1], [], []>} : vector<8x128xbf16>, vector<128x512xbf16>, vector<8x512xf32> -> vector<8x512xf32>
    %1073 = arith.addf %1070, %1072 : vector<8x512xf32>
    %1074 = vector.extract_strided_slice %1073 {offsets = [0, 0], sizes = [8, 128], strides = [1, 1]} : vector<8x512xf32> to vector<8x128xf32>
    %1075 = arith.negf %1074 : vector<8x128xf32>
    %1076 = math.exp %1075 : vector<8x128xf32>
    %cst_460 = arith.constant 1.000000e+00 : f32
    %1077 = vector.broadcast %cst_460 : f32 to vector<8x128xf32>
    %1078 = arith.addf %1077, %1076 : vector<8x128xf32>
    %1079 = arith.divf %1077, %1078 : vector<8x128xf32>
    %1080 = vector.extract_strided_slice %1073 {offsets = [0, 128], sizes = [8, 128], strides = [1, 1]} : vector<8x512xf32> to vector<8x128xf32>
    %1081 = arith.negf %1080 : vector<8x128xf32>
    %1082 = math.exp %1081 : vector<8x128xf32>
    %cst_461 = arith.constant 1.000000e+00 : f32
    %1083 = vector.broadcast %cst_461 : f32 to vector<8x128xf32>
    %1084 = arith.addf %1083, %1082 : vector<8x128xf32>
    %1085 = arith.divf %1083, %1084 : vector<8x128xf32>
    %1086 = vector.extract_strided_slice %1073 {offsets = [0, 256], sizes = [8, 128], strides = [1, 1]} : vector<8x512xf32> to vector<8x128xf32>
    %1087 = math.tanh %1086 : vector<8x128xf32>
    %1088 = vector.extract_strided_slice %1073 {offsets = [0, 384], sizes = [8, 128], strides = [1, 1]} : vector<8x512xf32> to vector<8x128xf32>
    %1089 = arith.negf %1088 : vector<8x128xf32>
    %1090 = math.exp %1089 : vector<8x128xf32>
    %cst_462 = arith.constant 1.000000e+00 : f32
    %1091 = vector.broadcast %cst_462 : f32 to vector<8x128xf32>
    %1092 = arith.addf %1091, %1090 : vector<8x128xf32>
    %1093 = arith.divf %1091, %1092 : vector<8x128xf32>
    %1094 = arith.mulf %1085, %1068 : vector<8x128xf32>
    %1095 = arith.mulf %1079, %1087 : vector<8x128xf32>
    %1096 = arith.addf %1094, %1095 : vector<8x128xf32>
    %1097 = math.tanh %1096 : vector<8x128xf32>
    %1098 = arith.mulf %1093, %1097 : vector<8x128xf32>
    %c0_463 = arith.constant 0 : index
    %c0_464 = arith.constant 0 : index
    %1099 = vector.load %arg13[%c0_463, %c0_464] : memref<8x128xf32, #tpu.memory_space<vmem>>, vector<8x128xf32>
    tpu.vector_store %arg13[%c0_463, %c0_464], %1096 {strides = array<i32>} : memref<8x128xf32, #tpu.memory_space<vmem>>, vector<8x128xf32>,
    %c0_465 = arith.constant 0 : index
    %c0_466 = arith.constant 0 : index
    %1100 = vector.load %arg12[%c0_465, %c0_466] : memref<8x128xf32, #tpu.memory_space<vmem>>, vector<8x128xf32>
    tpu.vector_store %arg12[%c0_465, %c0_466], %1098 {strides = array<i32>} : memref<8x128xf32, #tpu.memory_space<vmem>>, vector<8x128xf32>,
    %c13_i32_467 = arith.constant 13 : i32
    %c8_i32_468 = arith.constant 8 : i32
    %1101 = arith.muli %c13_i32_467, %c8_i32_468 : i32
    %1102 = tpu.assume_multiple %1101, 8 : i32
    %c0_469 = arith.constant 0 : index
    %c0_470 = arith.constant 0 : index
    %1103 = vector.load %arg12[%c0_469, %c0_470] : memref<8x128xf32, #tpu.memory_space<vmem>>, vector<8x128xf32>
    %c0_471 = arith.constant 0 : index
    %c0_472 = arith.constant 0 : index
    %1104 = vector.load %arg13[%c0_471, %c0_472] : memref<8x128xf32, #tpu.memory_space<vmem>>, vector<8x128xf32>
    %1105 = arith.index_cast %1102 : i32 to index
    %c0_473 = arith.constant 0 : index
    %1106 = vector.load %arg10[%1105, %c0_473] : memref<128x512xf32, #tpu.memory_space<vmem>>, vector<8x512xf32>
    %1107 = arith.truncf %1103 : vector<8x128xf32> to vector<8x128xbf16>
    %cst_474 = arith.constant dense<0.000000e+00> : vector<8x512xf32>
    %1108 = tpu.matmul %1107, %632, %cst_474 {dimension_numbers = #tpu.dot_dimension_numbers<[1], [0], [0], [1], [0, 0, 1, 1], [], []>} : vector<8x128xbf16>, vector<128x512xbf16>, vector<8x512xf32> -> vector<8x512xf32>
    %1109 = arith.addf %1106, %1108 : vector<8x512xf32>
    %1110 = vector.extract_strided_slice %1109 {offsets = [0, 0], sizes = [8, 128], strides = [1, 1]} : vector<8x512xf32> to vector<8x128xf32>
    %1111 = arith.negf %1110 : vector<8x128xf32>
    %1112 = math.exp %1111 : vector<8x128xf32>
    %cst_475 = arith.constant 1.000000e+00 : f32
    %1113 = vector.broadcast %cst_475 : f32 to vector<8x128xf32>
    %1114 = arith.addf %1113, %1112 : vector<8x128xf32>
    %1115 = arith.divf %1113, %1114 : vector<8x128xf32>
    %1116 = vector.extract_strided_slice %1109 {offsets = [0, 128], sizes = [8, 128], strides = [1, 1]} : vector<8x512xf32> to vector<8x128xf32>
    %1117 = arith.negf %1116 : vector<8x128xf32>
    %1118 = math.exp %1117 : vector<8x128xf32>
    %cst_476 = arith.constant 1.000000e+00 : f32
    %1119 = vector.broadcast %cst_476 : f32 to vector<8x128xf32>
    %1120 = arith.addf %1119, %1118 : vector<8x128xf32>
    %1121 = arith.divf %1119, %1120 : vector<8x128xf32>
    %1122 = vector.extract_strided_slice %1109 {offsets = [0, 256], sizes = [8, 128], strides = [1, 1]} : vector<8x512xf32> to vector<8x128xf32>
    %1123 = math.tanh %1122 : vector<8x128xf32>
    %1124 = vector.extract_strided_slice %1109 {offsets = [0, 384], sizes = [8, 128], strides = [1, 1]} : vector<8x512xf32> to vector<8x128xf32>
    %1125 = arith.negf %1124 : vector<8x128xf32>
    %1126 = math.exp %1125 : vector<8x128xf32>
    %cst_477 = arith.constant 1.000000e+00 : f32
    %1127 = vector.broadcast %cst_477 : f32 to vector<8x128xf32>
    %1128 = arith.addf %1127, %1126 : vector<8x128xf32>
    %1129 = arith.divf %1127, %1128 : vector<8x128xf32>
    %1130 = arith.mulf %1121, %1104 : vector<8x128xf32>
    %1131 = arith.mulf %1115, %1123 : vector<8x128xf32>
    %1132 = arith.addf %1130, %1131 : vector<8x128xf32>
    %1133 = math.tanh %1132 : vector<8x128xf32>
    %1134 = arith.mulf %1129, %1133 : vector<8x128xf32>
    %c0_478 = arith.constant 0 : index
    %c0_479 = arith.constant 0 : index
    %1135 = vector.load %arg13[%c0_478, %c0_479] : memref<8x128xf32, #tpu.memory_space<vmem>>, vector<8x128xf32>
    tpu.vector_store %arg13[%c0_478, %c0_479], %1132 {strides = array<i32>} : memref<8x128xf32, #tpu.memory_space<vmem>>, vector<8x128xf32>,
    %c0_480 = arith.constant 0 : index
    %c0_481 = arith.constant 0 : index
    %1136 = vector.load %arg12[%c0_480, %c0_481] : memref<8x128xf32, #tpu.memory_space<vmem>>, vector<8x128xf32>
    tpu.vector_store %arg12[%c0_480, %c0_481], %1134 {strides = array<i32>} : memref<8x128xf32, #tpu.memory_space<vmem>>, vector<8x128xf32>,
    %c14_i32_482 = arith.constant 14 : i32
    %c8_i32_483 = arith.constant 8 : i32
    %1137 = arith.muli %c14_i32_482, %c8_i32_483 : i32
    %1138 = tpu.assume_multiple %1137, 8 : i32
    %c0_484 = arith.constant 0 : index
    %c0_485 = arith.constant 0 : index
    %1139 = vector.load %arg12[%c0_484, %c0_485] : memref<8x128xf32, #tpu.memory_space<vmem>>, vector<8x128xf32>
    %c0_486 = arith.constant 0 : index
    %c0_487 = arith.constant 0 : index
    %1140 = vector.load %arg13[%c0_486, %c0_487] : memref<8x128xf32, #tpu.memory_space<vmem>>, vector<8x128xf32>
    %1141 = arith.index_cast %1138 : i32 to index
    %c0_488 = arith.constant 0 : index
    %1142 = vector.load %arg10[%1141, %c0_488] : memref<128x512xf32, #tpu.memory_space<vmem>>, vector<8x512xf32>
    %1143 = arith.truncf %1139 : vector<8x128xf32> to vector<8x128xbf16>
    %cst_489 = arith.constant dense<0.000000e+00> : vector<8x512xf32>
    %1144 = tpu.matmul %1143, %632, %cst_489 {dimension_numbers = #tpu.dot_dimension_numbers<[1], [0], [0], [1], [0, 0, 1, 1], [], []>} : vector<8x128xbf16>, vector<128x512xbf16>, vector<8x512xf32> -> vector<8x512xf32>
    %1145 = arith.addf %1142, %1144 : vector<8x512xf32>
    %1146 = vector.extract_strided_slice %1145 {offsets = [0, 0], sizes = [8, 128], strides = [1, 1]} : vector<8x512xf32> to vector<8x128xf32>
    %1147 = arith.negf %1146 : vector<8x128xf32>
    %1148 = math.exp %1147 : vector<8x128xf32>
    %cst_490 = arith.constant 1.000000e+00 : f32
    %1149 = vector.broadcast %cst_490 : f32 to vector<8x128xf32>
    %1150 = arith.addf %1149, %1148 : vector<8x128xf32>
    %1151 = arith.divf %1149, %1150 : vector<8x128xf32>
    %1152 = vector.extract_strided_slice %1145 {offsets = [0, 128], sizes = [8, 128], strides = [1, 1]} : vector<8x512xf32> to vector<8x128xf32>
    %1153 = arith.negf %1152 : vector<8x128xf32>
    %1154 = math.exp %1153 : vector<8x128xf32>
    %cst_491 = arith.constant 1.000000e+00 : f32
    %1155 = vector.broadcast %cst_491 : f32 to vector<8x128xf32>
    %1156 = arith.addf %1155, %1154 : vector<8x128xf32>
    %1157 = arith.divf %1155, %1156 : vector<8x128xf32>
    %1158 = vector.extract_strided_slice %1145 {offsets = [0, 256], sizes = [8, 128], strides = [1, 1]} : vector<8x512xf32> to vector<8x128xf32>
    %1159 = math.tanh %1158 : vector<8x128xf32>
    %1160 = vector.extract_strided_slice %1145 {offsets = [0, 384], sizes = [8, 128], strides = [1, 1]} : vector<8x512xf32> to vector<8x128xf32>
    %1161 = arith.negf %1160 : vector<8x128xf32>
    %1162 = math.exp %1161 : vector<8x128xf32>
    %cst_492 = arith.constant 1.000000e+00 : f32
    %1163 = vector.broadcast %cst_492 : f32 to vector<8x128xf32>
    %1164 = arith.addf %1163, %1162 : vector<8x128xf32>
    %1165 = arith.divf %1163, %1164 : vector<8x128xf32>
    %1166 = arith.mulf %1157, %1140 : vector<8x128xf32>
    %1167 = arith.mulf %1151, %1159 : vector<8x128xf32>
    %1168 = arith.addf %1166, %1167 : vector<8x128xf32>
    %1169 = math.tanh %1168 : vector<8x128xf32>
    %1170 = arith.mulf %1165, %1169 : vector<8x128xf32>
    %c0_493 = arith.constant 0 : index
    %c0_494 = arith.constant 0 : index
    %1171 = vector.load %arg13[%c0_493, %c0_494] : memref<8x128xf32, #tpu.memory_space<vmem>>, vector<8x128xf32>
    tpu.vector_store %arg13[%c0_493, %c0_494], %1168 {strides = array<i32>} : memref<8x128xf32, #tpu.memory_space<vmem>>, vector<8x128xf32>,
    %c0_495 = arith.constant 0 : index
    %c0_496 = arith.constant 0 : index
    %1172 = vector.load %arg12[%c0_495, %c0_496] : memref<8x128xf32, #tpu.memory_space<vmem>>, vector<8x128xf32>
    tpu.vector_store %arg12[%c0_495, %c0_496], %1170 {strides = array<i32>} : memref<8x128xf32, #tpu.memory_space<vmem>>, vector<8x128xf32>,
    %c15_i32_497 = arith.constant 15 : i32
    %c8_i32_498 = arith.constant 8 : i32
    %1173 = arith.muli %c15_i32_497, %c8_i32_498 : i32
    %1174 = tpu.assume_multiple %1173, 8 : i32
    %c0_499 = arith.constant 0 : index
    %c0_500 = arith.constant 0 : index
    %1175 = vector.load %arg12[%c0_499, %c0_500] : memref<8x128xf32, #tpu.memory_space<vmem>>, vector<8x128xf32>
    %c0_501 = arith.constant 0 : index
    %c0_502 = arith.constant 0 : index
    %1176 = vector.load %arg13[%c0_501, %c0_502] : memref<8x128xf32, #tpu.memory_space<vmem>>, vector<8x128xf32>
    %1177 = arith.index_cast %1174 : i32 to index
    %c0_503 = arith.constant 0 : index
    %1178 = vector.load %arg10[%1177, %c0_503] : memref<128x512xf32, #tpu.memory_space<vmem>>, vector<8x512xf32>
    %1179 = arith.truncf %1175 : vector<8x128xf32> to vector<8x128xbf16>
    %cst_504 = arith.constant dense<0.000000e+00> : vector<8x512xf32>
    %1180 = tpu.matmul %1179, %632, %cst_504 {dimension_numbers = #tpu.dot_dimension_numbers<[1], [0], [0], [1], [0, 0, 1, 1], [], []>} : vector<8x128xbf16>, vector<128x512xbf16>, vector<8x512xf32> -> vector<8x512xf32>
    %1181 = arith.addf %1178, %1180 : vector<8x512xf32>
    %1182 = vector.extract_strided_slice %1181 {offsets = [0, 0], sizes = [8, 128], strides = [1, 1]} : vector<8x512xf32> to vector<8x128xf32>
    %1183 = arith.negf %1182 : vector<8x128xf32>
    %1184 = math.exp %1183 : vector<8x128xf32>
    %cst_505 = arith.constant 1.000000e+00 : f32
    %1185 = vector.broadcast %cst_505 : f32 to vector<8x128xf32>
    %1186 = arith.addf %1185, %1184 : vector<8x128xf32>
    %1187 = arith.divf %1185, %1186 : vector<8x128xf32>
    %1188 = vector.extract_strided_slice %1181 {offsets = [0, 128], sizes = [8, 128], strides = [1, 1]} : vector<8x512xf32> to vector<8x128xf32>
    %1189 = arith.negf %1188 : vector<8x128xf32>
    %1190 = math.exp %1189 : vector<8x128xf32>
    %cst_506 = arith.constant 1.000000e+00 : f32
    %1191 = vector.broadcast %cst_506 : f32 to vector<8x128xf32>
    %1192 = arith.addf %1191, %1190 : vector<8x128xf32>
    %1193 = arith.divf %1191, %1192 : vector<8x128xf32>
    %1194 = vector.extract_strided_slice %1181 {offsets = [0, 256], sizes = [8, 128], strides = [1, 1]} : vector<8x512xf32> to vector<8x128xf32>
    %1195 = math.tanh %1194 : vector<8x128xf32>
    %1196 = vector.extract_strided_slice %1181 {offsets = [0, 384], sizes = [8, 128], strides = [1, 1]} : vector<8x512xf32> to vector<8x128xf32>
    %1197 = arith.negf %1196 : vector<8x128xf32>
    %1198 = math.exp %1197 : vector<8x128xf32>
    %cst_507 = arith.constant 1.000000e+00 : f32
    %1199 = vector.broadcast %cst_507 : f32 to vector<8x128xf32>
    %1200 = arith.addf %1199, %1198 : vector<8x128xf32>
    %1201 = arith.divf %1199, %1200 : vector<8x128xf32>
    %1202 = arith.mulf %1193, %1176 : vector<8x128xf32>
    %1203 = arith.mulf %1187, %1195 : vector<8x128xf32>
    %1204 = arith.addf %1202, %1203 : vector<8x128xf32>
    %1205 = math.tanh %1204 : vector<8x128xf32>
    %1206 = arith.mulf %1201, %1205 : vector<8x128xf32>
    %c0_508 = arith.constant 0 : index
    %c0_509 = arith.constant 0 : index
    %1207 = vector.load %arg13[%c0_508, %c0_509] : memref<8x128xf32, #tpu.memory_space<vmem>>, vector<8x128xf32>
    tpu.vector_store %arg13[%c0_508, %c0_509], %1204 {strides = array<i32>} : memref<8x128xf32, #tpu.memory_space<vmem>>, vector<8x128xf32>,
    %c0_510 = arith.constant 0 : index
    %c0_511 = arith.constant 0 : index
    %1208 = vector.load %arg12[%c0_510, %c0_511] : memref<8x128xf32, #tpu.memory_space<vmem>>, vector<8x128xf32>
    tpu.vector_store %arg12[%c0_510, %c0_511], %1206 {strides = array<i32>} : memref<8x128xf32, #tpu.memory_space<vmem>>, vector<8x128xf32>,
    %c16_i32_512 = arith.constant 16 : i32
    %c0_513 = arith.constant 0 : index
    %c0_514 = arith.constant 0 : index
    %1209 = vector.load %arg12[%c0_513, %c0_514] : memref<8x128xf32, #tpu.memory_space<vmem>>, vector<8x128xf32>
    %1210 = arith.truncf %1209 : vector<8x128xf32> to vector<8x128xbf16>
    %c0_515 = arith.constant 0 : index
    %c0_516 = arith.constant 0 : index
    %1211 = vector.load %arg7[%c0_515, %c0_516] : memref<128x5xbf16, #tpu.memory_space<vmem>>, vector<128x5xbf16>
    %cst_517 = arith.constant dense<0.000000e+00> : vector<8x5xf32>
    %1212 = tpu.matmul %1210, %1211, %cst_517 {dimension_numbers = #tpu.dot_dimension_numbers<[1], [0], [0], [1], [0, 0, 1, 1], [], []>} : vector<8x128xbf16>, vector<128x5xbf16>, vector<8x5xf32> -> vector<8x5xf32>
    %c0_518 = arith.constant 0 : index
    %c0_519 = arith.constant 0 : index
    %1213 = vector.load %arg8[%c0_518, %c0_519] : memref<1x5xf32, #tpu.memory_space<vmem>>, vector<1x5xf32>
    %1214 = vector.broadcast %1213 : vector<1x5xf32> to vector<8x5xf32>
    %1215 = arith.addf %1212, %1214 : vector<8x5xf32>
    %c0_520 = arith.constant 0 : index
    %c0_521 = arith.constant 0 : index
    %1216 = vector.load %arg9[%c0_520, %c0_521] : memref<8x5xf32, #tpu.memory_space<vmem>>, vector<8x5xf32>
    tpu.vector_store %arg9[%c0_520, %c0_521], %1215 {strides = array<i32>} : memref<8x5xf32, #tpu.memory_space<vmem>>, vector<8x5xf32>,
    return
  }
}

</mosaic_0001>

<bundles_post_ra>
// kernel: lstm_module_forward.1
= control target key start
LH: loop header
LB: loop body
LE: loop exit
PB: predicated region body
PF: predicated region fallthrough
CT: control target
= control target key end

     0   :  { %14 = vsyncpa [#allocation7], 0  ;;  %s9567_s0 = inlined_call_operand.vmem [shape: bf16[128,128], index: 0, kind: input, shape index: {}]   ;;  %s9568_s1 = inlined_call_operand.vmem [shape: bf16[128,512], index: 1, kind: input, shape index: {}]   ;;  %s9569_s2 = inlined_call_operand.vmem [shape: bf16[128,512], index: 2, kind: input, shape index: {}]   ;;  %s9570_s3 = inlined_call_operand.vmem [shape: f32[1,512], index: 3, kind: input, shape index: {}]   ;;  %s9571_s4 = inlined_call_operand.hbm [shape: bf16[128,512], index: 4, kind: input, shape index: {}]   ;;  %s9572_s5 = inlined_call_operand.hbm [shape: bf16[128,512], index: 5, kind: input, shape index: {}]   ;;  %s9573_s6 = inlined_call_operand.vmem [shape: f32[1,512], index: 6, kind: input, shape index: {}]   ;;  %s9574_s7 = inlined_call_operand.vmem [shape: bf16[128,5], index: 7, kind: input, shape index: {}]   ;;  %s9575_s8 = inlined_call_operand.vmem [shape: f32[1,5], index: 8, kind: input, shape index: {}]   ;;  %s9576_s9 = inlined_call_operand.hbm [shape: f32[8,5], index: 9, kind: output, shape index: {}]  }
   0x1   :  { %15 = vsyncpa [#allocation10], 0 }
   0x2   :  { %16 = vsyncpa [#allocation8], 0  ;;  %s6778_s30 = smov [#allocation6]   ;;  %s6706_s13 = scalar_lea.hbm %s9571_s4, 4096 }
   0x3   :  { %s30_s10 = sshll.u32 %s6778_s30, 4  ;;  %p6707_p0 = scmp.ne.s32.totalorder %s9571_s4, %s6706_s13  ;;  %s31_s10 = int_to_ptr.vmem [resolvable:$true] %s30_s10 }
   0x4   :  { %p6710_p1 = scmp.lt.u32.totalorder %s6706_s13, %s9571_s4 }
   0x6   :  { %p6712_p2 = pnand %p6710_p1, %p6707_p0 }
   0x8   :  { %6715 = shalt.err (!%p6712_p2)
}
   0x9   :  { %s6716_s18 = scalar_lea.vmem %s31_s10, 4096  ;;  %p6721_p4 = scmp.lt.s32.totalorder %s31_s10, %s31_s10 }
   0xa   :  { %p6717_p3 = scmp.ne.s32.totalorder %s31_s10, %s6716_s18  ;;  %p6722_p5 = scmp.lt.s32.totalorder %s6716_s18, %s6716_s18 }
   0xc   :  { %p6723_p6 = por %p6722_p5, %p6721_p4 }
   0xe   :  { %p6724_p7 = pnand %p6723_p6, %p6717_p3 }
  0x10   :  { %6727 = shalt.err (!%p6724_p7)
}
  0x11   :  { %s6779_s19 = smov 256   ;;  %s6780_s20 = smov 16  }
  0x12   :  { %36 = dma.hbm_to_vmem [thread:$0]  %s9571_s4, 4096, %s31_s10, [#allocation7], %s6779_s19, %s6779_s19, %s6780_s20  }
  0x13   :  { %s6781_s23 = smov [#allocation9]   ;;  %s6728_s27 = scalar_lea.hbm %s9572_s5, 4096 }
  0x14   :  { %s42_s24 = sshll.u32 %s6781_s23, 4  ;;  %p6729_p8 = scmp.ne.s32.totalorder %s9572_s5, %s6728_s27  ;;  %s43_s24 = int_to_ptr.vmem [resolvable:$true] %s42_s24 }
  0x15   :  { %p6732_p9 = scmp.lt.u32.totalorder %s6728_s27, %s9572_s5 }
  0x17   :  { %p6734_p10 = pnand %p6732_p9, %p6729_p8 }
  0x19   :  { %6737 = shalt.err (!%p6734_p10)
}
  0x1a   :  { %s6738_s12 = scalar_lea.vmem %s43_s24, 4096  ;;  %p6743_p12 = scmp.lt.s32.totalorder %s43_s24, %s43_s24 }
  0x1b   :  { %p6739_p11 = scmp.ne.s32.totalorder %s43_s24, %s6738_s12  ;;  %p6744_p13 = scmp.lt.s32.totalorder %s6738_s12, %s6738_s12 }
  0x1d   :  { %p6745_p0 = por %p6744_p13, %p6743_p12 }
  0x1f   :  { %p6746_p1 = pnand %p6745_p0, %p6739_p11 }
  0x21   :  { %6749 = shalt.err (!%p6746_p1)
}
  0x22   :  { %48 = dma.hbm_to_vmem [thread:$0]  %s9572_s5, 4096, %s43_s24, [#allocation10], %s6779_s19, %s6779_s19, %s6780_s20  }
  0x23   :  { %6772 = dma.done.wait [#allocation7], 4096  }
  0x24   :  { %6773 = vsyncadd [#allocation7], 4294963200 }
  0x25   :  { %6774 = dma.done.wait [#allocation10], 4096  }
  0x26   :  { %6775 = vsyncadd [#allocation10], 4294963200  ;;  %v9583_v0 = vmov 0   ;;  %v5858_v1 = vld [vmem:[%s9568_s1 + $0x4] ss:$16 sps:$4 sm:$0xff]   ;;  %v5910_v43 = vld [vmem:[%s9567_s0 + $0x8] sm:$0xff]  }
  0x27   :  { %372 = vmatprep.mubr.bf16.mxu0 %v9583_v0  ;;  %485 = vmatprep.mubr.bf16.mxu1 %v9583_v0  ;;  %v5860_v2 = vld [vmem:[%s9568_s1 + $0xc] ss:$16 sps:$4 sm:$0xff]   ;;  %v5862_v3 = vld [vmem:[%s9568_s1] ss:$16 sps:$4 sm:$0xff]   ;;  %v5863_v4 = vld [vmem:[%s9568_s1 + $0x8] ss:$16 sps:$4 sm:$0xff]  }
  0x28   :  { %340 = vmatprep.subr.bf16.mxu0 %v5858_v1  ;;  %453 = vmatprep.subr.bf16.mxu1 %v5860_v2  ;;  %v5864_v5 = vld [vmem:[%s9568_s1 + $0x24] ss:$16 sps:$4 sm:$0xff]   ;;  %v5866_v6 = vld [vmem:[%s9568_s1 + $0x2c] ss:$16 sps:$4 sm:$0xff]   ;;  %v5868_v7 = vld [vmem:[%s9568_s1 + $0x20] ss:$16 sps:$4 sm:$0xff]  }
  0x29   :  { %341 = vmatpush1.bf16.msra.mxu0 %v5862_v3  ;;  %454 = vmatpush1.bf16.msra.mxu1 %v5863_v4  ;;  %v5869_v8 = vld [vmem:[%s9568_s1 + $0x28] ss:$16 sps:$4 sm:$0xff]   ;;  %v5870_v9 = vld [vmem:[%s9568_s1 + $0x44] ss:$16 sps:$4 sm:$0xff]   ;;  %v5872_v10 = vld [vmem:[%s9568_s1 + $0x4c] ss:$16 sps:$4 sm:$0xff]  }
  0x2a   :  { %342 = vmatprep.subr.bf16.mxu0 %v5864_v5  ;;  %455 = vmatprep.subr.bf16.mxu1 %v5866_v6  ;;  %v5874_v11 = vld [vmem:[%s9568_s1 + $0x40] ss:$16 sps:$4 sm:$0xff]   ;;  %v5875_v12 = vld [vmem:[%s9568_s1 + $0x48] ss:$16 sps:$4 sm:$0xff]   ;;  %v5876_v13 = vld [vmem:[%s9568_s1 + $0x64] ss:$16 sps:$4 sm:$0xff]  }
  0x2b   :  { %v5878_v14 = vld [vmem:[%s9568_s1 + $0x6c] ss:$16 sps:$4 sm:$0xff]   ;;  %v5880_v15 = vld [vmem:[%s9568_s1 + $0x60] ss:$16 sps:$4 sm:$0xff]   ;;  %v5881_v16 = vld [vmem:[%s9568_s1 + $0x68] ss:$16 sps:$4 sm:$0xff]  }
  0x2c   :  { %v5882_v17 = vld [vmem:[%s9568_s1 + $0x84] ss:$16 sps:$4 sm:$0xff]   ;;  %v5884_v18 = vld [vmem:[%s9568_s1 + $0x8c] ss:$16 sps:$4 sm:$0xff]   ;;  %v5886_v19 = vld [vmem:[%s9568_s1 + $0x80] ss:$16 sps:$4 sm:$0xff]  }
  0x2d   :  { %343 = vmatpush1.bf16.msra.mxu0 %v5868_v7  ;;  %456 = vmatpush1.bf16.msra.mxu1 %v5869_v8  ;;  %v5887_v20 = vld [vmem:[%s9568_s1 + $0x88] ss:$16 sps:$4 sm:$0xff]   ;;  %v5888_v21 = vld [vmem:[%s9568_s1 + $0xa4] ss:$16 sps:$4 sm:$0xff]   ;;  %v5890_v22 = vld [vmem:[%s9568_s1 + $0xac] ss:$16 sps:$4 sm:$0xff]  }
  0x2e   :  { %344 = vmatprep.subr.bf16.mxu0 %v5870_v9  ;;  %457 = vmatprep.subr.bf16.mxu1 %v5872_v10  ;;  %v5892_v23 = vld [vmem:[%s9568_s1 + $0xa0] ss:$16 sps:$4 sm:$0xff]   ;;  %v5893_v24 = vld [vmem:[%s9568_s1 + $0xa8] ss:$16 sps:$4 sm:$0xff]   ;;  %v5894_v25 = vld [vmem:[%s9568_s1 + $0xc4] ss:$16 sps:$4 sm:$0xff]  }
  0x2f   :  { %v5896_v26 = vld [vmem:[%s9568_s1 + $0xcc] ss:$16 sps:$4 sm:$0xff]   ;;  %v5898_v27 = vld [vmem:[%s9568_s1 + $0xc0] ss:$16 sps:$4 sm:$0xff]   ;;  %v5899_v28 = vld [vmem:[%s9568_s1 + $0xc8] ss:$16 sps:$4 sm:$0xff]  }
  0x30   :  { %v5900_v29 = vld [vmem:[%s9568_s1 + $0xe4] ss:$16 sps:$4 sm:$0xff]   ;;  %v5902_v30 = vld [vmem:[%s9568_s1 + $0xec] ss:$16 sps:$4 sm:$0xff]   ;;  %v5904_v31 = vld [vmem:[%s9568_s1 + $0xe0] ss:$16 sps:$4 sm:$0xff]  }
  0x31   :  { %345 = vmatpush1.bf16.msra.mxu0 %v5874_v11  ;;  %458 = vmatpush1.bf16.msra.mxu1 %v5875_v12  ;;  %v5905_v32 = vld [vmem:[%s9568_s1 + $0xe8] ss:$16 sps:$4 sm:$0xff]   ;;  %v6962_v33 = vld [vmem:[%s9569_s2 + $0x4] ss:$16 sps:$4 sm:$0xff]   ;;  %v6967_v34 = vld [vmem:[%s9569_s2 + $0xc] ss:$16 sps:$4 sm:$0xff]   ;;  %v112_v11 = vlaneseq }
  0x32   :  { %346 = vmatprep.subr.bf16.mxu0 %v5876_v13  ;;  %459 = vmatprep.subr.bf16.mxu1 %v5878_v14  ;;  %v5906_v35 = vld [vmem:[%s9567_s0] sm:$0xff]   ;;  %v6987_v38 = vld [vmem:[%s9569_s2 + $0x8] ss:$16 sps:$4 sm:$0xff]   ;;  %v6992_v39 = vld [vmem:[%s9569_s2 + $0x2c] ss:$16 sps:$4 sm:$0xff]   ;;  %v9581_v10 = vmov 0.0|0.0  }
  0x33   :  { %v6975_v36 = vld [vmem:[%s9569_s2] ss:$16 sps:$4 sm:$0xff]   ;;  %v6981_v37 = vld [vmem:[%s9569_s2 + $0x24] ss:$16 sps:$4 sm:$0xff]   ;;  %v7012_v42 = vld [vmem:[%s9569_s2 + $0x28] ss:$16 sps:$4 sm:$0xff]  }
  0x34   :  { %v6999_v40 = vld [vmem:[%s9569_s2 + $0x20] ss:$16 sps:$4 sm:$0xff]   ;;  %v7006_v41 = vld [vmem:[%s9569_s2 + $0x44] ss:$16 sps:$4 sm:$0xff]   ;;  %v7033_v46 = vld [vmem:[%s9569_s2 + $0x4c] ss:$16 sps:$4 sm:$0xff]  }
  0x35   :  { %347 = vmatpush1.bf16.msra.mxu0 %v5880_v15  ;;  %460 = vmatpush1.bf16.msra.mxu1 %v5881_v16  ;;  %v7022_v44 = vld [vmem:[%s9569_s2 + $0x40] ss:$16 sps:$4 sm:$0xff]   ;;  %v7027_v45 = vld [vmem:[%s9569_s2 + $0x64] ss:$16 sps:$4 sm:$0xff]   ;;  %v7039_v47 = vld [vmem:[%s9569_s2 + $0x48] ss:$16 sps:$4 sm:$0xff]  }
  0x36   :  { %348 = vmatprep.subr.bf16.mxu0 %v5882_v17  ;;  %461 = vmatprep.subr.bf16.mxu1 %v5884_v18  ;;  %v7044_v48 = vld [vmem:[%s9569_s2 + $0x6c] ss:$16 sps:$4 sm:$0xff]   ;;  %v7052_v49 = vld [vmem:[%s9569_s2 + $0x60] ss:$16 sps:$4 sm:$0xff]   ;;  %v7058_v50 = vld [vmem:[%s9569_s2 + $0x84] ss:$16 sps:$4 sm:$0xff]  }
  0x37   :  { %v7065_v51 = vld [vmem:[%s9569_s2 + $0x68] ss:$16 sps:$4 sm:$0xff]   ;;  %v5916_v52 = vld [vmem:[%s9567_s0 + $0x10] sm:$0xff]   ;;  %v7080_v54 = vld [vmem:[%s9569_s2 + $0x8c] ss:$16 sps:$4 sm:$0xff]   ;;  %v7229_v12 = vshrl.u32 %v112_v11, 7 }
  0x38   :  { %v7074_v53 = vld [vmem:[%s9569_s2 + $0x80] ss:$16 sps:$4 sm:$0xff]   ;;  %v7086_v55 = vld [vmem:[%s9569_s2 + $0xa4] ss:$16 sps:$4 sm:$0xff]   ;;  %v7092_v56 = vld [vmem:[%s9569_s2 + $0x88] ss:$16 sps:$4 sm:$0xff]  }
  0x39   :  { %349 = vmatpush1.bf16.msra.mxu0 %v5886_v19  ;;  %462 = vmatpush1.bf16.msra.mxu1 %v5887_v20  ;;  %v7097_v57 = vld [vmem:[%s9569_s2 + $0xac] ss:$16 sps:$4 sm:$0xff]   ;;  %v7102_v58 = vld [vmem:[%s9569_s2 + $0xa0] ss:$16 sps:$4 sm:$0xff]   ;;  %v7109_v59 = vld [vmem:[%s9569_s2 + $0xc4] ss:$16 sps:$4 sm:$0xff]  }
  0x3a   :  { %350 = vmatprep.subr.bf16.mxu0 %v5888_v21  ;;  %463 = vmatprep.subr.bf16.mxu1 %v5890_v22  ;;  %v7114_v60 = vld [vmem:[%s9569_s2 + $0xa8] ss:$16 sps:$4 sm:$0xff]   ;;  %v7126_v62 = vld [vmem:[%s9569_s2 + $0xc0] ss:$16 sps:$4 sm:$0xff]   ;;  %v7132_v63 = vld [vmem:[%s9569_s2 + $0xcc] ss:$16 sps:$4 sm:$0xff]  }
  0x3b   :  { %v5923_v61 = vld [vmem:[%s9567_s0 + $0x18] sm:$0xff]   ;;  %v7137_v1 = vld [vmem:[%s9569_s2 + $0xe4] ss:$16 sps:$4 sm:$0xff]   ;;  %v7155_v4 = vld [vmem:[%s9569_s2 + $0xe0] ss:$16 sps:$4 sm:$0xff]   ;;  %9590 = vst [vmem:[#allocation15_spill] sm:$0xff] %v7229_v12 }
  0x3c   :  { %v7142_v2 = vld [vmem:[%s9569_s2 + $0xc8] ss:$16 sps:$4 sm:$0xff]   ;;  %v7148_v3 = vld [vmem:[%s9569_s2 + $0xec] ss:$16 sps:$4 sm:$0xff]   ;;  %v5930_v6 = vld [vmem:[%s9567_s0 + $0x20] sm:$0xff]   ;;  %v9579_v13 = vsub.s32 2, %v7229_v12 }
  0x3d   :  { %351 = vmatpush1.bf16.msra.mxu0 %v5892_v23  ;;  %464 = vmatpush1.bf16.msra.mxu1 %v5893_v24  ;;  %v7162_v5 = vld [vmem:[%s9569_s2 + $0xe8] ss:$16 sps:$4 sm:$0xff]   ;;  %v5944_v8 = vld [vmem:[%s9567_s0 + $0x30] sm:$0xff]   ;;  %v9577_v14 = vsub.s32 3, %v7229_v12  ;;  %v9580_v15 = vsub.s32 0, %v7229_v12  ;;  %v9578_v17 = vsub.s32 1, %v7229_v12 }
  0x3e   :  { %352 = vmatprep.subr.bf16.mxu0 %v5894_v25  ;;  %465 = vmatprep.subr.bf16.mxu1 %v5896_v26  ;;  %v5937_v7 = vld [vmem:[%s9567_s0 + $0x28] sm:$0xff]   ;;  %v5952_v9 = vld [vmem:[%s9567_s0 + $0x38] sm:$0xff]   ;;  %v110_v16 = vld [vmem:[%s9570_s3] sm:$0xf]  ;;  %vm6785_vm0 = vmmov 0   ;;  %s6786_s29 = smov [#allocation11]  }
  0x3f   :  { %v7240_v18 = vrot.slane %v110_v16, %v9579_v13  ;;  %v7248_v21 = vrot.slane %v110_v16, %v9577_v14  ;;  %v7252_v22 = vrot.slane %v110_v16, %v9580_v15  ;;  %v7260_v25 = vrot.slane %v110_v16, %v9578_v17  ;;  %s5554_s30 = sshll.u32 %s6786_s29, 4  ;;  %s5555_s30 = int_to_ptr.vmem [resolvable:$true] %s5554_s30 }
  0x40   :  { %vm5546_vm1 = vcmask 39936   ;;  %s6750_s11 = scalar_lea.vmem %s5555_s30, 128  ;;  %p6755_p3 = scmp.lt.s32.totalorder %s5555_s30, %s5555_s30 }
  0x41   :  { %353 = vmatpush1.bf16.msra.mxu0 %v5898_v27  ;;  %466 = vmatpush1.bf16.msra.mxu1 %v5899_v28  ;;  %p6751_p2 = scmp.ne.s32.totalorder %s5555_s30, %s6750_s11  ;;  %p6756_p4 = scmp.lt.s32.totalorder %s6750_s11, %s6750_s11 }
  0x42   :  { %354 = vmatprep.subr.bf16.mxu0 %v5900_v29  ;;  %467 = vmatprep.subr.bf16.mxu1 %v5902_v30 }
  0x43   :  { %p6757_p5 = por %p6756_p4, %p6755_p3 }
  0x45   :  { %355 = vmatpush1.bf16.msra.mxu0 %v5904_v31  ;;  %468 = vmatpush1.bf16.msra.mxu1 %v5905_v32  ;;  %p6758_p6 = pnand %p6757_p5, %p6751_p2 }
  0x46   :  { %834 = vmatprep.subr.bf16.mxu0 %v6962_v33  ;;  %875 = vmatprep.subr.bf16.mxu1 %v6967_v34 }
  0x48   :  { %373 = vmatmul.mubr.bf16.vlgmr.msra.gmra.mrb[0].mxu0 %v5906_v35  ;;  %486 = vmatmul.mubr.bf16.vlgmr.msra.gmra.mrb[0].mxu1 %v5906_v35 }
  0x49   :  { %835 = vmatpush1.bf16.msra.mxu0 %v6975_v36  ;;  %382 = vmatprep.mubr.bf16.mxu0 %v9583_v0 }
  0x4a   :  { %495 = vmatprep.mubr.bf16.mxu1 %v9583_v0  ;;  %836 = vmatprep.subr.bf16.mxu0 %v6981_v37 }
  0x4b   :  { %876 = vmatpush1.bf16.msra.mxu1 %v6987_v38 }
  0x4c   :  { %877 = vmatprep.subr.bf16.mxu1 %v6992_v39 }
  0x4d   :  { %837 = vmatpush1.bf16.msra.mxu0 %v6999_v40 }
  0x4e   :  { %838 = vmatprep.subr.bf16.mxu0 %v7006_v41 }
  0x4f   :  { %878 = vmatpush1.bf16.msra.mxu1 %v7012_v42 }
  0x50   :  { %383 = vmatmul.mubr.bf16.gmra.mrb[4].mxu0 %v5910_v43  ;;  %496 = vmatmul.mubr.bf16.gmra.mrb[4].mxu1 %v5910_v43 }
  0x51   :  { %392 = vmatprep.mubr.bf16.mxu0 %v9583_v0  ;;  %505 = vmatprep.mubr.bf16.mxu1 %v9583_v0 }
  0x52   :  { %839 = vmatpush1.bf16.msra.mxu0 %v7022_v44  ;;  %879 = vmatprep.subr.bf16.mxu1 %v7033_v46 }
  0x53   :  { %840 = vmatprep.subr.bf16.mxu0 %v7027_v45  ;;  %880 = vmatpush1.bf16.msra.mxu1 %v7039_v47 }
  0x54   :  { %881 = vmatprep.subr.bf16.mxu1 %v7044_v48 }
  0x56   :  { %841 = vmatpush1.bf16.msra.mxu0 %v7052_v49 }
  0x57   :  { %842 = vmatprep.subr.bf16.mxu0 %v7058_v50  ;;  %882 = vmatpush1.bf16.msra.mxu1 %v7065_v51 }
  0x58   :  { %393 = vmatmul.mubr.bf16.gmra.mrb[8].mxu0 %v5916_v52  ;;  %506 = vmatmul.mubr.bf16.gmra.mrb[8].mxu1 %v5916_v52 }
  0x59   :  { %402 = vmatprep.mubr.bf16.mxu0 %v9583_v0  ;;  %515 = vmatprep.mubr.bf16.mxu1 %v9583_v0 }
  0x5a   :  { %843 = vmatpush1.bf16.msra.mxu0 %v7074_v53  ;;  %883 = vmatprep.subr.bf16.mxu1 %v7080_v54 }
  0x5b   :  { %844 = vmatprep.subr.bf16.mxu0 %v7086_v55  ;;  %884 = vmatpush1.bf16.msra.mxu1 %v7092_v56 }
  0x5c   :  { %885 = vmatprep.subr.bf16.mxu1 %v7097_v57 }
  0x5e   :  { %845 = vmatpush1.bf16.msra.mxu0 %v7102_v58 }
  0x5f   :  { %846 = vmatprep.subr.bf16.mxu0 %v7109_v59  ;;  %886 = vmatpush1.bf16.msra.mxu1 %v7114_v60 }
  0x60   :  { %403 = vmatmul.mubr.bf16.gmra.mrb[12].mxu0 %v5923_v61  ;;  %516 = vmatmul.mubr.bf16.gmra.mrb[12].mxu1 %v5923_v61 }
  0x61   :  { %412 = vmatprep.mubr.bf16.mxu0 %v9583_v0  ;;  %525 = vmatprep.mubr.bf16.mxu1 %v9583_v0 }
  0x62   :  { %847 = vmatpush1.bf16.msra.mxu0 %v7126_v62  ;;  %887 = vmatprep.subr.bf16.mxu1 %v7132_v63 }
  0x63   :  { %848 = vmatprep.subr.bf16.mxu0 %v7137_v1  ;;  %888 = vmatpush1.bf16.msra.mxu1 %v7142_v2 }
  0x64   :  { %889 = vmatprep.subr.bf16.mxu1 %v7148_v3 }
  0x66   :  { %849 = vmatpush1.bf16.msra.mxu0 %v7155_v4 }
  0x67   :  { %890 = vmatpush1.bf16.msra.mxu1 %v7162_v5  ;;  %957 = vmatprep.subr.bf16.mxu0 %v6962_v33 }
  0x68   :  { %413 = vmatmul.mubr.bf16.gmra.mrb[16].mxu0 %v5930_v6  ;;  %526 = vmatmul.mubr.bf16.gmra.mrb[16].mxu1 %v5930_v6 }
  0x69   :  { %422 = vmatprep.mubr.bf16.mxu0 %v9583_v0  ;;  %535 = vmatprep.mubr.bf16.mxu1 %v9583_v0 }
  0x6a   :  { %998 = vmatprep.subr.bf16.mxu1 %v6967_v34 }
  0x70   :  { %423 = vmatmul.mubr.bf16.gmra.mrb[20].mxu0 %v5937_v7  ;;  %536 = vmatmul.mubr.bf16.gmra.mrb[20].mxu1 %v5937_v7 }
  0x71   :  { %432 = vmatprep.mubr.bf16.mxu0 %v9583_v0  ;;  %545 = vmatprep.mubr.bf16.mxu1 %v9583_v0 }
  0x78   :  { %433 = vmatmul.mubr.bf16.gmra.mrb[24].mxu0 %v5944_v8  ;;  %546 = vmatmul.mubr.bf16.gmra.mrb[24].mxu1 %v5944_v8 }
  0x79   :  { %442 = vmatprep.mubr.bf16.mxu0 %v9583_v0  ;;  %555 = vmatprep.mubr.bf16.mxu1 %v9583_v0 }
  0x80   :  { %443 = vmatmul.mubr.bf16.gmra.mrb[28].mxu0 %v5952_v9  ;;  %556 = vmatmul.mubr.bf16.gmra.mrb[28].mxu1 %v5952_v9 }
  0x81   :  { %866 = vmatprep.mubr.bf16.mxu0 %v9583_v0  ;;  %907 = vmatprep.mubr.bf16.mxu1 %v9583_v0 }
  0x88   :  { %867 = vmatmul.mubr.bf16.vlgmr.msra.gmra.mrb[32].mxu0 %v9581_v10  ;;  %908 = vmatmul.mubr.bf16.vlgmr.msra.gmra.mrb[32].mxu1 %v9581_v10 }
  0x89   :  { %958 = vmatpush1.bf16.msra.mxu0 %v6975_v36  ;;  %999 = vmatpush1.bf16.msra.mxu1 %v6987_v38 }
  0x8a   :  { %959 = vmatprep.subr.bf16.mxu0 %v6981_v37  ;;  %1000 = vmatprep.subr.bf16.mxu1 %v6992_v39 }
  0x8b   :  { %989 = vmatprep.mubr.bf16.mxu0 %v9583_v0  ;;  %1030 = vmatprep.mubr.bf16.mxu1 %v9583_v0 }
  0x8d   :  { %960 = vmatpush1.bf16.msra.mxu0 %v6999_v40  ;;  %1001 = vmatpush1.bf16.msra.mxu1 %v7012_v42 }
  0x8e   :  { %961 = vmatprep.subr.bf16.mxu0 %v7006_v41  ;;  %1002 = vmatprep.subr.bf16.mxu1 %v7033_v46 }
  0x91   :  { %962 = vmatpush1.bf16.msra.mxu0 %v7022_v44  ;;  %1003 = vmatpush1.bf16.msra.mxu1 %v7039_v47 }
  0x92   :  { %963 = vmatprep.subr.bf16.mxu0 %v7027_v45  ;;  %1004 = vmatprep.subr.bf16.mxu1 %v7044_v48 }
  0x95   :  { %964 = vmatpush1.bf16.msra.mxu0 %v7052_v49  ;;  %1005 = vmatpush1.bf16.msra.mxu1 %v7065_v51 }
  0x96   :  { %965 = vmatprep.subr.bf16.mxu0 %v7058_v50  ;;  %1006 = vmatprep.subr.bf16.mxu1 %v7080_v54 }
  0x99   :  { %966 = vmatpush1.bf16.msra.mxu0 %v7074_v53  ;;  %1007 = vmatpush1.bf16.msra.mxu1 %v7092_v56 }
  0x9a   :  { %967 = vmatprep.subr.bf16.mxu0 %v7086_v55  ;;  %1008 = vmatprep.subr.bf16.mxu1 %v7097_v57 }
  0x9d   :  { %968 = vmatpush1.bf16.msra.mxu0 %v7102_v58  ;;  %1009 = vmatpush1.bf16.msra.mxu1 %v7114_v60 }
  0x9e   :  { %969 = vmatprep.subr.bf16.mxu0 %v7109_v59  ;;  %1010 = vmatprep.subr.bf16.mxu1 %v7132_v63 }
  0xa1   :  { %970 = vmatpush1.bf16.msra.mxu0 %v7126_v62  ;;  %1011 = vmatpush1.bf16.msra.mxu1 %v7142_v2 }
  0xa2   :  { %971 = vmatprep.subr.bf16.mxu0 %v7137_v1  ;;  %1012 = vmatprep.subr.bf16.mxu1 %v7148_v3 }
  0xa5   :  { %972 = vmatpush1.bf16.msra.mxu0 %v7155_v4  ;;  %1013 = vmatpush1.bf16.msra.mxu1 %v7162_v5 }
  0xa6   :  { %1081 = vmatprep.subr.bf16.mxu0 %v6962_v33  ;;  %1122 = vmatprep.subr.bf16.mxu1 %v6967_v34 }
 0x11b   :  { %v7242_v19 = vpop.f32.mrb[0].mxu0  ;;  %v7244_v20 = vpop.f32.mrb[0].mxu1 }
 0x11c   :  { %v7254_v23 = vpop.f32.mrb[1].mxu0  ;;  %v7256_v24 = vpop.f32.mrb[1].mxu1 }
 0x11d   :  { %v378_v26 = vpop.f32.mrb[2].mxu0  ;;  %v491_v27 = vpop.f32.mrb[2].mxu1 }
 0x11e   :  { %v7263_v28 = vadd.f32 %v378_v26, %v7252_v22  ;;  %v380_v29 = vpop.f32.mrb[3].mxu0  ;;  %v7266_v30 = vadd.f32 %v491_v27, %v7240_v18  ;;  %v493_v31 = vpop.f32.mrb[3].mxu1 }
 0x11f   :  { %v7269_v32 = vadd.f32 %v380_v29, %v7260_v25  ;;  %v7272_v35 = vadd.f32 %v493_v31, %v7248_v21 }
 0x123   :  { %v384_v43 = vpop.f32.mrb[4].mxu0  ;;  %v497_v52 = vpop.f32.mrb[4].mxu1 }
 0x124   :  { %v7275_v61 = vadd.f32 %v384_v43, %v7252_v22  ;;  %v386_v6 = vpop.f32.mrb[5].mxu0  ;;  %v7278_v7 = vadd.f32 %v497_v52, %v7240_v18  ;;  %v499_v8 = vpop.f32.mrb[5].mxu1 }
 0x125   :  { %v7281_v9 = vadd.f32 %v386_v6, %v7260_v25  ;;  %v388_v11 = vpop.f32.mrb[6].mxu0  ;;  %v7284_v16 = vadd.f32 %v499_v8, %v7248_v21  ;;  %v501_v26 = vpop.f32.mrb[6].mxu1 }
 0x126   :  { %v7287_v27 = vadd.f32 %v388_v11, %v7252_v22  ;;  %v390_v29 = vpop.f32.mrb[7].mxu0  ;;  %v7290_v31 = vadd.f32 %v501_v26, %v7240_v18  ;;  %v503_v43 = vpop.f32.mrb[7].mxu1 }
 0x127   :  { %v7293_v52 = vadd.f32 %v390_v29, %v7260_v25  ;;  %v7296_v14 = vadd.f32 %v503_v43, %v7248_v21 }
 0x128   :  { %9591 = vst [vmem:[#allocation16_spill] sm:$0xff] %v7290_v31 }
 0x129   :  { %9592 = vst [vmem:[#allocation17_spill] sm:$0xff] %v7293_v52  ;;  %9593 = vst [vmem:[#allocation18_spill] sm:$0xff] %v7296_v14 }
 0x12b   :  { %v394_v6 = vpop.f32.mrb[8].mxu0  ;;  %v507_v17 = vpop.f32.mrb[8].mxu1 }
 0x12c   :  { %v7299_v8 = vadd.f32 %v394_v6, %v7252_v22  ;;  %v396_v13 = vpop.f32.mrb[9].mxu0  ;;  %v7302_v11 = vadd.f32 %v507_v17, %v7240_v18  ;;  %v509_v15 = vpop.f32.mrb[9].mxu1 }
 0x12d   :  { %v7305_v26 = vadd.f32 %v396_v13, %v7260_v25  ;;  %v398_v10 = vpop.f32.mrb[10].mxu0  ;;  %v7308_v29 = vadd.f32 %v509_v15, %v7248_v21  ;;  %v511_v0 = vpop.f32.mrb[10].mxu1 }
 0x12e   :  { %9594 = vst [vmem:[#allocation19_spill] sm:$0xff] %v7299_v8  ;;  %9595 = vst [vmem:[#allocation20_spill] sm:$0xff] %v7302_v11  ;;  %v7311_v43 = vadd.f32 %v398_v10, %v7252_v22  ;;  %v400_v12 = vpop.f32.mrb[11].mxu0  ;;  %v7314_v6 = vadd.f32 %v511_v0, %v7240_v18  ;;  %v513_v8 = vpop.f32.mrb[11].mxu1 }
 0x12f   :  { %9596 = vst [vmem:[#allocation21_spill] sm:$0xff] %v7305_v26  ;;  %9597 = vst [vmem:[#allocation22_spill] sm:$0xff] %v7308_v29  ;;  %v7317_v17 = vadd.f32 %v400_v12, %v7260_v25  ;;  %v7320_v11 = vadd.f32 %v513_v8, %v7248_v21 }
 0x130   :  { %9598 = vst [vmem:[#allocation23_spill] sm:$0xff] %v7311_v43  ;;  %9599 = vst [vmem:[#allocation24_spill] sm:$0xff] %v7314_v6 }
 0x131   :  { %9600 = vst [vmem:[#allocation25_spill] sm:$0xff] %v7317_v17  ;;  %9601 = vst [vmem:[#allocation26_spill] sm:$0xff] %v7320_v11 }
 0x133   :  { %v404_v13 = vpop.f32.mrb[12].mxu0  ;;  %v517_v26 = vpop.f32.mrb[12].mxu1 }
 0x134   :  { %v7323_v15 = vadd.f32 %v404_v13, %v7252_v22  ;;  %v406_v29 = vpop.f32.mrb[13].mxu0  ;;  %v7326_v10 = vadd.f32 %v517_v26, %v7240_v18  ;;  %v519_v43 = vpop.f32.mrb[13].mxu1 }
 0x135   :  { %v7329_v0 = vadd.f32 %v406_v29, %v7260_v25  ;;  %v408_v6 = vpop.f32.mrb[14].mxu0  ;;  %v7332_v12 = vadd.f32 %v519_v43, %v7248_v21  ;;  %v521_v17 = vpop.f32.mrb[14].mxu1 }
 0x136   :  { %9602 = vst [vmem:[#allocation27_spill] sm:$0xff] %v7323_v15  ;;  %9603 = vst [vmem:[#allocation28_spill] sm:$0xff] %v7326_v10  ;;  %v7335_v8 = vadd.f32 %v408_v6, %v7252_v22  ;;  %v410_v11 = vpop.f32.mrb[15].mxu0  ;;  %v7338_v13 = vadd.f32 %v521_v17, %v7240_v18  ;;  %v523_v15 = vpop.f32.mrb[15].mxu1 }
 0x137   :  { %9604 = vst [vmem:[#allocation29_spill] sm:$0xff] %v7329_v0  ;;  %9605 = vst [vmem:[#allocation30_spill] sm:$0xff] %v7332_v12  ;;  %v7341_v26 = vadd.f32 %v410_v11, %v7260_v25  ;;  %v7344_v10 = vadd.f32 %v523_v15, %v7248_v21 }
 0x138   :  { %9606 = vst [vmem:[#allocation31_spill] sm:$0xff] %v7335_v8  ;;  %9607 = vst [vmem:[#allocation32_spill] sm:$0xff] %v7338_v13 }
 0x139   :  { %9608 = vst [vmem:[#allocation33_spill] sm:$0xff] %v7341_v26  ;;  %9609 = vst [vmem:[#allocation34_spill] sm:$0xff] %v7344_v10 }
 0x13b   :  { %v414_v29 = vpop.f32.mrb[16].mxu0  ;;  %v527_v0 = vpop.f32.mrb[16].mxu1 }
 0x13c   :  { %v7347_v43 = vadd.f32 %v414_v29, %v7252_v22  ;;  %v416_v12 = vpop.f32.mrb[17].mxu0  ;;  %v7350_v6 = vadd.f32 %v527_v0, %v7240_v18  ;;  %v529_v8 = vpop.f32.mrb[17].mxu1 }
 0x13d   :  { %v7353_v17 = vadd.f32 %v416_v12, %v7260_v25  ;;  %v418_v13 = vpop.f32.mrb[18].mxu0  ;;  %v7356_v11 = vadd.f32 %v529_v8, %v7248_v21  ;;  %v531_v26 = vpop.f32.mrb[18].mxu1 }
 0x13e   :  { %9610 = vst [vmem:[#allocation35_spill] sm:$0xff] %v7347_v43  ;;  %9611 = vst [vmem:[#allocation36_spill] sm:$0xff] %v7350_v6  ;;  %v7359_v15 = vadd.f32 %v418_v13, %v7252_v22  ;;  %v420_v10 = vpop.f32.mrb[19].mxu0  ;;  %v7362_v29 = vadd.f32 %v531_v26, %v7240_v18  ;;  %v533_v43 = vpop.f32.mrb[19].mxu1 }
 0x13f   :  { %9612 = vst [vmem:[#allocation37_spill] sm:$0xff] %v7353_v17  ;;  %9613 = vst [vmem:[#allocation38_spill] sm:$0xff] %v7356_v11  ;;  %v7365_v0 = vadd.f32 %v420_v10, %v7260_v25  ;;  %v7368_v6 = vadd.f32 %v533_v43, %v7248_v21 }
 0x140   :  { %9614 = vst [vmem:[#allocation39_spill] sm:$0xff] %v7359_v15  ;;  %9615 = vst [vmem:[#allocation40_spill] sm:$0xff] %v7362_v29 }
 0x141   :  { %9616 = vst [vmem:[#allocation41_spill] sm:$0xff] %v7365_v0  ;;  %9617 = vst [vmem:[#allocation42_spill] sm:$0xff] %v7368_v6 }
 0x143   :  { %v424_v12 = vpop.f32.mrb[20].mxu0  ;;  %v537_v17 = vpop.f32.mrb[20].mxu1 }
 0x144   :  { %v7371_v8 = vadd.f32 %v424_v12, %v7252_v22  ;;  %v426_v11 = vpop.f32.mrb[21].mxu0  ;;  %v7374_v13 = vadd.f32 %v537_v17, %v7240_v18  ;;  %v539_v15 = vpop.f32.mrb[21].mxu1 }
 0x145   :  { %v7377_v26 = vadd.f32 %v426_v11, %v7260_v25  ;;  %v428_v29 = vpop.f32.mrb[22].mxu0  ;;  %v7380_v10 = vadd.f32 %v539_v15, %v7248_v21  ;;  %v541_v0 = vpop.f32.mrb[22].mxu1 }
 0x146   :  { %9618 = vst [vmem:[#allocation43_spill] sm:$0xff] %v7371_v8  ;;  %9619 = vst [vmem:[#allocation44_spill] sm:$0xff] %v7374_v13  ;;  %v7383_v43 = vadd.f32 %v428_v29, %v7252_v22  ;;  %v430_v6 = vpop.f32.mrb[23].mxu0  ;;  %v7386_v12 = vadd.f32 %v541_v0, %v7240_v18  ;;  %v543_v8 = vpop.f32.mrb[23].mxu1 }
 0x147   :  { %9620 = vst [vmem:[#allocation45_spill] sm:$0xff] %v7377_v26  ;;  %9621 = vst [vmem:[#allocation46_spill] sm:$0xff] %v7380_v10  ;;  %v7389_v17 = vadd.f32 %v430_v6, %v7260_v25  ;;  %v7392_v13 = vadd.f32 %v543_v8, %v7248_v21 }
 0x148   :  { %9622 = vst [vmem:[#allocation47_spill] sm:$0xff] %v7383_v43  ;;  %9623 = vst [vmem:[#allocation48_spill] sm:$0xff] %v7386_v12 }
 0x149   :  { %9624 = vst [vmem:[#allocation49_spill] sm:$0xff] %v7389_v17  ;;  %9625 = vst [vmem:[#allocation50_spill] sm:$0xff] %v7392_v13 }
 0x14b   :  { %v434_v11 = vpop.f32.mrb[24].mxu0  ;;  %v547_v26 = vpop.f32.mrb[24].mxu1 }
 0x14c   :  { %v7395_v15 = vadd.f32 %v434_v11, %v7252_v22  ;;  %v436_v10 = vpop.f32.mrb[25].mxu0  ;;  %v7398_v29 = vadd.f32 %v547_v26, %v7240_v18  ;;  %v549_v43 = vpop.f32.mrb[25].mxu1 }
 0x14d   :  { %v7401_v0 = vadd.f32 %v436_v10, %v7260_v25  ;;  %v438_v12 = vpop.f32.mrb[26].mxu0  ;;  %v7404_v6 = vadd.f32 %v549_v43, %v7248_v21  ;;  %v551_v17 = vpop.f32.mrb[26].mxu1 }
 0x14e   :  { %9626 = vst [vmem:[#allocation51_spill] sm:$0xff] %v7395_v15  ;;  %9627 = vst [vmem:[#allocation52_spill] sm:$0xff] %v7398_v29  ;;  %v7407_v8 = vadd.f32 %v438_v12, %v7252_v22  ;;  %v440_v13 = vpop.f32.mrb[27].mxu0  ;;  %v7410_v11 = vadd.f32 %v551_v17, %v7240_v18  ;;  %v553_v15 = vpop.f32.mrb[27].mxu1 }
 0x14f   :  { %9628 = vst [vmem:[#allocation53_spill] sm:$0xff] %v7401_v0  ;;  %9629 = vst [vmem:[#allocation54_spill] sm:$0xff] %v7404_v6  ;;  %v7413_v26 = vadd.f32 %v440_v13, %v7260_v25  ;;  %v7416_v29 = vadd.f32 %v553_v15, %v7248_v21 }
 0x150   :  { %9630 = vst [vmem:[#allocation55_spill] sm:$0xff] %v7407_v8  ;;  %9631 = vst [vmem:[#allocation56_spill] sm:$0xff] %v7410_v11 }
 0x151   :  { %9632 = vst [vmem:[#allocation57_spill] sm:$0xff] %v7413_v26  ;;  %9633 = vst [vmem:[#allocation58_spill] sm:$0xff] %v7416_v29 }
 0x153   :  { %v444_v10 = vpop.f32.mrb[28].mxu0  ;;  %v557_v0 = vpop.f32.mrb[28].mxu1 }
 0x154   :  { %v7419_v43 = vadd.f32 %v444_v10, %v7252_v22  ;;  %v446_v6 = vpop.f32.mrb[29].mxu0  ;;  %v7422_v12 = vadd.f32 %v557_v0, %v7240_v18  ;;  %v559_v8 = vpop.f32.mrb[29].mxu1 }
 0x155   :  { %v7425_v17 = vadd.f32 %v446_v6, %v7260_v25  ;;  %v448_v11 = vpop.f32.mrb[30].mxu0  ;;  %v7428_v13 = vadd.f32 %v559_v8, %v7248_v21  ;;  %v561_v26 = vpop.f32.mrb[30].mxu1  ;;  %v375_v6 = vadd.f32 %v7242_v19, %v7252_v22  ;;  %v488_v8 = vadd.f32 %v7244_v20, %v7240_v18 }
 0x156   :  { %9634 = vst [vmem:[#allocation59_spill] sm:$0xff] %v7419_v43  ;;  %9635 = vst [vmem:[#allocation60_spill] sm:$0xff] %v7422_v12  ;;  %v7431_v15 = vadd.f32 %v448_v11, %v7252_v22  ;;  %v450_v29 = vpop.f32.mrb[31].mxu0  ;;  %v7434_v10 = vadd.f32 %v561_v26, %v7240_v18  ;;  %v563_v43 = vpop.f32.mrb[31].mxu1  ;;  %v377_v11 = vadd.f32 %v7254_v23, %v7260_v25 }
 0x157   :  { %9636 = vst [vmem:[#allocation61_spill] sm:$0xff] %v7425_v17  ;;  %9637 = vst [vmem:[#allocation62_spill] sm:$0xff] %v7428_v13  ;;  %v7437_v0 = vadd.f32 %v450_v29, %v7260_v25  ;;  %v7440_v12 = vadd.f32 %v563_v43, %v7248_v21  ;;  %v490_v26 = vadd.f32 %v7256_v24, %v7248_v21 }
 0x158   :  { %9638 = vst [vmem:[#allocation63_spill] sm:$0xff] %v7431_v15  ;;  %9639 = vst [vmem:[#allocation64_spill] sm:$0xff] %v7434_v10 }
 0x159   :  { %9640 = vst [vmem:[#allocation65_spill] sm:$0xff] %v7437_v0  ;;  %9641 = vst [vmem:[#allocation66_spill] sm:$0xff] %v7440_v12 }
 0x15b   :  { %v868_v10 = vpop.f32.mrb[32].mxu0  ;;  %v909_v15 = vpop.f32.mrb[32].mxu1 }
 0x15c   :  { %v916_v13 = vadd.f32 %v868_v10, %v375_v6  ;;  %v918_v29 = vadd.f32 %v909_v15, %v488_v8  ;;  %v870_v0 = vpop.f32.mrb[33].mxu0  ;;  %v911_v17 = vpop.f32.mrb[33].mxu1 }
 0x15d   :  { %v917_v43 = vadd.f32 %v870_v0, %v377_v11  ;;  %v919_v12 = vadd.f32 %v911_v17, %v490_v26  ;;  %v872_v14 = vpop.f32.mrb[34].mxu0  ;;  %v913_v52 = vpop.f32.mrb[34].mxu1  ;;  %v9642_v26 = vmov 0  }
 0x15e   :  { %v5651_v19 = vmul.f32 -1.442695, %v916_v13  ;;  %v873_v22 = vpop.f32.mrb[35].mxu0  ;;  %v914_v31 = vpop.f32.mrb[35].mxu1 }
 0x15f   :  { %v5652_v18 = vmul.f32 -1.442695, %v917_v43  ;;  %v5653_v20 = vmul.f32 -1.442695, %v919_v12 }
 0x160   :  { %6066 = vpow2.f32 %v5651_v19 }
 0x161   :  { %6068 = vpow2.f32 %v5652_v18 }
 0x162   :  { %6070 = vpow2.f32 %v5653_v20 }
 0x163   :  { %6072 = vtanh.f32 %v918_v29 }
 0x16a   :  { %v6067_v23 = vpop.eup %6066 }
 0x16b   :  { %v6069_v25 = vpop.eup %6068  ;;  %v923_v21 = vadd.f32 1.0, %v6067_v23 }
 0x16c   :  { %v929_v24 = vadd.f32 1.0, %v6069_v25  ;;  %v6071_v15 = vpop.eup %6070 }
 0x16d   :  { %6074 = vrcp.f32 %v923_v21  ;;  %v6073_v10 = vpop.eup %6072  ;;  %v936_v13 = vadd.f32 1.0, %v6071_v15 }
 0x16e   :  { %6076 = vrcp.f32 %v929_v24 }
 0x16f   :  { %6078 = vrcp.f32 %v936_v13 }
 0x177   :  { %v6075_v17 = vpop.eup %6074 }
 0x178   :  { %v6077_v14 = vpop.eup %6076  ;;  %v940_v52 = vmul.f32 %v6075_v17, %v6073_v10 }
 0x179   :  { %v939_v0 = vmul.f32 0.0, %v6077_v14  ;;  %v6079_v12 = vpop.eup %6078 }
 0x17b   :  { %v7450_v31 = vadd.f32 %v940_v52, %v939_v0 }
 0x17d   :  { %6080 = vtanh.f32 %v7450_v31 }
 0x187   :  { %v6081_v6 = vpop.eup %6080 }
 0x188   :  { %v7453_v8 = vmul.f32 %v6081_v6, %v6079_v12 }
 0x18a   :  { %v956_v11 = vpack.c.bf16 %v7453_v8, %v7453_v8 }
 0x18c   :  { %990 = vmatmul.mubr.bf16.vlgmr.msra.gmra.mrb[36].mxu0 %v956_v11  ;;  %1031 = vmatmul.mubr.bf16.vlgmr.msra.gmra.mrb[36].mxu1 %v956_v11 }
 0x18d   :  { %1082 = vmatpush1.bf16.msra.mxu0 %v6975_v36  ;;  %1123 = vmatpush1.bf16.msra.mxu1 %v6987_v38 }
 0x18e   :  { %1083 = vmatprep.subr.bf16.mxu0 %v6981_v37  ;;  %1124 = vmatprep.subr.bf16.mxu1 %v6992_v39 }
 0x18f   :  { %1113 = vmatprep.mubr.bf16.mxu0 %v9642_v26  ;;  %1154 = vmatprep.mubr.bf16.mxu1 %v9642_v26 }
 0x191   :  { %1084 = vmatpush1.bf16.msra.mxu0 %v6999_v40  ;;  %1125 = vmatpush1.bf16.msra.mxu1 %v7012_v42 }
 0x192   :  { %1085 = vmatprep.subr.bf16.mxu0 %v7006_v41  ;;  %1126 = vmatprep.subr.bf16.mxu1 %v7033_v46 }
 0x195   :  { %1086 = vmatpush1.bf16.msra.mxu0 %v7022_v44  ;;  %1127 = vmatpush1.bf16.msra.mxu1 %v7039_v47 }
 0x196   :  { %1087 = vmatprep.subr.bf16.mxu0 %v7027_v45  ;;  %1128 = vmatprep.subr.bf16.mxu1 %v7044_v48 }
 0x199   :  { %1088 = vmatpush1.bf16.msra.mxu0 %v7052_v49  ;;  %1129 = vmatpush1.bf16.msra.mxu1 %v7065_v51 }
 0x19a   :  { %1089 = vmatprep.subr.bf16.mxu0 %v7058_v50  ;;  %1130 = vmatprep.subr.bf16.mxu1 %v7080_v54 }
 0x19d   :  { %1090 = vmatpush1.bf16.msra.mxu0 %v7074_v53  ;;  %1131 = vmatpush1.bf16.msra.mxu1 %v7092_v56 }
 0x19e   :  { %1091 = vmatprep.subr.bf16.mxu0 %v7086_v55  ;;  %1132 = vmatprep.subr.bf16.mxu1 %v7097_v57 }
 0x1a1   :  { %1092 = vmatpush1.bf16.msra.mxu0 %v7102_v58  ;;  %1133 = vmatpush1.bf16.msra.mxu1 %v7114_v60 }
 0x1a2   :  { %1093 = vmatprep.subr.bf16.mxu0 %v7109_v59  ;;  %1134 = vmatprep.subr.bf16.mxu1 %v7132_v63 }
 0x1a5   :  { %1094 = vmatpush1.bf16.msra.mxu0 %v7126_v62  ;;  %1135 = vmatpush1.bf16.msra.mxu1 %v7142_v2 }
 0x1a6   :  { %1095 = vmatprep.subr.bf16.mxu0 %v7137_v1  ;;  %1136 = vmatprep.subr.bf16.mxu1 %v7148_v3 }
 0x1a9   :  { %1096 = vmatpush1.bf16.msra.mxu0 %v7155_v4  ;;  %1137 = vmatpush1.bf16.msra.mxu1 %v7162_v5 }
 0x1aa   :  { %1205 = vmatprep.subr.bf16.mxu0 %v6962_v33  ;;  %1246 = vmatprep.subr.bf16.mxu1 %v6967_v34 }
 0x25f   :  { %v991_v29 = vpop.f32.mrb[36].mxu0  ;;  %v1032_v43 = vpop.f32.mrb[36].mxu1 }
 0x260   :  { %v1039_v19 = vadd.f32 %v991_v29, %v7263_v28  ;;  %v1041_v22 = vadd.f32 %v1032_v43, %v7266_v30  ;;  %v993_v18 = vpop.f32.mrb[37].mxu0  ;;  %v1034_v20 = vpop.f32.mrb[37].mxu1 }
 0x261   :  { %v1040_v23 = vadd.f32 %v993_v18, %v7269_v32  ;;  %v1042_v25 = vadd.f32 %v1034_v20, %v7272_v35  ;;  %v995_v21 = vpop.f32.mrb[38].mxu0  ;;  %v1036_v24 = vpop.f32.mrb[38].mxu1 }
 0x262   :  { %v5654_v15 = vmul.f32 -1.442695, %v1039_v19  ;;  %v996_v10 = vpop.f32.mrb[39].mxu0  ;;  %v1037_v17 = vpop.f32.mrb[39].mxu1 }
 0x263   :  { %v5655_v33 = vmul.f32 -1.442695, %v1040_v23  ;;  %v5656_v34 = vmul.f32 -1.442695, %v1042_v25  ;;  %v7568_v10 = vld [vmem:[%s9569_s2 + $0x8] ss:$16 sps:$4 sm:$0xff]  }
 0x264   :  { %6082 = vpow2.f32 %v5654_v15  ;;  %v7562_v15 = vld [vmem:[%s9569_s2] ss:$16 sps:$4 sm:$0xff]   ;;  %v7574_v17 = vld [vmem:[%s9569_s2 + $0x24] ss:$16 sps:$4 sm:$0xff]  }
 0x265   :  { %6084 = vpow2.f32 %v5655_v33  ;;  %v7580_v33 = vld [vmem:[%s9569_s2 + $0x2c] ss:$16 sps:$4 sm:$0xff]  }
 0x266   :  { %6086 = vpow2.f32 %v5656_v34  ;;  %v7588_v34 = vld [vmem:[%s9569_s2 + $0x20] ss:$16 sps:$4 sm:$0xff]  }
 0x267   :  { %6088 = vtanh.f32 %v1041_v22 }
 0x26e   :  { %v6083_v14 = vpop.eup %6082 }
 0x26f   :  { %v6085_v52 = vpop.eup %6084  ;;  %v1046_v28 = vadd.f32 1.0, %v6083_v14  ;;  %v7594_v14 = vld [vmem:[%s9569_s2 + $0x28] ss:$16 sps:$4 sm:$0xff]  }
 0x270   :  { %v1052_v30 = vadd.f32 1.0, %v6085_v52  ;;  %v6087_v32 = vpop.eup %6086  ;;  %v7600_v52 = vld [vmem:[%s9569_s2 + $0x44] ss:$16 sps:$4 sm:$0xff]  }
 0x271   :  { %6090 = vrcp.f32 %v1046_v28  ;;  %v6089_v13 = vpop.eup %6088  ;;  %v1059_v6 = vadd.f32 1.0, %v6087_v32  ;;  %v7606_v28 = vld [vmem:[%s9569_s2 + $0x4c] ss:$16 sps:$4 sm:$0xff]   ;;  %v7618_v32 = vld [vmem:[%s9569_s2 + $0x48] ss:$16 sps:$4 sm:$0xff]  }
 0x272   :  { %6092 = vrcp.f32 %v1052_v30  ;;  %v7612_v30 = vld [vmem:[%s9569_s2 + $0x40] ss:$16 sps:$4 sm:$0xff]  }
 0x273   :  { %6094 = vrcp.f32 %v1059_v6  ;;  %v7648_v6 = vld [vmem:[%s9569_s2 + $0x84] ss:$16 sps:$4 sm:$0xff]  }
 0x27b   :  { %v6091_v35 = vpop.eup %6090 }
 0x27c   :  { %v6093_v0 = vpop.eup %6092  ;;  %v1063_v12 = vmul.f32 %v6091_v35, %v6089_v13  ;;  %v7624_v13 = vld [vmem:[%s9569_s2 + $0x64] ss:$16 sps:$4 sm:$0xff]   ;;  %v7630_v35 = vld [vmem:[%s9569_s2 + $0x6c] ss:$16 sps:$4 sm:$0xff]  }
 0x27d   :  { %v1062_v11 = vmul.f32 %v6093_v0, %v7450_v31  ;;  %v6095_v43 = vpop.eup %6094  ;;  %v7636_v0 = vld [vmem:[%s9569_s2 + $0x60] ss:$16 sps:$4 sm:$0xff]  }
 0x27f   :  { %v7496_v29 = vadd.f32 %v1063_v12, %v1062_v11  ;;  %v7642_v12 = vld [vmem:[%s9569_s2 + $0x68] ss:$16 sps:$4 sm:$0xff]   ;;  %v7654_v11 = vld [vmem:[%s9569_s2 + $0x8c] ss:$16 sps:$4 sm:$0xff]  }
 0x281   :  { %6096 = vtanh.f32 %v7496_v29 }
 0x28b   :  { %v6097_v19 = vpop.eup %6096 }
 0x28c   :  { %v7499_v18 = vmul.f32 %v6097_v19, %v6095_v43  ;;  %v7666_v43 = vld [vmem:[%s9569_s2 + $0x88] ss:$16 sps:$4 sm:$0xff]   ;;  %v7672_v19 = vld [vmem:[%s9569_s2 + $0xa4] ss:$16 sps:$4 sm:$0xff]  }
 0x28e   :  { %v1080_v22 = vpack.c.bf16 %v7499_v18, %v7499_v18 }
 0x290   :  { %1114 = vmatmul.mubr.bf16.vlgmr.msra.gmra.mrb[40].mxu0 %v1080_v22  ;;  %1155 = vmatmul.mubr.bf16.vlgmr.msra.gmra.mrb[40].mxu1 %v1080_v22  ;;  %v7678_v22 = vld [vmem:[%s9569_s2 + $0xac] ss:$16 sps:$4 sm:$0xff]  }
 0x291   :  { %1206 = vmatpush1.bf16.msra.mxu0 %v6975_v36  ;;  %1247 = vmatpush1.bf16.msra.mxu1 %v6987_v38  ;;  %v7538_v36 = vld [vmem:[%s9569_s2 + $0x4] ss:$16 sps:$4 sm:$0xff]  }
 0x292   :  { %1207 = vmatprep.subr.bf16.mxu0 %v6981_v37  ;;  %1248 = vmatprep.subr.bf16.mxu1 %v6992_v39  ;;  %v7544_v37 = vld [vmem:[%s9569_s2 + $0xc] ss:$16 sps:$4 sm:$0xff]  }
 0x293   :  { %1237 = vmatprep.mubr.bf16.mxu0 %v9642_v26  ;;  %1278 = vmatprep.mubr.bf16.mxu1 %v9642_v26 }
 0x295   :  { %1208 = vmatpush1.bf16.msra.mxu0 %v6999_v40  ;;  %1249 = vmatpush1.bf16.msra.mxu1 %v7012_v42 }
 0x296   :  { %1209 = vmatprep.subr.bf16.mxu0 %v7006_v41  ;;  %1250 = vmatprep.subr.bf16.mxu1 %v7033_v46 }
 0x299   :  { %1210 = vmatpush1.bf16.msra.mxu0 %v7022_v44  ;;  %1251 = vmatpush1.bf16.msra.mxu1 %v7039_v47 }
 0x29a   :  { %1211 = vmatprep.subr.bf16.mxu0 %v7027_v45  ;;  %1252 = vmatprep.subr.bf16.mxu1 %v7044_v48 }
 0x29d   :  { %1212 = vmatpush1.bf16.msra.mxu0 %v7052_v49  ;;  %1253 = vmatpush1.bf16.msra.mxu1 %v7065_v51 }
 0x29e   :  { %1213 = vmatprep.subr.bf16.mxu0 %v7058_v50  ;;  %1254 = vmatprep.subr.bf16.mxu1 %v7080_v54 }
 0x2a1   :  { %1214 = vmatpush1.bf16.msra.mxu0 %v7074_v53  ;;  %1255 = vmatpush1.bf16.msra.mxu1 %v7092_v56 }
 0x2a2   :  { %1215 = vmatprep.subr.bf16.mxu0 %v7086_v55  ;;  %1256 = vmatprep.subr.bf16.mxu1 %v7097_v57 }
 0x2a5   :  { %1216 = vmatpush1.bf16.msra.mxu0 %v7102_v58  ;;  %1257 = vmatpush1.bf16.msra.mxu1 %v7114_v60 }
 0x2a6   :  { %1217 = vmatprep.subr.bf16.mxu0 %v7109_v59  ;;  %1258 = vmatprep.subr.bf16.mxu1 %v7132_v63 }
 0x2a9   :  { %1218 = vmatpush1.bf16.msra.mxu0 %v7126_v62  ;;  %1259 = vmatpush1.bf16.msra.mxu1 %v7142_v2 }
 0x2aa   :  { %1219 = vmatprep.subr.bf16.mxu0 %v7137_v1  ;;  %1260 = vmatprep.subr.bf16.mxu1 %v7148_v3 }
 0x2ad   :  { %1220 = vmatpush1.bf16.msra.mxu0 %v7155_v4  ;;  %1261 = vmatpush1.bf16.msra.mxu1 %v7162_v5 }
 0x2ae   :  { %1329 = vmatprep.subr.bf16.mxu0 %v7538_v36  ;;  %1370 = vmatprep.subr.bf16.mxu1 %v7544_v37 }
 0x363   :  { %v1115_v38 = vpop.f32.mrb[40].mxu0  ;;  %v1156_v39 = vpop.f32.mrb[40].mxu1 }
 0x364   :  { %v1163_v40 = vadd.f32 %v1115_v38, %v7275_v61  ;;  %v1165_v41 = vadd.f32 %v1156_v39, %v7278_v7  ;;  %v1117_v42 = vpop.f32.mrb[41].mxu0  ;;  %v1158_v44 = vpop.f32.mrb[41].mxu1  ;;  %v7684_v38 = vld [vmem:[%s9569_s2 + $0xa0] ss:$16 sps:$4 sm:$0xff]   ;;  %v7690_v39 = vld [vmem:[%s9569_s2 + $0xa8] ss:$16 sps:$4 sm:$0xff]  }
 0x365   :  { %v1164_v45 = vadd.f32 %v1117_v42, %v7281_v9  ;;  %v1166_v46 = vadd.f32 %v1158_v44, %v7284_v16  ;;  %v1119_v47 = vpop.f32.mrb[42].mxu0  ;;  %v1160_v48 = vpop.f32.mrb[42].mxu1  ;;  %v9643_v44 = vld [vmem:[#allocation16_spill] sm:$0xff] }
 0x366   :  { %v5657_v49 = vmul.f32 -1.442695, %v1163_v40  ;;  %v1120_v50 = vpop.f32.mrb[43].mxu0  ;;  %v1161_v51 = vpop.f32.mrb[43].mxu1  ;;  %v7696_v40 = vld [vmem:[%s9569_s2 + $0xc4] ss:$16 sps:$4 sm:$0xff]  }
 0x367   :  { %v5658_v53 = vmul.f32 -1.442695, %v1164_v45  ;;  %v5659_v54 = vmul.f32 -1.442695, %v1166_v46  ;;  %v9644_v46 = vld [vmem:[#allocation17_spill] sm:$0xff]  ;;  %v9645_v47 = vld [vmem:[#allocation18_spill] sm:$0xff] }
 0x368   :  { %6098 = vpow2.f32 %v5657_v49 }
 0x369   :  { %6100 = vpow2.f32 %v5658_v53 }
 0x36a   :  { %6102 = vpow2.f32 %v5659_v54 }
 0x36b   :  { %6104 = vtanh.f32 %v1165_v41 }
 0x372   :  { %v6099_v55 = vpop.eup %6098 }
 0x373   :  { %v6101_v56 = vpop.eup %6100  ;;  %v1170_v57 = vadd.f32 1.0, %v6099_v55 }
 0x374   :  { %v1176_v58 = vadd.f32 1.0, %v6101_v56  ;;  %v6103_v59 = vpop.eup %6102 }
 0x375   :  { %6106 = vrcp.f32 %v1170_v57  ;;  %v6105_v60 = vpop.eup %6104  ;;  %v1183_v16 = vadd.f32 1.0, %v6103_v59 }
 0x376   :  { %6108 = vrcp.f32 %v1176_v58 }
 0x377   :  { %6110 = vrcp.f32 %v1183_v16 }
 0x37f   :  { %v6107_v61 = vpop.eup %6106 }
 0x380   :  { %v6109_v7 = vpop.eup %6108  ;;  %v1187_v9 = vmul.f32 %v6107_v61, %v6105_v60 }
 0x381   :  { %v1186_v31 = vmul.f32 %v6109_v7, %v7496_v29  ;;  %v6111_v23 = vpop.eup %6110  ;;  %v7660_v29 = vld [vmem:[%s9569_s2 + $0x80] ss:$16 sps:$4 sm:$0xff]  }
 0x383   :  { %v7552_v20 = vadd.f32 %v1187_v9, %v1186_v31 }
 0x385   :  { %6112 = vtanh.f32 %v7552_v20 }
 0x38f   :  { %v6113_v25 = vpop.eup %6112 }
 0x390   :  { %v7555_v21 = vmul.f32 %v6113_v25, %v6111_v23 }
 0x392   :  { %v1204_v24 = vpack.c.bf16 %v7555_v21, %v7555_v21 }
 0x394   :  { %1238 = vmatmul.mubr.bf16.vlgmr.msra.gmra.mrb[44].mxu0 %v1204_v24  ;;  %1279 = vmatmul.mubr.bf16.vlgmr.msra.gmra.mrb[44].mxu1 %v1204_v24 }
 0x395   :  { %1330 = vmatpush1.bf16.msra.mxu0 %v7562_v15  ;;  %1371 = vmatpush1.bf16.msra.mxu1 %v7568_v10 }
 0x396   :  { %1331 = vmatprep.subr.bf16.mxu0 %v7574_v17  ;;  %1372 = vmatprep.subr.bf16.mxu1 %v7580_v33 }
 0x397   :  { %1361 = vmatprep.mubr.bf16.mxu0 %v9642_v26  ;;  %1402 = vmatprep.mubr.bf16.mxu1 %v9642_v26 }
 0x399   :  { %1332 = vmatpush1.bf16.msra.mxu0 %v7588_v34  ;;  %1373 = vmatpush1.bf16.msra.mxu1 %v7594_v14 }
 0x39a   :  { %1333 = vmatprep.subr.bf16.mxu0 %v7600_v52  ;;  %1374 = vmatprep.subr.bf16.mxu1 %v7606_v28 }
 0x39d   :  { %1334 = vmatpush1.bf16.msra.mxu0 %v7612_v30  ;;  %1375 = vmatpush1.bf16.msra.mxu1 %v7618_v32 }
 0x39e   :  { %1335 = vmatprep.subr.bf16.mxu0 %v7624_v13  ;;  %1376 = vmatprep.subr.bf16.mxu1 %v7630_v35 }
 0x3a1   :  { %1336 = vmatpush1.bf16.msra.mxu0 %v7636_v0  ;;  %1377 = vmatpush1.bf16.msra.mxu1 %v7642_v12 }
 0x3a2   :  { %1337 = vmatprep.subr.bf16.mxu0 %v7648_v6  ;;  %1378 = vmatprep.subr.bf16.mxu1 %v7654_v11 }
 0x3a5   :  { %1338 = vmatpush1.bf16.msra.mxu0 %v7660_v29  ;;  %1379 = vmatpush1.bf16.msra.mxu1 %v7666_v43 }
 0x3a6   :  { %1339 = vmatprep.subr.bf16.mxu0 %v7672_v19  ;;  %1380 = vmatprep.subr.bf16.mxu1 %v7678_v22 }
 0x3a9   :  { %1340 = vmatpush1.bf16.msra.mxu0 %v7684_v38  ;;  %1381 = vmatpush1.bf16.msra.mxu1 %v7690_v39 }
 0x3aa   :  { %1341 = vmatprep.subr.bf16.mxu0 %v7696_v40  ;;  %1382 = vmatprep.subr.bf16.mxu1 %v7132_v63 }
 0x3ad   :  { %1342 = vmatpush1.bf16.msra.mxu0 %v7126_v62  ;;  %1383 = vmatpush1.bf16.msra.mxu1 %v7142_v2 }
 0x3ae   :  { %1343 = vmatprep.subr.bf16.mxu0 %v7137_v1  ;;  %1384 = vmatprep.subr.bf16.mxu1 %v7148_v3 }
 0x3b1   :  { %1344 = vmatpush1.bf16.msra.mxu0 %v7155_v4  ;;  %1385 = vmatpush1.bf16.msra.mxu1 %v7162_v5 }
 0x3b2   :  { %1453 = vmatprep.subr.bf16.mxu0 %v7538_v36  ;;  %1494 = vmatprep.subr.bf16.mxu1 %v7544_v37 }
 0x467   :  { %v1239_v41 = vpop.f32.mrb[44].mxu0  ;;  %v1280_v42 = vpop.f32.mrb[44].mxu1 }
 0x468   :  { %v1287_v63 = vadd.f32 %v1239_v41, %v7287_v27  ;;  %v1289_v62 = vadd.f32 %v1280_v42, %v9643_v44  ;;  %v1241_v45 = vpop.f32.mrb[45].mxu0  ;;  %v1282_v2 = vpop.f32.mrb[45].mxu1  ;;  %v7754_v41 = vld [vmem:[%s9569_s2 + $0xc0] ss:$16 sps:$4 sm:$0xff]   ;;  %v7760_v42 = vld [vmem:[%s9569_s2 + $0xc8] ss:$16 sps:$4 sm:$0xff]  }
 0x469   :  { %v1288_v1 = vadd.f32 %v1241_v45, %v9644_v46  ;;  %v1290_v3 = vadd.f32 %v1282_v2, %v9645_v47  ;;  %v1243_v48 = vpop.f32.mrb[46].mxu0  ;;  %v1284_v4 = vpop.f32.mrb[46].mxu1  ;;  %v7772_v44 = vld [vmem:[%s9569_s2 + $0xec] ss:$16 sps:$4 sm:$0xff]   ;;  %v7784_v45 = vld [vmem:[%s9569_s2 + $0xe8] ss:$16 sps:$4 sm:$0xff]  }
 0x46a   :  { %v5660_v49 = vmul.f32 -1.442695, %v1287_v63  ;;  %v1244_v5 = vpop.f32.mrb[47].mxu0  ;;  %v1285_v50 = vpop.f32.mrb[47].mxu1  ;;  %v7766_v63 = vld [vmem:[%s9569_s2 + $0xe4] ss:$16 sps:$4 sm:$0xff]  }
 0x46b   :  { %v5661_v51 = vmul.f32 -1.442695, %v1288_v1  ;;  %v5662_v53 = vmul.f32 -1.442695, %v1290_v3  ;;  %v9646_v1 = vld [vmem:[#allocation19_spill] sm:$0xff]  ;;  %v9647_v3 = vld [vmem:[#allocation20_spill] sm:$0xff] }
 0x46c   :  { %6114 = vpow2.f32 %v5660_v49  ;;  %v9648_v5 = vld [vmem:[#allocation21_spill] sm:$0xff] }
 0x46d   :  { %6116 = vpow2.f32 %v5661_v51  ;;  %v9649_v51 = vld [vmem:[#allocation22_spill] sm:$0xff] }
 0x46e   :  { %6118 = vpow2.f32 %v5662_v53 }
 0x46f   :  { %6120 = vtanh.f32 %v1289_v62  ;;  %v7778_v62 = vld [vmem:[%s9569_s2 + $0xe0] ss:$16 sps:$4 sm:$0xff]  }
 0x476   :  { %v6115_v54 = vpop.eup %6114 }
 0x477   :  { %v6117_v55 = vpop.eup %6116  ;;  %v1294_v27 = vadd.f32 1.0, %v6115_v54 }
 0x478   :  { %v1300_v56 = vadd.f32 1.0, %v6117_v55  ;;  %v6119_v57 = vpop.eup %6118 }
 0x479   :  { %6122 = vrcp.f32 %v1294_v27  ;;  %v6121_v58 = vpop.eup %6120  ;;  %v1307_v7 = vadd.f32 1.0, %v6119_v57 }
 0x47a   :  { %6124 = vrcp.f32 %v1300_v56 }
 0x47b   :  { %6126 = vrcp.f32 %v1307_v7 }
 0x483   :  { %v6123_v59 = vpop.eup %6122 }
 0x484   :  { %v6125_v60 = vpop.eup %6124  ;;  %v1311_v61 = vmul.f32 %v6123_v59, %v6121_v58 }
 0x485   :  { %v1310_v9 = vmul.f32 %v6125_v60, %v7552_v20  ;;  %v6127_v31 = vpop.eup %6126  ;;  %v7748_v20 = vld [vmem:[%s9569_s2 + $0xcc] ss:$16 sps:$4 sm:$0xff]  }
 0x487   :  { %v7713_v16 = vadd.f32 %v1311_v61, %v1310_v9 }
 0x489   :  { %6128 = vtanh.f32 %v7713_v16 }
 0x493   :  { %v6129_v23 = vpop.eup %6128 }
 0x494   :  { %v7716_v25 = vmul.f32 %v6129_v23, %v6127_v31 }
 0x496   :  { %v1328_v24 = vpack.c.bf16 %v7716_v25, %v7716_v25 }
 0x498   :  { %1362 = vmatmul.mubr.bf16.vlgmr.msra.gmra.mrb[48].mxu0 %v1328_v24  ;;  %1403 = vmatmul.mubr.bf16.vlgmr.msra.gmra.mrb[48].mxu1 %v1328_v24 }
 0x499   :  { %1454 = vmatpush1.bf16.msra.mxu0 %v7562_v15  ;;  %1495 = vmatpush1.bf16.msra.mxu1 %v7568_v10 }
 0x49a   :  { %1455 = vmatprep.subr.bf16.mxu0 %v7574_v17  ;;  %1496 = vmatprep.subr.bf16.mxu1 %v7580_v33 }
 0x49b   :  { %1485 = vmatprep.mubr.bf16.mxu0 %v9642_v26  ;;  %1526 = vmatprep.mubr.bf16.mxu1 %v9642_v26 }
 0x49d   :  { %1456 = vmatpush1.bf16.msra.mxu0 %v7588_v34  ;;  %1497 = vmatpush1.bf16.msra.mxu1 %v7594_v14 }
 0x49e   :  { %1457 = vmatprep.subr.bf16.mxu0 %v7600_v52  ;;  %1498 = vmatprep.subr.bf16.mxu1 %v7606_v28 }
 0x4a1   :  { %1458 = vmatpush1.bf16.msra.mxu0 %v7612_v30  ;;  %1499 = vmatpush1.bf16.msra.mxu1 %v7618_v32 }
 0x4a2   :  { %1459 = vmatprep.subr.bf16.mxu0 %v7624_v13  ;;  %1500 = vmatprep.subr.bf16.mxu1 %v7630_v35 }
 0x4a5   :  { %1460 = vmatpush1.bf16.msra.mxu0 %v7636_v0  ;;  %1501 = vmatpush1.bf16.msra.mxu1 %v7642_v12 }
 0x4a6   :  { %1461 = vmatprep.subr.bf16.mxu0 %v7648_v6  ;;  %1502 = vmatprep.subr.bf16.mxu1 %v7654_v11 }
 0x4a9   :  { %1462 = vmatpush1.bf16.msra.mxu0 %v7660_v29  ;;  %1503 = vmatpush1.bf16.msra.mxu1 %v7666_v43 }
 0x4aa   :  { %1463 = vmatprep.subr.bf16.mxu0 %v7672_v19  ;;  %1504 = vmatprep.subr.bf16.mxu1 %v7678_v22 }
 0x4ad   :  { %1464 = vmatpush1.bf16.msra.mxu0 %v7684_v38  ;;  %1505 = vmatpush1.bf16.msra.mxu1 %v7690_v39 }
 0x4ae   :  { %1465 = vmatprep.subr.bf16.mxu0 %v7696_v40  ;;  %1506 = vmatprep.subr.bf16.mxu1 %v7748_v20 }
 0x4b1   :  { %1466 = vmatpush1.bf16.msra.mxu0 %v7754_v41  ;;  %1507 = vmatpush1.bf16.msra.mxu1 %v7760_v42 }
 0x4b2   :  { %1467 = vmatprep.subr.bf16.mxu0 %v7766_v63  ;;  %1508 = vmatprep.subr.bf16.mxu1 %v7772_v44 }
 0x4b5   :  { %1468 = vmatpush1.bf16.msra.mxu0 %v7778_v62  ;;  %1509 = vmatpush1.bf16.msra.mxu1 %v7784_v45 }
 0x4b6   :  { %1577 = vmatprep.subr.bf16.mxu0 %v7538_v36  ;;  %1618 = vmatprep.subr.bf16.mxu1 %v7544_v37 }
 0x56b   :  { %v1363_v2 = vpop.f32.mrb[48].mxu0  ;;  %v1404_v46 = vpop.f32.mrb[48].mxu1 }
 0x56c   :  { %v1411_v47 = vadd.f32 %v1363_v2, %v9646_v1  ;;  %v1413_v48 = vadd.f32 %v1404_v46, %v9647_v3  ;;  %v1365_v4 = vpop.f32.mrb[49].mxu0  ;;  %v1406_v49 = vpop.f32.mrb[49].mxu1 }
 0x56d   :  { %v1412_v50 = vadd.f32 %v1365_v4, %v9648_v5  ;;  %v1414_v53 = vadd.f32 %v1406_v49, %v9649_v51  ;;  %v1367_v54 = vpop.f32.mrb[50].mxu0  ;;  %v1408_v55 = vpop.f32.mrb[50].mxu1  ;;  %v9650_v51 = vld [vmem:[#allocation23_spill] sm:$0xff] }
 0x56e   :  { %v5663_v27 = vmul.f32 -1.442695, %v1411_v47  ;;  %v1368_v56 = vpop.f32.mrb[51].mxu0  ;;  %v1409_v57 = vpop.f32.mrb[51].mxu1  ;;  %v9651_v54 = vld [vmem:[#allocation24_spill] sm:$0xff] }
 0x56f   :  { %v5664_v58 = vmul.f32 -1.442695, %v1412_v50  ;;  %v5665_v59 = vmul.f32 -1.442695, %v1414_v53  ;;  %v9652_v57 = vld [vmem:[#allocation25_spill] sm:$0xff] }
 0x570   :  { %6130 = vpow2.f32 %v5663_v27 }
 0x571   :  { %6132 = vpow2.f32 %v5664_v58 }
 0x572   :  { %6134 = vpow2.f32 %v5665_v59  ;;  %v9653_v59 = vld [vmem:[#allocation26_spill] sm:$0xff] }
 0x573   :  { %6136 = vtanh.f32 %v1413_v48 }
 0x57a   :  { %v6131_v60 = vpop.eup %6130 }
 0x57b   :  { %v6133_v61 = vpop.eup %6132  ;;  %v1418_v7 = vadd.f32 1.0, %v6131_v60 }
 0x57c   :  { %v1424_v9 = vadd.f32 1.0, %v6133_v61  ;;  %v6135_v31 = vpop.eup %6134 }
 0x57d   :  { %6138 = vrcp.f32 %v1418_v7  ;;  %v6137_v23 = vpop.eup %6136  ;;  %v1431_v1 = vadd.f32 1.0, %v6135_v31 }
 0x57e   :  { %6140 = vrcp.f32 %v1424_v9 }
 0x57f   :  { %6142 = vrcp.f32 %v1431_v1 }
 0x587   :  { %v6139_v24 = vpop.eup %6138 }
 0x588   :  { %v6141_v2 = vpop.eup %6140  ;;  %v1435_v46 = vmul.f32 %v6139_v24, %v6137_v23 }
 0x589   :  { %v1434_v47 = vmul.f32 %v6141_v2, %v7713_v16  ;;  %v6143_v4 = vpop.eup %6142 }
 0x58b   :  { %v7794_v3 = vadd.f32 %v1435_v46, %v1434_v47 }
 0x58d   :  { %6144 = vtanh.f32 %v7794_v3 }
 0x597   :  { %v6145_v49 = vpop.eup %6144 }
 0x598   :  { %v7797_v5 = vmul.f32 %v6145_v49, %v6143_v4 }
 0x59a   :  { %v1452_v48 = vpack.c.bf16 %v7797_v5, %v7797_v5 }
 0x59c   :  { %1486 = vmatmul.mubr.bf16.vlgmr.msra.gmra.mrb[52].mxu0 %v1452_v48  ;;  %1527 = vmatmul.mubr.bf16.vlgmr.msra.gmra.mrb[52].mxu1 %v1452_v48 }
 0x59d   :  { %1578 = vmatpush1.bf16.msra.mxu0 %v7562_v15  ;;  %1619 = vmatpush1.bf16.msra.mxu1 %v7568_v10 }
 0x59e   :  { %1579 = vmatprep.subr.bf16.mxu0 %v7574_v17  ;;  %1620 = vmatprep.subr.bf16.mxu1 %v7580_v33 }
 0x59f   :  { %1609 = vmatprep.mubr.bf16.mxu0 %v9642_v26  ;;  %1650 = vmatprep.mubr.bf16.mxu1 %v9642_v26 }
 0x5a1   :  { %1580 = vmatpush1.bf16.msra.mxu0 %v7588_v34  ;;  %1621 = vmatpush1.bf16.msra.mxu1 %v7594_v14 }
 0x5a2   :  { %1581 = vmatprep.subr.bf16.mxu0 %v7600_v52  ;;  %1622 = vmatprep.subr.bf16.mxu1 %v7606_v28 }
 0x5a5   :  { %1582 = vmatpush1.bf16.msra.mxu0 %v7612_v30  ;;  %1623 = vmatpush1.bf16.msra.mxu1 %v7618_v32 }
 0x5a6   :  { %1583 = vmatprep.subr.bf16.mxu0 %v7624_v13  ;;  %1624 = vmatprep.subr.bf16.mxu1 %v7630_v35 }
 0x5a9   :  { %1584 = vmatpush1.bf16.msra.mxu0 %v7636_v0  ;;  %1625 = vmatpush1.bf16.msra.mxu1 %v7642_v12 }
 0x5aa   :  { %1585 = vmatprep.subr.bf16.mxu0 %v7648_v6  ;;  %1626 = vmatprep.subr.bf16.mxu1 %v7654_v11 }
 0x5ad   :  { %1586 = vmatpush1.bf16.msra.mxu0 %v7660_v29  ;;  %1627 = vmatpush1.bf16.msra.mxu1 %v7666_v43 }
 0x5ae   :  { %1587 = vmatprep.subr.bf16.mxu0 %v7672_v19  ;;  %1628 = vmatprep.subr.bf16.mxu1 %v7678_v22 }
 0x5b1   :  { %1588 = vmatpush1.bf16.msra.mxu0 %v7684_v38  ;;  %1629 = vmatpush1.bf16.msra.mxu1 %v7690_v39 }
 0x5b2   :  { %1589 = vmatprep.subr.bf16.mxu0 %v7696_v40  ;;  %1630 = vmatprep.subr.bf16.mxu1 %v7748_v20 }
 0x5b5   :  { %1590 = vmatpush1.bf16.msra.mxu0 %v7754_v41  ;;  %1631 = vmatpush1.bf16.msra.mxu1 %v7760_v42 }
 0x5b6   :  { %1591 = vmatprep.subr.bf16.mxu0 %v7766_v63  ;;  %1632 = vmatprep.subr.bf16.mxu1 %v7772_v44 }
 0x5b9   :  { %1592 = vmatpush1.bf16.msra.mxu0 %v7778_v62  ;;  %1633 = vmatpush1.bf16.msra.mxu1 %v7784_v45 }
 0x5ba   :  { %1701 = vmatprep.subr.bf16.mxu0 %v7538_v36  ;;  %1742 = vmatprep.subr.bf16.mxu1 %v7544_v37 }
 0x66f   :  { %v1487_v16 = vpop.f32.mrb[52].mxu0  ;;  %v1528_v50 = vpop.f32.mrb[52].mxu1 }
 0x670   :  { %v1535_v53 = vadd.f32 %v1487_v16, %v9650_v51  ;;  %v1537_v55 = vadd.f32 %v1528_v50, %v9651_v54  ;;  %v1489_v27 = vpop.f32.mrb[53].mxu0  ;;  %v1530_v56 = vpop.f32.mrb[53].mxu1 }
 0x671   :  { %v1536_v58 = vadd.f32 %v1489_v27, %v9652_v57  ;;  %v1538_v60 = vadd.f32 %v1530_v56, %v9653_v59  ;;  %v1491_v61 = vpop.f32.mrb[54].mxu0  ;;  %v1532_v7 = vpop.f32.mrb[54].mxu1 }
 0x672   :  { %v5666_v9 = vmul.f32 -1.442695, %v1535_v53  ;;  %v1492_v31 = vpop.f32.mrb[55].mxu0  ;;  %v1533_v23 = vpop.f32.mrb[55].mxu1  ;;  %v9655_v7 = vld [vmem:[#allocation28_spill] sm:$0xff] }
 0x673   :  { %v5667_v24 = vmul.f32 -1.442695, %v1536_v58  ;;  %v5668_v2 = vmul.f32 -1.442695, %v1538_v60  ;;  %v9654_v60 = vld [vmem:[#allocation27_spill] sm:$0xff] }
 0x674   :  { %6146 = vpow2.f32 %v5666_v9 }
 0x675   :  { %6148 = vpow2.f32 %v5667_v24  ;;  %v9656_v24 = vld [vmem:[#allocation29_spill] sm:$0xff] }
 0x676   :  { %6150 = vpow2.f32 %v5668_v2 }
 0x677   :  { %6152 = vtanh.f32 %v1537_v55 }
 0x67e   :  { %v6147_v46 = vpop.eup %6146 }
 0x67f   :  { %v6149_v1 = vpop.eup %6148  ;;  %v1542_v47 = vadd.f32 1.0, %v6147_v46  ;;  %v9657_v46 = vld [vmem:[#allocation30_spill] sm:$0xff] }
 0x680   :  { %v1548_v4 = vadd.f32 1.0, %v6149_v1  ;;  %v6151_v49 = vpop.eup %6150 }
 0x681   :  { %6154 = vrcp.f32 %v1542_v47  ;;  %v6153_v48 = vpop.eup %6152  ;;  %v1555_v53 = vadd.f32 1.0, %v6151_v49 }
 0x682   :  { %6156 = vrcp.f32 %v1548_v4 }
 0x683   :  { %6158 = vrcp.f32 %v1555_v53 }
 0x68b   :  { %v6155_v16 = vpop.eup %6154 }
 0x68c   :  { %v6157_v50 = vpop.eup %6156  ;;  %v1559_v51 = vmul.f32 %v6155_v16, %v6153_v48 }
 0x68d   :  { %v1558_v54 = vmul.f32 %v6157_v50, %v7794_v3  ;;  %v6159_v56 = vpop.eup %6158 }
 0x68f   :  { %v7840_v27 = vadd.f32 %v1559_v51, %v1558_v54 }
 0x691   :  { %6160 = vtanh.f32 %v7840_v27 }
 0x69b   :  { %v6161_v57 = vpop.eup %6160 }
 0x69c   :  { %v7843_v58 = vmul.f32 %v6161_v57, %v6159_v56 }
 0x69e   :  { %v1576_v55 = vpack.c.bf16 %v7843_v58, %v7843_v58 }
 0x6a0   :  { %1610 = vmatmul.mubr.bf16.vlgmr.msra.gmra.mrb[56].mxu0 %v1576_v55  ;;  %1651 = vmatmul.mubr.bf16.vlgmr.msra.gmra.mrb[56].mxu1 %v1576_v55 }
 0x6a1   :  { %1702 = vmatpush1.bf16.msra.mxu0 %v7562_v15  ;;  %1743 = vmatpush1.bf16.msra.mxu1 %v7568_v10 }
 0x6a2   :  { %1703 = vmatprep.subr.bf16.mxu0 %v7574_v17  ;;  %1744 = vmatprep.subr.bf16.mxu1 %v7580_v33 }
 0x6a3   :  { %1733 = vmatprep.mubr.bf16.mxu0 %v9642_v26  ;;  %1774 = vmatprep.mubr.bf16.mxu1 %v9642_v26 }
 0x6a5   :  { %1704 = vmatpush1.bf16.msra.mxu0 %v7588_v34  ;;  %1745 = vmatpush1.bf16.msra.mxu1 %v7594_v14 }
 0x6a6   :  { %1705 = vmatprep.subr.bf16.mxu0 %v7600_v52  ;;  %1746 = vmatprep.subr.bf16.mxu1 %v7606_v28 }
 0x6a9   :  { %1706 = vmatpush1.bf16.msra.mxu0 %v7612_v30  ;;  %1747 = vmatpush1.bf16.msra.mxu1 %v7618_v32 }
 0x6aa   :  { %1707 = vmatprep.subr.bf16.mxu0 %v7624_v13  ;;  %1748 = vmatprep.subr.bf16.mxu1 %v7630_v35 }
 0x6ad   :  { %1708 = vmatpush1.bf16.msra.mxu0 %v7636_v0  ;;  %1749 = vmatpush1.bf16.msra.mxu1 %v7642_v12 }
 0x6ae   :  { %1709 = vmatprep.subr.bf16.mxu0 %v7648_v6  ;;  %1750 = vmatprep.subr.bf16.mxu1 %v7654_v11 }
 0x6b1   :  { %1710 = vmatpush1.bf16.msra.mxu0 %v7660_v29  ;;  %1751 = vmatpush1.bf16.msra.mxu1 %v7666_v43 }
 0x6b2   :  { %1711 = vmatprep.subr.bf16.mxu0 %v7672_v19  ;;  %1752 = vmatprep.subr.bf16.mxu1 %v7678_v22 }
 0x6b5   :  { %1712 = vmatpush1.bf16.msra.mxu0 %v7684_v38  ;;  %1753 = vmatpush1.bf16.msra.mxu1 %v7690_v39 }
 0x6b6   :  { %1713 = vmatprep.subr.bf16.mxu0 %v7696_v40  ;;  %1754 = vmatprep.subr.bf16.mxu1 %v7748_v20 }
 0x6b9   :  { %1714 = vmatpush1.bf16.msra.mxu0 %v7754_v41  ;;  %1755 = vmatpush1.bf16.msra.mxu1 %v7760_v42 }
 0x6ba   :  { %1715 = vmatprep.subr.bf16.mxu0 %v7766_v63  ;;  %1756 = vmatprep.subr.bf16.mxu1 %v7772_v44 }
 0x6bd   :  { %1716 = vmatpush1.bf16.msra.mxu0 %v7778_v62  ;;  %1757 = vmatpush1.bf16.msra.mxu1 %v7784_v45 }
 0x6be   :  { %1825 = vmatprep.subr.bf16.mxu0 %v7538_v36  ;;  %1866 = vmatprep.subr.bf16.mxu1 %v7544_v37 }
 0x773   :  { %v1611_v3 = vpop.f32.mrb[56].mxu0  ;;  %v1652_v59 = vpop.f32.mrb[56].mxu1 }
 0x774   :  { %v1659_v61 = vadd.f32 %v1611_v3, %v9654_v60  ;;  %v1661_v9 = vadd.f32 %v1652_v59, %v9655_v7  ;;  %v1613_v31 = vpop.f32.mrb[57].mxu0  ;;  %v1654_v23 = vpop.f32.mrb[57].mxu1 }
 0x775   :  { %v1660_v2 = vadd.f32 %v1613_v31, %v9656_v24  ;;  %v1662_v1 = vadd.f32 %v1654_v23, %v9657_v46  ;;  %v1615_v47 = vpop.f32.mrb[58].mxu0  ;;  %v1656_v4 = vpop.f32.mrb[58].mxu1 }
 0x776   :  { %v5669_v49 = vmul.f32 -1.442695, %v1659_v61  ;;  %v1616_v48 = vpop.f32.mrb[59].mxu0  ;;  %v1657_v16 = vpop.f32.mrb[59].mxu1  ;;  %v9658_v47 = vld [vmem:[#allocation31_spill] sm:$0xff] }
 0x777   :  { %v5670_v50 = vmul.f32 -1.442695, %v1660_v2  ;;  %v5671_v51 = vmul.f32 -1.442695, %v1662_v1 }
 0x778   :  { %6162 = vpow2.f32 %v5669_v49  ;;  %v9659_v49 = vld [vmem:[#allocation32_spill] sm:$0xff] }
 0x779   :  { %6164 = vpow2.f32 %v5670_v50 }
 0x77a   :  { %6166 = vpow2.f32 %v5671_v51  ;;  %v9660_v51 = vld [vmem:[#allocation33_spill] sm:$0xff] }
 0x77b   :  { %6168 = vtanh.f32 %v1661_v9 }
 0x782   :  { %v6163_v53 = vpop.eup %6162 }
 0x783   :  { %v6165_v54 = vpop.eup %6164  ;;  %v1666_v56 = vadd.f32 1.0, %v6163_v53 }
 0x784   :  { %v1672_v57 = vadd.f32 1.0, %v6165_v54  ;;  %v6167_v55 = vpop.eup %6166  ;;  %v9661_v54 = vld [vmem:[#allocation34_spill] sm:$0xff] }
 0x785   :  { %6170 = vrcp.f32 %v1666_v56  ;;  %v6169_v3 = vpop.eup %6168  ;;  %v1679_v61 = vadd.f32 1.0, %v6167_v55 }
 0x786   :  { %6172 = vrcp.f32 %v1672_v57 }
 0x787   :  { %6174 = vrcp.f32 %v1679_v61 }
 0x78f   :  { %v6171_v59 = vpop.eup %6170 }
 0x790   :  { %v6173_v60 = vpop.eup %6172  ;;  %v1683_v7 = vmul.f32 %v6171_v59, %v6169_v3 }
 0x791   :  { %v1682_v31 = vmul.f32 %v6173_v60, %v7840_v27  ;;  %v6175_v24 = vpop.eup %6174 }
 0x793   :  { %v7886_v23 = vadd.f32 %v1683_v7, %v1682_v31 }
 0x795   :  { %6176 = vtanh.f32 %v7886_v23 }
 0x79f   :  { %v6177_v2 = vpop.eup %6176 }
 0x7a0   :  { %v7889_v46 = vmul.f32 %v6177_v2, %v6175_v24 }
 0x7a2   :  { %v1700_v9 = vpack.c.bf16 %v7889_v46, %v7889_v46 }
 0x7a4   :  { %1734 = vmatmul.mubr.bf16.vlgmr.msra.gmra.mrb[60].mxu0 %v1700_v9  ;;  %1775 = vmatmul.mubr.bf16.vlgmr.msra.gmra.mrb[60].mxu1 %v1700_v9 }
 0x7a5   :  { %1826 = vmatpush1.bf16.msra.mxu0 %v7562_v15  ;;  %1867 = vmatpush1.bf16.msra.mxu1 %v7568_v10 }
 0x7a6   :  { %1827 = vmatprep.subr.bf16.mxu0 %v7574_v17  ;;  %1868 = vmatprep.subr.bf16.mxu1 %v7580_v33 }
 0x7a7   :  { %1857 = vmatprep.mubr.bf16.mxu0 %v9642_v26  ;;  %1898 = vmatprep.mubr.bf16.mxu1 %v9642_v26 }
 0x7a9   :  { %1828 = vmatpush1.bf16.msra.mxu0 %v7588_v34  ;;  %1869 = vmatpush1.bf16.msra.mxu1 %v7594_v14 }
 0x7aa   :  { %1829 = vmatprep.subr.bf16.mxu0 %v7600_v52  ;;  %1870 = vmatprep.subr.bf16.mxu1 %v7606_v28 }
 0x7ad   :  { %1830 = vmatpush1.bf16.msra.mxu0 %v7612_v30  ;;  %1871 = vmatpush1.bf16.msra.mxu1 %v7618_v32 }
 0x7ae   :  { %1831 = vmatprep.subr.bf16.mxu0 %v7624_v13  ;;  %1872 = vmatprep.subr.bf16.mxu1 %v7630_v35 }
 0x7b1   :  { %1832 = vmatpush1.bf16.msra.mxu0 %v7636_v0  ;;  %1873 = vmatpush1.bf16.msra.mxu1 %v7642_v12 }
 0x7b2   :  { %1833 = vmatprep.subr.bf16.mxu0 %v7648_v6  ;;  %1874 = vmatprep.subr.bf16.mxu1 %v7654_v11 }
 0x7b5   :  { %1834 = vmatpush1.bf16.msra.mxu0 %v7660_v29  ;;  %1875 = vmatpush1.bf16.msra.mxu1 %v7666_v43 }
 0x7b6   :  { %1835 = vmatprep.subr.bf16.mxu0 %v7672_v19  ;;  %1876 = vmatprep.subr.bf16.mxu1 %v7678_v22 }
 0x7b9   :  { %1836 = vmatpush1.bf16.msra.mxu0 %v7684_v38  ;;  %1877 = vmatpush1.bf16.msra.mxu1 %v7690_v39 }
 0x7ba   :  { %1837 = vmatprep.subr.bf16.mxu0 %v7696_v40  ;;  %1878 = vmatprep.subr.bf16.mxu1 %v7748_v20 }
 0x7bd   :  { %1838 = vmatpush1.bf16.msra.mxu0 %v7754_v41  ;;  %1879 = vmatpush1.bf16.msra.mxu1 %v7760_v42 }
 0x7be   :  { %1839 = vmatprep.subr.bf16.mxu0 %v7766_v63  ;;  %1880 = vmatprep.subr.bf16.mxu1 %v7772_v44 }
 0x7c1   :  { %1840 = vmatpush1.bf16.msra.mxu0 %v7778_v62  ;;  %1881 = vmatpush1.bf16.msra.mxu1 %v7784_v45 }
 0x7c2   :  { %1949 = vmatprep.subr.bf16.mxu0 %v7538_v36  ;;  %1990 = vmatprep.subr.bf16.mxu1 %v7544_v37 }
 0x877   :  { %v1735_v27 = vpop.f32.mrb[60].mxu0  ;;  %v1776_v1 = vpop.f32.mrb[60].mxu1 }
 0x878   :  { %v1783_v4 = vadd.f32 %v1735_v27, %v9658_v47  ;;  %v1785_v48 = vadd.f32 %v1776_v1, %v9659_v49  ;;  %v1737_v16 = vpop.f32.mrb[61].mxu0  ;;  %v1778_v50 = vpop.f32.mrb[61].mxu1 }
 0x879   :  { %v1784_v53 = vadd.f32 %v1737_v16, %v9660_v51  ;;  %v1786_v56 = vadd.f32 %v1778_v50, %v9661_v54  ;;  %v1739_v57 = vpop.f32.mrb[62].mxu0  ;;  %v1780_v55 = vpop.f32.mrb[62].mxu1 }
 0x87a   :  { %v5672_v3 = vmul.f32 -1.442695, %v1783_v4  ;;  %v1740_v59 = vpop.f32.mrb[63].mxu0  ;;  %v1781_v60 = vpop.f32.mrb[63].mxu1  ;;  %v9662_v55 = vld [vmem:[#allocation35_spill] sm:$0xff] }
 0x87b   :  { %v5673_v7 = vmul.f32 -1.442695, %v1784_v53  ;;  %v5674_v61 = vmul.f32 -1.442695, %v1786_v56  ;;  %v9663_v59 = vld [vmem:[#allocation36_spill] sm:$0xff] }
 0x87c   :  { %6178 = vpow2.f32 %v5672_v3 }
 0x87d   :  { %6180 = vpow2.f32 %v5673_v7 }
 0x87e   :  { %6182 = vpow2.f32 %v5674_v61 }
 0x87f   :  { %6184 = vtanh.f32 %v1785_v48 }
 0x886   :  { %v6179_v31 = vpop.eup %6178 }
 0x887   :  { %v6181_v24 = vpop.eup %6180  ;;  %v1790_v2 = vadd.f32 1.0, %v6179_v31  ;;  %v9664_v31 = vld [vmem:[#allocation37_spill] sm:$0xff] }
 0x888   :  { %v1796_v9 = vadd.f32 1.0, %v6181_v24  ;;  %v6183_v27 = vpop.eup %6182 }
 0x889   :  { %6186 = vrcp.f32 %v1790_v2  ;;  %v6185_v1 = vpop.eup %6184  ;;  %v1803_v4 = vadd.f32 1.0, %v6183_v27  ;;  %v9665_v2 = vld [vmem:[#allocation38_spill] sm:$0xff] }
 0x88a   :  { %6188 = vrcp.f32 %v1796_v9 }
 0x88b   :  { %6190 = vrcp.f32 %v1803_v4 }
 0x893   :  { %v6187_v47 = vpop.eup %6186 }
 0x894   :  { %v6189_v49 = vpop.eup %6188  ;;  %v1807_v16 = vmul.f32 %v6187_v47, %v6185_v1 }
 0x895   :  { %v1806_v50 = vmul.f32 %v6189_v49, %v7886_v23  ;;  %v6191_v53 = vpop.eup %6190 }
 0x897   :  { %v7932_v51 = vadd.f32 %v1807_v16, %v1806_v50 }
 0x899   :  { %6192 = vtanh.f32 %v7932_v51 }
 0x8a3   :  { %v6193_v54 = vpop.eup %6192 }
 0x8a4   :  { %v7935_v56 = vmul.f32 %v6193_v54, %v6191_v53 }
 0x8a6   :  { %v1824_v48 = vpack.c.bf16 %v7935_v56, %v7935_v56 }
 0x8a8   :  { %1858 = vmatmul.mubr.bf16.vlgmr.msra.gmra.mrb[64].mxu0 %v1824_v48  ;;  %1899 = vmatmul.mubr.bf16.vlgmr.msra.gmra.mrb[64].mxu1 %v1824_v48 }
 0x8a9   :  { %1950 = vmatpush1.bf16.msra.mxu0 %v7562_v15  ;;  %1991 = vmatpush1.bf16.msra.mxu1 %v7568_v10 }
 0x8aa   :  { %1951 = vmatprep.subr.bf16.mxu0 %v7574_v17  ;;  %1992 = vmatprep.subr.bf16.mxu1 %v7580_v33 }
 0x8ab   :  { %1981 = vmatprep.mubr.bf16.mxu0 %v9642_v26  ;;  %2022 = vmatprep.mubr.bf16.mxu1 %v9642_v26 }
 0x8ad   :  { %1952 = vmatpush1.bf16.msra.mxu0 %v7588_v34  ;;  %1993 = vmatpush1.bf16.msra.mxu1 %v7594_v14 }
 0x8ae   :  { %1953 = vmatprep.subr.bf16.mxu0 %v7600_v52  ;;  %1994 = vmatprep.subr.bf16.mxu1 %v7606_v28 }
 0x8b1   :  { %1954 = vmatpush1.bf16.msra.mxu0 %v7612_v30  ;;  %1995 = vmatpush1.bf16.msra.mxu1 %v7618_v32 }
 0x8b2   :  { %1955 = vmatprep.subr.bf16.mxu0 %v7624_v13  ;;  %1996 = vmatprep.subr.bf16.mxu1 %v7630_v35 }
 0x8b5   :  { %1956 = vmatpush1.bf16.msra.mxu0 %v7636_v0  ;;  %1997 = vmatpush1.bf16.msra.mxu1 %v7642_v12 }
 0x8b6   :  { %1957 = vmatprep.subr.bf16.mxu0 %v7648_v6  ;;  %1998 = vmatprep.subr.bf16.mxu1 %v7654_v11 }
 0x8b9   :  { %1958 = vmatpush1.bf16.msra.mxu0 %v7660_v29  ;;  %1999 = vmatpush1.bf16.msra.mxu1 %v7666_v43 }
 0x8ba   :  { %1959 = vmatprep.subr.bf16.mxu0 %v7672_v19  ;;  %2000 = vmatprep.subr.bf16.mxu1 %v7678_v22 }
 0x8bd   :  { %1960 = vmatpush1.bf16.msra.mxu0 %v7684_v38  ;;  %2001 = vmatpush1.bf16.msra.mxu1 %v7690_v39 }
 0x8be   :  { %1961 = vmatprep.subr.bf16.mxu0 %v7696_v40  ;;  %2002 = vmatprep.subr.bf16.mxu1 %v7748_v20 }
 0x8c1   :  { %1962 = vmatpush1.bf16.msra.mxu0 %v7754_v41  ;;  %2003 = vmatpush1.bf16.msra.mxu1 %v7760_v42 }
 0x8c2   :  { %1963 = vmatprep.subr.bf16.mxu0 %v7766_v63  ;;  %2004 = vmatprep.subr.bf16.mxu1 %v7772_v44 }
 0x8c5   :  { %1964 = vmatpush1.bf16.msra.mxu0 %v7778_v62  ;;  %2005 = vmatpush1.bf16.msra.mxu1 %v7784_v45 }
 0x8c6   :  { %2073 = vmatprep.subr.bf16.mxu0 %v7538_v36  ;;  %2114 = vmatprep.subr.bf16.mxu1 %v7544_v37 }
 0x97b   :  { %v1859_v23 = vpop.f32.mrb[64].mxu0  ;;  %v1900_v57 = vpop.f32.mrb[64].mxu1 }
 0x97c   :  { %v1907_v3 = vadd.f32 %v1859_v23, %v9662_v55  ;;  %v1909_v60 = vadd.f32 %v1900_v57, %v9663_v59  ;;  %v1861_v7 = vpop.f32.mrb[65].mxu0  ;;  %v1902_v61 = vpop.f32.mrb[65].mxu1 }
 0x97d   :  { %v1908_v24 = vadd.f32 %v1861_v7, %v9664_v31  ;;  %v1910_v9 = vadd.f32 %v1902_v61, %v9665_v2  ;;  %v1863_v27 = vpop.f32.mrb[66].mxu0  ;;  %v1904_v1 = vpop.f32.mrb[66].mxu1 }
 0x97e   :  { %v5675_v47 = vmul.f32 -1.442695, %v1907_v3  ;;  %v1864_v49 = vpop.f32.mrb[67].mxu0  ;;  %v1905_v16 = vpop.f32.mrb[67].mxu1 }
 0x97f   :  { %v5676_v36 = vmul.f32 -1.442695, %v1908_v24  ;;  %v5677_v37 = vmul.f32 -1.442695, %v1910_v9 }
 0x980   :  { %6194 = vpow2.f32 %v5675_v47 }
 0x981   :  { %6196 = vpow2.f32 %v5676_v36 }
 0x982   :  { %6198 = vpow2.f32 %v5677_v37 }
 0x983   :  { %6200 = vtanh.f32 %v1909_v60 }
 0x98a   :  { %v6195_v4 = vpop.eup %6194 }
 0x98b   :  { %v6197_v50 = vpop.eup %6196  ;;  %v1914_v53 = vadd.f32 1.0, %v6195_v4 }
 0x98c   :  { %v1920_v54 = vadd.f32 1.0, %v6197_v50  ;;  %v6199_v48 = vpop.eup %6198 }
 0x98d   :  { %6202 = vrcp.f32 %v1914_v53  ;;  %v6201_v23 = vpop.eup %6200  ;;  %v1927_v3 = vadd.f32 1.0, %v6199_v48 }
 0x98e   :  { %6204 = vrcp.f32 %v1920_v54 }
 0x98f   :  { %6206 = vrcp.f32 %v1927_v3  ;;  %v8070_v3 = vld [vmem:[%s9569_s2 + $0x20] ss:$16 sps:$4 sm:$0xff]  }
 0x997   :  { %v6203_v57 = vpop.eup %6202 }
 0x998   :  { %v6205_v55 = vpop.eup %6204  ;;  %v1931_v59 = vmul.f32 %v6203_v57, %v6201_v23  ;;  %v8044_v23 = vld [vmem:[%s9569_s2] ss:$16 sps:$4 sm:$0xff]   ;;  %v8050_v57 = vld [vmem:[%s9569_s2 + $0x8] ss:$16 sps:$4 sm:$0xff]  }
 0x999   :  { %v1930_v7 = vmul.f32 %v6205_v55, %v7932_v51  ;;  %v6207_v31 = vpop.eup %6206  ;;  %v8056_v55 = vld [vmem:[%s9569_s2 + $0x24] ss:$16 sps:$4 sm:$0xff]  }
 0x99b   :  { %v7978_v61 = vadd.f32 %v1931_v59, %v1930_v7  ;;  %v8062_v59 = vld [vmem:[%s9569_s2 + $0x2c] ss:$16 sps:$4 sm:$0xff]   ;;  %v8076_v7 = vld [vmem:[%s9569_s2 + $0x28] ss:$16 sps:$4 sm:$0xff]  }
 0x99d   :  { %6208 = vtanh.f32 %v7978_v61 }
 0x9a7   :  { %v6209_v24 = vpop.eup %6208 }
 0x9a8   :  { %v7981_v2 = vmul.f32 %v6209_v24, %v6207_v31  ;;  %v8088_v31 = vld [vmem:[%s9569_s2 + $0x4c] ss:$16 sps:$4 sm:$0xff]   ;;  %v8094_v24 = vld [vmem:[%s9569_s2 + $0x40] ss:$16 sps:$4 sm:$0xff]  }
 0x9aa   :  { %v1948_v60 = vpack.c.bf16 %v7981_v2, %v7981_v2 }
 0x9ac   :  { %1982 = vmatmul.mubr.bf16.vlgmr.msra.gmra.mrb[68].mxu0 %v1948_v60  ;;  %2023 = vmatmul.mubr.bf16.vlgmr.msra.gmra.mrb[68].mxu1 %v1948_v60  ;;  %v8100_v60 = vld [vmem:[%s9569_s2 + $0x48] ss:$16 sps:$4 sm:$0xff]  }
 0x9ad   :  { %2074 = vmatpush1.bf16.msra.mxu0 %v7562_v15  ;;  %2115 = vmatpush1.bf16.msra.mxu1 %v7568_v10  ;;  %v8020_v15 = vld [vmem:[%s9569_s2 + $0x4] ss:$16 sps:$4 sm:$0xff]   ;;  %v8026_v10 = vld [vmem:[%s9569_s2 + $0xc] ss:$16 sps:$4 sm:$0xff]  }
 0x9ae   :  { %2075 = vmatprep.subr.bf16.mxu0 %v7574_v17  ;;  %2116 = vmatprep.subr.bf16.mxu1 %v7580_v33 }
 0x9af   :  { %2105 = vmatprep.mubr.bf16.mxu0 %v9642_v26  ;;  %2146 = vmatprep.mubr.bf16.mxu1 %v9642_v26 }
 0x9b1   :  { %2076 = vmatpush1.bf16.msra.mxu0 %v7588_v34  ;;  %2117 = vmatpush1.bf16.msra.mxu1 %v7594_v14  ;;  %v9666_v34 = vld [vmem:[#allocation39_spill] sm:$0xff] }
 0x9b2   :  { %2077 = vmatprep.subr.bf16.mxu0 %v7600_v52  ;;  %2118 = vmatprep.subr.bf16.mxu1 %v7606_v28  ;;  %v9667_v52 = vld [vmem:[#allocation40_spill] sm:$0xff] }
 0x9b5   :  { %2078 = vmatpush1.bf16.msra.mxu0 %v7612_v30  ;;  %2119 = vmatpush1.bf16.msra.mxu1 %v7618_v32 }
 0x9b6   :  { %2079 = vmatprep.subr.bf16.mxu0 %v7624_v13  ;;  %2120 = vmatprep.subr.bf16.mxu1 %v7630_v35  ;;  %v9668_v13 = vld [vmem:[#allocation41_spill] sm:$0xff] }
 0x9b9   :  { %2080 = vmatpush1.bf16.msra.mxu0 %v7636_v0  ;;  %2121 = vmatpush1.bf16.msra.mxu1 %v7642_v12  ;;  %v9669_v0 = vld [vmem:[#allocation42_spill] sm:$0xff] }
 0x9ba   :  { %2081 = vmatprep.subr.bf16.mxu0 %v7648_v6  ;;  %2122 = vmatprep.subr.bf16.mxu1 %v7654_v11 }
 0x9bd   :  { %2082 = vmatpush1.bf16.msra.mxu0 %v7660_v29  ;;  %2123 = vmatpush1.bf16.msra.mxu1 %v7666_v43 }
 0x9be   :  { %2083 = vmatprep.subr.bf16.mxu0 %v7672_v19  ;;  %2124 = vmatprep.subr.bf16.mxu1 %v7678_v22 }
 0x9c1   :  { %2084 = vmatpush1.bf16.msra.mxu0 %v7684_v38  ;;  %2125 = vmatpush1.bf16.msra.mxu1 %v7690_v39 }
 0x9c2   :  { %2085 = vmatprep.subr.bf16.mxu0 %v7696_v40  ;;  %2126 = vmatprep.subr.bf16.mxu1 %v7748_v20 }
 0x9c5   :  { %2086 = vmatpush1.bf16.msra.mxu0 %v7754_v41  ;;  %2127 = vmatpush1.bf16.msra.mxu1 %v7760_v42 }
 0x9c6   :  { %2087 = vmatprep.subr.bf16.mxu0 %v7766_v63  ;;  %2128 = vmatprep.subr.bf16.mxu1 %v7772_v44 }
 0x9c9   :  { %2088 = vmatpush1.bf16.msra.mxu0 %v7778_v62  ;;  %2129 = vmatpush1.bf16.msra.mxu1 %v7784_v45 }
 0x9ca   :  { %2197 = vmatprep.subr.bf16.mxu0 %v8020_v15  ;;  %2238 = vmatprep.subr.bf16.mxu1 %v8026_v10 }
 0xa7f   :  { %v1983_v17 = vpop.f32.mrb[68].mxu0  ;;  %v2024_v33 = vpop.f32.mrb[68].mxu1 }
 0xa80   :  { %v2031_v14 = vadd.f32 %v1983_v17, %v9666_v34  ;;  %v2033_v28 = vadd.f32 %v2024_v33, %v9667_v52  ;;  %v1985_v30 = vpop.f32.mrb[69].mxu0  ;;  %v2026_v32 = vpop.f32.mrb[69].mxu1  ;;  %v8106_v17 = vld [vmem:[%s9569_s2 + $0x64] ss:$16 sps:$4 sm:$0xff]   ;;  %v8112_v33 = vld [vmem:[%s9569_s2 + $0x6c] ss:$16 sps:$4 sm:$0xff]  }
 0xa81   :  { %v2032_v35 = vadd.f32 %v1985_v30, %v9668_v13  ;;  %v2034_v12 = vadd.f32 %v2026_v32, %v9669_v0  ;;  %v1987_v6 = vpop.f32.mrb[70].mxu0  ;;  %v2028_v11 = vpop.f32.mrb[70].mxu1  ;;  %v8118_v34 = vld [vmem:[%s9569_s2 + $0x60] ss:$16 sps:$4 sm:$0xff]   ;;  %v8130_v52 = vld [vmem:[%s9569_s2 + $0x84] ss:$16 sps:$4 sm:$0xff]  }
 0xa82   :  { %v5678_v29 = vmul.f32 -1.442695, %v2031_v14  ;;  %v1988_v43 = vpop.f32.mrb[71].mxu0  ;;  %v2029_v19 = vpop.f32.mrb[71].mxu1  ;;  %v8124_v14 = vld [vmem:[%s9569_s2 + $0x68] ss:$16 sps:$4 sm:$0xff]  }
 0xa83   :  { %v5679_v22 = vmul.f32 -1.442695, %v2032_v35  ;;  %v5680_v38 = vmul.f32 -1.442695, %v2034_v12  ;;  %v8142_v30 = vld [vmem:[%s9569_s2 + $0x80] ss:$16 sps:$4 sm:$0xff]  }
 0xa84   :  { %6210 = vpow2.f32 %v5678_v29  ;;  %v8148_v32 = vld [vmem:[%s9569_s2 + $0x88] ss:$16 sps:$4 sm:$0xff]   ;;  %v8154_v13 = vld [vmem:[%s9569_s2 + $0xa4] ss:$16 sps:$4 sm:$0xff]   ;;  %v8160_v35 = vld [vmem:[%s9569_s2 + $0xac] ss:$16 sps:$4 sm:$0xff]  }
 0xa85   :  { %6212 = vpow2.f32 %v5679_v22  ;;  %v8166_v0 = vld [vmem:[%s9569_s2 + $0xa0] ss:$16 sps:$4 sm:$0xff]   ;;  %v8172_v12 = vld [vmem:[%s9569_s2 + $0xa8] ss:$16 sps:$4 sm:$0xff]   ;;  %v8178_v6 = vld [vmem:[%s9569_s2 + $0xc4] ss:$16 sps:$4 sm:$0xff]  }
 0xa86   :  { %6214 = vpow2.f32 %v5680_v38  ;;  %v9671_v43 = vld [vmem:[#allocation43_spill] sm:$0xff]  ;;  %v9672_v19 = vld [vmem:[#allocation44_spill] sm:$0xff]  ;;  %v9673_v38 = vld [vmem:[#allocation45_spill] sm:$0xff] }
 0xa87   :  { %6216 = vtanh.f32 %v2033_v28  ;;  %v8136_v28 = vld [vmem:[%s9569_s2 + $0x8c] ss:$16 sps:$4 sm:$0xff]  }
 0xa8e   :  { %v6211_v39 = vpop.eup %6210 }
 0xa8f   :  { %v6213_v40 = vpop.eup %6212  ;;  %v2038_v51 = vadd.f32 1.0, %v6211_v39  ;;  %v9674_v39 = vld [vmem:[#allocation46_spill] sm:$0xff] }
 0xa90   :  { %v2044_v9 = vadd.f32 1.0, %v6213_v40  ;;  %v6215_v27 = vpop.eup %6214 }
 0xa91   :  { %6218 = vrcp.f32 %v2038_v51  ;;  %v6217_v1 = vpop.eup %6216  ;;  %v2051_v36 = vadd.f32 1.0, %v6215_v27 }
 0xa92   :  { %6220 = vrcp.f32 %v2044_v9 }
 0xa93   :  { %6222 = vrcp.f32 %v2051_v36 }
 0xa9b   :  { %v6219_v47 = vpop.eup %6218 }
 0xa9c   :  { %v6221_v49 = vpop.eup %6220  ;;  %v2055_v16 = vmul.f32 %v6219_v47, %v6217_v1 }
 0xa9d   :  { %v2054_v37 = vmul.f32 %v6221_v49, %v7978_v61  ;;  %v6223_v50 = vpop.eup %6222  ;;  %v8082_v61 = vld [vmem:[%s9569_s2 + $0x44] ss:$16 sps:$4 sm:$0xff]  }
 0xa9f   :  { %v8034_v4 = vadd.f32 %v2055_v16, %v2054_v37 }
 0xaa1   :  { %6224 = vtanh.f32 %v8034_v4 }
 0xaab   :  { %v6225_v53 = vpop.eup %6224 }
 0xaac   :  { %v8037_v54 = vmul.f32 %v6225_v53, %v6223_v50 }
 0xaae   :  { %9670 = vst [vmem:[#allocation16_spill] sm:$0xff] %v8037_v54  ;;  %v2072_v48 = vpack.c.bf16 %v8037_v54, %v8037_v54 }
 0xab0   :  { %2106 = vmatmul.mubr.bf16.vlgmr.msra.gmra.mrb[72].mxu0 %v2072_v48  ;;  %2147 = vmatmul.mubr.bf16.vlgmr.msra.gmra.mrb[72].mxu1 %v2072_v48 }
 0xab1   :  { %2198 = vmatpush1.bf16.msra.mxu0 %v8044_v23  ;;  %2239 = vmatpush1.bf16.msra.mxu1 %v8050_v57 }
 0xab2   :  { %2199 = vmatprep.subr.bf16.mxu0 %v8056_v55  ;;  %2240 = vmatprep.subr.bf16.mxu1 %v8062_v59 }
 0xab3   :  { %2229 = vmatprep.mubr.bf16.mxu0 %v9642_v26  ;;  %2270 = vmatprep.mubr.bf16.mxu1 %v9642_v26 }
 0xab5   :  { %2200 = vmatpush1.bf16.msra.mxu0 %v8070_v3  ;;  %2241 = vmatpush1.bf16.msra.mxu1 %v8076_v7 }
 0xab6   :  { %2201 = vmatprep.subr.bf16.mxu0 %v8082_v61  ;;  %2242 = vmatprep.subr.bf16.mxu1 %v8088_v31 }
 0xab9   :  { %2202 = vmatpush1.bf16.msra.mxu0 %v8094_v24  ;;  %2243 = vmatpush1.bf16.msra.mxu1 %v8100_v60 }
 0xaba   :  { %2203 = vmatprep.subr.bf16.mxu0 %v8106_v17  ;;  %2244 = vmatprep.subr.bf16.mxu1 %v8112_v33 }
 0xabd   :  { %2204 = vmatpush1.bf16.msra.mxu0 %v8118_v34  ;;  %2245 = vmatpush1.bf16.msra.mxu1 %v8124_v14 }
 0xabe   :  { %2205 = vmatprep.subr.bf16.mxu0 %v8130_v52  ;;  %2246 = vmatprep.subr.bf16.mxu1 %v8136_v28 }
 0xac1   :  { %2206 = vmatpush1.bf16.msra.mxu0 %v8142_v30  ;;  %2247 = vmatpush1.bf16.msra.mxu1 %v8148_v32 }
 0xac2   :  { %2207 = vmatprep.subr.bf16.mxu0 %v8154_v13  ;;  %2248 = vmatprep.subr.bf16.mxu1 %v8160_v35 }
 0xac5   :  { %2208 = vmatpush1.bf16.msra.mxu0 %v8166_v0  ;;  %2249 = vmatpush1.bf16.msra.mxu1 %v8172_v12 }
 0xac6   :  { %2209 = vmatprep.subr.bf16.mxu0 %v8178_v6  ;;  %2250 = vmatprep.subr.bf16.mxu1 %v7748_v20 }
 0xac9   :  { %2210 = vmatpush1.bf16.msra.mxu0 %v7754_v41  ;;  %2251 = vmatpush1.bf16.msra.mxu1 %v7760_v42 }
 0xaca   :  { %2211 = vmatprep.subr.bf16.mxu0 %v7766_v63  ;;  %2252 = vmatprep.subr.bf16.mxu1 %v7772_v44 }
 0xacd   :  { %2212 = vmatpush1.bf16.msra.mxu0 %v7778_v62  ;;  %2253 = vmatpush1.bf16.msra.mxu1 %v7784_v45 }
 0xace   :  { %2321 = vmatprep.subr.bf16.mxu0 %v8020_v15  ;;  %2362 = vmatprep.subr.bf16.mxu1 %v8026_v10 }
 0xb83   :  { %v2107_v11 = vpop.f32.mrb[72].mxu0  ;;  %v2148_v29 = vpop.f32.mrb[72].mxu1 }
 0xb84   :  { %v2155_v20 = vadd.f32 %v2107_v11, %v9671_v43  ;;  %v2157_v41 = vadd.f32 %v2148_v29, %v9672_v19  ;;  %v2109_v22 = vpop.f32.mrb[73].mxu0  ;;  %v2150_v42 = vpop.f32.mrb[73].mxu1 }
 0xb85   :  { %v2156_v63 = vadd.f32 %v2109_v22, %v9673_v38  ;;  %v2158_v44 = vadd.f32 %v2150_v42, %v9674_v39  ;;  %v2111_v40 = vpop.f32.mrb[74].mxu0  ;;  %v2152_v62 = vpop.f32.mrb[74].mxu1  ;;  %v8236_v38 = vld [vmem:[%s9569_s2 + $0xc0] ss:$16 sps:$4 sm:$0xff]   ;;  %v8248_v39 = vld [vmem:[%s9569_s2 + $0xe4] ss:$16 sps:$4 sm:$0xff]  }
 0xb86   :  { %v5681_v51 = vmul.f32 -1.442695, %v2155_v20  ;;  %v2112_v45 = vpop.f32.mrb[75].mxu0  ;;  %v2153_v9 = vpop.f32.mrb[75].mxu1  ;;  %v8260_v40 = vld [vmem:[%s9569_s2 + $0xe0] ss:$16 sps:$4 sm:$0xff]  }
 0xb87   :  { %v5682_v27 = vmul.f32 -1.442695, %v2156_v63  ;;  %v5683_v1 = vmul.f32 -1.442695, %v2158_v44  ;;  %v8242_v63 = vld [vmem:[%s9569_s2 + $0xc8] ss:$16 sps:$4 sm:$0xff]  }
 0xb88   :  { %6226 = vpow2.f32 %v5681_v51  ;;  %v8254_v44 = vld [vmem:[%s9569_s2 + $0xec] ss:$16 sps:$4 sm:$0xff]   ;;  %v8266_v62 = vld [vmem:[%s9569_s2 + $0xe8] ss:$16 sps:$4 sm:$0xff]   ;;  %v9676_v9 = vld [vmem:[#allocation47_spill] sm:$0xff] }
 0xb89   :  { %6228 = vpow2.f32 %v5682_v27 }
 0xb8a   :  { %6230 = vpow2.f32 %v5683_v1  ;;  %v9677_v1 = vld [vmem:[#allocation48_spill] sm:$0xff] }
 0xb8b   :  { %6232 = vtanh.f32 %v2157_v41 }
 0xb92   :  { %v6227_v47 = vpop.eup %6226 }
 0xb93   :  { %v6229_v49 = vpop.eup %6228  ;;  %v2162_v16 = vadd.f32 1.0, %v6227_v47 }
 0xb94   :  { %v2168_v36 = vadd.f32 1.0, %v6229_v49  ;;  %v6231_v37 = vpop.eup %6230 }
 0xb95   :  { %6234 = vrcp.f32 %v2162_v16  ;;  %v6233_v50 = vpop.eup %6232  ;;  %v2175_v29 = vadd.f32 1.0, %v6231_v37 }
 0xb96   :  { %6236 = vrcp.f32 %v2168_v36  ;;  %v9678_v36 = vld [vmem:[#allocation49_spill] sm:$0xff] }
 0xb97   :  { %6238 = vrcp.f32 %v2175_v29 }
 0xb9f   :  { %v6235_v53 = vpop.eup %6234 }
 0xba0   :  { %v6237_v48 = vpop.eup %6236  ;;  %v2179_v11 = vmul.f32 %v6235_v53, %v6233_v50  ;;  %v9679_v50 = vld [vmem:[#allocation50_spill] sm:$0xff] }
 0xba1   :  { %v2178_v43 = vmul.f32 %v6237_v48, %v8034_v4  ;;  %v6239_v19 = vpop.eup %6238  ;;  %v8230_v4 = vld [vmem:[%s9569_s2 + $0xcc] ss:$16 sps:$4 sm:$0xff]  }
 0xba3   :  { %v8195_v20 = vadd.f32 %v2179_v11, %v2178_v43 }
 0xba5   :  { %6240 = vtanh.f32 %v8195_v20 }
 0xbaf   :  { %v6241_v22 = vpop.eup %6240 }
 0xbb0   :  { %v8198_v42 = vmul.f32 %v6241_v22, %v6239_v19 }
 0xbb2   :  { %9675 = vst [vmem:[#allocation17_spill] sm:$0xff] %v8198_v42  ;;  %v2196_v41 = vpack.c.bf16 %v8198_v42, %v8198_v42 }
 0xbb4   :  { %2230 = vmatmul.mubr.bf16.vlgmr.msra.gmra.mrb[76].mxu0 %v2196_v41  ;;  %2271 = vmatmul.mubr.bf16.vlgmr.msra.gmra.mrb[76].mxu1 %v2196_v41 }
 0xbb5   :  { %2322 = vmatpush1.bf16.msra.mxu0 %v8044_v23  ;;  %2363 = vmatpush1.bf16.msra.mxu1 %v8050_v57 }
 0xbb6   :  { %2323 = vmatprep.subr.bf16.mxu0 %v8056_v55  ;;  %2364 = vmatprep.subr.bf16.mxu1 %v8062_v59 }
 0xbb7   :  { %2353 = vmatprep.mubr.bf16.mxu0 %v9642_v26  ;;  %2394 = vmatprep.mubr.bf16.mxu1 %v9642_v26 }
 0xbb9   :  { %2324 = vmatpush1.bf16.msra.mxu0 %v8070_v3  ;;  %2365 = vmatpush1.bf16.msra.mxu1 %v8076_v7 }
 0xbba   :  { %2325 = vmatprep.subr.bf16.mxu0 %v8082_v61  ;;  %2366 = vmatprep.subr.bf16.mxu1 %v8088_v31 }
 0xbbd   :  { %2326 = vmatpush1.bf16.msra.mxu0 %v8094_v24  ;;  %2367 = vmatpush1.bf16.msra.mxu1 %v8100_v60 }
 0xbbe   :  { %2327 = vmatprep.subr.bf16.mxu0 %v8106_v17  ;;  %2368 = vmatprep.subr.bf16.mxu1 %v8112_v33 }
 0xbc1   :  { %2328 = vmatpush1.bf16.msra.mxu0 %v8118_v34  ;;  %2369 = vmatpush1.bf16.msra.mxu1 %v8124_v14 }
 0xbc2   :  { %2329 = vmatprep.subr.bf16.mxu0 %v8130_v52  ;;  %2370 = vmatprep.subr.bf16.mxu1 %v8136_v28 }
 0xbc5   :  { %2330 = vmatpush1.bf16.msra.mxu0 %v8142_v30  ;;  %2371 = vmatpush1.bf16.msra.mxu1 %v8148_v32 }
 0xbc6   :  { %2331 = vmatprep.subr.bf16.mxu0 %v8154_v13  ;;  %2372 = vmatprep.subr.bf16.mxu1 %v8160_v35 }
 0xbc9   :  { %2332 = vmatpush1.bf16.msra.mxu0 %v8166_v0  ;;  %2373 = vmatpush1.bf16.msra.mxu1 %v8172_v12 }
 0xbca   :  { %2333 = vmatprep.subr.bf16.mxu0 %v8178_v6  ;;  %2374 = vmatprep.subr.bf16.mxu1 %v8230_v4 }
 0xbcd   :  { %2334 = vmatpush1.bf16.msra.mxu0 %v8236_v38  ;;  %2375 = vmatpush1.bf16.msra.mxu1 %v8242_v63 }
 0xbce   :  { %2335 = vmatprep.subr.bf16.mxu0 %v8248_v39  ;;  %2376 = vmatprep.subr.bf16.mxu1 %v8254_v44 }
 0xbd1   :  { %2336 = vmatpush1.bf16.msra.mxu0 %v8260_v40  ;;  %2377 = vmatpush1.bf16.msra.mxu1 %v8266_v62 }
 0xbd2   :  { %2445 = vmatprep.subr.bf16.mxu0 %v8020_v15  ;;  %2486 = vmatprep.subr.bf16.mxu1 %v8026_v10 }
 0xc87   :  { %v2231_v51 = vpop.f32.mrb[76].mxu0  ;;  %v2272_v45 = vpop.f32.mrb[76].mxu1 }
 0xc88   :  { %v2279_v27 = vadd.f32 %v2231_v51, %v9676_v9  ;;  %v2281_v47 = vadd.f32 %v2272_v45, %v9677_v1  ;;  %v2233_v49 = vpop.f32.mrb[77].mxu0  ;;  %v2274_v16 = vpop.f32.mrb[77].mxu1 }
 0xc89   :  { %v2280_v37 = vadd.f32 %v2233_v49, %v9678_v36  ;;  %v2282_v53 = vadd.f32 %v2274_v16, %v9679_v50  ;;  %v2235_v48 = vpop.f32.mrb[78].mxu0  ;;  %v2276_v11 = vpop.f32.mrb[78].mxu1 }
 0xc8a   :  { %v5684_v29 = vmul.f32 -1.442695, %v2279_v27  ;;  %v2236_v43 = vpop.f32.mrb[79].mxu0  ;;  %v2277_v19 = vpop.f32.mrb[79].mxu1  ;;  %v9681_v11 = vld [vmem:[#allocation51_spill] sm:$0xff] }
 0xc8b   :  { %v5685_v22 = vmul.f32 -1.442695, %v2280_v37  ;;  %v5686_v41 = vmul.f32 -1.442695, %v2282_v53  ;;  %v9682_v43 = vld [vmem:[#allocation52_spill] sm:$0xff] }
 0xc8c   :  { %6242 = vpow2.f32 %v5684_v29 }
 0xc8d   :  { %6244 = vpow2.f32 %v5685_v22 }
 0xc8e   :  { %6246 = vpow2.f32 %v5686_v41 }
 0xc8f   :  { %6248 = vtanh.f32 %v2281_v47 }
 0xc96   :  { %v6243_v42 = vpop.eup %6242 }
 0xc97   :  { %v6245_v54 = vpop.eup %6244  ;;  %v2286_v51 = vadd.f32 1.0, %v6243_v42 }
 0xc98   :  { %v2292_v45 = vadd.f32 1.0, %v6245_v54  ;;  %v6247_v9 = vpop.eup %6246 }
 0xc99   :  { %6250 = vrcp.f32 %v2286_v51  ;;  %v6249_v1 = vpop.eup %6248  ;;  %v2299_v27 = vadd.f32 1.0, %v6247_v9  ;;  %v9683_v51 = vld [vmem:[#allocation53_spill] sm:$0xff]  ;;  %v9684_v9 = vld [vmem:[#allocation54_spill] sm:$0xff] }
 0xc9a   :  { %6252 = vrcp.f32 %v2292_v45 }
 0xc9b   :  { %6254 = vrcp.f32 %v2299_v27 }
 0xca3   :  { %v6251_v49 = vpop.eup %6250 }
 0xca4   :  { %v6253_v16 = vpop.eup %6252  ;;  %v2303_v36 = vmul.f32 %v6251_v49, %v6249_v1 }
 0xca5   :  { %v2302_v50 = vmul.f32 %v6253_v16, %v8195_v20  ;;  %v6255_v53 = vpop.eup %6254 }
 0xca7   :  { %v8276_v37 = vadd.f32 %v2303_v36, %v2302_v50 }
 0xca9   :  { %6256 = vtanh.f32 %v8276_v37 }
 0xcb3   :  { %v6257_v42 = vpop.eup %6256 }
 0xcb4   :  { %v8279_v48 = vmul.f32 %v6257_v42, %v6255_v53 }
 0xcb6   :  { %9680 = vst [vmem:[#allocation18_spill] sm:$0xff] %v8279_v48  ;;  %v2320_v54 = vpack.c.bf16 %v8279_v48, %v8279_v48 }
 0xcb8   :  { %2354 = vmatmul.mubr.bf16.vlgmr.msra.gmra.mrb[80].mxu0 %v2320_v54  ;;  %2395 = vmatmul.mubr.bf16.vlgmr.msra.gmra.mrb[80].mxu1 %v2320_v54 }
 0xcb9   :  { %2446 = vmatpush1.bf16.msra.mxu0 %v8044_v23  ;;  %2487 = vmatpush1.bf16.msra.mxu1 %v8050_v57 }
 0xcba   :  { %2447 = vmatprep.subr.bf16.mxu0 %v8056_v55  ;;  %2488 = vmatprep.subr.bf16.mxu1 %v8062_v59 }
 0xcbb   :  { %2477 = vmatprep.mubr.bf16.mxu0 %v9642_v26  ;;  %2518 = vmatprep.mubr.bf16.mxu1 %v9642_v26 }
 0xcbd   :  { %2448 = vmatpush1.bf16.msra.mxu0 %v8070_v3  ;;  %2489 = vmatpush1.bf16.msra.mxu1 %v8076_v7 }
 0xcbe   :  { %2449 = vmatprep.subr.bf16.mxu0 %v8082_v61  ;;  %2490 = vmatprep.subr.bf16.mxu1 %v8088_v31 }
 0xcc1   :  { %2450 = vmatpush1.bf16.msra.mxu0 %v8094_v24  ;;  %2491 = vmatpush1.bf16.msra.mxu1 %v8100_v60 }
 0xcc2   :  { %2451 = vmatprep.subr.bf16.mxu0 %v8106_v17  ;;  %2492 = vmatprep.subr.bf16.mxu1 %v8112_v33 }
 0xcc5   :  { %2452 = vmatpush1.bf16.msra.mxu0 %v8118_v34  ;;  %2493 = vmatpush1.bf16.msra.mxu1 %v8124_v14 }
 0xcc6   :  { %2453 = vmatprep.subr.bf16.mxu0 %v8130_v52  ;;  %2494 = vmatprep.subr.bf16.mxu1 %v8136_v28 }
 0xcc9   :  { %2454 = vmatpush1.bf16.msra.mxu0 %v8142_v30  ;;  %2495 = vmatpush1.bf16.msra.mxu1 %v8148_v32 }
 0xcca   :  { %2455 = vmatprep.subr.bf16.mxu0 %v8154_v13  ;;  %2496 = vmatprep.subr.bf16.mxu1 %v8160_v35 }
 0xccd   :  { %2456 = vmatpush1.bf16.msra.mxu0 %v8166_v0  ;;  %2497 = vmatpush1.bf16.msra.mxu1 %v8172_v12 }
 0xcce   :  { %2457 = vmatprep.subr.bf16.mxu0 %v8178_v6  ;;  %2498 = vmatprep.subr.bf16.mxu1 %v8230_v4 }
 0xcd1   :  { %2458 = vmatpush1.bf16.msra.mxu0 %v8236_v38  ;;  %2499 = vmatpush1.bf16.msra.mxu1 %v8242_v63 }
 0xcd2   :  { %2459 = vmatprep.subr.bf16.mxu0 %v8248_v39  ;;  %2500 = vmatprep.subr.bf16.mxu1 %v8254_v44 }
 0xcd5   :  { %2460 = vmatpush1.bf16.msra.mxu0 %v8260_v40  ;;  %2501 = vmatpush1.bf16.msra.mxu1 %v8266_v62 }
 0xcd6   :  { %2569 = vmatprep.subr.bf16.mxu0 %v8020_v15  ;;  %2610 = vmatprep.subr.bf16.mxu1 %v8026_v10 }
 0xd8b   :  { %v2355_v20 = vpop.f32.mrb[80].mxu0  ;;  %v2396_v47 = vpop.f32.mrb[80].mxu1 }
 0xd8c   :  { %v2403_v29 = vadd.f32 %v2355_v20, %v9681_v11  ;;  %v2405_v19 = vadd.f32 %v2396_v47, %v9682_v43  ;;  %v2357_v22 = vpop.f32.mrb[81].mxu0  ;;  %v2398_v41 = vpop.f32.mrb[81].mxu1 }
 0xd8d   :  { %v2404_v45 = vadd.f32 %v2357_v22, %v9683_v51  ;;  %v2406_v1 = vadd.f32 %v2398_v41, %v9684_v9  ;;  %v2359_v49 = vpop.f32.mrb[82].mxu0  ;;  %v2400_v16 = vpop.f32.mrb[82].mxu1 }
 0xd8e   :  { %v5687_v36 = vmul.f32 -1.442695, %v2403_v29  ;;  %v2360_v27 = vpop.f32.mrb[83].mxu0  ;;  %v2401_v50 = vpop.f32.mrb[83].mxu1 }
 0xd8f   :  { %v5688_v53 = vmul.f32 -1.442695, %v2404_v45  ;;  %v5689_v42 = vmul.f32 -1.442695, %v2406_v1  ;;  %v9686_v50 = vld [vmem:[#allocation56_spill] sm:$0xff] }
 0xd90   :  { %6258 = vpow2.f32 %v5687_v36  ;;  %v9685_v36 = vld [vmem:[#allocation55_spill] sm:$0xff] }
 0xd91   :  { %6260 = vpow2.f32 %v5688_v53 }
 0xd92   :  { %6262 = vpow2.f32 %v5689_v42 }
 0xd93   :  { %6264 = vtanh.f32 %v2405_v19 }
 0xd9a   :  { %v6259_v54 = vpop.eup %6258 }
 0xd9b   :  { %v6261_v48 = vpop.eup %6260  ;;  %v2410_v20 = vadd.f32 1.0, %v6259_v54 }
 0xd9c   :  { %v2416_v47 = vadd.f32 1.0, %v6261_v48  ;;  %v6263_v11 = vpop.eup %6262 }
 0xd9d   :  { %6266 = vrcp.f32 %v2410_v20  ;;  %v6265_v43 = vpop.eup %6264  ;;  %v2423_v29 = vadd.f32 1.0, %v6263_v11  ;;  %v9687_v20 = vld [vmem:[#allocation57_spill] sm:$0xff]  ;;  %v9688_v11 = vld [vmem:[#allocation58_spill] sm:$0xff] }
 0xd9e   :  { %6268 = vrcp.f32 %v2416_v47 }
 0xd9f   :  { %6270 = vrcp.f32 %v2423_v29 }
 0xda7   :  { %v6267_v22 = vpop.eup %6266 }
 0xda8   :  { %v6269_v41 = vpop.eup %6268  ;;  %v2427_v51 = vmul.f32 %v6267_v22, %v6265_v43 }
 0xda9   :  { %v2426_v9 = vmul.f32 %v6269_v41, %v8276_v37  ;;  %v6271_v1 = vpop.eup %6270 }
 0xdab   :  { %v8322_v45 = vadd.f32 %v2427_v51, %v2426_v9 }
 0xdad   :  { %6272 = vtanh.f32 %v8322_v45 }
 0xdb7   :  { %v6273_v49 = vpop.eup %6272 }
 0xdb8   :  { %v8325_v16 = vmul.f32 %v6273_v49, %v6271_v1 }
 0xdba   :  { %v2444_v48 = vpack.c.bf16 %v8325_v16, %v8325_v16 }
 0xdbc   :  { %2478 = vmatmul.mubr.bf16.vlgmr.msra.gmra.mrb[84].mxu0 %v2444_v48  ;;  %2519 = vmatmul.mubr.bf16.vlgmr.msra.gmra.mrb[84].mxu1 %v2444_v48 }
 0xdbd   :  { %2570 = vmatpush1.bf16.msra.mxu0 %v8044_v23  ;;  %2611 = vmatpush1.bf16.msra.mxu1 %v8050_v57 }
 0xdbe   :  { %2571 = vmatprep.subr.bf16.mxu0 %v8056_v55  ;;  %2612 = vmatprep.subr.bf16.mxu1 %v8062_v59 }
 0xdbf   :  { %2601 = vmatprep.mubr.bf16.mxu0 %v9642_v26  ;;  %2642 = vmatprep.mubr.bf16.mxu1 %v9642_v26 }
 0xdc1   :  { %2572 = vmatpush1.bf16.msra.mxu0 %v8070_v3  ;;  %2613 = vmatpush1.bf16.msra.mxu1 %v8076_v7 }
 0xdc2   :  { %2573 = vmatprep.subr.bf16.mxu0 %v8082_v61  ;;  %2614 = vmatprep.subr.bf16.mxu1 %v8088_v31 }
 0xdc5   :  { %2574 = vmatpush1.bf16.msra.mxu0 %v8094_v24  ;;  %2615 = vmatpush1.bf16.msra.mxu1 %v8100_v60 }
 0xdc6   :  { %2575 = vmatprep.subr.bf16.mxu0 %v8106_v17  ;;  %2616 = vmatprep.subr.bf16.mxu1 %v8112_v33 }
 0xdc9   :  { %2576 = vmatpush1.bf16.msra.mxu0 %v8118_v34  ;;  %2617 = vmatpush1.bf16.msra.mxu1 %v8124_v14 }
 0xdca   :  { %2577 = vmatprep.subr.bf16.mxu0 %v8130_v52  ;;  %2618 = vmatprep.subr.bf16.mxu1 %v8136_v28 }
 0xdcd   :  { %2578 = vmatpush1.bf16.msra.mxu0 %v8142_v30  ;;  %2619 = vmatpush1.bf16.msra.mxu1 %v8148_v32 }
 0xdce   :  { %2579 = vmatprep.subr.bf16.mxu0 %v8154_v13  ;;  %2620 = vmatprep.subr.bf16.mxu1 %v8160_v35 }
 0xdd1   :  { %2580 = vmatpush1.bf16.msra.mxu0 %v8166_v0  ;;  %2621 = vmatpush1.bf16.msra.mxu1 %v8172_v12 }
 0xdd2   :  { %2581 = vmatprep.subr.bf16.mxu0 %v8178_v6  ;;  %2622 = vmatprep.subr.bf16.mxu1 %v8230_v4 }
 0xdd5   :  { %2582 = vmatpush1.bf16.msra.mxu0 %v8236_v38  ;;  %2623 = vmatpush1.bf16.msra.mxu1 %v8242_v63 }
 0xdd6   :  { %2583 = vmatprep.subr.bf16.mxu0 %v8248_v39  ;;  %2624 = vmatprep.subr.bf16.mxu1 %v8254_v44 }
 0xdd9   :  { %2584 = vmatpush1.bf16.msra.mxu0 %v8260_v40  ;;  %2625 = vmatpush1.bf16.msra.mxu1 %v8266_v62 }
 0xdda   :  { %2693 = vmatprep.subr.bf16.mxu0 %v8020_v15  ;;  %2734 = vmatprep.subr.bf16.mxu1 %v8026_v10 }
 0xe8f   :  { %v2479_v37 = vpop.f32.mrb[84].mxu0  ;;  %v2520_v19 = vpop.f32.mrb[84].mxu1 }
 0xe90   :  { %v2527_v27 = vadd.f32 %v2479_v37, %v9685_v36  ;;  %v2529_v53 = vadd.f32 %v2520_v19, %v9686_v50  ;;  %v2481_v42 = vpop.f32.mrb[85].mxu0  ;;  %v2522_v54 = vpop.f32.mrb[85].mxu1 }
 0xe91   :  { %v2528_v47 = vadd.f32 %v2481_v42, %v9687_v20  ;;  %v2530_v43 = vadd.f32 %v2522_v54, %v9688_v11  ;;  %v2483_v22 = vpop.f32.mrb[86].mxu0  ;;  %v2524_v41 = vpop.f32.mrb[86].mxu1 }
 0xe92   :  { %v5690_v51 = vmul.f32 -1.442695, %v2527_v27  ;;  %v2484_v29 = vpop.f32.mrb[87].mxu0  ;;  %v2525_v9 = vpop.f32.mrb[87].mxu1 }
 0xe93   :  { %v5691_v15 = vmul.f32 -1.442695, %v2528_v47  ;;  %v5692_v10 = vmul.f32 -1.442695, %v2530_v43 }
 0xe94   :  { %6274 = vpow2.f32 %v5690_v51 }
 0xe95   :  { %6276 = vpow2.f32 %v5691_v15 }
 0xe96   :  { %6278 = vpow2.f32 %v5692_v10  ;;  %v5962_v10 = vld [vmem:[#allocation6] ss:$16 sps:$4 sm:$0xff]  }
 0xe97   :  { %6280 = vtanh.f32 %v2529_v53 }
 0xe9e   :  { %v6275_v1 = vpop.eup %6274 }
 0xe9f   :  { %v6277_v49 = vpop.eup %6276  ;;  %v2534_v48 = vadd.f32 1.0, %v6275_v1  ;;  %v5965_v1 = vld [vmem:[#allocation6 + $0x8] ss:$16 sps:$4 sm:$0xff]  }
 0xea0   :  { %v2540_v37 = vadd.f32 1.0, %v6277_v49  ;;  %v6279_v19 = vpop.eup %6278 }
 0xea1   :  { %6282 = vrcp.f32 %v2534_v48  ;;  %v6281_v36 = vpop.eup %6280  ;;  %v2547_v27 = vadd.f32 1.0, %v6279_v19  ;;  %v5970_v48 = vld [vmem:[#allocation6 + $0x24] ss:$16 sps:$4 sm:$0xff]   ;;  %v5968_v19 = vld [vmem:[#allocation6 + $0x20] ss:$16 sps:$4 sm:$0xff]  }
 0xea2   :  { %6284 = vrcp.f32 %v2540_v37  ;;  %v5973_v37 = vld [vmem:[#allocation6 + $0x2c] ss:$16 sps:$4 sm:$0xff]  }
 0xea3   :  { %6286 = vrcp.f32 %v2547_v27  ;;  %v5977_v27 = vld [vmem:[#allocation6 + $0x48] ss:$16 sps:$4 sm:$0xff]  }
 0xeab   :  { %v6283_v50 = vpop.eup %6282 }
 0xeac   :  { %v6285_v42 = vpop.eup %6284  ;;  %v2551_v54 = vmul.f32 %v6283_v50, %v6281_v36  ;;  %v5971_v36 = vld [vmem:[#allocation6 + $0x28] ss:$16 sps:$4 sm:$0xff]   ;;  %v5976_v50 = vld [vmem:[#allocation6 + $0x44] ss:$16 sps:$4 sm:$0xff]  }
 0xead   :  { %v2550_v20 = vmul.f32 %v6285_v42, %v8322_v45  ;;  %v6287_v11 = vpop.eup %6286  ;;  %v5979_v42 = vld [vmem:[#allocation6 + $0x4c] ss:$16 sps:$4 sm:$0xff]  }
 0xeaf   :  { %v8368_v47 = vadd.f32 %v2551_v54, %v2550_v20  ;;  %v5974_v54 = vld [vmem:[#allocation6 + $0x40] ss:$16 sps:$4 sm:$0xff]   ;;  %v5982_v20 = vld [vmem:[#allocation6 + $0x64] ss:$16 sps:$4 sm:$0xff]  }
 0xeb1   :  { %6288 = vtanh.f32 %v8368_v47 }
 0xebb   :  { %v6289_v43 = vpop.eup %6288 }
 0xebc   :  { %v8371_v22 = vmul.f32 %v6289_v43, %v6287_v11  ;;  %v5980_v11 = vld [vmem:[#allocation6 + $0x60] ss:$16 sps:$4 sm:$0xff]   ;;  %v5983_v43 = vld [vmem:[#allocation6 + $0x68] ss:$16 sps:$4 sm:$0xff]  }
 0xebe   :  { %v2568_v53 = vpack.c.bf16 %v8371_v22, %v8371_v22 }
 0xec0   :  { %2602 = vmatmul.mubr.bf16.vlgmr.msra.gmra.mrb[88].mxu0 %v2568_v53  ;;  %2643 = vmatmul.mubr.bf16.vlgmr.msra.gmra.mrb[88].mxu1 %v2568_v53  ;;  %v5988_v53 = vld [vmem:[#allocation6 + $0x84] ss:$16 sps:$4 sm:$0xff]  }
 0xec1   :  { %2694 = vmatpush1.bf16.msra.mxu0 %v8044_v23  ;;  %2735 = vmatpush1.bf16.msra.mxu1 %v8050_v57  ;;  %v5964_v23 = vld [vmem:[#allocation6 + $0x4] ss:$16 sps:$4 sm:$0xff]   ;;  %v5967_v57 = vld [vmem:[#allocation6 + $0xc] ss:$16 sps:$4 sm:$0xff]  }
 0xec2   :  { %2695 = vmatprep.subr.bf16.mxu0 %v8056_v55  ;;  %2736 = vmatprep.subr.bf16.mxu1 %v8062_v59 }
 0xec3   :  { %2725 = vmatprep.mubr.bf16.mxu0 %v9642_v26  ;;  %2766 = vmatprep.mubr.bf16.mxu1 %v9642_v26 }
 0xec5   :  { %2696 = vmatpush1.bf16.msra.mxu0 %v8070_v3  ;;  %2737 = vmatpush1.bf16.msra.mxu1 %v8076_v7  ;;  %v9689_v3 = vld [vmem:[#allocation59_spill] sm:$0xff] }
 0xec6   :  { %2697 = vmatprep.subr.bf16.mxu0 %v8082_v61  ;;  %2738 = vmatprep.subr.bf16.mxu1 %v8088_v31  ;;  %v9690_v61 = vld [vmem:[#allocation60_spill] sm:$0xff] }
 0xec9   :  { %2698 = vmatpush1.bf16.msra.mxu0 %v8094_v24  ;;  %2739 = vmatpush1.bf16.msra.mxu1 %v8100_v60 }
 0xeca   :  { %2699 = vmatprep.subr.bf16.mxu0 %v8106_v17  ;;  %2740 = vmatprep.subr.bf16.mxu1 %v8112_v33  ;;  %v9691_v17 = vld [vmem:[#allocation61_spill] sm:$0xff] }
 0xecd   :  { %2700 = vmatpush1.bf16.msra.mxu0 %v8118_v34  ;;  %2741 = vmatpush1.bf16.msra.mxu1 %v8124_v14  ;;  %v9692_v34 = vld [vmem:[#allocation62_spill] sm:$0xff] }
 0xece   :  { %2701 = vmatprep.subr.bf16.mxu0 %v8130_v52  ;;  %2742 = vmatprep.subr.bf16.mxu1 %v8136_v28 }
 0xed1   :  { %2702 = vmatpush1.bf16.msra.mxu0 %v8142_v30  ;;  %2743 = vmatpush1.bf16.msra.mxu1 %v8148_v32 }
 0xed2   :  { %2703 = vmatprep.subr.bf16.mxu0 %v8154_v13  ;;  %2744 = vmatprep.subr.bf16.mxu1 %v8160_v35 }
 0xed5   :  { %2704 = vmatpush1.bf16.msra.mxu0 %v8166_v0  ;;  %2745 = vmatpush1.bf16.msra.mxu1 %v8172_v12 }
 0xed6   :  { %2705 = vmatprep.subr.bf16.mxu0 %v8178_v6  ;;  %2746 = vmatprep.subr.bf16.mxu1 %v8230_v4 }
 0xed9   :  { %2706 = vmatpush1.bf16.msra.mxu0 %v8236_v38  ;;  %2747 = vmatpush1.bf16.msra.mxu1 %v8242_v63 }
 0xeda   :  { %2707 = vmatprep.subr.bf16.mxu0 %v8248_v39  ;;  %2748 = vmatprep.subr.bf16.mxu1 %v8254_v44 }
 0xedd   :  { %2708 = vmatpush1.bf16.msra.mxu0 %v8260_v40  ;;  %2749 = vmatpush1.bf16.msra.mxu1 %v8266_v62 }
 0xede   :  { %3045 = vmatprep.subr.bf16.mxu0 %v5964_v23  ;;  %3158 = vmatprep.subr.bf16.mxu1 %v5967_v57  ;;  %v5991_v23 = vld [vmem:[#allocation6 + $0x8c] ss:$16 sps:$4 sm:$0xff]   ;;  %v5986_v57 = vld [vmem:[#allocation6 + $0x80] ss:$16 sps:$4 sm:$0xff]  }
 0xf93   :  { %v2603_v55 = vpop.f32.mrb[88].mxu0  ;;  %v2644_v59 = vpop.f32.mrb[88].mxu1 }
 0xf94   :  { %v2651_v7 = vadd.f32 %v2603_v55, %v9689_v3  ;;  %v2653_v31 = vadd.f32 %v2644_v59, %v9690_v61  ;;  %v2605_v24 = vpop.f32.mrb[89].mxu0  ;;  %v2646_v60 = vpop.f32.mrb[89].mxu1  ;;  %v5989_v55 = vld [vmem:[#allocation6 + $0x88] ss:$16 sps:$4 sm:$0xff]   ;;  %v5994_v59 = vld [vmem:[#allocation6 + $0xa4] ss:$16 sps:$4 sm:$0xff]  }
 0xf95   :  { %v2652_v33 = vadd.f32 %v2605_v24, %v9691_v17  ;;  %v2654_v14 = vadd.f32 %v2646_v60, %v9692_v34  ;;  %v2607_v52 = vpop.f32.mrb[90].mxu0  ;;  %v2648_v28 = vpop.f32.mrb[90].mxu1  ;;  %v5997_v3 = vld [vmem:[#allocation6 + $0xac] ss:$16 sps:$4 sm:$0xff]   ;;  %v5995_v61 = vld [vmem:[#allocation6 + $0xa8] ss:$16 sps:$4 sm:$0xff]  }
 0xf96   :  { %v5693_v30 = vmul.f32 -1.442695, %v2651_v7  ;;  %v2608_v32 = vpop.f32.mrb[91].mxu0  ;;  %v2649_v13 = vpop.f32.mrb[91].mxu1  ;;  %v5992_v7 = vld [vmem:[#allocation6 + $0xa0] ss:$16 sps:$4 sm:$0xff]  }
 0xf97   :  { %v5694_v35 = vmul.f32 -1.442695, %v2652_v33  ;;  %v5695_v0 = vmul.f32 -1.442695, %v2654_v14  ;;  %v6003_v24 = vld [vmem:[#allocation6 + $0xcc] ss:$16 sps:$4 sm:$0xff]   ;;  %v2824_v13 = vpack.c.bf16 %v7716_v25, %v7555_v21 }
 0xf98   :  { %6290 = vpow2.f32 %v5693_v30  ;;  %v5998_v60 = vld [vmem:[#allocation6 + $0xc0] ss:$16 sps:$4 sm:$0xff]   ;;  %v6001_v17 = vld [vmem:[#allocation6 + $0xc8] ss:$16 sps:$4 sm:$0xff]   ;;  %v6006_v33 = vld [vmem:[#allocation6 + $0xe4] ss:$16 sps:$4 sm:$0xff]   ;;  %v2823_v30 = vpack.c.bf16 %v7499_v18, %v7453_v8  ;;  %v2825_v8 = vpack.c.bf16 %v7843_v58, %v7797_v5  ;;  %v2826_v18 = vpack.c.bf16 %v7935_v56, %v7889_v46 }
 0xf99   :  { %6292 = vpow2.f32 %v5694_v35  ;;  %v6009_v34 = vld [vmem:[#allocation6 + $0xec] ss:$16 sps:$4 sm:$0xff]   ;;  %v6004_v14 = vld [vmem:[#allocation6 + $0xe0] ss:$16 sps:$4 sm:$0xff]   ;;  %v6007_v52 = vld [vmem:[#allocation6 + $0xe8] ss:$16 sps:$4 sm:$0xff]   ;;  %v2829_v46 = vpack.c.bf16 %v8371_v22, %v8325_v16 }
 0xf9a   :  { %6294 = vpow2.f32 %v5695_v0  ;;  %v8421_v28 = vld [vmem:[#allocation9 + $0x4] ss:$16 sps:$4 sm:$0xff]   ;;  %v8426_v32 = vld [vmem:[#allocation9] ss:$16 sps:$4 sm:$0xff]   ;;  %v9694_v5 = vld [vmem:[#allocation17_spill] sm:$0xff] }
 0xf9b   :  { %6296 = vtanh.f32 %v2653_v31  ;;  %v6000_v31 = vld [vmem:[#allocation6 + $0xc4] ss:$16 sps:$4 sm:$0xff]   ;;  %v8455_v56 = vld [vmem:[#allocation9 + $0xc] ss:$16 sps:$4 sm:$0xff]   ;;  %v8467_v16 = vld [vmem:[#allocation9 + $0x28] ss:$16 sps:$4 sm:$0xff]  }
 0xf9c   :  { %v9693_v21 = vld [vmem:[#allocation16_spill] sm:$0xff]  ;;  %v9695_v58 = vld [vmem:[#allocation18_spill] sm:$0xff] }
 0xf9d   :  { %v2827_v25 = vpack.c.bf16 %v9693_v21, %v7981_v2  ;;  %v2828_v35 = vpack.c.bf16 %v9695_v58, %v9694_v5  ;;  %v8457_v2 = vld [vmem:[#allocation9 + $0x8] ss:$16 sps:$4 sm:$0xff]   ;;  %v8461_v0 = vld [vmem:[#allocation9 + $0x24] ss:$16 sps:$4 sm:$0xff]  }
 0xf9e   :  { %v8470_v22 = vld [vmem:[#allocation9 + $0x44] ss:$16 sps:$4 sm:$0xff]  }
 0xfa2   :  { %v6291_v12 = vpop.eup %6290 }
 0xfa3   :  { %v6293_v6 = vpop.eup %6292  ;;  %v2658_v4 = vadd.f32 1.0, %v6291_v12  ;;  %v8463_v12 = vld [vmem:[#allocation9 + $0x2c] ss:$16 sps:$4 sm:$0xff]  }
 0xfa4   :  { %v2664_v38 = vadd.f32 1.0, %v6293_v6  ;;  %v6295_v63 = vpop.eup %6294  ;;  %v8465_v6 = vld [vmem:[#allocation9 + $0x20] ss:$16 sps:$4 sm:$0xff]  }
 0xfa5   :  { %6298 = vrcp.f32 %v2658_v4  ;;  %v6297_v39 = vpop.eup %6296  ;;  %v2671_v45 = vadd.f32 1.0, %v6295_v63  ;;  %v8474_v4 = vld [vmem:[#allocation9 + $0x40] ss:$16 sps:$4 sm:$0xff]   ;;  %v8480_v63 = vld [vmem:[#allocation9 + $0x64] ss:$16 sps:$4 sm:$0xff]  }
 0xfa6   :  { %6300 = vrcp.f32 %v2664_v38  ;;  %v8477_v38 = vld [vmem:[#allocation9 + $0x4c] ss:$16 sps:$4 sm:$0xff]  }
 0xfa7   :  { %6302 = vrcp.f32 %v2671_v45  ;;  %v8494_v45 = vld [vmem:[#allocation9 + $0x84] ss:$16 sps:$4 sm:$0xff]  }
 0xfaf   :  { %v6299_v44 = vpop.eup %6298 }
 0xfb0   :  { %v6301_v40 = vpop.eup %6300  ;;  %v2675_v62 = vmul.f32 %v6299_v44, %v6297_v39  ;;  %v8482_v39 = vld [vmem:[#allocation9 + $0x48] ss:$16 sps:$4 sm:$0xff]   ;;  %v8485_v44 = vld [vmem:[#allocation9 + $0x6c] ss:$16 sps:$4 sm:$0xff]  }
 0xfb1   :  { %v2674_v41 = vmul.f32 %v6301_v40, %v8368_v47  ;;  %v6303_v29 = vpop.eup %6302  ;;  %v5985_v47 = vld [vmem:[#allocation6 + $0x6c] ss:$16 sps:$4 sm:$0xff]   ;;  %v8488_v40 = vld [vmem:[#allocation9 + $0x60] ss:$16 sps:$4 sm:$0xff]  }
 0xfb3   :  { %v8412_v51 = vadd.f32 %v2675_v62, %v2674_v41  ;;  %v8491_v62 = vld [vmem:[#allocation9 + $0x68] ss:$16 sps:$4 sm:$0xff]   ;;  %v8498_v41 = vld [vmem:[#allocation9 + $0x80] ss:$16 sps:$4 sm:$0xff]  }
 0xfb5   :  { %6304 = vtanh.f32 %v8412_v51 }
 0xfbf   :  { %v6305_v9 = vpop.eup %6304 }
 0xfc0   :  { %v8415_v15 = vmul.f32 %v6305_v9, %v6303_v29  ;;  %v8502_v29 = vld [vmem:[#allocation9 + $0xa4] ss:$16 sps:$4 sm:$0xff]   ;;  %v8504_v9 = vld [vmem:[#allocation9 + $0x8c] ss:$16 sps:$4 sm:$0xff]  }
 0xfc2   :  { %v2692_v49 = vpack.c.bf16 %v8415_v15, %v8415_v15 }
 0xfc4   :  { %2726 = vmatmul.mubr.bf16.vlgmr.msra.gmra.mrb[92].mxu0 %v2692_v49  ;;  %2767 = vmatmul.mubr.bf16.vlgmr.msra.gmra.mrb[92].mxu1 %v2692_v49  ;;  %v8514_v49 = vld [vmem:[#allocation9 + $0xc4] ss:$16 sps:$4 sm:$0xff]  }
 0xfc5   :  { %3046 = vmatpush1.bf16.msra.mxu0 %v5962_v10  ;;  %3159 = vmatpush1.bf16.msra.mxu1 %v5965_v1  ;;  %v8506_v10 = vld [vmem:[#allocation9 + $0x88] ss:$16 sps:$4 sm:$0xff]   ;;  %v8510_v1 = vld [vmem:[#allocation9 + $0xa0] ss:$16 sps:$4 sm:$0xff]  }
 0xfc6   :  { %3047 = vmatprep.subr.bf16.mxu0 %v5970_v48  ;;  %3160 = vmatprep.subr.bf16.mxu1 %v5973_v37  ;;  %v8516_v48 = vld [vmem:[#allocation9 + $0xac] ss:$16 sps:$4 sm:$0xff]   ;;  %v8518_v37 = vld [vmem:[#allocation9 + $0xa8] ss:$16 sps:$4 sm:$0xff]  }
 0xfc7   :  { %3077 = vmatprep.mubr.bf16.mxu0 %v9642_v26  ;;  %3190 = vmatprep.mubr.bf16.mxu1 %v9642_v26 }
 0xfc9   :  { %3048 = vmatpush1.bf16.msra.mxu0 %v5968_v19  ;;  %3161 = vmatpush1.bf16.msra.mxu1 %v5971_v36  ;;  %v8522_v19 = vld [vmem:[#allocation9 + $0xc0] ss:$16 sps:$4 sm:$0xff]   ;;  %v8526_v36 = vld [vmem:[#allocation9 + $0xcc] ss:$16 sps:$4 sm:$0xff]  }
 0xfca   :  { %3049 = vmatprep.subr.bf16.mxu0 %v5976_v50  ;;  %3162 = vmatprep.subr.bf16.mxu1 %v5979_v42  ;;  %v8528_v50 = vld [vmem:[#allocation9 + $0xc8] ss:$16 sps:$4 sm:$0xff]   ;;  %v8532_v42 = vld [vmem:[#allocation9 + $0xe4] ss:$16 sps:$4 sm:$0xff]  }
 0xfcd   :  { %3050 = vmatpush1.bf16.msra.mxu0 %v5974_v54  ;;  %3163 = vmatpush1.bf16.msra.mxu1 %v5977_v27  ;;  %v8535_v54 = vld [vmem:[#allocation9 + $0xe0] ss:$16 sps:$4 sm:$0xff]   ;;  %v8537_v27 = vld [vmem:[#allocation9 + $0xec] ss:$16 sps:$4 sm:$0xff]  }
 0xfce   :  { %3051 = vmatprep.subr.bf16.mxu0 %v5982_v20  ;;  %3164 = vmatprep.subr.bf16.mxu1 %v5985_v47  ;;  %v8539_v20 = vld [vmem:[#allocation9 + $0xe8] ss:$16 sps:$4 sm:$0xff]  }
 0xfd1   :  { %3052 = vmatpush1.bf16.msra.mxu0 %v5980_v11  ;;  %3165 = vmatpush1.bf16.msra.mxu1 %v5983_v43  ;;  %v9696_v43 = vld [vmem:[#allocation63_spill] sm:$0xff] }
 0xfd2   :  { %3053 = vmatprep.subr.bf16.mxu0 %v5988_v53  ;;  %3166 = vmatprep.subr.bf16.mxu1 %v5991_v23  ;;  %v9697_v23 = vld [vmem:[#allocation64_spill] sm:$0xff] }
 0xfd5   :  { %3054 = vmatpush1.bf16.msra.mxu0 %v5986_v57  ;;  %3167 = vmatpush1.bf16.msra.mxu1 %v5989_v55 }
 0xfd6   :  { %3055 = vmatprep.subr.bf16.mxu0 %v5994_v59  ;;  %3168 = vmatprep.subr.bf16.mxu1 %v5997_v3  ;;  %v9698_v3 = vld [vmem:[#allocation65_spill] sm:$0xff] }
 0xfd9   :  { %3056 = vmatpush1.bf16.msra.mxu0 %v5992_v7  ;;  %3169 = vmatpush1.bf16.msra.mxu1 %v5995_v61  ;;  %v9699_v61 = vld [vmem:[#allocation66_spill] sm:$0xff] }
 0xfda   :  { %3057 = vmatprep.subr.bf16.mxu0 %v6000_v31  ;;  %3170 = vmatprep.subr.bf16.mxu1 %v6003_v24 }
 0xfdd   :  { %3058 = vmatpush1.bf16.msra.mxu0 %v5998_v60  ;;  %3171 = vmatpush1.bf16.msra.mxu1 %v6001_v17 }
 0xfde   :  { %3059 = vmatprep.subr.bf16.mxu0 %v6006_v33  ;;  %3172 = vmatprep.subr.bf16.mxu1 %v6009_v34 }
 0xfe1   :  { %3060 = vmatpush1.bf16.msra.mxu0 %v6004_v14  ;;  %3173 = vmatpush1.bf16.msra.mxu1 %v6007_v52 }
 0xfe2   :  { %3536 = vmatprep.subr.bf16.mxu0 %v8421_v28  ;;  %3577 = vmatprep.subr.bf16.mxu1 %v8455_v56 }
 0xfe4   :  { %3078 = vmatmul.mubr.bf16.vlgmr.msra.gmra.mrb[96].mxu0 %v2823_v30  ;;  %3191 = vmatmul.mubr.bf16.vlgmr.msra.gmra.mrb[96].mxu1 %v2823_v30 }
 0xfe5   :  { %3087 = vmatprep.mubr.bf16.mxu0 %v9642_v26  ;;  %3200 = vmatprep.mubr.bf16.mxu1 %v9642_v26 }
 0xfe6   :  { %3537 = vmatpush1.bf16.msra.mxu0 %v8426_v32  ;;  %3578 = vmatpush1.bf16.msra.mxu1 %v8457_v2 }
 0xfe7   :  { %3538 = vmatprep.subr.bf16.mxu0 %v8461_v0  ;;  %3579 = vmatprep.subr.bf16.mxu1 %v8463_v12 }
 0xfea   :  { %3539 = vmatpush1.bf16.msra.mxu0 %v8465_v6  ;;  %3580 = vmatpush1.bf16.msra.mxu1 %v8467_v16 }
 0xfeb   :  { %3540 = vmatprep.subr.bf16.mxu0 %v8470_v22  ;;  %3581 = vmatprep.subr.bf16.mxu1 %v8477_v38 }
 0xfec   :  { %3088 = vmatmul.mubr.bf16.gmra.mrb[100].mxu0 %v2824_v13  ;;  %3201 = vmatmul.mubr.bf16.gmra.mrb[100].mxu1 %v2824_v13 }
 0xfed   :  { %3097 = vmatprep.mubr.bf16.mxu0 %v9642_v26  ;;  %3210 = vmatprep.mubr.bf16.mxu1 %v9642_v26 }
 0xfee   :  { %3541 = vmatpush1.bf16.msra.mxu0 %v8474_v4  ;;  %3582 = vmatpush1.bf16.msra.mxu1 %v8482_v39 }
 0xfef   :  { %3542 = vmatprep.subr.bf16.mxu0 %v8480_v63  ;;  %3583 = vmatprep.subr.bf16.mxu1 %v8485_v44 }
 0xff2   :  { %3543 = vmatpush1.bf16.msra.mxu0 %v8488_v40  ;;  %3584 = vmatpush1.bf16.msra.mxu1 %v8491_v62 }
 0xff3   :  { %3544 = vmatprep.subr.bf16.mxu0 %v8494_v45  ;;  %3585 = vmatprep.subr.bf16.mxu1 %v8504_v9 }
 0xff4   :  { %3098 = vmatmul.mubr.bf16.gmra.mrb[104].mxu0 %v2825_v8  ;;  %3211 = vmatmul.mubr.bf16.gmra.mrb[104].mxu1 %v2825_v8 }
 0xff5   :  { %3107 = vmatprep.mubr.bf16.mxu0 %v9642_v26  ;;  %3220 = vmatprep.mubr.bf16.mxu1 %v9642_v26 }
 0xff6   :  { %3545 = vmatpush1.bf16.msra.mxu0 %v8498_v41  ;;  %3586 = vmatpush1.bf16.msra.mxu1 %v8506_v10 }
 0xff7   :  { %3546 = vmatprep.subr.bf16.mxu0 %v8502_v29  ;;  %3587 = vmatprep.subr.bf16.mxu1 %v8516_v48 }
 0xffa   :  { %3547 = vmatpush1.bf16.msra.mxu0 %v8510_v1  ;;  %3588 = vmatpush1.bf16.msra.mxu1 %v8518_v37 }
 0xffb   :  { %3548 = vmatprep.subr.bf16.mxu0 %v8514_v49  ;;  %3589 = vmatprep.subr.bf16.mxu1 %v8526_v36 }
 0xffc   :  { %3108 = vmatmul.mubr.bf16.gmra.mrb[108].mxu0 %v2826_v18  ;;  %3221 = vmatmul.mubr.bf16.gmra.mrb[108].mxu1 %v2826_v18 }
 0xffd   :  { %3117 = vmatprep.mubr.bf16.mxu0 %v9642_v26  ;;  %3230 = vmatprep.mubr.bf16.mxu1 %v9642_v26 }
 0xffe   :  { %3549 = vmatpush1.bf16.msra.mxu0 %v8522_v19  ;;  %3590 = vmatpush1.bf16.msra.mxu1 %v8528_v50 }
 0xfff   :  { %3550 = vmatprep.subr.bf16.mxu0 %v8532_v42  ;;  %3591 = vmatprep.subr.bf16.mxu1 %v8537_v27 }
0x1002   :  { %3551 = vmatpush1.bf16.msra.mxu0 %v8535_v54  ;;  %3592 = vmatpush1.bf16.msra.mxu1 %v8539_v20 }
0x1003   :  { %3655 = vmatprep.subr.bf16.mxu0 %v8421_v28  ;;  %3696 = vmatprep.subr.bf16.mxu1 %v8455_v56 }
0x1004   :  { %3118 = vmatmul.mubr.bf16.gmra.mrb[112].mxu0 %v2827_v25  ;;  %3231 = vmatmul.mubr.bf16.gmra.mrb[112].mxu1 %v2827_v25 }
0x1005   :  { %3127 = vmatprep.mubr.bf16.mxu0 %v9642_v26  ;;  %3240 = vmatprep.mubr.bf16.mxu1 %v9642_v26 }
0x100c   :  { %3128 = vmatmul.mubr.bf16.gmra.mrb[116].mxu0 %v2828_v35  ;;  %3241 = vmatmul.mubr.bf16.gmra.mrb[116].mxu1 %v2828_v35 }
0x100d   :  { %3137 = vmatprep.mubr.bf16.mxu0 %v9642_v26  ;;  %3250 = vmatprep.mubr.bf16.mxu1 %v9642_v26 }
0x1014   :  { %3138 = vmatmul.mubr.bf16.gmra.mrb[120].mxu0 %v2829_v46  ;;  %3251 = vmatmul.mubr.bf16.gmra.mrb[120].mxu1 %v2829_v46 }
0x1015   :  { %3147 = vmatprep.mubr.bf16.mxu0 %v9642_v26  ;;  %3260 = vmatprep.mubr.bf16.mxu1 %v9642_v26 }
0x1097   :  { %v2727_v47 = vpop.f32.mrb[92].mxu0  ;;  %v2768_v11 = vpop.f32.mrb[92].mxu1 }
0x1098   :  { %v2775_v53 = vadd.f32 %v2727_v47, %v9696_v43  ;;  %v2777_v57 = vadd.f32 %v2768_v11, %v9697_v23  ;;  %v2729_v55 = vpop.f32.mrb[93].mxu0  ;;  %v2770_v59 = vpop.f32.mrb[93].mxu1 }
0x1099   :  { %v2776_v7 = vadd.f32 %v2729_v55, %v9698_v3  ;;  %v2778_v31 = vadd.f32 %v2770_v59, %v9699_v61  ;;  %v2731_v24 = vpop.f32.mrb[94].mxu0  ;;  %v2772_v60 = vpop.f32.mrb[94].mxu1 }
0x109a   :  { %v5696_v17 = vmul.f32 -1.442695, %v2775_v53  ;;  %v2732_v33 = vpop.f32.mrb[95].mxu0  ;;  %v2773_v34 = vpop.f32.mrb[95].mxu1 }
0x109b   :  { %v5697_v14 = vmul.f32 -1.442695, %v2776_v7  ;;  %v5698_v52 = vmul.f32 -1.442695, %v2778_v31 }
0x109c   :  { %6306 = vpow2.f32 %v5696_v17 }
0x109d   :  { %6308 = vpow2.f32 %v5697_v14 }
0x109e   :  { %6310 = vpow2.f32 %v5698_v52 }
0x109f   :  { %6312 = vtanh.f32 %v2777_v57 }
0x10a6   :  { %v6307_v30 = vpop.eup %6306 }
0x10a7   :  { %v6309_v13 = vpop.eup %6308  ;;  %v2782_v8 = vadd.f32 1.0, %v6307_v30 }
0x10a8   :  { %v2788_v18 = vadd.f32 1.0, %v6309_v13  ;;  %v6311_v21 = vpop.eup %6310 }
0x10a9   :  { %6314 = vrcp.f32 %v2782_v8  ;;  %v6313_v25 = vpop.eup %6312  ;;  %v2795_v46 = vadd.f32 1.0, %v6311_v21 }
0x10aa   :  { %6316 = vrcp.f32 %v2788_v18 }
0x10ab   :  { %6318 = vrcp.f32 %v2795_v46 }
0x10b3   :  { %v6315_v5 = vpop.eup %6314 }
0x10b4   :  { %v6317_v58 = vpop.eup %6316  ;;  %v2799_v35 = vmul.f32 %v6315_v5, %v6313_v25 }
0x10b5   :  { %v2798_v47 = vmul.f32 %v6317_v58, %v8412_v51  ;;  %v6319_v33 = vpop.eup %6318 }
0x10b7   :  { %v8552_v11 = vpop.f32.mrb[96].mxu0  ;;  %v8554_v43 = vpop.f32.mrb[96].mxu1  ;;  %v2800_v53 = vadd.f32 %v2799_v35, %v2798_v47 }
0x10b8   :  { %v8556_v23 = vpop.f32.mrb[97].mxu0  ;;  %v8558_v57 = vpop.f32.mrb[97].mxu1 }
0x10b9   :  { %v8560_v55 = vpop.f32.mrb[98].mxu0  ;;  %v8562_v59 = vpop.f32.mrb[98].mxu1  ;;  %6320 = vtanh.f32 %v2800_v53 }
0x10ba   :  { %v8564_v3 = vpop.f32.mrb[99].mxu0  ;;  %v8566_v7 = vpop.f32.mrb[99].mxu1 }
0x10bf   :  { %v8568_v51 = vpop.f32.mrb[100].mxu0  ;;  %v8570_v61 = vpop.f32.mrb[100].mxu1 }
0x10c0   :  { %9700 = vst [vmem:[#allocation19_spill] sm:$0xff] %v8570_v61  ;;  %v8572_v31 = vpop.f32.mrb[101].mxu0  ;;  %v8574_v24 = vpop.f32.mrb[101].mxu1 }
0x10c1   :  { %9701 = vst [vmem:[#allocation20_spill] sm:$0xff] %v8572_v31  ;;  %9702 = vst [vmem:[#allocation21_spill] sm:$0xff] %v8574_v24  ;;  %v8576_v60 = vpop.f32.mrb[102].mxu0  ;;  %v8578_v17 = vpop.f32.mrb[102].mxu1 }
0x10c2   :  { %9703 = vst [vmem:[#allocation22_spill] sm:$0xff] %v8576_v60  ;;  %9704 = vst [vmem:[#allocation23_spill] sm:$0xff] %v8578_v17  ;;  %v8580_v34 = vpop.f32.mrb[103].mxu0  ;;  %v8582_v14 = vpop.f32.mrb[103].mxu1 }
0x10c3   :  { %9705 = vst [vmem:[#allocation24_spill] sm:$0xff] %v8580_v34  ;;  %9706 = vst [vmem:[#allocation25_spill] sm:$0xff] %v8582_v14  ;;  %v6321_v52 = vpop.eup %6320 }
0x10c4   :  { %v2802_v30 = vmul.f32 %v6321_v52, %v6319_v33  ;;  %v9719_v52 = vmov 0.0|0.0  }
0x10c6   :  { %v2830_v13 = vpack.c.bf16 %v2802_v30, %v8415_v15 }
0x10c7   :  { %v8585_v8 = vpop.f32.mrb[104].mxu0  ;;  %v8587_v18 = vpop.f32.mrb[104].mxu1 }
0x10c8   :  { %9707 = vst [vmem:[#allocation26_spill] sm:$0xff] %v8585_v8  ;;  %9708 = vst [vmem:[#allocation27_spill] sm:$0xff] %v8587_v18  ;;  %v8589_v21 = vpop.f32.mrb[105].mxu0  ;;  %v8591_v25 = vpop.f32.mrb[105].mxu1  ;;  %3148 = vmatmul.mubr.bf16.gmra.mrb[124].mxu0 %v2830_v13  ;;  %3261 = vmatmul.mubr.bf16.gmra.mrb[124].mxu1 %v2830_v13 }
0x10c9   :  { %9709 = vst [vmem:[#allocation28_spill] sm:$0xff] %v8589_v21  ;;  %9710 = vst [vmem:[#allocation29_spill] sm:$0xff] %v8591_v25  ;;  %v8593_v5 = vpop.f32.mrb[106].mxu0  ;;  %v8595_v58 = vpop.f32.mrb[106].mxu1  ;;  %3568 = vmatprep.mubr.bf16.mxu0 %v9642_v26  ;;  %3609 = vmatprep.mubr.bf16.mxu1 %v9642_v26 }
0x10ca   :  { %9711 = vst [vmem:[#allocation30_spill] sm:$0xff] %v8593_v5  ;;  %9712 = vst [vmem:[#allocation31_spill] sm:$0xff] %v8595_v58  ;;  %v8599_v35 = vpop.f32.mrb[107].mxu0  ;;  %v8601_v15 = vpop.f32.mrb[107].mxu1 }
0x10cb   :  { %9713 = vst [vmem:[#allocation32_spill] sm:$0xff] %v8599_v35  ;;  %9714 = vst [vmem:[#allocation33_spill] sm:$0xff] %v8601_v15 }
0x10cf   :  { %v8603_v46 = vpop.f32.mrb[108].mxu0  ;;  %v8605_v47 = vpop.f32.mrb[108].mxu1 }
0x10d0   :  { %9715 = vst [vmem:[#allocation34_spill] sm:$0xff] %v8603_v46  ;;  %9716 = vst [vmem:[#allocation35_spill] sm:$0xff] %v8605_v47  ;;  %v8607_v53 = vpop.f32.mrb[109].mxu0  ;;  %v8609_v33 = vpop.f32.mrb[109].mxu1  ;;  %3569 = vmatmul.mubr.bf16.vlgmr.msra.gmra.mrb[128].mxu0 %v9719_v52  ;;  %3610 = vmatmul.mubr.bf16.vlgmr.msra.gmra.mrb[128].mxu1 %v9719_v52 }
0x10d1   :  { %9717 = vst [vmem:[#allocation36_spill] sm:$0xff] %v8607_v53  ;;  %9718 = vst [vmem:[#allocation37_spill] sm:$0xff] %v8609_v33  ;;  %v8613_v30 = vpop.f32.mrb[110].mxu0  ;;  %v8615_v13 = vpop.f32.mrb[110].mxu1  ;;  %3656 = vmatpush1.bf16.msra.mxu0 %v8426_v32  ;;  %3697 = vmatpush1.bf16.msra.mxu1 %v8457_v2 }
0x10d2   :  { %9720 = vst [vmem:[#allocation38_spill] sm:$0xff] %v8613_v30  ;;  %9721 = vst [vmem:[#allocation39_spill] sm:$0xff] %v8615_v13  ;;  %v8619_v15 = vpop.f32.mrb[111].mxu0  ;;  %v8621_v46 = vpop.f32.mrb[111].mxu1  ;;  %3657 = vmatprep.subr.bf16.mxu0 %v8461_v0  ;;  %3698 = vmatprep.subr.bf16.mxu1 %v8463_v12 }
0x10d3   :  { %9722 = vst [vmem:[#allocation40_spill] sm:$0xff] %v8619_v15  ;;  %9723 = vst [vmem:[#allocation41_spill] sm:$0xff] %v8621_v46  ;;  %3687 = vmatprep.mubr.bf16.mxu0 %v9642_v26  ;;  %3728 = vmatprep.mubr.bf16.mxu1 %v9642_v26 }
0x10d5   :  { %3658 = vmatpush1.bf16.msra.mxu0 %v8465_v6  ;;  %3699 = vmatpush1.bf16.msra.mxu1 %v8467_v16 }
0x10d6   :  { %3659 = vmatprep.subr.bf16.mxu0 %v8470_v22  ;;  %3700 = vmatprep.subr.bf16.mxu1 %v8477_v38 }
0x10d7   :  { %v8631_v52 = vpop.f32.mrb[112].mxu0  ;;  %v8633_v15 = vpop.f32.mrb[112].mxu1 }
0x10d8   :  { %9724 = vst [vmem:[#allocation42_spill] sm:$0xff] %v8631_v52  ;;  %9725 = vst [vmem:[#allocation43_spill] sm:$0xff] %v8633_v15  ;;  %v8635_v46 = vpop.f32.mrb[113].mxu0  ;;  %v8637_v13 = vpop.f32.mrb[113].mxu1 }
0x10d9   :  { %9726 = vst [vmem:[#allocation44_spill] sm:$0xff] %v8635_v46  ;;  %9727 = vst [vmem:[#allocation45_spill] sm:$0xff] %v8637_v13  ;;  %v8639_v30 = vpop.f32.mrb[114].mxu0  ;;  %v8641_v33 = vpop.f32.mrb[114].mxu1  ;;  %3660 = vmatpush1.bf16.msra.mxu0 %v8474_v4  ;;  %3701 = vmatpush1.bf16.msra.mxu1 %v8482_v39 }
0x10da   :  { %9728 = vst [vmem:[#allocation46_spill] sm:$0xff] %v8639_v30  ;;  %9729 = vst [vmem:[#allocation47_spill] sm:$0xff] %v8641_v33  ;;  %v8645_v53 = vpop.f32.mrb[115].mxu0  ;;  %v8647_v47 = vpop.f32.mrb[115].mxu1  ;;  %3661 = vmatprep.subr.bf16.mxu0 %v8480_v63  ;;  %3702 = vmatprep.subr.bf16.mxu1 %v8485_v44 }
0x10db   :  { %9730 = vst [vmem:[#allocation48_spill] sm:$0xff] %v8645_v53  ;;  %9731 = vst [vmem:[#allocation49_spill] sm:$0xff] %v8647_v47 }
0x10dd   :  { %3662 = vmatpush1.bf16.msra.mxu0 %v8488_v40  ;;  %3703 = vmatpush1.bf16.msra.mxu1 %v8491_v62 }
0x10de   :  { %3663 = vmatprep.subr.bf16.mxu0 %v8494_v45  ;;  %3704 = vmatprep.subr.bf16.mxu1 %v8504_v9 }
0x10df   :  { %v8655_v33 = vpop.f32.mrb[116].mxu0  ;;  %v8657_v30 = vpop.f32.mrb[116].mxu1 }
0x10e0   :  { %9732 = vst [vmem:[#allocation50_spill] sm:$0xff] %v8655_v33  ;;  %9733 = vst [vmem:[#allocation51_spill] sm:$0xff] %v8657_v30  ;;  %v8659_v13 = vpop.f32.mrb[117].mxu0  ;;  %v8661_v53 = vpop.f32.mrb[117].mxu1 }
0x10e1   :  { %9734 = vst [vmem:[#allocation52_spill] sm:$0xff] %v8659_v13  ;;  %9735 = vst [vmem:[#allocation53_spill] sm:$0xff] %v8661_v53  ;;  %v8663_v47 = vpop.f32.mrb[118].mxu0  ;;  %v8665_v46 = vpop.f32.mrb[118].mxu1  ;;  %3664 = vmatpush1.bf16.msra.mxu0 %v8498_v41  ;;  %3705 = vmatpush1.bf16.msra.mxu1 %v8506_v10 }
0x10e2   :  { %9736 = vst [vmem:[#allocation54_spill] sm:$0xff] %v8663_v47  ;;  %9737 = vst [vmem:[#allocation55_spill] sm:$0xff] %v8665_v46  ;;  %v8669_v15 = vpop.f32.mrb[119].mxu0  ;;  %v8671_v52 = vpop.f32.mrb[119].mxu1  ;;  %3665 = vmatprep.subr.bf16.mxu0 %v8502_v29  ;;  %3706 = vmatprep.subr.bf16.mxu1 %v8516_v48 }
0x10e3   :  { %9738 = vst [vmem:[#allocation56_spill] sm:$0xff] %v8669_v15  ;;  %9739 = vst [vmem:[#allocation57_spill] sm:$0xff] %v8671_v52 }
0x10e5   :  { %3666 = vmatpush1.bf16.msra.mxu0 %v8510_v1  ;;  %3707 = vmatpush1.bf16.msra.mxu1 %v8518_v37 }
0x10e6   :  { %3667 = vmatprep.subr.bf16.mxu0 %v8514_v49  ;;  %3708 = vmatprep.subr.bf16.mxu1 %v8526_v36 }
0x10e7   :  { %v8679_v46 = vpop.f32.mrb[120].mxu0  ;;  %v8681_v47 = vpop.f32.mrb[120].mxu1 }
0x10e8   :  { %9740 = vst [vmem:[#allocation58_spill] sm:$0xff] %v8679_v46  ;;  %9741 = vst [vmem:[#allocation59_spill] sm:$0xff] %v8681_v47  ;;  %v8683_v53 = vpop.f32.mrb[121].mxu0  ;;  %v8685_v15 = vpop.f32.mrb[121].mxu1  ;;  %v9754_v46 = vld [vmem:[#allocation15_spill] sm:$0xff] }
0x10e9   :  { %9742 = vst [vmem:[#allocation60_spill] sm:$0xff] %v8683_v53  ;;  %9743 = vst [vmem:[#allocation61_spill] sm:$0xff] %v8685_v15  ;;  %v8687_v52 = vpop.f32.mrb[122].mxu0  ;;  %v8689_v13 = vpop.f32.mrb[122].mxu1  ;;  %3668 = vmatpush1.bf16.msra.mxu0 %v8522_v19  ;;  %3709 = vmatpush1.bf16.msra.mxu1 %v8528_v50  ;;  %v9755_v35 = vsub.s32 0, %v9754_v46  ;;  %v9756_v5 = vsub.s32 2, %v9754_v46 }
0x10ea   :  { %9744 = vst [vmem:[#allocation62_spill] sm:$0xff] %v8687_v52  ;;  %9745 = vst [vmem:[#allocation16_spill] sm:$0xff] %v8689_v13  ;;  %v8693_v30 = vpop.f32.mrb[123].mxu0  ;;  %v8695_v33 = vpop.f32.mrb[123].mxu1  ;;  %3669 = vmatprep.subr.bf16.mxu0 %v8532_v42  ;;  %3710 = vmatprep.subr.bf16.mxu1 %v8537_v27  ;;  %v2863_v13 = vld [vmem:[%s9573_s6] sm:$0xf] }
0x10eb   :  { %9746 = vst [vmem:[#allocation17_spill] sm:$0xff] %v8693_v30  ;;  %9747 = vst [vmem:[#allocation18_spill] sm:$0xff] %v8695_v33  ;;  %v8720_v58 = vrot.slane %v2863_v13, %v9755_v35  ;;  %v8724_v25 = vrot.slane %v2863_v13, %v9756_v5 }
0x10ed   :  { %3670 = vmatpush1.bf16.msra.mxu0 %v8535_v54  ;;  %3711 = vmatpush1.bf16.msra.mxu1 %v8539_v20  ;;  %v3080_v35 = vadd.f32 %v8552_v11, %v8720_v58 }
0x10ee   :  { %3774 = vmatprep.subr.bf16.mxu0 %v8421_v28  ;;  %3815 = vmatprep.subr.bf16.mxu1 %v8455_v56 }
0x119b   :  { %v8706_v52 = vpop.f32.mrb[124].mxu0  ;;  %v8708_v30 = vpop.f32.mrb[124].mxu1 }
0x119c   :  { %9748 = vst [vmem:[#allocation63_spill] sm:$0xff] %v8706_v52  ;;  %9749 = vst [vmem:[#allocation64_spill] sm:$0xff] %v8708_v30  ;;  %v8710_v33 = vpop.f32.mrb[125].mxu0  ;;  %v8712_v15 = vpop.f32.mrb[125].mxu1 }
0x119d   :  { %9750 = vst [vmem:[#allocation65_spill] sm:$0xff] %v8710_v33  ;;  %9751 = vst [vmem:[#allocation66_spill] sm:$0xff] %v8712_v15  ;;  %v8714_v53 = vpop.f32.mrb[126].mxu0  ;;  %v8716_v47 = vpop.f32.mrb[126].mxu1  ;;  %v9759_v33 = vsub.s32 1, %v9754_v46 }
0x119e   :  { %9752 = vst [vmem:[#allocation67_spill] sm:$0xff] %v8714_v53  ;;  %9753 = vst [vmem:[#allocation68_spill] sm:$0xff] %v8716_v47  ;;  %v8726_v21 = vpop.f32.mrb[127].mxu0  ;;  %v8728_v52 = vpop.f32.mrb[127].mxu1  ;;  %v9760_v53 = vsub.s32 3, %v9754_v46  ;;  %v3193_v47 = vadd.f32 %v8554_v43, %v8724_v25 }
0x119f   :  { %9757 = vst [vmem:[#allocation15_spill] sm:$0xff] %v8726_v21  ;;  %9758 = vst [vmem:[#allocation69_spill] sm:$0xff] %v8728_v52  ;;  %v8732_v30 = vrot.slane %v2863_v13, %v9759_v33 }
0x11a0   :  { %v8736_v15 = vrot.slane %v2863_v13, %v9760_v53 }
0x11a1   :  { %v3082_v5 = vadd.f32 %v8556_v23, %v8732_v30 }
0x11a2   :  { %v3195_v52 = vadd.f32 %v8558_v57, %v8736_v15 }
0x11a3   :  { %v3570_v21 = vpop.f32.mrb[128].mxu0  ;;  %v3611_v18 = vpop.f32.mrb[128].mxu1 }
0x11a4   :  { %v3618_v33 = vadd.f32 %v3570_v21, %v3080_v35  ;;  %v3620_v8 = vadd.f32 %v3611_v18, %v3193_v47  ;;  %v3572_v14 = vpop.f32.mrb[129].mxu0  ;;  %v3613_v46 = vpop.f32.mrb[129].mxu1 }
0x11a5   :  { %v3619_v53 = vadd.f32 %v3572_v14, %v3082_v5  ;;  %v3621_v13 = vadd.f32 %v3613_v46, %v3195_v52  ;;  %v3574_v34 = vpop.f32.mrb[130].mxu0  ;;  %v3615_v17 = vpop.f32.mrb[130].mxu1  ;;  %v3086_v46 = vadd.f32 %v8564_v3, %v8732_v30 }
0x11a6   :  { %v5763_v11 = vmul.f32 -1.442695, %v3618_v33  ;;  %v3575_v60 = vpop.f32.mrb[131].mxu0  ;;  %v3616_v24 = vpop.f32.mrb[131].mxu1 }
0x11a7   :  { %v5764_v43 = vmul.f32 -1.442695, %v3619_v53  ;;  %v5765_v23 = vmul.f32 -1.442695, %v3621_v13  ;;  %v3199_v53 = vadd.f32 %v8566_v7, %v8736_v15 }
0x11a8   :  { %6322 = vpow2.f32 %v5763_v11 }
0x11a9   :  { %6324 = vpow2.f32 %v5764_v43 }
0x11aa   :  { %6326 = vpow2.f32 %v5765_v23 }
0x11ab   :  { %6328 = vtanh.f32 %v3620_v8  ;;  %v3197_v8 = vadd.f32 %v8562_v59, %v8724_v25 }
0x11b2   :  { %v6323_v31 = vpop.eup %6322 }
0x11b3   :  { %v6325_v61 = vpop.eup %6324  ;;  %v3625_v57 = vadd.f32 1.0, %v6323_v31 }
0x11b4   :  { %v3631_v21 = vadd.f32 1.0, %v6325_v61  ;;  %v6327_v18 = vpop.eup %6326  ;;  %v3084_v61 = vadd.f32 %v8560_v55, %v8720_v58 }
0x11b5   :  { %6330 = vrcp.f32 %v3625_v57  ;;  %v6329_v14 = vpop.eup %6328  ;;  %v3638_v52 = vadd.f32 1.0, %v6327_v18 }
0x11b6   :  { %6332 = vrcp.f32 %v3631_v21 }
0x11b7   :  { %6334 = vrcp.f32 %v3638_v52 }
0x11bf   :  { %v6331_v47 = vpop.eup %6330 }
0x11c0   :  { %v6333_v34 = vpop.eup %6332  ;;  %v3642_v17 = vmul.f32 %v6331_v47, %v6329_v14 }
0x11c1   :  { %v3641_v60 = vmul.f32 0.0, %v6333_v34  ;;  %v6335_v35 = vpop.eup %6334 }
0x11c3   :  { %v8746_v24 = vadd.f32 %v3642_v17, %v3641_v60 }
0x11c5   :  { %6336 = vtanh.f32 %v8746_v24 }
0x11cf   :  { %v6337_v5 = vpop.eup %6336 }
0x11d0   :  { %v3645_v31 = vmul.f32 %v6337_v5, %v6335_v35 }
0x11d2   :  { %v3654_v33 = vpack.c.bf16 %v3645_v31, %v3645_v31 }
0x11d4   :  { %3688 = vmatmul.mubr.bf16.vlgmr.msra.gmra.mrb[132].mxu0 %v3654_v33  ;;  %3729 = vmatmul.mubr.bf16.vlgmr.msra.gmra.mrb[132].mxu1 %v3654_v33 }
0x11d5   :  { %3775 = vmatpush1.bf16.msra.mxu0 %v8426_v32  ;;  %3816 = vmatpush1.bf16.msra.mxu1 %v8457_v2 }
0x11d6   :  { %3776 = vmatprep.subr.bf16.mxu0 %v8461_v0  ;;  %3817 = vmatprep.subr.bf16.mxu1 %v8463_v12 }
0x11d7   :  { %3806 = vmatprep.mubr.bf16.mxu0 %v9642_v26  ;;  %3847 = vmatprep.mubr.bf16.mxu1 %v9642_v26 }
0x11d9   :  { %3777 = vmatpush1.bf16.msra.mxu0 %v8465_v6  ;;  %3818 = vmatpush1.bf16.msra.mxu1 %v8467_v16 }
0x11da   :  { %3778 = vmatprep.subr.bf16.mxu0 %v8470_v22  ;;  %3819 = vmatprep.subr.bf16.mxu1 %v8477_v38 }
0x11dd   :  { %3779 = vmatpush1.bf16.msra.mxu0 %v8474_v4  ;;  %3820 = vmatpush1.bf16.msra.mxu1 %v8482_v39 }
0x11de   :  { %3780 = vmatprep.subr.bf16.mxu0 %v8480_v63  ;;  %3821 = vmatprep.subr.bf16.mxu1 %v8485_v44 }
0x11e1   :  { %3781 = vmatpush1.bf16.msra.mxu0 %v8488_v40  ;;  %3822 = vmatpush1.bf16.msra.mxu1 %v8491_v62 }
0x11e2   :  { %3782 = vmatprep.subr.bf16.mxu0 %v8494_v45  ;;  %3823 = vmatprep.subr.bf16.mxu1 %v8504_v9 }
0x11e5   :  { %3783 = vmatpush1.bf16.msra.mxu0 %v8498_v41  ;;  %3824 = vmatpush1.bf16.msra.mxu1 %v8506_v10 }
0x11e6   :  { %3784 = vmatprep.subr.bf16.mxu0 %v8502_v29  ;;  %3825 = vmatprep.subr.bf16.mxu1 %v8516_v48 }
0x11e9   :  { %3785 = vmatpush1.bf16.msra.mxu0 %v8510_v1  ;;  %3826 = vmatpush1.bf16.msra.mxu1 %v8518_v37 }
0x11ea   :  { %3786 = vmatprep.subr.bf16.mxu0 %v8514_v49  ;;  %3827 = vmatprep.subr.bf16.mxu1 %v8526_v36 }
0x11ed   :  { %3787 = vmatpush1.bf16.msra.mxu0 %v8522_v19  ;;  %3828 = vmatpush1.bf16.msra.mxu1 %v8528_v50 }
0x11ee   :  { %3788 = vmatprep.subr.bf16.mxu0 %v8532_v42  ;;  %3829 = vmatprep.subr.bf16.mxu1 %v8537_v27 }
0x11f1   :  { %3789 = vmatpush1.bf16.msra.mxu0 %v8535_v54  ;;  %3830 = vmatpush1.bf16.msra.mxu1 %v8539_v20 }
0x11f2   :  { %3893 = vmatprep.subr.bf16.mxu0 %v8421_v28  ;;  %3934 = vmatprep.subr.bf16.mxu1 %v8455_v56 }
0x12a7   :  { %v3689_v13 = vpop.f32.mrb[132].mxu0  ;;  %v3730_v11 = vpop.f32.mrb[132].mxu1 }
0x12a8   :  { %v3737_v43 = vadd.f32 %v3689_v13, %v3084_v61  ;;  %v3739_v23 = vadd.f32 %v3730_v11, %v3197_v8  ;;  %v3691_v57 = vpop.f32.mrb[133].mxu0  ;;  %v3732_v21 = vpop.f32.mrb[133].mxu1 }
0x12a9   :  { %v3738_v18 = vadd.f32 %v3691_v57, %v3086_v46  ;;  %v3740_v14 = vadd.f32 %v3732_v21, %v3199_v53  ;;  %v3693_v47 = vpop.f32.mrb[134].mxu0  ;;  %v3734_v34 = vpop.f32.mrb[134].mxu1 }
0x12aa   :  { %v5766_v55 = vmul.f32 -1.442695, %v3737_v43  ;;  %v3694_v17 = vpop.f32.mrb[135].mxu0  ;;  %v3735_v52 = vpop.f32.mrb[135].mxu1  ;;  %v9762_v47 = vld [vmem:[#allocation20_spill] sm:$0xff] }
0x12ab   :  { %v5767_v59 = vmul.f32 -1.442695, %v3738_v18  ;;  %v5768_v3 = vmul.f32 -1.442695, %v3740_v14  ;;  %v9761_v18 = vld [vmem:[#allocation19_spill] sm:$0xff]  ;;  %v3092_v34 = vadd.f32 %v9762_v47, %v8732_v30 }
0x12ac   :  { %6338 = vpow2.f32 %v5766_v55  ;;  %v3203_v14 = vadd.f32 %v9761_v18, %v8724_v25  ;;  %v9763_v55 = vld [vmem:[#allocation21_spill] sm:$0xff] }
0x12ad   :  { %6340 = vpow2.f32 %v5767_v59  ;;  %v3205_v17 = vadd.f32 %v9763_v55, %v8736_v15 }
0x12ae   :  { %6342 = vpow2.f32 %v5768_v3 }
0x12af   :  { %6344 = vtanh.f32 %v3739_v23 }
0x12b6   :  { %v6339_v60 = vpop.eup %6338 }
0x12b7   :  { %v6341_v35 = vpop.eup %6340  ;;  %v3744_v7 = vadd.f32 1.0, %v6339_v60 }
0x12b8   :  { %v3750_v5 = vadd.f32 1.0, %v6341_v35  ;;  %v6343_v31 = vpop.eup %6342 }
0x12b9   :  { %6346 = vrcp.f32 %v3744_v7  ;;  %v6345_v33 = vpop.eup %6344  ;;  %v3757_v53 = vadd.f32 1.0, %v6343_v31 }
0x12ba   :  { %6348 = vrcp.f32 %v3750_v5 }
0x12bb   :  { %6350 = vrcp.f32 %v3757_v53 }
0x12c3   :  { %v6347_v61 = vpop.eup %6346 }
0x12c4   :  { %v6349_v8 = vpop.eup %6348  ;;  %v3761_v46 = vmul.f32 %v6347_v61, %v6345_v33 }
0x12c5   :  { %v3760_v13 = vmul.f32 %v6349_v8, %v8746_v24  ;;  %v6351_v43 = vpop.eup %6350  ;;  %v3090_v24 = vadd.f32 %v8568_v51, %v8720_v58 }
0x12c7   :  { %v8792_v11 = vadd.f32 %v3761_v46, %v3760_v13 }
0x12c9   :  { %6352 = vtanh.f32 %v8792_v11 }
0x12d3   :  { %v6353_v57 = vpop.eup %6352 }
0x12d4   :  { %v3764_v21 = vmul.f32 %v6353_v57, %v6351_v43 }
0x12d6   :  { %v3773_v23 = vpack.c.bf16 %v3764_v21, %v3764_v21 }
0x12d8   :  { %3807 = vmatmul.mubr.bf16.vlgmr.msra.gmra.mrb[136].mxu0 %v3773_v23  ;;  %3848 = vmatmul.mubr.bf16.vlgmr.msra.gmra.mrb[136].mxu1 %v3773_v23 }
0x12d9   :  { %3894 = vmatpush1.bf16.msra.mxu0 %v8426_v32  ;;  %3935 = vmatpush1.bf16.msra.mxu1 %v8457_v2 }
0x12da   :  { %3895 = vmatprep.subr.bf16.mxu0 %v8461_v0  ;;  %3936 = vmatprep.subr.bf16.mxu1 %v8463_v12 }
0x12db   :  { %3925 = vmatprep.mubr.bf16.mxu0 %v9642_v26  ;;  %3966 = vmatprep.mubr.bf16.mxu1 %v9642_v26 }
0x12dd   :  { %3896 = vmatpush1.bf16.msra.mxu0 %v8465_v6  ;;  %3937 = vmatpush1.bf16.msra.mxu1 %v8467_v16 }
0x12de   :  { %3897 = vmatprep.subr.bf16.mxu0 %v8470_v22  ;;  %3938 = vmatprep.subr.bf16.mxu1 %v8477_v38 }
0x12e1   :  { %3898 = vmatpush1.bf16.msra.mxu0 %v8474_v4  ;;  %3939 = vmatpush1.bf16.msra.mxu1 %v8482_v39 }
0x12e2   :  { %3899 = vmatprep.subr.bf16.mxu0 %v8480_v63  ;;  %3940 = vmatprep.subr.bf16.mxu1 %v8485_v44 }
0x12e5   :  { %3900 = vmatpush1.bf16.msra.mxu0 %v8488_v40  ;;  %3941 = vmatpush1.bf16.msra.mxu1 %v8491_v62 }
0x12e6   :  { %3901 = vmatprep.subr.bf16.mxu0 %v8494_v45  ;;  %3942 = vmatprep.subr.bf16.mxu1 %v8504_v9 }
0x12e9   :  { %3902 = vmatpush1.bf16.msra.mxu0 %v8498_v41  ;;  %3943 = vmatpush1.bf16.msra.mxu1 %v8506_v10 }
0x12ea   :  { %3903 = vmatprep.subr.bf16.mxu0 %v8502_v29  ;;  %3944 = vmatprep.subr.bf16.mxu1 %v8516_v48 }
0x12ed   :  { %3904 = vmatpush1.bf16.msra.mxu0 %v8510_v1  ;;  %3945 = vmatpush1.bf16.msra.mxu1 %v8518_v37 }
0x12ee   :  { %3905 = vmatprep.subr.bf16.mxu0 %v8514_v49  ;;  %3946 = vmatprep.subr.bf16.mxu1 %v8526_v36 }
0x12f1   :  { %3906 = vmatpush1.bf16.msra.mxu0 %v8522_v19  ;;  %3947 = vmatpush1.bf16.msra.mxu1 %v8528_v50 }
0x12f2   :  { %3907 = vmatprep.subr.bf16.mxu0 %v8532_v42  ;;  %3948 = vmatprep.subr.bf16.mxu1 %v8537_v27 }
0x12f5   :  { %3908 = vmatpush1.bf16.msra.mxu0 %v8535_v54  ;;  %3949 = vmatpush1.bf16.msra.mxu1 %v8539_v20 }
0x12f6   :  { %4012 = vmatprep.subr.bf16.mxu0 %v8421_v28  ;;  %4053 = vmatprep.subr.bf16.mxu1 %v8455_v56 }
0x13ab   :  { %v3808_v52 = vpop.f32.mrb[136].mxu0  ;;  %v3849_v59 = vpop.f32.mrb[136].mxu1 }
0x13ac   :  { %v3856_v3 = vadd.f32 %v3808_v52, %v3090_v24  ;;  %v3858_v60 = vadd.f32 %v3849_v59, %v3203_v14  ;;  %v3810_v35 = vpop.f32.mrb[137].mxu0  ;;  %v3851_v7 = vpop.f32.mrb[137].mxu1 }
0x13ad   :  { %v3857_v5 = vadd.f32 %v3810_v35, %v3092_v34  ;;  %v3859_v31 = vadd.f32 %v3851_v7, %v3205_v17  ;;  %v3812_v33 = vpop.f32.mrb[138].mxu0  ;;  %v3853_v61 = vpop.f32.mrb[138].mxu1  ;;  %v9765_v7 = vld [vmem:[#allocation23_spill] sm:$0xff] }
0x13ae   :  { %v5769_v51 = vmul.f32 -1.442695, %v3856_v3  ;;  %v3813_v8 = vpop.f32.mrb[139].mxu0  ;;  %v3854_v46 = vpop.f32.mrb[139].mxu1  ;;  %v9767_v61 = vld [vmem:[#allocation25_spill] sm:$0xff] }
0x13af   :  { %v5770_v53 = vmul.f32 -1.442695, %v3857_v5  ;;  %v5771_v13 = vmul.f32 -1.442695, %v3859_v31  ;;  %v3207_v5 = vadd.f32 %v9765_v7, %v8724_v25  ;;  %v9766_v31 = vld [vmem:[#allocation24_spill] sm:$0xff] }
0x13b0   :  { %6354 = vpow2.f32 %v5769_v51  ;;  %v3096_v33 = vadd.f32 %v9766_v31, %v8732_v30  ;;  %v3209_v51 = vadd.f32 %v9767_v61, %v8736_v15 }
0x13b1   :  { %6356 = vpow2.f32 %v5770_v53 }
0x13b2   :  { %6358 = vpow2.f32 %v5771_v13 }
0x13b3   :  { %6360 = vtanh.f32 %v3858_v60 }
0x13ba   :  { %v6355_v43 = vpop.eup %6354 }
0x13bb   :  { %v6357_v57 = vpop.eup %6356  ;;  %v3863_v21 = vadd.f32 1.0, %v6355_v43 }
0x13bc   :  { %v3869_v23 = vadd.f32 1.0, %v6357_v57  ;;  %v6359_v24 = vpop.eup %6358 }
0x13bd   :  { %6362 = vrcp.f32 %v3863_v21  ;;  %v6361_v18 = vpop.eup %6360  ;;  %v3876_v55 = vadd.f32 1.0, %v6359_v24 }
0x13be   :  { %6364 = vrcp.f32 %v3869_v23 }
0x13bf   :  { %6366 = vrcp.f32 %v3876_v55 }
0x13c7   :  { %v6363_v14 = vpop.eup %6362 }
0x13c8   :  { %v6365_v47 = vpop.eup %6364  ;;  %v3880_v34 = vmul.f32 %v6363_v14, %v6361_v18 }
0x13c9   :  { %v3879_v17 = vmul.f32 %v6365_v47, %v8792_v11  ;;  %v6367_v59 = vpop.eup %6366 }
0x13cb   :  { %v8838_v52 = vadd.f32 %v3880_v34, %v3879_v17 }
0x13cd   :  { %6368 = vtanh.f32 %v8838_v52 }
0x13d7   :  { %v6369_v3 = vpop.eup %6368 }
0x13d8   :  { %v3883_v35 = vmul.f32 %v6369_v3, %v6367_v59 }
0x13da   :  { %v3892_v60 = vpack.c.bf16 %v3883_v35, %v3883_v35 }
0x13dc   :  { %3926 = vmatmul.mubr.bf16.vlgmr.msra.gmra.mrb[140].mxu0 %v3892_v60  ;;  %3967 = vmatmul.mubr.bf16.vlgmr.msra.gmra.mrb[140].mxu1 %v3892_v60 }
0x13dd   :  { %4013 = vmatpush1.bf16.msra.mxu0 %v8426_v32  ;;  %4054 = vmatpush1.bf16.msra.mxu1 %v8457_v2  ;;  %v9764_v32 = vld [vmem:[#allocation22_spill] sm:$0xff] }
0x13de   :  { %4014 = vmatprep.subr.bf16.mxu0 %v8461_v0  ;;  %4055 = vmatprep.subr.bf16.mxu1 %v8463_v12  ;;  %v3094_v11 = vadd.f32 %v9764_v32, %v8720_v58 }
0x13df   :  { %4044 = vmatprep.mubr.bf16.mxu0 %v9642_v26  ;;  %4085 = vmatprep.mubr.bf16.mxu1 %v9642_v26 }
0x13e1   :  { %4015 = vmatpush1.bf16.msra.mxu0 %v8465_v6  ;;  %4056 = vmatpush1.bf16.msra.mxu1 %v8467_v16 }
0x13e2   :  { %4016 = vmatprep.subr.bf16.mxu0 %v8470_v22  ;;  %4057 = vmatprep.subr.bf16.mxu1 %v8477_v38 }
0x13e5   :  { %4017 = vmatpush1.bf16.msra.mxu0 %v8474_v4  ;;  %4058 = vmatpush1.bf16.msra.mxu1 %v8482_v39 }
0x13e6   :  { %4018 = vmatprep.subr.bf16.mxu0 %v8480_v63  ;;  %4059 = vmatprep.subr.bf16.mxu1 %v8485_v44 }
0x13e9   :  { %4019 = vmatpush1.bf16.msra.mxu0 %v8488_v40  ;;  %4060 = vmatpush1.bf16.msra.mxu1 %v8491_v62 }
0x13ea   :  { %4020 = vmatprep.subr.bf16.mxu0 %v8494_v45  ;;  %4061 = vmatprep.subr.bf16.mxu1 %v8504_v9 }
0x13ed   :  { %4021 = vmatpush1.bf16.msra.mxu0 %v8498_v41  ;;  %4062 = vmatpush1.bf16.msra.mxu1 %v8506_v10 }
0x13ee   :  { %4022 = vmatprep.subr.bf16.mxu0 %v8502_v29  ;;  %4063 = vmatprep.subr.bf16.mxu1 %v8516_v48 }
0x13f1   :  { %4023 = vmatpush1.bf16.msra.mxu0 %v8510_v1  ;;  %4064 = vmatpush1.bf16.msra.mxu1 %v8518_v37 }
0x13f2   :  { %4024 = vmatprep.subr.bf16.mxu0 %v8514_v49  ;;  %4065 = vmatprep.subr.bf16.mxu1 %v8526_v36 }
0x13f5   :  { %4025 = vmatpush1.bf16.msra.mxu0 %v8522_v19  ;;  %4066 = vmatpush1.bf16.msra.mxu1 %v8528_v50 }
0x13f6   :  { %4026 = vmatprep.subr.bf16.mxu0 %v8532_v42  ;;  %4067 = vmatprep.subr.bf16.mxu1 %v8537_v27 }
0x13f9   :  { %4027 = vmatpush1.bf16.msra.mxu0 %v8535_v54  ;;  %4068 = vmatpush1.bf16.msra.mxu1 %v8539_v20 }
0x13fa   :  { %4131 = vmatprep.subr.bf16.mxu0 %v8421_v28  ;;  %4172 = vmatprep.subr.bf16.mxu1 %v8455_v56 }
0x14af   :  { %v3927_v8 = vpop.f32.mrb[140].mxu0  ;;  %v3968_v46 = vpop.f32.mrb[140].mxu1 }
0x14b0   :  { %v3975_v53 = vadd.f32 %v3927_v8, %v3094_v11  ;;  %v3977_v13 = vadd.f32 %v3968_v46, %v3207_v5  ;;  %v3929_v43 = vpop.f32.mrb[141].mxu0  ;;  %v3970_v28 = vpop.f32.mrb[141].mxu1 }
0x14b1   :  { %v3976_v57 = vadd.f32 %v3929_v43, %v3096_v33  ;;  %v3978_v56 = vadd.f32 %v3970_v28, %v3209_v51  ;;  %v3931_v21 = vpop.f32.mrb[142].mxu0  ;;  %v3972_v23 = vpop.f32.mrb[142].mxu1 }
0x14b2   :  { %v5772_v24 = vmul.f32 -1.442695, %v3975_v53  ;;  %v3932_v18 = vpop.f32.mrb[143].mxu0  ;;  %v3973_v14 = vpop.f32.mrb[143].mxu1  ;;  %v8887_v53 = vld [vmem:[#allocation9] ss:$16 sps:$4 sm:$0xff]  }
0x14b3   :  { %v5773_v47 = vmul.f32 -1.442695, %v3976_v57  ;;  %v5774_v34 = vmul.f32 -1.442695, %v3978_v56 }
0x14b4   :  { %6370 = vpow2.f32 %v5772_v24 }
0x14b5   :  { %6372 = vpow2.f32 %v5773_v47 }
0x14b6   :  { %6374 = vpow2.f32 %v5774_v34  ;;  %v8940_v34 = vld [vmem:[#allocation9 + $0x8] ss:$16 sps:$4 sm:$0xff]  }
0x14b7   :  { %6376 = vtanh.f32 %v3977_v13 }
0x14be   :  { %v6371_v55 = vpop.eup %6370 }
0x14bf   :  { %v6373_v17 = vpop.eup %6372  ;;  %v3982_v59 = vadd.f32 1.0, %v6371_v55  ;;  %v8943_v55 = vld [vmem:[#allocation9 + $0x24] ss:$16 sps:$4 sm:$0xff]  }
0x14c0   :  { %v3988_v3 = vadd.f32 1.0, %v6373_v17  ;;  %v6375_v35 = vpop.eup %6374  ;;  %v8946_v17 = vld [vmem:[#allocation9 + $0x2c] ss:$16 sps:$4 sm:$0xff]  }
0x14c1   :  { %6378 = vrcp.f32 %v3982_v59  ;;  %v6377_v60 = vpop.eup %6376  ;;  %v3995_v5 = vadd.f32 1.0, %v6375_v35  ;;  %v8951_v59 = vld [vmem:[#allocation9 + $0x20] ss:$16 sps:$4 sm:$0xff]   ;;  %v8957_v35 = vld [vmem:[#allocation9 + $0x44] ss:$16 sps:$4 sm:$0xff]  }
0x14c2   :  { %6380 = vrcp.f32 %v3988_v3  ;;  %v8954_v3 = vld [vmem:[#allocation9 + $0x28] ss:$16 sps:$4 sm:$0xff]  }
0x14c3   :  { %6382 = vrcp.f32 %v3995_v5  ;;  %v8972_v5 = vld [vmem:[#allocation9 + $0x6c] ss:$16 sps:$4 sm:$0xff]  }
0x14cb   :  { %v6379_v32 = vpop.eup %6378 }
0x14cc   :  { %v6381_v11 = vpop.eup %6380  ;;  %v3999_v7 = vmul.f32 %v6379_v32, %v6377_v60  ;;  %v8960_v60 = vld [vmem:[#allocation9 + $0x4c] ss:$16 sps:$4 sm:$0xff]   ;;  %v8963_v32 = vld [vmem:[#allocation9 + $0x40] ss:$16 sps:$4 sm:$0xff]  }
0x14cd   :  { %v3998_v31 = vmul.f32 %v6381_v11, %v8838_v52  ;;  %v6383_v61 = vpop.eup %6382  ;;  %v8966_v11 = vld [vmem:[#allocation9 + $0x48] ss:$16 sps:$4 sm:$0xff]  }
0x14cf   :  { %v8884_v33 = vadd.f32 %v3999_v7, %v3998_v31  ;;  %v8969_v7 = vld [vmem:[#allocation9 + $0x64] ss:$16 sps:$4 sm:$0xff]   ;;  %v8975_v31 = vld [vmem:[#allocation9 + $0x60] ss:$16 sps:$4 sm:$0xff]  }
0x14d1   :  { %6384 = vtanh.f32 %v8884_v33 }
0x14db   :  { %v6385_v51 = vpop.eup %6384 }
0x14dc   :  { %v4002_v8 = vmul.f32 %v6385_v51, %v6383_v61  ;;  %v8981_v61 = vld [vmem:[#allocation9 + $0x84] ss:$16 sps:$4 sm:$0xff]   ;;  %v8984_v51 = vld [vmem:[#allocation9 + $0x8c] ss:$16 sps:$4 sm:$0xff]  }
0x14de   :  { %v4011_v46 = vpack.c.bf16 %v4002_v8, %v4002_v8  ;;  %v8987_v8 = vld [vmem:[#allocation9 + $0x80] ss:$16 sps:$4 sm:$0xff]  }
0x14e0   :  { %4045 = vmatmul.mubr.bf16.vlgmr.msra.gmra.mrb[144].mxu0 %v4011_v46  ;;  %4086 = vmatmul.mubr.bf16.vlgmr.msra.gmra.mrb[144].mxu1 %v4011_v46  ;;  %v8990_v46 = vld [vmem:[#allocation9 + $0x88] ss:$16 sps:$4 sm:$0xff]  }
0x14e1   :  { %4132 = vmatpush1.bf16.msra.mxu0 %v8887_v53  ;;  %4173 = vmatpush1.bf16.msra.mxu1 %v8457_v2  ;;  %v8921_v2 = vld [vmem:[#allocation9 + $0x4] ss:$16 sps:$4 sm:$0xff]  }
0x14e2   :  { %4133 = vmatprep.subr.bf16.mxu0 %v8461_v0  ;;  %4174 = vmatprep.subr.bf16.mxu1 %v8463_v12  ;;  %v8924_v0 = vld [vmem:[#allocation9 + $0xc] ss:$16 sps:$4 sm:$0xff]   ;;  %v9768_v12 = vld [vmem:[#allocation26_spill] sm:$0xff] }
0x14e3   :  { %4163 = vmatprep.mubr.bf16.mxu0 %v9642_v26  ;;  %4204 = vmatprep.mubr.bf16.mxu1 %v9642_v26 }
0x14e5   :  { %4134 = vmatpush1.bf16.msra.mxu0 %v8465_v6  ;;  %4175 = vmatpush1.bf16.msra.mxu1 %v8467_v16  ;;  %v3100_v6 = vadd.f32 %v9768_v12, %v8720_v58  ;;  %v9769_v16 = vld [vmem:[#allocation27_spill] sm:$0xff]  ;;  %v8993_v12 = vld [vmem:[#allocation9 + $0xa4] ss:$16 sps:$4 sm:$0xff]  }
0x14e6   :  { %4135 = vmatprep.subr.bf16.mxu0 %v8470_v22  ;;  %4176 = vmatprep.subr.bf16.mxu1 %v8477_v38  ;;  %v3213_v22 = vadd.f32 %v9769_v16, %v8724_v25  ;;  %v8999_v16 = vld [vmem:[#allocation9 + $0xa0] ss:$16 sps:$4 sm:$0xff]  }
0x14e9   :  { %4136 = vmatpush1.bf16.msra.mxu0 %v8474_v4  ;;  %4177 = vmatpush1.bf16.msra.mxu1 %v8482_v39  ;;  %v9770_v4 = vld [vmem:[#allocation28_spill] sm:$0xff] }
0x14ea   :  { %4137 = vmatprep.subr.bf16.mxu0 %v8480_v63  ;;  %4178 = vmatprep.subr.bf16.mxu1 %v8485_v44  ;;  %v3102_v38 = vadd.f32 %v9770_v4, %v8732_v30  ;;  %v9771_v63 = vld [vmem:[#allocation29_spill] sm:$0xff]  ;;  %v9005_v4 = vld [vmem:[#allocation9 + $0xc4] ss:$16 sps:$4 sm:$0xff]  }
0x14eb   :  { %v3215_v39 = vadd.f32 %v9771_v63, %v8736_v15  ;;  %v9011_v63 = vld [vmem:[#allocation9 + $0xc0] ss:$16 sps:$4 sm:$0xff]  }
0x14ed   :  { %4138 = vmatpush1.bf16.msra.mxu0 %v8488_v40  ;;  %4179 = vmatpush1.bf16.msra.mxu1 %v8491_v62 }
0x14ee   :  { %4139 = vmatprep.subr.bf16.mxu0 %v8494_v45  ;;  %4180 = vmatprep.subr.bf16.mxu1 %v8504_v9 }
0x14f1   :  { %4140 = vmatpush1.bf16.msra.mxu0 %v8498_v41  ;;  %4181 = vmatpush1.bf16.msra.mxu1 %v8506_v10 }
0x14f2   :  { %4141 = vmatprep.subr.bf16.mxu0 %v8502_v29  ;;  %4182 = vmatprep.subr.bf16.mxu1 %v8516_v48 }
0x14f5   :  { %4142 = vmatpush1.bf16.msra.mxu0 %v8510_v1  ;;  %4183 = vmatpush1.bf16.msra.mxu1 %v8518_v37 }
0x14f6   :  { %4143 = vmatprep.subr.bf16.mxu0 %v8514_v49  ;;  %4184 = vmatprep.subr.bf16.mxu1 %v8526_v36 }
0x14f9   :  { %4144 = vmatpush1.bf16.msra.mxu0 %v8522_v19  ;;  %4185 = vmatpush1.bf16.msra.mxu1 %v8528_v50 }
0x14fa   :  { %4145 = vmatprep.subr.bf16.mxu0 %v8532_v42  ;;  %4186 = vmatprep.subr.bf16.mxu1 %v8537_v27 }
0x14fd   :  { %4146 = vmatpush1.bf16.msra.mxu0 %v8535_v54  ;;  %4187 = vmatpush1.bf16.msra.mxu1 %v8539_v20 }
0x14fe   :  { %4250 = vmatprep.subr.bf16.mxu0 %v8921_v2  ;;  %4291 = vmatprep.subr.bf16.mxu1 %v8924_v0 }
0x15b3   :  { %v4046_v44 = vpop.f32.mrb[144].mxu0  ;;  %v4087_v40 = vpop.f32.mrb[144].mxu1 }
0x15b4   :  { %v4094_v62 = vadd.f32 %v4046_v44, %v3100_v6  ;;  %v4096_v45 = vadd.f32 %v4087_v40, %v3213_v22  ;;  %v4048_v41 = vpop.f32.mrb[145].mxu0  ;;  %v4089_v29 = vpop.f32.mrb[145].mxu1  ;;  %v8996_v6 = vld [vmem:[#allocation9 + $0xac] ss:$16 sps:$4 sm:$0xff]   ;;  %v9002_v22 = vld [vmem:[#allocation9 + $0xa8] ss:$16 sps:$4 sm:$0xff]  }
0x15b5   :  { %v4095_v9 = vadd.f32 %v4048_v41, %v3102_v38  ;;  %v4097_v10 = vadd.f32 %v4089_v29, %v3215_v39  ;;  %v4050_v1 = vpop.f32.mrb[146].mxu0  ;;  %v4091_v49 = vpop.f32.mrb[146].mxu1  ;;  %v9008_v38 = vld [vmem:[#allocation9 + $0xcc] ss:$16 sps:$4 sm:$0xff]   ;;  %v9014_v39 = vld [vmem:[#allocation9 + $0xc8] ss:$16 sps:$4 sm:$0xff]  }
0x15b6   :  { %v5775_v48 = vmul.f32 -1.442695, %v4094_v62  ;;  %v4051_v37 = vpop.f32.mrb[147].mxu0  ;;  %v4092_v19 = vpop.f32.mrb[147].mxu1  ;;  %v9017_v44 = vld [vmem:[#allocation9 + $0xe4] ss:$16 sps:$4 sm:$0xff]  }
0x15b7   :  { %v5776_v36 = vmul.f32 -1.442695, %v4095_v9  ;;  %v5777_v50 = vmul.f32 -1.442695, %v4097_v10  ;;  %v9020_v40 = vld [vmem:[#allocation9 + $0xec] ss:$16 sps:$4 sm:$0xff]  }
0x15b8   :  { %6386 = vpow2.f32 %v5775_v48  ;;  %v9023_v62 = vld [vmem:[#allocation9 + $0xe0] ss:$16 sps:$4 sm:$0xff]   ;;  %v9773_v9 = vld [vmem:[#allocation31_spill] sm:$0xff]  ;;  %v9775_v48 = vld [vmem:[#allocation33_spill] sm:$0xff] }
0x15b9   :  { %6388 = vpow2.f32 %v5776_v36  ;;  %v9772_v41 = vld [vmem:[#allocation30_spill] sm:$0xff]  ;;  %v3217_v10 = vadd.f32 %v9773_v9, %v8724_v25  ;;  %v9774_v1 = vld [vmem:[#allocation32_spill] sm:$0xff]  ;;  %v3219_v37 = vadd.f32 %v9775_v48, %v8736_v15 }
0x15ba   :  { %6390 = vpow2.f32 %v5777_v50  ;;  %v3104_v29 = vadd.f32 %v9772_v41, %v8720_v58  ;;  %v3106_v49 = vadd.f32 %v9774_v1, %v8732_v30 }
0x15bb   :  { %6392 = vtanh.f32 %v4096_v45  ;;  %v9026_v45 = vld [vmem:[#allocation9 + $0xe8] ss:$16 sps:$4 sm:$0xff]  }
0x15c2   :  { %v6387_v42 = vpop.eup %6386 }
0x15c3   :  { %v6389_v54 = vpop.eup %6388  ;;  %v4101_v27 = vadd.f32 1.0, %v6387_v42 }
0x15c4   :  { %v4107_v20 = vadd.f32 1.0, %v6389_v54  ;;  %v6391_v52 = vpop.eup %6390 }
0x15c5   :  { %6394 = vrcp.f32 %v4101_v27  ;;  %v6393_v13 = vpop.eup %6392  ;;  %v4114_v56 = vadd.f32 1.0, %v6391_v52 }
0x15c6   :  { %6396 = vrcp.f32 %v4107_v20 }
0x15c7   :  { %6398 = vrcp.f32 %v4114_v56 }
0x15cf   :  { %v6395_v43 = vpop.eup %6394 }
0x15d0   :  { %v6397_v28 = vpop.eup %6396  ;;  %v4118_v57 = vmul.f32 %v6395_v43, %v6393_v13 }
0x15d1   :  { %v4117_v21 = vmul.f32 %v6397_v28, %v8884_v33  ;;  %v6399_v24 = vpop.eup %6398  ;;  %v8978_v33 = vld [vmem:[#allocation9 + $0x68] ss:$16 sps:$4 sm:$0xff]  }
0x15d3   :  { %v8936_v23 = vadd.f32 %v4118_v57, %v4117_v21 }
0x15d5   :  { %6400 = vtanh.f32 %v8936_v23 }
0x15df   :  { %v6401_v18 = vpop.eup %6400 }
0x15e0   :  { %v4121_v14 = vmul.f32 %v6401_v18, %v6399_v24 }
0x15e2   :  { %v4130_v47 = vpack.c.bf16 %v4121_v14, %v4121_v14 }
0x15e4   :  { %4164 = vmatmul.mubr.bf16.vlgmr.msra.gmra.mrb[148].mxu0 %v4130_v47  ;;  %4205 = vmatmul.mubr.bf16.vlgmr.msra.gmra.mrb[148].mxu1 %v4130_v47 }
0x15e5   :  { %4251 = vmatpush1.bf16.msra.mxu0 %v8887_v53  ;;  %4292 = vmatpush1.bf16.msra.mxu1 %v8940_v34 }
0x15e6   :  { %4252 = vmatprep.subr.bf16.mxu0 %v8943_v55  ;;  %4293 = vmatprep.subr.bf16.mxu1 %v8946_v17 }
0x15e7   :  { %4282 = vmatprep.mubr.bf16.mxu0 %v9642_v26  ;;  %4323 = vmatprep.mubr.bf16.mxu1 %v9642_v26 }
0x15e9   :  { %4253 = vmatpush1.bf16.msra.mxu0 %v8951_v59  ;;  %4294 = vmatpush1.bf16.msra.mxu1 %v8954_v3 }
0x15ea   :  { %4254 = vmatprep.subr.bf16.mxu0 %v8957_v35  ;;  %4295 = vmatprep.subr.bf16.mxu1 %v8960_v60 }
0x15ed   :  { %4255 = vmatpush1.bf16.msra.mxu0 %v8963_v32  ;;  %4296 = vmatpush1.bf16.msra.mxu1 %v8966_v11 }
0x15ee   :  { %4256 = vmatprep.subr.bf16.mxu0 %v8969_v7  ;;  %4297 = vmatprep.subr.bf16.mxu1 %v8972_v5 }
0x15f1   :  { %4257 = vmatpush1.bf16.msra.mxu0 %v8975_v31  ;;  %4298 = vmatpush1.bf16.msra.mxu1 %v8978_v33 }
0x15f2   :  { %4258 = vmatprep.subr.bf16.mxu0 %v8981_v61  ;;  %4299 = vmatprep.subr.bf16.mxu1 %v8984_v51 }
0x15f5   :  { %4259 = vmatpush1.bf16.msra.mxu0 %v8987_v8  ;;  %4300 = vmatpush1.bf16.msra.mxu1 %v8990_v46 }
0x15f6   :  { %4260 = vmatprep.subr.bf16.mxu0 %v8993_v12  ;;  %4301 = vmatprep.subr.bf16.mxu1 %v8996_v6 }
0x15f9   :  { %4261 = vmatpush1.bf16.msra.mxu0 %v8999_v16  ;;  %4302 = vmatpush1.bf16.msra.mxu1 %v9002_v22 }
0x15fa   :  { %4262 = vmatprep.subr.bf16.mxu0 %v9005_v4  ;;  %4303 = vmatprep.subr.bf16.mxu1 %v9008_v38 }
0x15fd   :  { %4263 = vmatpush1.bf16.msra.mxu0 %v9011_v63  ;;  %4304 = vmatpush1.bf16.msra.mxu1 %v9014_v39 }
0x15fe   :  { %4264 = vmatprep.subr.bf16.mxu0 %v9017_v44  ;;  %4305 = vmatprep.subr.bf16.mxu1 %v9020_v40 }
0x1601   :  { %4265 = vmatpush1.bf16.msra.mxu0 %v9023_v62  ;;  %4306 = vmatpush1.bf16.msra.mxu1 %v9026_v45 }
0x1602   :  { %4369 = vmatprep.subr.bf16.mxu0 %v8921_v2  ;;  %4410 = vmatprep.subr.bf16.mxu1 %v8924_v0 }
0x16b7   :  { %v4165_v19 = vpop.f32.mrb[148].mxu0  ;;  %v4206_v36 = vpop.f32.mrb[148].mxu1 }
0x16b8   :  { %v4213_v50 = vadd.f32 %v4165_v19, %v3104_v29  ;;  %v4215_v42 = vadd.f32 %v4206_v36, %v3217_v10  ;;  %v4167_v54 = vpop.f32.mrb[149].mxu0  ;;  %v4208_v27 = vpop.f32.mrb[149].mxu1 }
0x16b9   :  { %v4214_v20 = vadd.f32 %v4167_v54, %v3106_v49  ;;  %v4216_v52 = vadd.f32 %v4208_v27, %v3219_v37  ;;  %v4169_v13 = vpop.f32.mrb[150].mxu0  ;;  %v4210_v43 = vpop.f32.mrb[150].mxu1 }
0x16ba   :  { %v5778_v28 = vmul.f32 -1.442695, %v4213_v50  ;;  %v4170_v57 = vpop.f32.mrb[151].mxu0  ;;  %v4211_v56 = vpop.f32.mrb[151].mxu1  ;;  %v9778_v13 = vld [vmem:[#allocation36_spill] sm:$0xff] }
0x16bb   :  { %v5779_v21 = vmul.f32 -1.442695, %v4214_v20  ;;  %v5780_v24 = vmul.f32 -1.442695, %v4216_v52  ;;  %v9777_v20 = vld [vmem:[#allocation35_spill] sm:$0xff]  ;;  %v3112_v43 = vadd.f32 %v9778_v13, %v8732_v30 }
0x16bc   :  { %6402 = vpow2.f32 %v5778_v28  ;;  %v3223_v52 = vadd.f32 %v9777_v20, %v8724_v25  ;;  %v9779_v28 = vld [vmem:[#allocation37_spill] sm:$0xff] }
0x16bd   :  { %6404 = vpow2.f32 %v5779_v21  ;;  %v3225_v57 = vadd.f32 %v9779_v28, %v8736_v15 }
0x16be   :  { %6406 = vpow2.f32 %v5780_v24 }
0x16bf   :  { %6408 = vtanh.f32 %v4215_v42 }
0x16c6   :  { %v6403_v18 = vpop.eup %6402 }
0x16c7   :  { %v6405_v14 = vpop.eup %6404  ;;  %v4220_v47 = vadd.f32 1.0, %v6403_v18 }
0x16c8   :  { %v4226_v41 = vadd.f32 1.0, %v6405_v14  ;;  %v6407_v29 = vpop.eup %6406 }
0x16c9   :  { %6410 = vrcp.f32 %v4220_v47  ;;  %v6409_v9 = vpop.eup %6408  ;;  %v4233_v48 = vadd.f32 1.0, %v6407_v29 }
0x16ca   :  { %6412 = vrcp.f32 %v4226_v41 }
0x16cb   :  { %6414 = vrcp.f32 %v4233_v48 }
0x16d3   :  { %v6411_v10 = vpop.eup %6410 }
0x16d4   :  { %v6413_v1 = vpop.eup %6412  ;;  %v4237_v49 = vmul.f32 %v6411_v10, %v6409_v9 }
0x16d5   :  { %v4236_v37 = vmul.f32 %v6413_v1, %v8936_v23  ;;  %v6415_v36 = vpop.eup %6414  ;;  %v9776_v23 = vld [vmem:[#allocation34_spill] sm:$0xff] }
0x16d6   :  { %v3110_v27 = vadd.f32 %v9776_v23, %v8720_v58 }
0x16d7   :  { %v9040_v19 = vadd.f32 %v4237_v49, %v4236_v37 }
0x16d9   :  { %6416 = vtanh.f32 %v9040_v19 }
0x16e3   :  { %v6417_v50 = vpop.eup %6416 }
0x16e4   :  { %v4240_v54 = vmul.f32 %v6417_v50, %v6415_v36 }
0x16e6   :  { %v4249_v42 = vpack.c.bf16 %v4240_v54, %v4240_v54 }
0x16e8   :  { %4283 = vmatmul.mubr.bf16.vlgmr.msra.gmra.mrb[152].mxu0 %v4249_v42  ;;  %4324 = vmatmul.mubr.bf16.vlgmr.msra.gmra.mrb[152].mxu1 %v4249_v42 }
0x16e9   :  { %4370 = vmatpush1.bf16.msra.mxu0 %v8887_v53  ;;  %4411 = vmatpush1.bf16.msra.mxu1 %v8940_v34 }
0x16ea   :  { %4371 = vmatprep.subr.bf16.mxu0 %v8943_v55  ;;  %4412 = vmatprep.subr.bf16.mxu1 %v8946_v17 }
0x16eb   :  { %4401 = vmatprep.mubr.bf16.mxu0 %v9642_v26  ;;  %4442 = vmatprep.mubr.bf16.mxu1 %v9642_v26 }
0x16ed   :  { %4372 = vmatpush1.bf16.msra.mxu0 %v8951_v59  ;;  %4413 = vmatpush1.bf16.msra.mxu1 %v8954_v3 }
0x16ee   :  { %4373 = vmatprep.subr.bf16.mxu0 %v8957_v35  ;;  %4414 = vmatprep.subr.bf16.mxu1 %v8960_v60 }
0x16f1   :  { %4374 = vmatpush1.bf16.msra.mxu0 %v8963_v32  ;;  %4415 = vmatpush1.bf16.msra.mxu1 %v8966_v11 }
0x16f2   :  { %4375 = vmatprep.subr.bf16.mxu0 %v8969_v7  ;;  %4416 = vmatprep.subr.bf16.mxu1 %v8972_v5 }
0x16f5   :  { %4376 = vmatpush1.bf16.msra.mxu0 %v8975_v31  ;;  %4417 = vmatpush1.bf16.msra.mxu1 %v8978_v33 }
0x16f6   :  { %4377 = vmatprep.subr.bf16.mxu0 %v8981_v61  ;;  %4418 = vmatprep.subr.bf16.mxu1 %v8984_v51 }
0x16f9   :  { %4378 = vmatpush1.bf16.msra.mxu0 %v8987_v8  ;;  %4419 = vmatpush1.bf16.msra.mxu1 %v8990_v46 }
0x16fa   :  { %4379 = vmatprep.subr.bf16.mxu0 %v8993_v12  ;;  %4420 = vmatprep.subr.bf16.mxu1 %v8996_v6 }
0x16fd   :  { %4380 = vmatpush1.bf16.msra.mxu0 %v8999_v16  ;;  %4421 = vmatpush1.bf16.msra.mxu1 %v9002_v22 }
0x16fe   :  { %4381 = vmatprep.subr.bf16.mxu0 %v9005_v4  ;;  %4422 = vmatprep.subr.bf16.mxu1 %v9008_v38 }
0x1701   :  { %4382 = vmatpush1.bf16.msra.mxu0 %v9011_v63  ;;  %4423 = vmatpush1.bf16.msra.mxu1 %v9014_v39 }
0x1702   :  { %4383 = vmatprep.subr.bf16.mxu0 %v9017_v44  ;;  %4424 = vmatprep.subr.bf16.mxu1 %v9020_v40 }
0x1705   :  { %4384 = vmatpush1.bf16.msra.mxu0 %v9023_v62  ;;  %4425 = vmatpush1.bf16.msra.mxu1 %v9026_v45 }
0x1706   :  { %4488 = vmatprep.subr.bf16.mxu0 %v8921_v2  ;;  %4529 = vmatprep.subr.bf16.mxu1 %v8924_v0 }
0x17bb   :  { %v4284_v56 = vpop.f32.mrb[152].mxu0  ;;  %v4325_v21 = vpop.f32.mrb[152].mxu1 }
0x17bc   :  { %v4332_v24 = vadd.f32 %v4284_v56, %v3110_v27  ;;  %v4334_v18 = vadd.f32 %v4325_v21, %v3223_v52  ;;  %v4286_v14 = vpop.f32.mrb[153].mxu0  ;;  %v4327_v47 = vpop.f32.mrb[153].mxu1 }
0x17bd   :  { %v4333_v41 = vadd.f32 %v4286_v14, %v3112_v43  ;;  %v4335_v29 = vadd.f32 %v4327_v47, %v3225_v57  ;;  %v4288_v9 = vpop.f32.mrb[154].mxu0  ;;  %v4329_v10 = vpop.f32.mrb[154].mxu1 }
0x17be   :  { %v5781_v1 = vmul.f32 -1.442695, %v4332_v24  ;;  %v4289_v49 = vpop.f32.mrb[155].mxu0  ;;  %v4330_v48 = vpop.f32.mrb[155].mxu1  ;;  %v9782_v9 = vld [vmem:[#allocation40_spill] sm:$0xff] }
0x17bf   :  { %v5782_v37 = vmul.f32 -1.442695, %v4333_v41  ;;  %v5783_v36 = vmul.f32 -1.442695, %v4335_v29  ;;  %v9781_v41 = vld [vmem:[#allocation39_spill] sm:$0xff]  ;;  %v3116_v10 = vadd.f32 %v9782_v9, %v8732_v30 }
0x17c0   :  { %6418 = vpow2.f32 %v5781_v1  ;;  %v3227_v29 = vadd.f32 %v9781_v41, %v8724_v25  ;;  %v9783_v1 = vld [vmem:[#allocation41_spill] sm:$0xff] }
0x17c1   :  { %6420 = vpow2.f32 %v5782_v37  ;;  %v3229_v49 = vadd.f32 %v9783_v1, %v8736_v15 }
0x17c2   :  { %6422 = vpow2.f32 %v5783_v36 }
0x17c3   :  { %6424 = vtanh.f32 %v4334_v18 }
0x17ca   :  { %v6419_v50 = vpop.eup %6418 }
0x17cb   :  { %v6421_v54 = vpop.eup %6420  ;;  %v4339_v42 = vadd.f32 1.0, %v6419_v50 }
0x17cc   :  { %v4345_v23 = vadd.f32 1.0, %v6421_v54  ;;  %v6423_v27 = vpop.eup %6422 }
0x17cd   :  { %6426 = vrcp.f32 %v4339_v42  ;;  %v6425_v20 = vpop.eup %6424  ;;  %v4352_v28 = vadd.f32 1.0, %v6423_v27 }
0x17ce   :  { %6428 = vrcp.f32 %v4345_v23 }
0x17cf   :  { %6430 = vrcp.f32 %v4352_v28 }
0x17d7   :  { %v6427_v52 = vpop.eup %6426 }
0x17d8   :  { %v6429_v13 = vpop.eup %6428  ;;  %v4356_v43 = vmul.f32 %v6427_v52, %v6425_v20 }
0x17d9   :  { %v4355_v57 = vmul.f32 %v6429_v13, %v9040_v19  ;;  %v6431_v21 = vpop.eup %6430  ;;  %v9780_v19 = vld [vmem:[#allocation38_spill] sm:$0xff] }
0x17da   :  { %v3114_v47 = vadd.f32 %v9780_v19, %v8720_v58 }
0x17db   :  { %v9086_v56 = vadd.f32 %v4356_v43, %v4355_v57 }
0x17dd   :  { %6432 = vtanh.f32 %v9086_v56 }
0x17e7   :  { %v6433_v24 = vpop.eup %6432 }
0x17e8   :  { %v4359_v14 = vmul.f32 %v6433_v24, %v6431_v21 }
0x17ea   :  { %v4368_v18 = vpack.c.bf16 %v4359_v14, %v4359_v14 }
0x17ec   :  { %4402 = vmatmul.mubr.bf16.vlgmr.msra.gmra.mrb[156].mxu0 %v4368_v18  ;;  %4443 = vmatmul.mubr.bf16.vlgmr.msra.gmra.mrb[156].mxu1 %v4368_v18 }
0x17ed   :  { %4489 = vmatpush1.bf16.msra.mxu0 %v8887_v53  ;;  %4530 = vmatpush1.bf16.msra.mxu1 %v8940_v34 }
0x17ee   :  { %4490 = vmatprep.subr.bf16.mxu0 %v8943_v55  ;;  %4531 = vmatprep.subr.bf16.mxu1 %v8946_v17 }
0x17ef   :  { %4520 = vmatprep.mubr.bf16.mxu0 %v9642_v26  ;;  %4561 = vmatprep.mubr.bf16.mxu1 %v9642_v26 }
0x17f1   :  { %4491 = vmatpush1.bf16.msra.mxu0 %v8951_v59  ;;  %4532 = vmatpush1.bf16.msra.mxu1 %v8954_v3 }
0x17f2   :  { %4492 = vmatprep.subr.bf16.mxu0 %v8957_v35  ;;  %4533 = vmatprep.subr.bf16.mxu1 %v8960_v60 }
0x17f5   :  { %4493 = vmatpush1.bf16.msra.mxu0 %v8963_v32  ;;  %4534 = vmatpush1.bf16.msra.mxu1 %v8966_v11 }
0x17f6   :  { %4494 = vmatprep.subr.bf16.mxu0 %v8969_v7  ;;  %4535 = vmatprep.subr.bf16.mxu1 %v8972_v5 }
0x17f9   :  { %4495 = vmatpush1.bf16.msra.mxu0 %v8975_v31  ;;  %4536 = vmatpush1.bf16.msra.mxu1 %v8978_v33 }
0x17fa   :  { %4496 = vmatprep.subr.bf16.mxu0 %v8981_v61  ;;  %4537 = vmatprep.subr.bf16.mxu1 %v8984_v51 }
0x17fd   :  { %4497 = vmatpush1.bf16.msra.mxu0 %v8987_v8  ;;  %4538 = vmatpush1.bf16.msra.mxu1 %v8990_v46 }
0x17fe   :  { %4498 = vmatprep.subr.bf16.mxu0 %v8993_v12  ;;  %4539 = vmatprep.subr.bf16.mxu1 %v8996_v6 }
0x1801   :  { %4499 = vmatpush1.bf16.msra.mxu0 %v8999_v16  ;;  %4540 = vmatpush1.bf16.msra.mxu1 %v9002_v22 }
0x1802   :  { %4500 = vmatprep.subr.bf16.mxu0 %v9005_v4  ;;  %4541 = vmatprep.subr.bf16.mxu1 %v9008_v38 }
0x1805   :  { %4501 = vmatpush1.bf16.msra.mxu0 %v9011_v63  ;;  %4542 = vmatpush1.bf16.msra.mxu1 %v9014_v39 }
0x1806   :  { %4502 = vmatprep.subr.bf16.mxu0 %v9017_v44  ;;  %4543 = vmatprep.subr.bf16.mxu1 %v9020_v40 }
0x1809   :  { %4503 = vmatpush1.bf16.msra.mxu0 %v9023_v62  ;;  %4544 = vmatpush1.bf16.msra.mxu1 %v9026_v45 }
0x180a   :  { %4607 = vmatprep.subr.bf16.mxu0 %v8921_v2  ;;  %4648 = vmatprep.subr.bf16.mxu1 %v8924_v0 }
0x18bf   :  { %v4403_v48 = vpop.f32.mrb[156].mxu0  ;;  %v4444_v37 = vpop.f32.mrb[156].mxu1 }
0x18c0   :  { %v4451_v36 = vadd.f32 %v4403_v48, %v3114_v47  ;;  %v4453_v50 = vadd.f32 %v4444_v37, %v3227_v29  ;;  %v4405_v54 = vpop.f32.mrb[157].mxu0  ;;  %v4446_v42 = vpop.f32.mrb[157].mxu1 }
0x18c1   :  { %v4452_v23 = vadd.f32 %v4405_v54, %v3116_v10  ;;  %v4454_v27 = vadd.f32 %v4446_v42, %v3229_v49  ;;  %v4407_v20 = vpop.f32.mrb[158].mxu0  ;;  %v4448_v52 = vpop.f32.mrb[158].mxu1 }
0x18c2   :  { %v5784_v13 = vmul.f32 -1.442695, %v4451_v36  ;;  %v4408_v43 = vpop.f32.mrb[159].mxu0  ;;  %v4449_v28 = vpop.f32.mrb[159].mxu1  ;;  %v9786_v20 = vld [vmem:[#allocation44_spill] sm:$0xff] }
0x18c3   :  { %v5785_v57 = vmul.f32 -1.442695, %v4452_v23  ;;  %v5786_v21 = vmul.f32 -1.442695, %v4454_v27  ;;  %v9785_v23 = vld [vmem:[#allocation43_spill] sm:$0xff]  ;;  %v3122_v52 = vadd.f32 %v9786_v20, %v8732_v30 }
0x18c4   :  { %6434 = vpow2.f32 %v5784_v13  ;;  %v3233_v27 = vadd.f32 %v9785_v23, %v8724_v25  ;;  %v9787_v13 = vld [vmem:[#allocation45_spill] sm:$0xff] }
0x18c5   :  { %6436 = vpow2.f32 %v5785_v57  ;;  %v3235_v43 = vadd.f32 %v9787_v13, %v8736_v15 }
0x18c6   :  { %6438 = vpow2.f32 %v5786_v21 }
0x18c7   :  { %6440 = vtanh.f32 %v4453_v50 }
0x18ce   :  { %v6435_v24 = vpop.eup %6434 }
0x18cf   :  { %v6437_v14 = vpop.eup %6436  ;;  %v4458_v18 = vadd.f32 1.0, %v6435_v24 }
0x18d0   :  { %v4464_v19 = vadd.f32 1.0, %v6437_v14  ;;  %v6439_v47 = vpop.eup %6438 }
0x18d1   :  { %6442 = vrcp.f32 %v4458_v18  ;;  %v6441_v41 = vpop.eup %6440  ;;  %v4471_v1 = vadd.f32 1.0, %v6439_v47 }
0x18d2   :  { %6444 = vrcp.f32 %v4464_v19 }
0x18d3   :  { %6446 = vrcp.f32 %v4471_v1 }
0x18db   :  { %v6443_v29 = vpop.eup %6442 }
0x18dc   :  { %v6445_v9 = vpop.eup %6444  ;;  %v4475_v10 = vmul.f32 %v6443_v29, %v6441_v41 }
0x18dd   :  { %v4474_v49 = vmul.f32 %v6445_v9, %v9086_v56  ;;  %v6447_v37 = vpop.eup %6446  ;;  %v9784_v56 = vld [vmem:[#allocation42_spill] sm:$0xff] }
0x18de   :  { %v3120_v42 = vadd.f32 %v9784_v56, %v8720_v58 }
0x18df   :  { %v9132_v48 = vadd.f32 %v4475_v10, %v4474_v49 }
0x18e1   :  { %6448 = vtanh.f32 %v9132_v48 }
0x18eb   :  { %v6449_v36 = vpop.eup %6448 }
0x18ec   :  { %v4478_v54 = vmul.f32 %v6449_v36, %v6447_v37 }
0x18ee   :  { %v4487_v50 = vpack.c.bf16 %v4478_v54, %v4478_v54 }
0x18f0   :  { %4521 = vmatmul.mubr.bf16.vlgmr.msra.gmra.mrb[160].mxu0 %v4487_v50  ;;  %4562 = vmatmul.mubr.bf16.vlgmr.msra.gmra.mrb[160].mxu1 %v4487_v50 }
0x18f1   :  { %4608 = vmatpush1.bf16.msra.mxu0 %v8887_v53  ;;  %4649 = vmatpush1.bf16.msra.mxu1 %v8940_v34 }
0x18f2   :  { %4609 = vmatprep.subr.bf16.mxu0 %v8943_v55  ;;  %4650 = vmatprep.subr.bf16.mxu1 %v8946_v17 }
0x18f3   :  { %4639 = vmatprep.mubr.bf16.mxu0 %v9642_v26  ;;  %4680 = vmatprep.mubr.bf16.mxu1 %v9642_v26 }
0x18f5   :  { %4610 = vmatpush1.bf16.msra.mxu0 %v8951_v59  ;;  %4651 = vmatpush1.bf16.msra.mxu1 %v8954_v3 }
0x18f6   :  { %4611 = vmatprep.subr.bf16.mxu0 %v8957_v35  ;;  %4652 = vmatprep.subr.bf16.mxu1 %v8960_v60 }
0x18f9   :  { %4612 = vmatpush1.bf16.msra.mxu0 %v8963_v32  ;;  %4653 = vmatpush1.bf16.msra.mxu1 %v8966_v11 }
0x18fa   :  { %4613 = vmatprep.subr.bf16.mxu0 %v8969_v7  ;;  %4654 = vmatprep.subr.bf16.mxu1 %v8972_v5 }
0x18fd   :  { %4614 = vmatpush1.bf16.msra.mxu0 %v8975_v31  ;;  %4655 = vmatpush1.bf16.msra.mxu1 %v8978_v33 }
0x18fe   :  { %4615 = vmatprep.subr.bf16.mxu0 %v8981_v61  ;;  %4656 = vmatprep.subr.bf16.mxu1 %v8984_v51 }
0x1901   :  { %4616 = vmatpush1.bf16.msra.mxu0 %v8987_v8  ;;  %4657 = vmatpush1.bf16.msra.mxu1 %v8990_v46 }
0x1902   :  { %4617 = vmatprep.subr.bf16.mxu0 %v8993_v12  ;;  %4658 = vmatprep.subr.bf16.mxu1 %v8996_v6 }
0x1905   :  { %4618 = vmatpush1.bf16.msra.mxu0 %v8999_v16  ;;  %4659 = vmatpush1.bf16.msra.mxu1 %v9002_v22 }
0x1906   :  { %4619 = vmatprep.subr.bf16.mxu0 %v9005_v4  ;;  %4660 = vmatprep.subr.bf16.mxu1 %v9008_v38 }
0x1909   :  { %4620 = vmatpush1.bf16.msra.mxu0 %v9011_v63  ;;  %4661 = vmatpush1.bf16.msra.mxu1 %v9014_v39 }
0x190a   :  { %4621 = vmatprep.subr.bf16.mxu0 %v9017_v44  ;;  %4662 = vmatprep.subr.bf16.mxu1 %v9020_v40 }
0x190d   :  { %4622 = vmatpush1.bf16.msra.mxu0 %v9023_v62  ;;  %4663 = vmatpush1.bf16.msra.mxu1 %v9026_v45 }
0x190e   :  { %4726 = vmatprep.subr.bf16.mxu0 %v8921_v2  ;;  %4767 = vmatprep.subr.bf16.mxu1 %v8924_v0 }
0x19c3   :  { %v4522_v28 = vpop.f32.mrb[160].mxu0  ;;  %v4563_v57 = vpop.f32.mrb[160].mxu1 }
0x19c4   :  { %v4570_v21 = vadd.f32 %v4522_v28, %v3120_v42  ;;  %v4572_v24 = vadd.f32 %v4563_v57, %v3233_v27  ;;  %v4524_v14 = vpop.f32.mrb[161].mxu0  ;;  %v4565_v18 = vpop.f32.mrb[161].mxu1 }
0x19c5   :  { %v4571_v19 = vadd.f32 %v4524_v14, %v3122_v52  ;;  %v4573_v47 = vadd.f32 %v4565_v18, %v3235_v43  ;;  %v4526_v41 = vpop.f32.mrb[162].mxu0  ;;  %v4567_v29 = vpop.f32.mrb[162].mxu1 }
0x19c6   :  { %v5787_v9 = vmul.f32 -1.442695, %v4570_v21  ;;  %v4527_v10 = vpop.f32.mrb[163].mxu0  ;;  %v4568_v1 = vpop.f32.mrb[163].mxu1  ;;  %v9790_v41 = vld [vmem:[#allocation48_spill] sm:$0xff] }
0x19c7   :  { %v5788_v49 = vmul.f32 -1.442695, %v4571_v19  ;;  %v5789_v37 = vmul.f32 -1.442695, %v4573_v47  ;;  %v9789_v19 = vld [vmem:[#allocation47_spill] sm:$0xff]  ;;  %v3126_v29 = vadd.f32 %v9790_v41, %v8732_v30 }
0x19c8   :  { %6450 = vpow2.f32 %v5787_v9  ;;  %v3237_v47 = vadd.f32 %v9789_v19, %v8724_v25  ;;  %v9791_v9 = vld [vmem:[#allocation49_spill] sm:$0xff] }
0x19c9   :  { %6452 = vpow2.f32 %v5788_v49  ;;  %v3239_v10 = vadd.f32 %v9791_v9, %v8736_v15 }
0x19ca   :  { %6454 = vpow2.f32 %v5789_v37 }
0x19cb   :  { %6456 = vtanh.f32 %v4572_v24 }
0x19d2   :  { %v6451_v36 = vpop.eup %6450 }
0x19d3   :  { %v6453_v54 = vpop.eup %6452  ;;  %v4577_v50 = vadd.f32 1.0, %v6451_v36 }
0x19d4   :  { %v4583_v56 = vadd.f32 1.0, %v6453_v54  ;;  %v6455_v42 = vpop.eup %6454 }
0x19d5   :  { %6458 = vrcp.f32 %v4577_v50  ;;  %v6457_v23 = vpop.eup %6456  ;;  %v4590_v13 = vadd.f32 1.0, %v6455_v42 }
0x19d6   :  { %6460 = vrcp.f32 %v4583_v56 }
0x19d7   :  { %6462 = vrcp.f32 %v4590_v13 }
0x19df   :  { %v6459_v27 = vpop.eup %6458 }
0x19e0   :  { %v6461_v20 = vpop.eup %6460  ;;  %v4594_v52 = vmul.f32 %v6459_v27, %v6457_v23 }
0x19e1   :  { %v4593_v43 = vmul.f32 %v6461_v20, %v9132_v48  ;;  %v6463_v57 = vpop.eup %6462  ;;  %v9788_v48 = vld [vmem:[#allocation46_spill] sm:$0xff] }
0x19e2   :  { %v3124_v18 = vadd.f32 %v9788_v48, %v8720_v58 }
0x19e3   :  { %v9178_v28 = vadd.f32 %v4594_v52, %v4593_v43 }
0x19e5   :  { %6464 = vtanh.f32 %v9178_v28 }
0x19ef   :  { %v6465_v21 = vpop.eup %6464 }
0x19f0   :  { %v4597_v14 = vmul.f32 %v6465_v21, %v6463_v57 }
0x19f2   :  { %v4606_v24 = vpack.c.bf16 %v4597_v14, %v4597_v14 }
0x19f4   :  { %4640 = vmatmul.mubr.bf16.vlgmr.msra.gmra.mrb[164].mxu0 %v4606_v24  ;;  %4681 = vmatmul.mubr.bf16.vlgmr.msra.gmra.mrb[164].mxu1 %v4606_v24 }
0x19f5   :  { %4727 = vmatpush1.bf16.msra.mxu0 %v8887_v53  ;;  %4768 = vmatpush1.bf16.msra.mxu1 %v8940_v34 }
0x19f6   :  { %4728 = vmatprep.subr.bf16.mxu0 %v8943_v55  ;;  %4769 = vmatprep.subr.bf16.mxu1 %v8946_v17 }
0x19f7   :  { %4758 = vmatprep.mubr.bf16.mxu0 %v9642_v26  ;;  %4799 = vmatprep.mubr.bf16.mxu1 %v9642_v26 }
0x19f9   :  { %4729 = vmatpush1.bf16.msra.mxu0 %v8951_v59  ;;  %4770 = vmatpush1.bf16.msra.mxu1 %v8954_v3 }
0x19fa   :  { %4730 = vmatprep.subr.bf16.mxu0 %v8957_v35  ;;  %4771 = vmatprep.subr.bf16.mxu1 %v8960_v60 }
0x19fd   :  { %4731 = vmatpush1.bf16.msra.mxu0 %v8963_v32  ;;  %4772 = vmatpush1.bf16.msra.mxu1 %v8966_v11 }
0x19fe   :  { %4732 = vmatprep.subr.bf16.mxu0 %v8969_v7  ;;  %4773 = vmatprep.subr.bf16.mxu1 %v8972_v5 }
0x1a01   :  { %4733 = vmatpush1.bf16.msra.mxu0 %v8975_v31  ;;  %4774 = vmatpush1.bf16.msra.mxu1 %v8978_v33 }
0x1a02   :  { %4734 = vmatprep.subr.bf16.mxu0 %v8981_v61  ;;  %4775 = vmatprep.subr.bf16.mxu1 %v8984_v51 }
0x1a05   :  { %4735 = vmatpush1.bf16.msra.mxu0 %v8987_v8  ;;  %4776 = vmatpush1.bf16.msra.mxu1 %v8990_v46 }
0x1a06   :  { %4736 = vmatprep.subr.bf16.mxu0 %v8993_v12  ;;  %4777 = vmatprep.subr.bf16.mxu1 %v8996_v6 }
0x1a09   :  { %4737 = vmatpush1.bf16.msra.mxu0 %v8999_v16  ;;  %4778 = vmatpush1.bf16.msra.mxu1 %v9002_v22 }
0x1a0a   :  { %4738 = vmatprep.subr.bf16.mxu0 %v9005_v4  ;;  %4779 = vmatprep.subr.bf16.mxu1 %v9008_v38 }
0x1a0d   :  { %4739 = vmatpush1.bf16.msra.mxu0 %v9011_v63  ;;  %4780 = vmatpush1.bf16.msra.mxu1 %v9014_v39 }
0x1a0e   :  { %4740 = vmatprep.subr.bf16.mxu0 %v9017_v44  ;;  %4781 = vmatprep.subr.bf16.mxu1 %v9020_v40 }
0x1a11   :  { %4741 = vmatpush1.bf16.msra.mxu0 %v9023_v62  ;;  %4782 = vmatpush1.bf16.msra.mxu1 %v9026_v45 }
0x1a12   :  { %4845 = vmatprep.subr.bf16.mxu0 %v8921_v2  ;;  %4886 = vmatprep.subr.bf16.mxu1 %v8924_v0 }
0x1ac7   :  { %v4641_v1 = vpop.f32.mrb[164].mxu0  ;;  %v4682_v49 = vpop.f32.mrb[164].mxu1 }
0x1ac8   :  { %v4689_v37 = vadd.f32 %v4641_v1, %v3124_v18  ;;  %v4691_v36 = vadd.f32 %v4682_v49, %v3237_v47  ;;  %v4643_v54 = vpop.f32.mrb[165].mxu0  ;;  %v4684_v50 = vpop.f32.mrb[165].mxu1 }
0x1ac9   :  { %v4690_v56 = vadd.f32 %v4643_v54, %v3126_v29  ;;  %v4692_v42 = vadd.f32 %v4684_v50, %v3239_v10  ;;  %v4645_v23 = vpop.f32.mrb[166].mxu0  ;;  %v4686_v27 = vpop.f32.mrb[166].mxu1  ;;  %v9793_v50 = vld [vmem:[#allocation51_spill] sm:$0xff] }
0x1aca   :  { %v5790_v20 = vmul.f32 -1.442695, %v4689_v37  ;;  %v4646_v52 = vpop.f32.mrb[167].mxu0  ;;  %v4687_v13 = vpop.f32.mrb[167].mxu1  ;;  %v9795_v27 = vld [vmem:[#allocation53_spill] sm:$0xff] }
0x1acb   :  { %v5791_v43 = vmul.f32 -1.442695, %v4690_v56  ;;  %v5792_v57 = vmul.f32 -1.442695, %v4692_v42  ;;  %v3243_v56 = vadd.f32 %v9793_v50, %v8724_v25  ;;  %v9794_v42 = vld [vmem:[#allocation52_spill] sm:$0xff] }
0x1acc   :  { %6466 = vpow2.f32 %v5790_v20  ;;  %v3132_v23 = vadd.f32 %v9794_v42, %v8732_v30  ;;  %v3245_v20 = vadd.f32 %v9795_v27, %v8736_v15 }
0x1acd   :  { %6468 = vpow2.f32 %v5791_v43 }
0x1ace   :  { %6470 = vpow2.f32 %v5792_v57 }
0x1acf   :  { %6472 = vtanh.f32 %v4691_v36 }
0x1ad6   :  { %v6467_v21 = vpop.eup %6466 }
0x1ad7   :  { %v6469_v14 = vpop.eup %6468  ;;  %v4696_v24 = vadd.f32 1.0, %v6467_v21 }
0x1ad8   :  { %v4702_v48 = vadd.f32 1.0, %v6469_v14  ;;  %v6471_v18 = vpop.eup %6470 }
0x1ad9   :  { %6474 = vrcp.f32 %v4696_v24  ;;  %v6473_v19 = vpop.eup %6472  ;;  %v4709_v9 = vadd.f32 1.0, %v6471_v18 }
0x1ada   :  { %6476 = vrcp.f32 %v4702_v48 }
0x1adb   :  { %6478 = vrcp.f32 %v4709_v9 }
0x1ae3   :  { %v6475_v47 = vpop.eup %6474 }
0x1ae4   :  { %v6477_v41 = vpop.eup %6476  ;;  %v4713_v29 = vmul.f32 %v6475_v47, %v6473_v19 }
0x1ae5   :  { %v4712_v10 = vmul.f32 %v6477_v41, %v9178_v28  ;;  %v6479_v49 = vpop.eup %6478 }
0x1ae7   :  { %v9224_v1 = vadd.f32 %v4713_v29, %v4712_v10 }
0x1ae9   :  { %6480 = vtanh.f32 %v9224_v1 }
0x1af3   :  { %v6481_v37 = vpop.eup %6480 }
0x1af4   :  { %v4716_v54 = vmul.f32 %v6481_v37, %v6479_v49 }
0x1af6   :  { %v4725_v36 = vpack.c.bf16 %v4716_v54, %v4716_v54 }
0x1af8   :  { %4759 = vmatmul.mubr.bf16.vlgmr.msra.gmra.mrb[168].mxu0 %v4725_v36  ;;  %4800 = vmatmul.mubr.bf16.vlgmr.msra.gmra.mrb[168].mxu1 %v4725_v36 }
0x1af9   :  { %4846 = vmatpush1.bf16.msra.mxu0 %v8887_v53  ;;  %4887 = vmatpush1.bf16.msra.mxu1 %v8940_v34  ;;  %v9792_v53 = vld [vmem:[#allocation50_spill] sm:$0xff] }
0x1afa   :  { %4847 = vmatprep.subr.bf16.mxu0 %v8943_v55  ;;  %4888 = vmatprep.subr.bf16.mxu1 %v8946_v17  ;;  %v3130_v28 = vadd.f32 %v9792_v53, %v8720_v58 }
0x1afb   :  { %4877 = vmatprep.mubr.bf16.mxu0 %v9642_v26  ;;  %4918 = vmatprep.mubr.bf16.mxu1 %v9642_v26 }
0x1afd   :  { %4848 = vmatpush1.bf16.msra.mxu0 %v8951_v59  ;;  %4889 = vmatpush1.bf16.msra.mxu1 %v8954_v3 }
0x1afe   :  { %4849 = vmatprep.subr.bf16.mxu0 %v8957_v35  ;;  %4890 = vmatprep.subr.bf16.mxu1 %v8960_v60 }
0x1b01   :  { %4850 = vmatpush1.bf16.msra.mxu0 %v8963_v32  ;;  %4891 = vmatpush1.bf16.msra.mxu1 %v8966_v11 }
0x1b02   :  { %4851 = vmatprep.subr.bf16.mxu0 %v8969_v7  ;;  %4892 = vmatprep.subr.bf16.mxu1 %v8972_v5 }
0x1b05   :  { %4852 = vmatpush1.bf16.msra.mxu0 %v8975_v31  ;;  %4893 = vmatpush1.bf16.msra.mxu1 %v8978_v33 }
0x1b06   :  { %4853 = vmatprep.subr.bf16.mxu0 %v8981_v61  ;;  %4894 = vmatprep.subr.bf16.mxu1 %v8984_v51 }
0x1b09   :  { %4854 = vmatpush1.bf16.msra.mxu0 %v8987_v8  ;;  %4895 = vmatpush1.bf16.msra.mxu1 %v8990_v46 }
0x1b0a   :  { %4855 = vmatprep.subr.bf16.mxu0 %v8993_v12  ;;  %4896 = vmatprep.subr.bf16.mxu1 %v8996_v6 }
0x1b0d   :  { %4856 = vmatpush1.bf16.msra.mxu0 %v8999_v16  ;;  %4897 = vmatpush1.bf16.msra.mxu1 %v9002_v22 }
0x1b0e   :  { %4857 = vmatprep.subr.bf16.mxu0 %v9005_v4  ;;  %4898 = vmatprep.subr.bf16.mxu1 %v9008_v38 }
0x1b11   :  { %4858 = vmatpush1.bf16.msra.mxu0 %v9011_v63  ;;  %4899 = vmatpush1.bf16.msra.mxu1 %v9014_v39 }
0x1b12   :  { %4859 = vmatprep.subr.bf16.mxu0 %v9017_v44  ;;  %4900 = vmatprep.subr.bf16.mxu1 %v9020_v40 }
0x1b15   :  { %4860 = vmatpush1.bf16.msra.mxu0 %v9023_v62  ;;  %4901 = vmatpush1.bf16.msra.mxu1 %v9026_v45 }
0x1b16   :  { %4964 = vmatprep.subr.bf16.mxu0 %v8921_v2  ;;  %5005 = vmatprep.subr.bf16.mxu1 %v8924_v0 }
0x1bcb   :  { %v4760_v52 = vpop.f32.mrb[168].mxu0  ;;  %v4801_v13 = vpop.f32.mrb[168].mxu1 }
0x1bcc   :  { %v4808_v43 = vadd.f32 %v4760_v52, %v3130_v28  ;;  %v4810_v57 = vadd.f32 %v4801_v13, %v3243_v56  ;;  %v4762_v21 = vpop.f32.mrb[169].mxu0  ;;  %v4803_v2 = vpop.f32.mrb[169].mxu1 }
0x1bcd   :  { %v4809_v14 = vadd.f32 %v4762_v21, %v3132_v23  ;;  %v4811_v0 = vadd.f32 %v4803_v2, %v3245_v20  ;;  %v4764_v24 = vpop.f32.mrb[170].mxu0  ;;  %v4805_v48 = vpop.f32.mrb[170].mxu1 }
0x1bce   :  { %v5793_v18 = vmul.f32 -1.442695, %v4808_v43  ;;  %v4765_v19 = vpop.f32.mrb[171].mxu0  ;;  %v4806_v47 = vpop.f32.mrb[171].mxu1  ;;  %v9273_v43 = vld [vmem:[#allocation9] ss:$16 sps:$4 sm:$0xff]  }
0x1bcf   :  { %v5794_v41 = vmul.f32 -1.442695, %v4809_v14  ;;  %v5795_v29 = vmul.f32 -1.442695, %v4811_v0 }
0x1bd0   :  { %6482 = vpow2.f32 %v5793_v18 }
0x1bd1   :  { %6484 = vpow2.f32 %v5794_v41 }
0x1bd2   :  { %6486 = vpow2.f32 %v5795_v29  ;;  %v9326_v29 = vld [vmem:[#allocation9 + $0x8] ss:$16 sps:$4 sm:$0xff]  }
0x1bd3   :  { %6488 = vtanh.f32 %v4810_v57 }
0x1bda   :  { %v6483_v9 = vpop.eup %6482 }
0x1bdb   :  { %v6485_v10 = vpop.eup %6484  ;;  %v4815_v49 = vadd.f32 1.0, %v6483_v9  ;;  %v9329_v9 = vld [vmem:[#allocation9 + $0x24] ss:$16 sps:$4 sm:$0xff]  }
0x1bdc   :  { %v4821_v37 = vadd.f32 1.0, %v6485_v10  ;;  %v6487_v54 = vpop.eup %6486  ;;  %v9332_v10 = vld [vmem:[#allocation9 + $0x2c] ss:$16 sps:$4 sm:$0xff]  }
0x1bdd   :  { %6490 = vrcp.f32 %v4815_v49  ;;  %v6489_v36 = vpop.eup %6488  ;;  %v4828_v56 = vadd.f32 1.0, %v6487_v54  ;;  %v9337_v49 = vld [vmem:[#allocation9 + $0x20] ss:$16 sps:$4 sm:$0xff]   ;;  %v9343_v54 = vld [vmem:[#allocation9 + $0x44] ss:$16 sps:$4 sm:$0xff]  }
0x1bde   :  { %6492 = vrcp.f32 %v4821_v37  ;;  %v9340_v37 = vld [vmem:[#allocation9 + $0x28] ss:$16 sps:$4 sm:$0xff]  }
0x1bdf   :  { %6494 = vrcp.f32 %v4828_v56  ;;  %v9358_v56 = vld [vmem:[#allocation9 + $0x6c] ss:$16 sps:$4 sm:$0xff]  }
0x1be7   :  { %v6491_v53 = vpop.eup %6490 }
0x1be8   :  { %v6493_v28 = vpop.eup %6492  ;;  %v4832_v50 = vmul.f32 %v6491_v53, %v6489_v36  ;;  %v9346_v36 = vld [vmem:[#allocation9 + $0x4c] ss:$16 sps:$4 sm:$0xff]   ;;  %v9349_v53 = vld [vmem:[#allocation9 + $0x40] ss:$16 sps:$4 sm:$0xff]  }
0x1be9   :  { %v4831_v42 = vmul.f32 %v6493_v28, %v9224_v1  ;;  %v6495_v27 = vpop.eup %6494  ;;  %v9352_v28 = vld [vmem:[#allocation9 + $0x48] ss:$16 sps:$4 sm:$0xff]  }
0x1beb   :  { %v9270_v23 = vadd.f32 %v4832_v50, %v4831_v42  ;;  %v9355_v50 = vld [vmem:[#allocation9 + $0x64] ss:$16 sps:$4 sm:$0xff]   ;;  %v9361_v42 = vld [vmem:[#allocation9 + $0x60] ss:$16 sps:$4 sm:$0xff]  }
0x1bed   :  { %6496 = vtanh.f32 %v9270_v23 }
0x1bf7   :  { %v6497_v20 = vpop.eup %6496 }
0x1bf8   :  { %v4835_v52 = vmul.f32 %v6497_v20, %v6495_v27  ;;  %v9367_v27 = vld [vmem:[#allocation9 + $0x84] ss:$16 sps:$4 sm:$0xff]   ;;  %v9370_v20 = vld [vmem:[#allocation9 + $0x8c] ss:$16 sps:$4 sm:$0xff]  }
0x1bfa   :  { %v4844_v13 = vpack.c.bf16 %v4835_v52, %v4835_v52  ;;  %v9373_v52 = vld [vmem:[#allocation9 + $0x80] ss:$16 sps:$4 sm:$0xff]  }
0x1bfc   :  { %4878 = vmatmul.mubr.bf16.vlgmr.msra.gmra.mrb[172].mxu0 %v4844_v13  ;;  %4919 = vmatmul.mubr.bf16.vlgmr.msra.gmra.mrb[172].mxu1 %v4844_v13  ;;  %v9376_v13 = vld [vmem:[#allocation9 + $0x88] ss:$16 sps:$4 sm:$0xff]  }
0x1bfd   :  { %4965 = vmatpush1.bf16.msra.mxu0 %v9273_v43  ;;  %5006 = vmatpush1.bf16.msra.mxu1 %v8940_v34  ;;  %v9307_v34 = vld [vmem:[#allocation9 + $0x4] ss:$16 sps:$4 sm:$0xff]  }
0x1bfe   :  { %4966 = vmatprep.subr.bf16.mxu0 %v8943_v55  ;;  %5007 = vmatprep.subr.bf16.mxu1 %v8946_v17  ;;  %v9310_v55 = vld [vmem:[#allocation9 + $0xc] ss:$16 sps:$4 sm:$0xff]   ;;  %v9796_v17 = vld [vmem:[#allocation54_spill] sm:$0xff] }
0x1bff   :  { %4996 = vmatprep.mubr.bf16.mxu0 %v9642_v26  ;;  %5037 = vmatprep.mubr.bf16.mxu1 %v9642_v26 }
0x1c01   :  { %4967 = vmatpush1.bf16.msra.mxu0 %v8951_v59  ;;  %5008 = vmatpush1.bf16.msra.mxu1 %v8954_v3  ;;  %v3134_v59 = vadd.f32 %v9796_v17, %v8720_v58  ;;  %v9797_v3 = vld [vmem:[#allocation55_spill] sm:$0xff]  ;;  %v9379_v17 = vld [vmem:[#allocation9 + $0xa4] ss:$16 sps:$4 sm:$0xff]  }
0x1c02   :  { %4968 = vmatprep.subr.bf16.mxu0 %v8957_v35  ;;  %5009 = vmatprep.subr.bf16.mxu1 %v8960_v60  ;;  %v3247_v35 = vadd.f32 %v9797_v3, %v8724_v25  ;;  %v9798_v60 = vld [vmem:[#allocation56_spill] sm:$0xff] }
0x1c03   :  { %v9385_v3 = vld [vmem:[#allocation9 + $0xa0] ss:$16 sps:$4 sm:$0xff]  }
0x1c05   :  { %4969 = vmatpush1.bf16.msra.mxu0 %v8963_v32  ;;  %5010 = vmatpush1.bf16.msra.mxu1 %v8966_v11  ;;  %v3136_v32 = vadd.f32 %v9798_v60, %v8732_v30  ;;  %v9799_v11 = vld [vmem:[#allocation57_spill] sm:$0xff]  ;;  %v9391_v60 = vld [vmem:[#allocation9 + $0xc4] ss:$16 sps:$4 sm:$0xff]  }
0x1c06   :  { %4970 = vmatprep.subr.bf16.mxu0 %v8969_v7  ;;  %5011 = vmatprep.subr.bf16.mxu1 %v8972_v5  ;;  %v3249_v7 = vadd.f32 %v9799_v11, %v8736_v15  ;;  %v9397_v11 = vld [vmem:[#allocation9 + $0xc0] ss:$16 sps:$4 sm:$0xff]  }
0x1c09   :  { %4971 = vmatpush1.bf16.msra.mxu0 %v8975_v31  ;;  %5012 = vmatpush1.bf16.msra.mxu1 %v8978_v33 }
0x1c0a   :  { %4972 = vmatprep.subr.bf16.mxu0 %v8981_v61  ;;  %5013 = vmatprep.subr.bf16.mxu1 %v8984_v51 }
0x1c0d   :  { %4973 = vmatpush1.bf16.msra.mxu0 %v8987_v8  ;;  %5014 = vmatpush1.bf16.msra.mxu1 %v8990_v46 }
0x1c0e   :  { %4974 = vmatprep.subr.bf16.mxu0 %v8993_v12  ;;  %5015 = vmatprep.subr.bf16.mxu1 %v8996_v6 }
0x1c11   :  { %4975 = vmatpush1.bf16.msra.mxu0 %v8999_v16  ;;  %5016 = vmatpush1.bf16.msra.mxu1 %v9002_v22 }
0x1c12   :  { %4976 = vmatprep.subr.bf16.mxu0 %v9005_v4  ;;  %5017 = vmatprep.subr.bf16.mxu1 %v9008_v38 }
0x1c15   :  { %4977 = vmatpush1.bf16.msra.mxu0 %v9011_v63  ;;  %5018 = vmatpush1.bf16.msra.mxu1 %v9014_v39 }
0x1c16   :  { %4978 = vmatprep.subr.bf16.mxu0 %v9017_v44  ;;  %5019 = vmatprep.subr.bf16.mxu1 %v9020_v40 }
0x1c19   :  { %4979 = vmatpush1.bf16.msra.mxu0 %v9023_v62  ;;  %5020 = vmatpush1.bf16.msra.mxu1 %v9026_v45 }
0x1c1a   :  { %5083 = vmatprep.subr.bf16.mxu0 %v9307_v34  ;;  %5124 = vmatprep.subr.bf16.mxu1 %v9310_v55 }
0x1ccf   :  { %v4879_v5 = vpop.f32.mrb[172].mxu0  ;;  %v4920_v31 = vpop.f32.mrb[172].mxu1 }
0x1cd0   :  { %v4927_v33 = vadd.f32 %v4879_v5, %v3134_v59  ;;  %v4929_v61 = vadd.f32 %v4920_v31, %v3247_v35  ;;  %v4881_v51 = vpop.f32.mrb[173].mxu0  ;;  %v4922_v8 = vpop.f32.mrb[173].mxu1  ;;  %v9382_v59 = vld [vmem:[#allocation9 + $0xac] ss:$16 sps:$4 sm:$0xff]   ;;  %v9388_v35 = vld [vmem:[#allocation9 + $0xa8] ss:$16 sps:$4 sm:$0xff]  }
0x1cd1   :  { %v4928_v46 = vadd.f32 %v4881_v51, %v3136_v32  ;;  %v4930_v12 = vadd.f32 %v4922_v8, %v3249_v7  ;;  %v4883_v6 = vpop.f32.mrb[174].mxu0  ;;  %v4924_v16 = vpop.f32.mrb[174].mxu1  ;;  %v9394_v32 = vld [vmem:[#allocation9 + $0xcc] ss:$16 sps:$4 sm:$0xff]   ;;  %v9400_v7 = vld [vmem:[#allocation9 + $0xc8] ss:$16 sps:$4 sm:$0xff]  }
0x1cd2   :  { %v5796_v22 = vmul.f32 -1.442695, %v4927_v33  ;;  %v4884_v4 = vpop.f32.mrb[175].mxu0  ;;  %v4925_v38 = vpop.f32.mrb[175].mxu1  ;;  %v9403_v5 = vld [vmem:[#allocation9 + $0xe4] ss:$16 sps:$4 sm:$0xff]  }
0x1cd3   :  { %v5797_v63 = vmul.f32 -1.442695, %v4928_v46  ;;  %v5798_v39 = vmul.f32 -1.442695, %v4930_v12  ;;  %v9406_v31 = vld [vmem:[#allocation9 + $0xec] ss:$16 sps:$4 sm:$0xff]  }
0x1cd4   :  { %6498 = vpow2.f32 %v5796_v22  ;;  %v9409_v33 = vld [vmem:[#allocation9 + $0xe0] ss:$16 sps:$4 sm:$0xff]   ;;  %v9801_v46 = vld [vmem:[#allocation59_spill] sm:$0xff]  ;;  %v9803_v22 = vld [vmem:[#allocation61_spill] sm:$0xff] }
0x1cd5   :  { %6500 = vpow2.f32 %v5797_v63  ;;  %v9800_v51 = vld [vmem:[#allocation58_spill] sm:$0xff]  ;;  %v3253_v12 = vadd.f32 %v9801_v46, %v8724_v25  ;;  %v9802_v6 = vld [vmem:[#allocation60_spill] sm:$0xff]  ;;  %v3255_v4 = vadd.f32 %v9803_v22, %v8736_v15 }
0x1cd6   :  { %6502 = vpow2.f32 %v5798_v39  ;;  %v3140_v8 = vadd.f32 %v9800_v51, %v8720_v58  ;;  %v3142_v16 = vadd.f32 %v9802_v6, %v8732_v30 }
0x1cd7   :  { %6504 = vtanh.f32 %v4929_v61  ;;  %v9412_v61 = vld [vmem:[#allocation9 + $0xe8] ss:$16 sps:$4 sm:$0xff]  }
0x1cde   :  { %v6499_v44 = vpop.eup %6498 }
0x1cdf   :  { %v6501_v40 = vpop.eup %6500  ;;  %v4934_v62 = vadd.f32 1.0, %v6499_v44 }
0x1ce0   :  { %v4940_v45 = vadd.f32 1.0, %v6501_v40  ;;  %v6503_v1 = vpop.eup %6502 }
0x1ce1   :  { %6506 = vrcp.f32 %v4934_v62  ;;  %v6505_v57 = vpop.eup %6504  ;;  %v4947_v0 = vadd.f32 1.0, %v6503_v1 }
0x1ce2   :  { %6508 = vrcp.f32 %v4940_v45 }
0x1ce3   :  { %6510 = vrcp.f32 %v4947_v0 }
0x1ceb   :  { %v6507_v21 = vpop.eup %6506 }
0x1cec   :  { %v6509_v2 = vpop.eup %6508  ;;  %v4951_v14 = vmul.f32 %v6507_v21, %v6505_v57 }
0x1ced   :  { %v4950_v24 = vmul.f32 %v6509_v2, %v9270_v23  ;;  %v6511_v18 = vpop.eup %6510  ;;  %v9364_v23 = vld [vmem:[#allocation9 + $0x68] ss:$16 sps:$4 sm:$0xff]  }
0x1cef   :  { %v9322_v48 = vadd.f32 %v4951_v14, %v4950_v24 }
0x1cf1   :  { %6512 = vtanh.f32 %v9322_v48 }
0x1cfb   :  { %v6513_v19 = vpop.eup %6512 }
0x1cfc   :  { %v4954_v47 = vmul.f32 %v6513_v19, %v6511_v18 }
0x1cfe   :  { %v4963_v41 = vpack.c.bf16 %v4954_v47, %v4954_v47 }
0x1d00   :  { %4997 = vmatmul.mubr.bf16.vlgmr.msra.gmra.mrb[176].mxu0 %v4963_v41  ;;  %5038 = vmatmul.mubr.bf16.vlgmr.msra.gmra.mrb[176].mxu1 %v4963_v41 }
0x1d01   :  { %5084 = vmatpush1.bf16.msra.mxu0 %v9273_v43  ;;  %5125 = vmatpush1.bf16.msra.mxu1 %v9326_v29 }
0x1d02   :  { %5085 = vmatprep.subr.bf16.mxu0 %v9329_v9  ;;  %5126 = vmatprep.subr.bf16.mxu1 %v9332_v10 }
0x1d03   :  { %5115 = vmatprep.mubr.bf16.mxu0 %v9642_v26  ;;  %5156 = vmatprep.mubr.bf16.mxu1 %v9642_v26 }
0x1d05   :  { %5086 = vmatpush1.bf16.msra.mxu0 %v9337_v49  ;;  %5127 = vmatpush1.bf16.msra.mxu1 %v9340_v37 }
0x1d06   :  { %5087 = vmatprep.subr.bf16.mxu0 %v9343_v54  ;;  %5128 = vmatprep.subr.bf16.mxu1 %v9346_v36 }
0x1d09   :  { %5088 = vmatpush1.bf16.msra.mxu0 %v9349_v53  ;;  %5129 = vmatpush1.bf16.msra.mxu1 %v9352_v28 }
0x1d0a   :  { %5089 = vmatprep.subr.bf16.mxu0 %v9355_v50  ;;  %5130 = vmatprep.subr.bf16.mxu1 %v9358_v56 }
0x1d0d   :  { %5090 = vmatpush1.bf16.msra.mxu0 %v9361_v42  ;;  %5131 = vmatpush1.bf16.msra.mxu1 %v9364_v23 }
0x1d0e   :  { %5091 = vmatprep.subr.bf16.mxu0 %v9367_v27  ;;  %5132 = vmatprep.subr.bf16.mxu1 %v9370_v20 }
0x1d11   :  { %5092 = vmatpush1.bf16.msra.mxu0 %v9373_v52  ;;  %5133 = vmatpush1.bf16.msra.mxu1 %v9376_v13 }
0x1d12   :  { %5093 = vmatprep.subr.bf16.mxu0 %v9379_v17  ;;  %5134 = vmatprep.subr.bf16.mxu1 %v9382_v59 }
0x1d15   :  { %5094 = vmatpush1.bf16.msra.mxu0 %v9385_v3  ;;  %5135 = vmatpush1.bf16.msra.mxu1 %v9388_v35 }
0x1d16   :  { %5095 = vmatprep.subr.bf16.mxu0 %v9391_v60  ;;  %5136 = vmatprep.subr.bf16.mxu1 %v9394_v32 }
0x1d19   :  { %5096 = vmatpush1.bf16.msra.mxu0 %v9397_v11  ;;  %5137 = vmatpush1.bf16.msra.mxu1 %v9400_v7 }
0x1d1a   :  { %5097 = vmatprep.subr.bf16.mxu0 %v9403_v5  ;;  %5138 = vmatprep.subr.bf16.mxu1 %v9406_v31 }
0x1d1d   :  { %5098 = vmatpush1.bf16.msra.mxu0 %v9409_v33  ;;  %5139 = vmatpush1.bf16.msra.mxu1 %v9412_v61 }
0x1d1e   :  { %5202 = vmatprep.subr.bf16.mxu0 %v9307_v34  ;;  %5243 = vmatprep.subr.bf16.mxu1 %v9310_v55 }
0x1dd3   :  { %v4998_v38 = vpop.f32.mrb[176].mxu0  ;;  %v5039_v63 = vpop.f32.mrb[176].mxu1 }
0x1dd4   :  { %v5046_v39 = vadd.f32 %v4998_v38, %v3140_v8  ;;  %v5048_v44 = vadd.f32 %v5039_v63, %v3253_v12  ;;  %v5000_v40 = vpop.f32.mrb[177].mxu0  ;;  %v5041_v62 = vpop.f32.mrb[177].mxu1 }
0x1dd5   :  { %v5047_v45 = vadd.f32 %v5000_v40, %v3142_v16  ;;  %v5049_v1 = vadd.f32 %v5041_v62, %v3255_v4  ;;  %v5002_v57 = vpop.f32.mrb[178].mxu0  ;;  %v5043_v21 = vpop.f32.mrb[178].mxu1 }
0x1dd6   :  { %v5799_v2 = vmul.f32 -1.442695, %v5046_v39  ;;  %v5003_v14 = vpop.f32.mrb[179].mxu0  ;;  %v5044_v0 = vpop.f32.mrb[179].mxu1  ;;  %v9806_v57 = vld [vmem:[#allocation17_spill] sm:$0xff] }
0x1dd7   :  { %v5800_v24 = vmul.f32 -1.442695, %v5047_v45  ;;  %v5801_v18 = vmul.f32 -1.442695, %v5049_v1  ;;  %v9805_v45 = vld [vmem:[#allocation16_spill] sm:$0xff]  ;;  %v3146_v21 = vadd.f32 %v9806_v57, %v8732_v30 }
0x1dd8   :  { %6514 = vpow2.f32 %v5799_v2  ;;  %v3257_v1 = vadd.f32 %v9805_v45, %v8724_v25  ;;  %v9807_v2 = vld [vmem:[#allocation18_spill] sm:$0xff] }
0x1dd9   :  { %6516 = vpow2.f32 %v5800_v24  ;;  %v3259_v14 = vadd.f32 %v9807_v2, %v8736_v15 }
0x1dda   :  { %6518 = vpow2.f32 %v5801_v18 }
0x1ddb   :  { %6520 = vtanh.f32 %v5048_v44 }
0x1de2   :  { %v6515_v19 = vpop.eup %6514 }
0x1de3   :  { %v6517_v47 = vpop.eup %6516  ;;  %v5053_v41 = vadd.f32 1.0, %v6515_v19 }
0x1de4   :  { %v5059_v51 = vadd.f32 1.0, %v6517_v47  ;;  %v6519_v8 = vpop.eup %6518 }
0x1de5   :  { %6522 = vrcp.f32 %v5053_v41  ;;  %v6521_v46 = vpop.eup %6520  ;;  %v5066_v22 = vadd.f32 1.0, %v6519_v8 }
0x1de6   :  { %6524 = vrcp.f32 %v5059_v51 }
0x1de7   :  { %6526 = vrcp.f32 %v5066_v22 }
0x1def   :  { %v6523_v12 = vpop.eup %6522 }
0x1df0   :  { %v6525_v6 = vpop.eup %6524  ;;  %v5070_v16 = vmul.f32 %v6523_v12, %v6521_v46 }
0x1df1   :  { %v5069_v4 = vmul.f32 %v6525_v6, %v9322_v48  ;;  %v6527_v63 = vpop.eup %6526  ;;  %v9804_v48 = vld [vmem:[#allocation62_spill] sm:$0xff] }
0x1df2   :  { %v3144_v62 = vadd.f32 %v9804_v48, %v8720_v58 }
0x1df3   :  { %v9426_v38 = vadd.f32 %v5070_v16, %v5069_v4 }
0x1df5   :  { %6528 = vtanh.f32 %v9426_v38 }
0x1dff   :  { %v6529_v39 = vpop.eup %6528 }
0x1e00   :  { %v5073_v40 = vmul.f32 %v6529_v39, %v6527_v63 }
0x1e02   :  { %v5082_v44 = vpack.c.bf16 %v5073_v40, %v5073_v40 }
0x1e04   :  { %5116 = vmatmul.mubr.bf16.vlgmr.msra.gmra.mrb[180].mxu0 %v5082_v44  ;;  %5157 = vmatmul.mubr.bf16.vlgmr.msra.gmra.mrb[180].mxu1 %v5082_v44 }
0x1e05   :  { %5203 = vmatpush1.bf16.msra.mxu0 %v9273_v43  ;;  %5244 = vmatpush1.bf16.msra.mxu1 %v9326_v29 }
0x1e06   :  { %5204 = vmatprep.subr.bf16.mxu0 %v9329_v9  ;;  %5245 = vmatprep.subr.bf16.mxu1 %v9332_v10 }
0x1e07   :  { %5234 = vmatprep.mubr.bf16.mxu0 %v9642_v26  ;;  %5275 = vmatprep.mubr.bf16.mxu1 %v9642_v26 }
0x1e09   :  { %5205 = vmatpush1.bf16.msra.mxu0 %v9337_v49  ;;  %5246 = vmatpush1.bf16.msra.mxu1 %v9340_v37 }
0x1e0a   :  { %5206 = vmatprep.subr.bf16.mxu0 %v9343_v54  ;;  %5247 = vmatprep.subr.bf16.mxu1 %v9346_v36 }
0x1e0d   :  { %5207 = vmatpush1.bf16.msra.mxu0 %v9349_v53  ;;  %5248 = vmatpush1.bf16.msra.mxu1 %v9352_v28 }
0x1e0e   :  { %5208 = vmatprep.subr.bf16.mxu0 %v9355_v50  ;;  %5249 = vmatprep.subr.bf16.mxu1 %v9358_v56 }
0x1e11   :  { %5209 = vmatpush1.bf16.msra.mxu0 %v9361_v42  ;;  %5250 = vmatpush1.bf16.msra.mxu1 %v9364_v23 }
0x1e12   :  { %5210 = vmatprep.subr.bf16.mxu0 %v9367_v27  ;;  %5251 = vmatprep.subr.bf16.mxu1 %v9370_v20 }
0x1e15   :  { %5211 = vmatpush1.bf16.msra.mxu0 %v9373_v52  ;;  %5252 = vmatpush1.bf16.msra.mxu1 %v9376_v13 }
0x1e16   :  { %5212 = vmatprep.subr.bf16.mxu0 %v9379_v17  ;;  %5253 = vmatprep.subr.bf16.mxu1 %v9382_v59 }
0x1e19   :  { %5213 = vmatpush1.bf16.msra.mxu0 %v9385_v3  ;;  %5254 = vmatpush1.bf16.msra.mxu1 %v9388_v35 }
0x1e1a   :  { %5214 = vmatprep.subr.bf16.mxu0 %v9391_v60  ;;  %5255 = vmatprep.subr.bf16.mxu1 %v9394_v32 }
0x1e1d   :  { %5215 = vmatpush1.bf16.msra.mxu0 %v9397_v11  ;;  %5256 = vmatpush1.bf16.msra.mxu1 %v9400_v7 }
0x1e1e   :  { %5216 = vmatprep.subr.bf16.mxu0 %v9403_v5  ;;  %5257 = vmatprep.subr.bf16.mxu1 %v9406_v31 }
0x1e21   :  { %5217 = vmatpush1.bf16.msra.mxu0 %v9409_v33  ;;  %5258 = vmatpush1.bf16.msra.mxu1 %v9412_v61 }
0x1e22   :  { %5321 = vmatprep.subr.bf16.mxu0 %v9307_v34  ;;  %5362 = vmatprep.subr.bf16.mxu1 %v9310_v55 }
0x1ed7   :  { %v5117_v0 = vpop.f32.mrb[180].mxu0  ;;  %v5158_v24 = vpop.f32.mrb[180].mxu1 }
0x1ed8   :  { %v5165_v18 = vadd.f32 %v5117_v0, %v3144_v62  ;;  %v5167_v19 = vadd.f32 %v5158_v24, %v3257_v1  ;;  %v5119_v47 = vpop.f32.mrb[181].mxu0  ;;  %v5160_v34 = vpop.f32.mrb[181].mxu1 }
0x1ed9   :  { %v5166_v41 = vadd.f32 %v5119_v47, %v3146_v21  ;;  %v5168_v55 = vadd.f32 %v5160_v34, %v3259_v14  ;;  %v5121_v51 = vpop.f32.mrb[182].mxu0  ;;  %v5162_v8 = vpop.f32.mrb[182].mxu1 }
0x1eda   :  { %v5802_v46 = vmul.f32 -1.442695, %v5165_v18  ;;  %v5122_v12 = vpop.f32.mrb[183].mxu0  ;;  %v5163_v6 = vpop.f32.mrb[183].mxu1 }
0x1edb   :  { %v5803_v16 = vmul.f32 -1.442695, %v5166_v41  ;;  %v5804_v22 = vmul.f32 -1.442695, %v5168_v55  ;;  %v6784_v12 = vmov 0.0   ;;  %v6059_v6 = vld [vmem:[%s9574_s7 + $0x8] sm:$0xff]  }
0x1edc   :  { %6530 = vpow2.f32 %v5802_v46  ;;  %v6058_v46 = vld [vmem:[%s9574_s7] sm:$0xff]  }
0x1edd   :  { %6532 = vpow2.f32 %v5803_v16  ;;  %v6060_v16 = vld [vmem:[%s9574_s7 + $0x10] sm:$0xff]  }
0x1ede   :  { %6534 = vpow2.f32 %v5804_v22  ;;  %v6061_v22 = vld [vmem:[%s9574_s7 + $0x18] sm:$0xff]  }
0x1edf   :  { %6536 = vtanh.f32 %v5167_v19 }
0x1ee6   :  { %v6531_v4 = vpop.eup %6530 }
0x1ee7   :  { %v6533_v63 = vpop.eup %6532  ;;  %v5172_v39 = vadd.f32 1.0, %v6531_v4  ;;  %v6062_v4 = vld [vmem:[%s9574_s7 + $0x20] sm:$0xff]  }
0x1ee8   :  { %v5178_v40 = vadd.f32 1.0, %v6533_v63  ;;  %v6535_v44 = vpop.eup %6534  ;;  %v6063_v63 = vld [vmem:[%s9574_s7 + $0x28] sm:$0xff]  }
0x1ee9   :  { %6538 = vrcp.f32 %v5172_v39  ;;  %v6537_v48 = vpop.eup %6536  ;;  %v5185_v57 = vadd.f32 1.0, %v6535_v44  ;;  %v6064_v39 = vld [vmem:[%s9574_s7 + $0x30] sm:$0xff]   ;;  %v9812_v44 = vld [vmem:[#allocation67_spill] sm:$0xff] }
0x1eea   :  { %6540 = vrcp.f32 %v5178_v40  ;;  %v6065_v40 = vld [vmem:[%s9574_s7 + $0x38] sm:$0xff]  }
0x1eeb   :  { %6542 = vrcp.f32 %v5185_v57 }
0x1ef3   :  { %v6539_v62 = vpop.eup %6538 }
0x1ef4   :  { %v6541_v45 = vpop.eup %6540  ;;  %v5189_v1 = vmul.f32 %v6539_v62, %v6537_v48  ;;  %v3154_v48 = vadd.f32 %v9812_v44, %v8720_v58  ;;  %v9813_v62 = vld [vmem:[#allocation68_spill] sm:$0xff] }
0x1ef5   :  { %v5188_v21 = vmul.f32 %v6541_v45, %v9426_v38  ;;  %v6543_v14 = vpop.eup %6542  ;;  %v3267_v45 = vadd.f32 %v9813_v62, %v8724_v25 }
0x1ef7   :  { %v9472_v2 = vadd.f32 %v5189_v1, %v5188_v21  ;;  %v9814_v1 = vld [vmem:[#allocation15_spill] sm:$0xff]  ;;  %v9815_v21 = vld [vmem:[#allocation69_spill] sm:$0xff] }
0x1ef8   :  { %v3156_v57 = vadd.f32 %v9814_v1, %v8732_v30 }
0x1ef9   :  { %6544 = vtanh.f32 %v9472_v2 }
0x1f03   :  { %v6545_v0 = vpop.eup %6544 }
0x1f04   :  { %v5192_v24 = vmul.f32 %v6545_v0, %v6543_v14 }
0x1f06   :  { %v5201_v18 = vpack.c.bf16 %v5192_v24, %v5192_v24 }
0x1f08   :  { %5235 = vmatmul.mubr.bf16.vlgmr.msra.gmra.mrb[184].mxu0 %v5201_v18  ;;  %5276 = vmatmul.mubr.bf16.vlgmr.msra.gmra.mrb[184].mxu1 %v5201_v18 }
0x1f09   :  { %5322 = vmatpush1.bf16.msra.mxu0 %v9273_v43  ;;  %5363 = vmatpush1.bf16.msra.mxu1 %v9326_v29  ;;  %v9809_v29 = vld [vmem:[#allocation64_spill] sm:$0xff] }
0x1f0a   :  { %5323 = vmatprep.subr.bf16.mxu0 %v9329_v9  ;;  %5364 = vmatprep.subr.bf16.mxu1 %v9332_v10  ;;  %v3263_v9 = vadd.f32 %v9809_v29, %v8724_v25  ;;  %v9810_v10 = vld [vmem:[#allocation65_spill] sm:$0xff] }
0x1f0b   :  { %5353 = vmatprep.mubr.bf16.mxu0 %v9642_v26  ;;  %5394 = vmatprep.mubr.bf16.mxu1 %v9642_v26  ;;  %v9808_v26 = vld [vmem:[#allocation63_spill] sm:$0xff] }
0x1f0c   :  { %v3150_v43 = vadd.f32 %v9808_v26, %v8720_v58 }
0x1f0d   :  { %5324 = vmatpush1.bf16.msra.mxu0 %v9337_v49  ;;  %5365 = vmatpush1.bf16.msra.mxu1 %v9340_v37  ;;  %v3152_v49 = vadd.f32 %v9810_v10, %v8732_v30  ;;  %v9811_v37 = vld [vmem:[#allocation66_spill] sm:$0xff] }
0x1f0e   :  { %5325 = vmatprep.subr.bf16.mxu0 %v9343_v54  ;;  %5366 = vmatprep.subr.bf16.mxu1 %v9346_v36  ;;  %v3265_v54 = vadd.f32 %v9811_v37, %v8736_v15 }
0x1f11   :  { %5326 = vmatpush1.bf16.msra.mxu0 %v9349_v53  ;;  %5367 = vmatpush1.bf16.msra.mxu1 %v9352_v28 }
0x1f12   :  { %5327 = vmatprep.subr.bf16.mxu0 %v9355_v50  ;;  %5368 = vmatprep.subr.bf16.mxu1 %v9358_v56 }
0x1f15   :  { %5328 = vmatpush1.bf16.msra.mxu0 %v9361_v42  ;;  %5369 = vmatpush1.bf16.msra.mxu1 %v9364_v23 }
0x1f16   :  { %5329 = vmatprep.subr.bf16.mxu0 %v9367_v27  ;;  %5370 = vmatprep.subr.bf16.mxu1 %v9370_v20 }
0x1f19   :  { %5330 = vmatpush1.bf16.msra.mxu0 %v9373_v52  ;;  %5371 = vmatpush1.bf16.msra.mxu1 %v9376_v13 }
0x1f1a   :  { %5331 = vmatprep.subr.bf16.mxu0 %v9379_v17  ;;  %5372 = vmatprep.subr.bf16.mxu1 %v9382_v59 }
0x1f1d   :  { %5332 = vmatpush1.bf16.msra.mxu0 %v9385_v3  ;;  %5373 = vmatpush1.bf16.msra.mxu1 %v9388_v35 }
0x1f1e   :  { %5333 = vmatprep.subr.bf16.mxu0 %v9391_v60  ;;  %5374 = vmatprep.subr.bf16.mxu1 %v9394_v32 }
0x1f21   :  { %5334 = vmatpush1.bf16.msra.mxu0 %v9397_v11  ;;  %5375 = vmatpush1.bf16.msra.mxu1 %v9400_v7 }
0x1f22   :  { %5335 = vmatprep.subr.bf16.mxu0 %v9403_v5  ;;  %5376 = vmatprep.subr.bf16.mxu1 %v9406_v31 }
0x1f25   :  { %5336 = vmatpush1.bf16.msra.mxu0 %v9409_v33  ;;  %5377 = vmatpush1.bf16.msra.mxu1 %v9412_v61 }
0x1f26   :  { %5829 = vmatprep.subr.bf16.mxu0 %v6784_v12 }
0x1fdb   :  { %v5236_v36 = vpop.f32.mrb[184].mxu0  ;;  %v5277_v53 = vpop.f32.mrb[184].mxu1 }
0x1fdc   :  { %v5284_v28 = vadd.f32 %v5236_v36, %v3150_v43  ;;  %v5286_v50 = vadd.f32 %v5277_v53, %v3263_v9  ;;  %v5238_v56 = vpop.f32.mrb[185].mxu0  ;;  %v5279_v42 = vpop.f32.mrb[185].mxu1 }
0x1fdd   :  { %v5285_v23 = vadd.f32 %v5238_v56, %v3152_v49  ;;  %v5287_v27 = vadd.f32 %v5279_v42, %v3265_v54  ;;  %v5240_v20 = vpop.f32.mrb[186].mxu0  ;;  %v5281_v52 = vpop.f32.mrb[186].mxu1 }
0x1fde   :  { %v5805_v13 = vmul.f32 -1.442695, %v5284_v28  ;;  %v5241_v17 = vpop.f32.mrb[187].mxu0  ;;  %v5282_v59 = vpop.f32.mrb[187].mxu1 }
0x1fdf   :  { %v5806_v3 = vmul.f32 -1.442695, %v5285_v23  ;;  %v5807_v35 = vmul.f32 -1.442695, %v5287_v27 }
0x1fe0   :  { %6546 = vpow2.f32 %v5805_v13 }
0x1fe1   :  { %6548 = vpow2.f32 %v5806_v3 }
0x1fe2   :  { %6550 = vpow2.f32 %v5807_v35 }
0x1fe3   :  { %6552 = vtanh.f32 %v5286_v50 }
0x1fea   :  { %v6547_v60 = vpop.eup %6546 }
0x1feb   :  { %v6549_v32 = vpop.eup %6548  ;;  %v5291_v11 = vadd.f32 1.0, %v6547_v60  ;;  %v5811_v60 = vld [vmem:[%s9575_s8] ss:$0 sm:$0xff] }
0x1fec   :  { %v5297_v7 = vadd.f32 1.0, %v6549_v32  ;;  %v6551_v5 = vpop.eup %6550 }
0x1fed   :  { %6554 = vrcp.f32 %v5291_v11  ;;  %v6553_v31 = vpop.eup %6552  ;;  %v5304_v19 = vadd.f32 1.0, %v6551_v5 }
0x1fee   :  { %6556 = vrcp.f32 %v5297_v7 }
0x1fef   :  { %6558 = vrcp.f32 %v5304_v19 }
0x1ff7   :  { %v6555_v33 = vpop.eup %6554 }
0x1ff8   :  { %v6557_v61 = vpop.eup %6556  ;;  %v5308_v38 = vmul.f32 %v6555_v33, %v6553_v31 }
0x1ff9   :  { %v5307_v47 = vmul.f32 %v6557_v61, %v9472_v2  ;;  %v6559_v41 = vpop.eup %6558  ;;  %v3269_v2 = vadd.f32 %v9815_v21, %v8736_v15 }
0x1ffb   :  { %v9516_v34 = vadd.f32 %v5308_v38, %v5307_v47 }
0x1ffd   :  { %6560 = vtanh.f32 %v9516_v34 }
0x2007   :  { %v6561_v55 = vpop.eup %6560 }
0x2008   :  { %v5311_v51 = vmul.f32 %v6561_v55, %v6559_v41 }
0x200a   :  { %v5320_v8 = vpack.c.bf16 %v5311_v51, %v5311_v51 }
0x200c   :  { %5354 = vmatmul.mubr.bf16.vlgmr.msra.gmra.mrb[188].mxu0 %v5320_v8  ;;  %5395 = vmatmul.mubr.bf16.vlgmr.msra.gmra.mrb[188].mxu1 %v5320_v8 }
0x200d   :  { %5830 = vmatpush3.bf16.msra.mxu0 %v6058_v46  ;;  %5845 = vmatprep.mubr.msk.bf16.mxu0 %vm6785_vm0, %v6784_v12 }
0x200e   :  { %5831 = vmatprep.subr.bf16.mxu0 %v6784_v12 }
0x2011   :  { %5832 = vmatpush3.bf16.msra.mxu0 %v6059_v6 }
0x2012   :  { %5833 = vmatprep.subr.bf16.mxu0 %v6784_v12 }
0x2015   :  { %5834 = vmatpush3.bf16.msra.mxu0 %v6060_v16 }
0x2016   :  { %5835 = vmatprep.subr.bf16.mxu0 %v6784_v12 }
0x2019   :  { %5836 = vmatpush3.bf16.msra.mxu0 %v6061_v22 }
0x201a   :  { %5837 = vmatprep.subr.bf16.mxu0 %v6784_v12 }
0x201d   :  { %5838 = vmatpush3.bf16.msra.mxu0 %v6062_v4 }
0x201e   :  { %5839 = vmatprep.subr.bf16.mxu0 %v6784_v12 }
0x2021   :  { %5840 = vmatpush3.bf16.msra.mxu0 %v6063_v63 }
0x2022   :  { %5841 = vmatprep.subr.bf16.mxu0 %v6784_v12 }
0x2025   :  { %5842 = vmatpush3.bf16.msra.mxu0 %v6064_v39 }
0x2026   :  { %5843 = vmatprep.subr.bf16.mxu0 %v6784_v12 }
0x2029   :  { %5844 = vmatpush3.bf16.msra.mxu0 %v6065_v40 }
0x20df   :  { %v5355_v14 = vpop.f32.mrb[188].mxu0  ;;  %v5396_v0 = vpop.f32.mrb[188].mxu1 }
0x20e0   :  { %v5403_v24 = vadd.f32 %v5355_v14, %v3154_v48  ;;  %v5405_v18 = vadd.f32 %v5396_v0, %v3267_v45  ;;  %v5357_v26 = vpop.f32.mrb[189].mxu0  ;;  %v5398_v43 = vpop.f32.mrb[189].mxu1 }
0x20e1   :  { %v5404_v29 = vadd.f32 %v5357_v26, %v3156_v57  ;;  %v5406_v9 = vadd.f32 %v5398_v43, %v3269_v2  ;;  %v5359_v10 = vpop.f32.mrb[190].mxu0  ;;  %v5400_v49 = vpop.f32.mrb[190].mxu1 }
0x20e2   :  { %v5808_v58 = vmul.f32 -1.442695, %v5403_v24  ;;  %v5360_v37 = vpop.f32.mrb[191].mxu0  ;;  %v5401_v54 = vpop.f32.mrb[191].mxu1 }
0x20e3   :  { %v5809_v25 = vmul.f32 -1.442695, %v5404_v29  ;;  %v5810_v30 = vmul.f32 -1.442695, %v5406_v9 }
0x20e4   :  { %6562 = vpow2.f32 %v5808_v58 }
0x20e5   :  { %6564 = vpow2.f32 %v5809_v25 }
0x20e6   :  { %6566 = vpow2.f32 %v5810_v30 }
0x20e7   :  { %6568 = vtanh.f32 %v5405_v18 }
0x20ee   :  { %v6563_v36 = vpop.eup %6562 }
0x20ef   :  { %v6565_v53 = vpop.eup %6564  ;;  %v5410_v15 = vadd.f32 1.0, %v6563_v36 }
0x20f0   :  { %v5416_v28 = vadd.f32 1.0, %v6565_v53  ;;  %v6567_v50 = vpop.eup %6566 }
0x20f1   :  { %6570 = vrcp.f32 %v5410_v15  ;;  %v6569_v56 = vpop.eup %6568  ;;  %v5423_v20 = vadd.f32 1.0, %v6567_v50 }
0x20f2   :  { %6572 = vrcp.f32 %v5416_v28 }
0x20f3   :  { %6574 = vrcp.f32 %v5423_v20 }
0x20fb   :  { %v6571_v42 = vpop.eup %6570 }
0x20fc   :  { %v6573_v23 = vpop.eup %6572  ;;  %v5427_v27 = vmul.f32 %v6571_v42, %v6569_v56 }
0x20fd   :  { %v5426_v52 = vmul.f32 %v6573_v23, %v9516_v34  ;;  %v6575_v17 = vpop.eup %6574 }
0x20ff   :  { %v5428_v13 = vadd.f32 %v5427_v27, %v5426_v52 }
0x2101   :  { %6576 = vtanh.f32 %v5428_v13 }
0x210b   :  { %v6577_v59 = vpop.eup %6576 }
0x210c   :  { %v5430_v3 = vmul.f32 %v6577_v59, %v6575_v17 }
0x210e   :  { %v5434_v35 = vpack.c.bf16 %v5430_v3, %v5430_v3 }
0x2110   :  { %5846 = vmatmul.mubr.bf16.vlgmr.msra.gmra.mrb[192].mxu0 %v5434_v35 }
0x21e3   :  { %v5540_v32 = vpop.f32.mrb[192].mxu0 }
0x21e4   :  { %v5541_v11 = vadd.f32 %v5811_v60, %v5540_v32  ;;  %v5847_v7 = vpop.f32.mrb[193].mxu0 }
0x21e5   :  { %v5543_v5 = vpop.f32.mrb[194].mxu0 }
0x21e6   :  { %v5848_v31 = vpop.f32.mrb[195].mxu0  ;;  %5547 = vst.msk [vmem:[#allocation11] sm:$0xff] %vm5546_vm1, %v5541_v11 }
0x21e7   :  { %6761 = shalt.err (!%p6758_p6)
}
0x21e8   :  { %s6762_s8 = scalar_lea.hbm %s9576_s9, 128 }
0x21e9   :  { %p6763_p7 = scmp.ne.s32.totalorder %s9576_s9, %s6762_s8  ;;  %p6766_p8 = scmp.lt.u32.totalorder %s6762_s8, %s9576_s9 }
0x21eb   :  { %p6768_p9 = pnand %p6766_p8, %p6763_p7 }
0x21ed   :  { %6771 = shalt.err (!%p6768_p9)
}
0x21ee   :  { %5557 = dma.vmem_to_hbm [thread:$0]  %s5555_s30, 128, %s9576_s9, [#allocation8]  }
0x21ef   :  { %6776 = dma.done.wait [#allocation8], 128  }
0x21f0   :  { %6777 = vsyncadd [#allocation8], 4294967168 }
0x21f1   :  { %5561 = vsyncpa [#allocation7], 1 }
0x21f2   :  { %5562 = vsyncpa [#allocation10], 1 }
0x21f3   :  { %5563 = vsyncpa [#allocation8], 1 }

</bundles_post_ra>
